<compile_context>
chip_gen: v7x
topology: tpu7x:2x2x1
jax: 0.10.0
libtpu: 0.0.40
codegen_flags: <defaults>
</compile_context>

<pallas_src>
import numpy as np

import jax
import jax.numpy as jnp
from jax import lax
from jax.experimental import pallas as pl
from jax.experimental.pallas import tpu as pltpu

jax.config.update("jax_default_matmul_precision", "highest")

DIM = 8            # C  (must be divisible by CA_HEADS)
CA_HEADS = 4
EXPAND = 2
B, H, W = 2, 8, 8
N = H * W
BN_EPS = 1e-5
KMAX = 3 + 2 * (CA_HEADS - 1)   # largest depthwise kernel (9)
PMAX = KMAX // 2                # unified padding (4)


# ----------------------------------------------------------------------------
# Parameter init (PyTorch layouts), deterministic.
# ----------------------------------------------------------------------------
def init_params(key, dim=DIM, heads=CA_HEADS, expand=EXPAND):
    C = dim
    Cg = C // heads
    Ce = C * expand
    keys = iter(jax.random.split(key, 32))

    def nrm(shape, scale=0.2):
        return scale * jax.random.normal(next(keys), shape, dtype=jnp.float32)

    p = {}
    p["v_w"], p["v_b"] = nrm((C, C)), nrm((C,))                  # Linear (out,in)
    p["s_w"], p["s_b"] = nrm((C, C)), nrm((C,))
    p["conv_w"], p["conv_b"] = [], []
    for i in range(heads):
        k = 3 + 2 * i
        p["conv_w"].append(nrm((Cg, 1, k, k)))                   # depthwise OIHW
        p["conv_b"].append(nrm((Cg,)))
    p["proj0_w"] = nrm((Ce, C // Cg, 1, 1))                      # grouped 1x1 (groups=Cg)
    p["proj0_b"] = nrm((Ce,))
    p["bn_g"] = 1.0 + nrm((Ce,), 0.1)
    p["bn_b"] = nrm((Ce,), 0.1)
    p["proj1_w"] = nrm((C, Ce, 1, 1))
    p["proj1_b"] = nrm((C,))
    p["proj_w"], p["proj_b"] = nrm((C, C)), nrm((C,))
    return p


# ----------------------------------------------------------------------------
# Host-side glue: pack PyTorch-layout params into two kernel inputs:
#   * one contiguous (rows, PW) parameter slab (single DMA),
#   * one (KMAX*KMAX, C) unified tap table for the multi-scale depthwise convs.
# ----------------------------------------------------------------------------
def pack_kernel_params(p, dim=DIM, heads=CA_HEADS, expand=EXPAND):
    C = dim
    Cg = C // heads
    groups = Cg                       # split_groups
    Ce = C * expand
    PW = max(2 * C, Ce, C)            # slab width (16 at the defaults)

    # fused v/s projection: one (C, 2C) weight, one (1, 2C) bias
    wvs = np.concatenate([np.asarray(p["v_w"]).T, np.asarray(p["s_w"]).T], axis=1)
    bvs = np.concatenate([np.asarray(p["v_b"]), np.asarray(p["s_b"])])[None, :]

    # Unified tap table: kernel channel order is head-major (c_k = head*Cg + g).
    # Every head's (3+2i)x(3+2i) kernel is centered inside the 9x9 window;
    # channels a head does not cover at a given tap get weight 0.
    tapw = np.zeros((KMAX * KMAX, C), np.float32)
    bconv = np.zeros((C,), np.float32)
    for i in range(heads):
        k = 3 + 2 * i
        pad = 1 + i
        w = np.asarray(p["conv_w"][i])[:, 0]          # (Cg, k, k)
        for ky in range(k):
            for kx in range(k):
                t = (ky - pad + PMAX) * KMAX + (kx - pad + PMAX)
                tapw[t, i * Cg:(i + 1) * Cg] = w[:, ky, kx]
        bconv[i * Cg:(i + 1) * Cg] = np.asarray(p["conv_b"][i])

    # Dense-ify grouped 1x1 proj0 (block-diagonal) and permute its input rows
    # from PyTorch s_out channel order (c_pt = g*heads + i) to the kernel's
    # head-major order (c_k = i*Cg + g), so the kernel can do a plain matmul.
    w0g = np.asarray(p["proj0_w"])[:, :, 0, 0]        # (Ce, in_per_group)
    out_pg, in_pg = Ce // groups, C // groups
    w0_dense = np.zeros((C, Ce), dtype=np.float32)
    for o in range(Ce):
        g = o // out_pg
        for j in range(in_pg):
            w0_dense[g * in_pg + j, o] = w0g[o, j]
    perm = np.array([(ck % Cg) * heads + (ck // Cg) for ck in range(C)])
    w0 = w0_dense[perm]                               # (C, Ce), rows in kernel order
    # Fold the depthwise-conv biases through proj0 (exact: bias passes linearly).
    b0 = np.asarray(p["proj0_b"]) + bconv @ w0        # (Ce,)

    w1 = np.asarray(p["proj1_w"])[:, :, 0, 0].T       # (Ce, C)
    wp = np.asarray(p["proj_w"]).T                    # (C, C)

    def padw(a):
        a = np.asarray(a, np.float32)
        if a.ndim == 1:
            a = a[None, :]
        out = np.zeros((a.shape[0], PW), np.float32)
        out[:, :a.shape[1]] = a
        return out

    # Slab row layout (matrix segments 8-row aligned at the default sizes):
    #   [0,      C)        wvs   (C, 2C)
    #   [C,      2C)       w0    (C, Ce)
    #   [2C,     2C+Ce)    w1    (Ce, C)
    #   [2C+Ce,  3C+Ce)    wp    (C, C)
    #   [3C+Ce,  3C+Ce+6)  bvs, b0_eff, bn_g, bn_b, b1, bp   (one row each)
    slab = np.concatenate(
        [padw(wvs), padw(w0), padw(w1), padw(wp),
         padw(bvs), padw(b0), padw(p["bn_g"]), padw(p["bn_b"]),
         padw(p["proj1_b"]), padw(p["proj_b"])], axis=0)

    return {"slab": jnp.asarray(slab), "tapw": jnp.asarray(tapw)}


# ----------------------------------------------------------------------------
# Pallas kernel.
# ----------------------------------------------------------------------------
def mhmc_pallas(x, kp, Hh=H, Ww=W, heads=CA_HEADS, expand=EXPAND):
    Bb, Nn, C = x.shape
    Ce = C * expand
    BN = Bb * Nn
    Hp, Wp = Hh + 2 * PMAX, Ww + 2 * PMAX

    # Static row offsets into the packed parameter slab.
    R_WVS = 0
    R_W0 = C
    R_W1 = 2 * C
    R_WP = 2 * C + Ce
    R_VEC = 3 * C + Ce

    def kernel(x_ref, pm_ref, tw_ref, out_ref, vs_ref, spad_ref):
        # ---- packed parameters: one slab, static slices ---------------------
        wvs = pm_ref[R_WVS:R_WVS + C, 0:2 * C]          # (C, 2C)
        w0 = pm_ref[R_W0:R_W0 + C, 0:Ce]                # (C, Ce)
        w1 = pm_ref[R_W1:R_W1 + Ce, 0:C]                # (Ce, C)
        wp = pm_ref[R_WP:R_WP + C, 0:C]                 # (C, C)
        bvs = pm_ref[R_VEC + 0:R_VEC + 1, 0:2 * C]
        b0 = pm_ref[R_VEC + 1:R_VEC + 2, 0:Ce]
        bn_g = pm_ref[R_VEC + 2:R_VEC + 3, 0:Ce]
        bn_b = pm_ref[R_VEC + 3:R_VEC + 4, 0:Ce]
        b1 = pm_ref[R_VEC + 4:R_VEC + 5, 0:C]
        bp = pm_ref[R_VEC + 5:R_VEC + 6, 0:C]

        xv = x_ref[...].reshape(BN, C)

        # ---- fused v / s projections: one MXU matmul instead of two ---------
        vs_ref[...] = jnp.dot(xv, wvs, preferred_element_type=jnp.float32) + bvs
        v = vs_ref[:, 0:C]                              # (BN, C)
        s_lin = vs_ref[:, C:2 * C]                      # (BN, C), head-major channels

        # ---- multi-scale depthwise convs: unified 81-tap, register-accum ----
        # Zero-padded NHWC scratch; padding PMAX covers every head's kernel.
        spad_ref[...] = jnp.zeros((Bb, Hp, Wp, C), jnp.float32)
        spad_ref[:, PMAX:PMAX + Hh, PMAX:PMAX + Ww, :] = s_lin.reshape(Bb, Hh, Ww, C)

        tw = tw_ref[...]                                # (81, C) tap table in vregs
        acc = jnp.zeros((Bb, Hh, Ww, C), jnp.float32)   # register accumulator
        for t in range(KMAX * KMAX):
            ty, tx = t // KMAX, t % KMAX
            w_t = tw[t:t + 1, :].reshape(1, 1, 1, C)
            src = spad_ref[:, ty:ty + Hh, tx:tx + Ww, :]
            acc = acc + src * w_t                       # no per-tap VMEM stores
        s_conv = acc.reshape(BN, C)

        # ---- proj0 (grouped 1x1, dense-ified; conv biases folded into b0) ---
        y0 = jnp.dot(s_conv, w0, preferred_element_type=jnp.float32) + b0

        # ---- BatchNorm2d, training-mode batch stats, single pass ------------
        mean = jnp.mean(y0, axis=0, keepdims=True)
        msq = jnp.mean(y0 * y0, axis=0, keepdims=True)
        var = msq - mean * mean                         # biased variance, f32 accum
        y0 = (y0 - mean) * lax.rsqrt(var + BN_EPS) * bn_g + bn_b

        # ---- GELU (tanh approximation; EUP tanh, |err| ~3e-4) ---------------
        y0 = 0.5 * y0 * (1.0 + jnp.tanh(
            0.7978845608028654 * (y0 + 0.044715 * y0 * y0 * y0)))

        # ---- proj1 (1x1 conv) -> modulate v -> final Linear proj ------------
        s_out = jnp.dot(y0, w1, preferred_element_type=jnp.float32) + b1
        xm = s_out * v
        out = jnp.dot(xm, wp, preferred_element_type=jnp.float32) + bp
        out_ref[...] = out.reshape(Bb, Nn, C)

    vmem = pl.BlockSpec(memory_space=pltpu.MemorySpace.VMEM)
    return pl.pallas_call(
        kernel,
        out_shape=jax.ShapeDtypeStruct((Bb, Nn, C), jnp.float32),
        in_specs=[vmem, vmem, vmem],
        out_specs=vmem,
        scratch_shapes=[
            pltpu.VMEM((BN, 2 * C), jnp.float32),       # fused v/s result
            pltpu.VMEM((Bb, Hp, Wp, C), jnp.float32),   # zero-padded s (NHWC)
        ],
    )(x, kp["slab"], kp["tapw"])


# ----------------------------------------------------------------------------
# Pure-JAX reference (mirrors the PyTorch forward 1:1, using torch-layout params)
# ----------------------------------------------------------------------------
def mhmc_reference(x, p, Hh=H, Ww=W, heads=CA_HEADS):
    Bb, Nn, C = x.shape
    Cg = C // heads
    v = x @ p["v_w"].T + p["v_b"]
    s = (x @ p["s_w"].T + p["s_b"]).reshape(Bb, Hh, Ww, heads, Cg)
    s = jnp.transpose(s, (3, 0, 4, 1, 2))                   # (heads, B, Cg, H, W)
    outs = []
    for i in range(heads):
        pad = 1 + i
        si = lax.conv_general_dilated(
            s[i], p["conv_w"][i], (1, 1), [(pad, pad), (pad, pad)],
            dimension_numbers=("NCHW", "OIHW", "NCHW"),
            feature_group_count=Cg) + p["conv_b"][i][None, :, None, None]
        outs.append(si.reshape(Bb, Cg, 1, Hh, Ww))
    s_out = jnp.concatenate(outs, axis=2).reshape(Bb, C, Hh, Ww)
    y0 = lax.conv_general_dilated(
        s_out, p["proj0_w"], (1, 1), [(0, 0), (0, 0)],
        dimension_numbers=("NCHW", "OIHW", "NCHW"),
        feature_group_count=Cg) + p["proj0_b"][None, :, None, None]
    mean = y0.mean(axis=(0, 2, 3), keepdims=True)
    var = ((y0 - mean) ** 2).mean(axis=(0, 2, 3), keepdims=True)
    y0 = (y0 - mean) / jnp.sqrt(var + BN_EPS) * p["bn_g"][None, :, None, None] \
         + p["bn_b"][None, :, None, None]
    y0 = jax.nn.gelu(y0, approximate=False)
    s_out = lax.conv_general_dilated(
        y0, p["proj1_w"], (1, 1), [(0, 0), (0, 0)],
        dimension_numbers=("NCHW", "OIHW", "NCHW")) + p["proj1_b"][None, :, None, None]
    s_out = jnp.transpose(s_out.reshape(Bb, C, Nn), (0, 2, 1))
    return (s_out * v) @ p["proj_w"].T + p["proj_b"]


if __name__ == "__main__":
    key = jax.random.PRNGKey(0)
    kx, kparam = jax.random.split(key)
    x = jax.random.normal(kx, (B, N, DIM), dtype=jnp.float32)

    params = init_params(kparam)
    kparams = pack_kernel_params(params)

    out = mhmc_pallas(x, kparams)
    out = jax.block_until_ready(out)
    assert out.shape == (B, N, DIM) and out.dtype == jnp.float32

    ref = jax.block_until_ready(mhmc_reference(x, params))
    max_err = float(jnp.max(jnp.abs(out - ref)))
    assert max_err < 2e-2, f"mismatch vs reference: max abs err = {max_err}"

    print("KERNEL_OK")
</pallas_src>

<mosaic_0001>
module attributes {stable_mosaic.version = 11 : i64} {
  func.func @kernel(%arg0: memref<2x64x8xf32, #tpu.memory_space<vmem>>, %arg1: memref<46x16xf32, #tpu.memory_space<vmem>>, %arg2: memref<81x8xf32, #tpu.memory_space<vmem>>, %arg3: memref<2x64x8xf32, #tpu.memory_space<vmem>>, %arg4: memref<128x16xf32, #tpu.memory_space<vmem>>, %arg5: memref<2x16x16x8xf32, #tpu.memory_space<vmem>>) attributes {dimension_semantics = [], scalar_prefetch = 0 : i64, scratch_operands = 2 : i64, tpu.core_type = #tpu.core_type<tc>} {
    %c0 = arith.constant 0 : index
    %c0_0 = arith.constant 0 : index
    %0 = vector.load %arg1[%c0, %c0_0] : memref<46x16xf32, #tpu.memory_space<vmem>>, vector<8x16xf32>
    %c8 = arith.constant 8 : index
    %c0_1 = arith.constant 0 : index
    %1 = vector.load %arg1[%c8, %c0_1] : memref<46x16xf32, #tpu.memory_space<vmem>>, vector<8x16xf32>
    %c16 = arith.constant 16 : index
    %c0_2 = arith.constant 0 : index
    %2 = vector.load %arg1[%c16, %c0_2] : memref<46x16xf32, #tpu.memory_space<vmem>>, vector<16x8xf32>
    %c32 = arith.constant 32 : index
    %c0_3 = arith.constant 0 : index
    %3 = vector.load %arg1[%c32, %c0_3] : memref<46x16xf32, #tpu.memory_space<vmem>>, vector<8x8xf32>
    %c40 = arith.constant 40 : index
    %c0_4 = arith.constant 0 : index
    %4 = vector.load %arg1[%c40, %c0_4] : memref<46x16xf32, #tpu.memory_space<vmem>>, vector<1x16xf32>
    %c41 = arith.constant 41 : index
    %c0_5 = arith.constant 0 : index
    %5 = vector.load %arg1[%c41, %c0_5] : memref<46x16xf32, #tpu.memory_space<vmem>>, vector<1x16xf32>
    %c42 = arith.constant 42 : index
    %c0_6 = arith.constant 0 : index
    %6 = vector.load %arg1[%c42, %c0_6] : memref<46x16xf32, #tpu.memory_space<vmem>>, vector<1x16xf32>
    %c43 = arith.constant 43 : index
    %c0_7 = arith.constant 0 : index
    %7 = vector.load %arg1[%c43, %c0_7] : memref<46x16xf32, #tpu.memory_space<vmem>>, vector<1x16xf32>
    %c44 = arith.constant 44 : index
    %c0_8 = arith.constant 0 : index
    %8 = vector.load %arg1[%c44, %c0_8] : memref<46x16xf32, #tpu.memory_space<vmem>>, vector<1x8xf32>
    %c45 = arith.constant 45 : index
    %c0_9 = arith.constant 0 : index
    %9 = vector.load %arg1[%c45, %c0_9] : memref<46x16xf32, #tpu.memory_space<vmem>>, vector<1x8xf32>
    %c0_10 = arith.constant 0 : index
    %c0_11 = arith.constant 0 : index
    %c0_12 = arith.constant 0 : index
    %10 = vector.load %arg0[%c0_10, %c0_11, %c0_12] : memref<2x64x8xf32, #tpu.memory_space<vmem>>, vector<2x64x8xf32>
    %11 = vector.shape_cast %10 : vector<2x64x8xf32> to vector<128x8xf32>
    %cst = arith.constant dense<0.000000e+00> : vector<128x16xf32>
    %12 = tpu.matmul %11, %0, %cst {dimension_numbers = #tpu.dot_dimension_numbers<[1], [0], [0], [1], [0, 0, 1, 1], [], []>, precision = #tpu.contract_precision<fp32>} : vector<128x8xf32>, vector<8x16xf32>, vector<128x16xf32> -> vector<128x16xf32>
    %13 = vector.broadcast %4 : vector<1x16xf32> to vector<128x16xf32>
    %14 = arith.addf %12, %13 : vector<128x16xf32>
    %c0_13 = arith.constant 0 : index
    %c0_14 = arith.constant 0 : index
    %15 = vector.load %arg4[%c0_13, %c0_14] : memref<128x16xf32, #tpu.memory_space<vmem>>, vector<128x16xf32>
    tpu.vector_store %arg4[%c0_13, %c0_14], %14 {strides = array<i32>} : memref<128x16xf32, #tpu.memory_space<vmem>>, vector<128x16xf32>,
    %c0_15 = arith.constant 0 : index
    %c0_16 = arith.constant 0 : index
    %16 = vector.load %arg4[%c0_15, %c0_16] : memref<128x16xf32, #tpu.memory_space<vmem>>, vector<128x8xf32>
    %c0_17 = arith.constant 0 : index
    %c8_18 = arith.constant 8 : index
    %17 = vector.load %arg4[%c0_17, %c8_18] : memref<128x16xf32, #tpu.memory_space<vmem>>, vector<128x8xf32>
    %cst_19 = arith.constant 0.000000e+00 : f32
    %18 = vector.broadcast %cst_19 : f32 to vector<2x16x16x8xf32>
    %c0_20 = arith.constant 0 : index
    %c0_21 = arith.constant 0 : index
    %c0_22 = arith.constant 0 : index
    %c0_23 = arith.constant 0 : index
    %19 = vector.load %arg5[%c0_20, %c0_21, %c0_22, %c0_23] : memref<2x16x16x8xf32, #tpu.memory_space<vmem>>, vector<2x16x16x8xf32>
    tpu.vector_store %arg5[%c0_20, %c0_21, %c0_22, %c0_23], %18 {strides = array<i32>} : memref<2x16x16x8xf32, #tpu.memory_space<vmem>>, vector<2x16x16x8xf32>,
    %20 = vector.shape_cast %17 : vector<128x8xf32> to vector<2x8x8x8xf32>
    %c0_24 = arith.constant 0 : index
    %c4 = arith.constant 4 : index
    %c4_25 = arith.constant 4 : index
    %c0_26 = arith.constant 0 : index
    %21 = vector.load %arg5[%c0_24, %c4, %c4_25, %c0_26] : memref<2x16x16x8xf32, #tpu.memory_space<vmem>>, vector<2x8x8x8xf32>
    tpu.vector_store %arg5[%c0_24, %c4, %c4_25, %c0_26], %20 {strides = array<i32>} : memref<2x16x16x8xf32, #tpu.memory_space<vmem>>, vector<2x8x8x8xf32>,
    %c0_27 = arith.constant 0 : index
    %c0_28 = arith.constant 0 : index
    %22 = vector.load %arg2[%c0_27, %c0_28] : memref<81x8xf32, #tpu.memory_space<vmem>>, vector<81x8xf32>
    %cst_29 = arith.constant 0.000000e+00 : f32
    %23 = vector.broadcast %cst_29 : f32 to vector<2x8x8x8xf32>
    %24 = vector.extract_strided_slice %22 {offsets = [0, 0], sizes = [1, 8], strides = [1, 1]} : vector<81x8xf32> to vector<1x8xf32>
    %25 = vector.shape_cast %24 : vector<1x8xf32> to vector<1x1x1x8xf32>
    %c0_30 = arith.constant 0 : index
    %c0_31 = arith.constant 0 : index
    %c0_32 = arith.constant 0 : index
    %c0_33 = arith.constant 0 : index
    %26 = vector.load %arg5[%c0_30, %c0_31, %c0_32, %c0_33] : memref<2x16x16x8xf32, #tpu.memory_space<vmem>>, vector<2x8x8x8xf32>
    %27 = vector.broadcast %25 : vector<1x1x1x8xf32> to vector<2x8x8x8xf32>
    %28 = arith.mulf %26, %27 : vector<2x8x8x8xf32>
    %29 = arith.addf %23, %28 : vector<2x8x8x8xf32>
    %30 = vector.extract_strided_slice %22 {offsets = [1, 0], sizes = [1, 8], strides = [1, 1]} : vector<81x8xf32> to vector<1x8xf32>
    %31 = vector.shape_cast %30 : vector<1x8xf32> to vector<1x1x1x8xf32>
    %c0_34 = arith.constant 0 : index
    %c0_35 = arith.constant 0 : index
    %c1 = arith.constant 1 : index
    %c0_36 = arith.constant 0 : index
    %32 = vector.load %arg5[%c0_34, %c0_35, %c1, %c0_36] : memref<2x16x16x8xf32, #tpu.memory_space<vmem>>, vector<2x8x8x8xf32>
    %33 = vector.broadcast %31 : vector<1x1x1x8xf32> to vector<2x8x8x8xf32>
    %34 = arith.mulf %32, %33 : vector<2x8x8x8xf32>
    %35 = arith.addf %29, %34 : vector<2x8x8x8xf32>
    %36 = vector.extract_strided_slice %22 {offsets = [2, 0], sizes = [1, 8], strides = [1, 1]} : vector<81x8xf32> to vector<1x8xf32>
    %37 = vector.shape_cast %36 : vector<1x8xf32> to vector<1x1x1x8xf32>
    %c0_37 = arith.constant 0 : index
    %c0_38 = arith.constant 0 : index
    %c2 = arith.constant 2 : index
    %c0_39 = arith.constant 0 : index
    %38 = vector.load %arg5[%c0_37, %c0_38, %c2, %c0_39] : memref<2x16x16x8xf32, #tpu.memory_space<vmem>>, vector<2x8x8x8xf32>
    %39 = vector.broadcast %37 : vector<1x1x1x8xf32> to vector<2x8x8x8xf32>
    %40 = arith.mulf %38, %39 : vector<2x8x8x8xf32>
    %41 = arith.addf %35, %40 : vector<2x8x8x8xf32>
    %42 = vector.extract_strided_slice %22 {offsets = [3, 0], sizes = [1, 8], strides = [1, 1]} : vector<81x8xf32> to vector<1x8xf32>
    %43 = vector.shape_cast %42 : vector<1x8xf32> to vector<1x1x1x8xf32>
    %c0_40 = arith.constant 0 : index
    %c0_41 = arith.constant 0 : index
    %c3 = arith.constant 3 : index
    %c0_42 = arith.constant 0 : index
    %44 = vector.load %arg5[%c0_40, %c0_41, %c3, %c0_42] : memref<2x16x16x8xf32, #tpu.memory_space<vmem>>, vector<2x8x8x8xf32>
    %45 = vector.broadcast %43 : vector<1x1x1x8xf32> to vector<2x8x8x8xf32>
    %46 = arith.mulf %44, %45 : vector<2x8x8x8xf32>
    %47 = arith.addf %41, %46 : vector<2x8x8x8xf32>
    %48 = vector.extract_strided_slice %22 {offsets = [4, 0], sizes = [1, 8], strides = [1, 1]} : vector<81x8xf32> to vector<1x8xf32>
    %49 = vector.shape_cast %48 : vector<1x8xf32> to vector<1x1x1x8xf32>
    %c0_43 = arith.constant 0 : index
    %c0_44 = arith.constant 0 : index
    %c4_45 = arith.constant 4 : index
    %c0_46 = arith.constant 0 : index
    %50 = vector.load %arg5[%c0_43, %c0_44, %c4_45, %c0_46] : memref<2x16x16x8xf32, #tpu.memory_space<vmem>>, vector<2x8x8x8xf32>
    %51 = vector.broadcast %49 : vector<1x1x1x8xf32> to vector<2x8x8x8xf32>
    %52 = arith.mulf %50, %51 : vector<2x8x8x8xf32>
    %53 = arith.addf %47, %52 : vector<2x8x8x8xf32>
    %54 = vector.extract_strided_slice %22 {offsets = [5, 0], sizes = [1, 8], strides = [1, 1]} : vector<81x8xf32> to vector<1x8xf32>
    %55 = vector.shape_cast %54 : vector<1x8xf32> to vector<1x1x1x8xf32>
    %c0_47 = arith.constant 0 : index
    %c0_48 = arith.constant 0 : index
    %c5 = arith.constant 5 : index
    %c0_49 = arith.constant 0 : index
    %56 = vector.load %arg5[%c0_47, %c0_48, %c5, %c0_49] : memref<2x16x16x8xf32, #tpu.memory_space<vmem>>, vector<2x8x8x8xf32>
    %57 = vector.broadcast %55 : vector<1x1x1x8xf32> to vector<2x8x8x8xf32>
    %58 = arith.mulf %56, %57 : vector<2x8x8x8xf32>
    %59 = arith.addf %53, %58 : vector<2x8x8x8xf32>
    %60 = vector.extract_strided_slice %22 {offsets = [6, 0], sizes = [1, 8], strides = [1, 1]} : vector<81x8xf32> to vector<1x8xf32>
    %61 = vector.shape_cast %60 : vector<1x8xf32> to vector<1x1x1x8xf32>
    %c0_50 = arith.constant 0 : index
    %c0_51 = arith.constant 0 : index
    %c6 = arith.constant 6 : index
    %c0_52 = arith.constant 0 : index
    %62 = vector.load %arg5[%c0_50, %c0_51, %c6, %c0_52] : memref<2x16x16x8xf32, #tpu.memory_space<vmem>>, vector<2x8x8x8xf32>
    %63 = vector.broadcast %61 : vector<1x1x1x8xf32> to vector<2x8x8x8xf32>
    %64 = arith.mulf %62, %63 : vector<2x8x8x8xf32>
    %65 = arith.addf %59, %64 : vector<2x8x8x8xf32>
    %66 = vector.extract_strided_slice %22 {offsets = [7, 0], sizes = [1, 8], strides = [1, 1]} : vector<81x8xf32> to vector<1x8xf32>
    %67 = vector.shape_cast %66 : vector<1x8xf32> to vector<1x1x1x8xf32>
    %c0_53 = arith.constant 0 : index
    %c0_54 = arith.constant 0 : index
    %c7 = arith.constant 7 : index
    %c0_55 = arith.constant 0 : index
    %68 = vector.load %arg5[%c0_53, %c0_54, %c7, %c0_55] : memref<2x16x16x8xf32, #tpu.memory_space<vmem>>, vector<2x8x8x8xf32>
    %69 = vector.broadcast %67 : vector<1x1x1x8xf32> to vector<2x8x8x8xf32>
    %70 = arith.mulf %68, %69 : vector<2x8x8x8xf32>
    %71 = arith.addf %65, %70 : vector<2x8x8x8xf32>
    %72 = vector.extract_strided_slice %22 {offsets = [8, 0], sizes = [1, 8], strides = [1, 1]} : vector<81x8xf32> to vector<1x8xf32>
    %73 = vector.shape_cast %72 : vector<1x8xf32> to vector<1x1x1x8xf32>
    %c0_56 = arith.constant 0 : index
    %c0_57 = arith.constant 0 : index
    %c8_58 = arith.constant 8 : index
    %c0_59 = arith.constant 0 : index
    %74 = vector.load %arg5[%c0_56, %c0_57, %c8_58, %c0_59] : memref<2x16x16x8xf32, #tpu.memory_space<vmem>>, vector<2x8x8x8xf32>
    %75 = vector.broadcast %73 : vector<1x1x1x8xf32> to vector<2x8x8x8xf32>
    %76 = arith.mulf %74, %75 : vector<2x8x8x8xf32>
    %77 = arith.addf %71, %76 : vector<2x8x8x8xf32>
    %78 = vector.extract_strided_slice %22 {offsets = [9, 0], sizes = [1, 8], strides = [1, 1]} : vector<81x8xf32> to vector<1x8xf32>
    %79 = vector.shape_cast %78 : vector<1x8xf32> to vector<1x1x1x8xf32>
    %c0_60 = arith.constant 0 : index
    %c1_61 = arith.constant 1 : index
    %c0_62 = arith.constant 0 : index
    %c0_63 = arith.constant 0 : index
    %80 = vector.load %arg5[%c0_60, %c1_61, %c0_62, %c0_63] : memref<2x16x16x8xf32, #tpu.memory_space<vmem>>, vector<2x8x8x8xf32>
    %81 = vector.broadcast %79 : vector<1x1x1x8xf32> to vector<2x8x8x8xf32>
    %82 = arith.mulf %80, %81 : vector<2x8x8x8xf32>
    %83 = arith.addf %77, %82 : vector<2x8x8x8xf32>
    %84 = vector.extract_strided_slice %22 {offsets = [10, 0], sizes = [1, 8], strides = [1, 1]} : vector<81x8xf32> to vector<1x8xf32>
    %85 = vector.shape_cast %84 : vector<1x8xf32> to vector<1x1x1x8xf32>
    %c0_64 = arith.constant 0 : index
    %c1_65 = arith.constant 1 : index
    %c1_66 = arith.constant 1 : index
    %c0_67 = arith.constant 0 : index
    %86 = vector.load %arg5[%c0_64, %c1_65, %c1_66, %c0_67] : memref<2x16x16x8xf32, #tpu.memory_space<vmem>>, vector<2x8x8x8xf32>
    %87 = vector.broadcast %85 : vector<1x1x1x8xf32> to vector<2x8x8x8xf32>
    %88 = arith.mulf %86, %87 : vector<2x8x8x8xf32>
    %89 = arith.addf %83, %88 : vector<2x8x8x8xf32>
    %90 = vector.extract_strided_slice %22 {offsets = [11, 0], sizes = [1, 8], strides = [1, 1]} : vector<81x8xf32> to vector<1x8xf32>
    %91 = vector.shape_cast %90 : vector<1x8xf32> to vector<1x1x1x8xf32>
    %c0_68 = arith.constant 0 : index
    %c1_69 = arith.constant 1 : index
    %c2_70 = arith.constant 2 : index
    %c0_71 = arith.constant 0 : index
    %92 = vector.load %arg5[%c0_68, %c1_69, %c2_70, %c0_71] : memref<2x16x16x8xf32, #tpu.memory_space<vmem>>, vector<2x8x8x8xf32>
    %93 = vector.broadcast %91 : vector<1x1x1x8xf32> to vector<2x8x8x8xf32>
    %94 = arith.mulf %92, %93 : vector<2x8x8x8xf32>
    %95 = arith.addf %89, %94 : vector<2x8x8x8xf32>
    %96 = vector.extract_strided_slice %22 {offsets = [12, 0], sizes = [1, 8], strides = [1, 1]} : vector<81x8xf32> to vector<1x8xf32>
    %97 = vector.shape_cast %96 : vector<1x8xf32> to vector<1x1x1x8xf32>
    %c0_72 = arith.constant 0 : index
    %c1_73 = arith.constant 1 : index
    %c3_74 = arith.constant 3 : index
    %c0_75 = arith.constant 0 : index
    %98 = vector.load %arg5[%c0_72, %c1_73, %c3_74, %c0_75] : memref<2x16x16x8xf32, #tpu.memory_space<vmem>>, vector<2x8x8x8xf32>
    %99 = vector.broadcast %97 : vector<1x1x1x8xf32> to vector<2x8x8x8xf32>
    %100 = arith.mulf %98, %99 : vector<2x8x8x8xf32>
    %101 = arith.addf %95, %100 : vector<2x8x8x8xf32>
    %102 = vector.extract_strided_slice %22 {offsets = [13, 0], sizes = [1, 8], strides = [1, 1]} : vector<81x8xf32> to vector<1x8xf32>
    %103 = vector.shape_cast %102 : vector<1x8xf32> to vector<1x1x1x8xf32>
    %c0_76 = arith.constant 0 : index
    %c1_77 = arith.constant 1 : index
    %c4_78 = arith.constant 4 : index
    %c0_79 = arith.constant 0 : index
    %104 = vector.load %arg5[%c0_76, %c1_77, %c4_78, %c0_79] : memref<2x16x16x8xf32, #tpu.memory_space<vmem>>, vector<2x8x8x8xf32>
    %105 = vector.broadcast %103 : vector<1x1x1x8xf32> to vector<2x8x8x8xf32>
    %106 = arith.mulf %104, %105 : vector<2x8x8x8xf32>
    %107 = arith.addf %101, %106 : vector<2x8x8x8xf32>
    %108 = vector.extract_strided_slice %22 {offsets = [14, 0], sizes = [1, 8], strides = [1, 1]} : vector<81x8xf32> to vector<1x8xf32>
    %109 = vector.shape_cast %108 : vector<1x8xf32> to vector<1x1x1x8xf32>
    %c0_80 = arith.constant 0 : index
    %c1_81 = arith.constant 1 : index
    %c5_82 = arith.constant 5 : index
    %c0_83 = arith.constant 0 : index
    %110 = vector.load %arg5[%c0_80, %c1_81, %c5_82, %c0_83] : memref<2x16x16x8xf32, #tpu.memory_space<vmem>>, vector<2x8x8x8xf32>
    %111 = vector.broadcast %109 : vector<1x1x1x8xf32> to vector<2x8x8x8xf32>
    %112 = arith.mulf %110, %111 : vector<2x8x8x8xf32>
    %113 = arith.addf %107, %112 : vector<2x8x8x8xf32>
    %114 = vector.extract_strided_slice %22 {offsets = [15, 0], sizes = [1, 8], strides = [1, 1]} : vector<81x8xf32> to vector<1x8xf32>
    %115 = vector.shape_cast %114 : vector<1x8xf32> to vector<1x1x1x8xf32>
    %c0_84 = arith.constant 0 : index
    %c1_85 = arith.constant 1 : index
    %c6_86 = arith.constant 6 : index
    %c0_87 = arith.constant 0 : index
    %116 = vector.load %arg5[%c0_84, %c1_85, %c6_86, %c0_87] : memref<2x16x16x8xf32, #tpu.memory_space<vmem>>, vector<2x8x8x8xf32>
    %117 = vector.broadcast %115 : vector<1x1x1x8xf32> to vector<2x8x8x8xf32>
    %118 = arith.mulf %116, %117 : vector<2x8x8x8xf32>
    %119 = arith.addf %113, %118 : vector<2x8x8x8xf32>
    %120 = vector.extract_strided_slice %22 {offsets = [16, 0], sizes = [1, 8], strides = [1, 1]} : vector<81x8xf32> to vector<1x8xf32>
    %121 = vector.shape_cast %120 : vector<1x8xf32> to vector<1x1x1x8xf32>
    %c0_88 = arith.constant 0 : index
    %c1_89 = arith.constant 1 : index
    %c7_90 = arith.constant 7 : index
    %c0_91 = arith.constant 0 : index
    %122 = vector.load %arg5[%c0_88, %c1_89, %c7_90, %c0_91] : memref<2x16x16x8xf32, #tpu.memory_space<vmem>>, vector<2x8x8x8xf32>
    %123 = vector.broadcast %121 : vector<1x1x1x8xf32> to vector<2x8x8x8xf32>
    %124 = arith.mulf %122, %123 : vector<2x8x8x8xf32>
    %125 = arith.addf %119, %124 : vector<2x8x8x8xf32>
    %126 = vector.extract_strided_slice %22 {offsets = [17, 0], sizes = [1, 8], strides = [1, 1]} : vector<81x8xf32> to vector<1x8xf32>
    %127 = vector.shape_cast %126 : vector<1x8xf32> to vector<1x1x1x8xf32>
    %c0_92 = arith.constant 0 : index
    %c1_93 = arith.constant 1 : index
    %c8_94 = arith.constant 8 : index
    %c0_95 = arith.constant 0 : index
    %128 = vector.load %arg5[%c0_92, %c1_93, %c8_94, %c0_95] : memref<2x16x16x8xf32, #tpu.memory_space<vmem>>, vector<2x8x8x8xf32>
    %129 = vector.broadcast %127 : vector<1x1x1x8xf32> to vector<2x8x8x8xf32>
    %130 = arith.mulf %128, %129 : vector<2x8x8x8xf32>
    %131 = arith.addf %125, %130 : vector<2x8x8x8xf32>
    %132 = vector.extract_strided_slice %22 {offsets = [18, 0], sizes = [1, 8], strides = [1, 1]} : vector<81x8xf32> to vector<1x8xf32>
    %133 = vector.shape_cast %132 : vector<1x8xf32> to vector<1x1x1x8xf32>
    %c0_96 = arith.constant 0 : index
    %c2_97 = arith.constant 2 : index
    %c0_98 = arith.constant 0 : index
    %c0_99 = arith.constant 0 : index
    %134 = vector.load %arg5[%c0_96, %c2_97, %c0_98, %c0_99] : memref<2x16x16x8xf32, #tpu.memory_space<vmem>>, vector<2x8x8x8xf32>
    %135 = vector.broadcast %133 : vector<1x1x1x8xf32> to vector<2x8x8x8xf32>
    %136 = arith.mulf %134, %135 : vector<2x8x8x8xf32>
    %137 = arith.addf %131, %136 : vector<2x8x8x8xf32>
    %138 = vector.extract_strided_slice %22 {offsets = [19, 0], sizes = [1, 8], strides = [1, 1]} : vector<81x8xf32> to vector<1x8xf32>
    %139 = vector.shape_cast %138 : vector<1x8xf32> to vector<1x1x1x8xf32>
    %c0_100 = arith.constant 0 : index
    %c2_101 = arith.constant 2 : index
    %c1_102 = arith.constant 1 : index
    %c0_103 = arith.constant 0 : index
    %140 = vector.load %arg5[%c0_100, %c2_101, %c1_102, %c0_103] : memref<2x16x16x8xf32, #tpu.memory_space<vmem>>, vector<2x8x8x8xf32>
    %141 = vector.broadcast %139 : vector<1x1x1x8xf32> to vector<2x8x8x8xf32>
    %142 = arith.mulf %140, %141 : vector<2x8x8x8xf32>
    %143 = arith.addf %137, %142 : vector<2x8x8x8xf32>
    %144 = vector.extract_strided_slice %22 {offsets = [20, 0], sizes = [1, 8], strides = [1, 1]} : vector<81x8xf32> to vector<1x8xf32>
    %145 = vector.shape_cast %144 : vector<1x8xf32> to vector<1x1x1x8xf32>
    %c0_104 = arith.constant 0 : index
    %c2_105 = arith.constant 2 : index
    %c2_106 = arith.constant 2 : index
    %c0_107 = arith.constant 0 : index
    %146 = vector.load %arg5[%c0_104, %c2_105, %c2_106, %c0_107] : memref<2x16x16x8xf32, #tpu.memory_space<vmem>>, vector<2x8x8x8xf32>
    %147 = vector.broadcast %145 : vector<1x1x1x8xf32> to vector<2x8x8x8xf32>
    %148 = arith.mulf %146, %147 : vector<2x8x8x8xf32>
    %149 = arith.addf %143, %148 : vector<2x8x8x8xf32>
    %150 = vector.extract_strided_slice %22 {offsets = [21, 0], sizes = [1, 8], strides = [1, 1]} : vector<81x8xf32> to vector<1x8xf32>
    %151 = vector.shape_cast %150 : vector<1x8xf32> to vector<1x1x1x8xf32>
    %c0_108 = arith.constant 0 : index
    %c2_109 = arith.constant 2 : index
    %c3_110 = arith.constant 3 : index
    %c0_111 = arith.constant 0 : index
    %152 = vector.load %arg5[%c0_108, %c2_109, %c3_110, %c0_111] : memref<2x16x16x8xf32, #tpu.memory_space<vmem>>, vector<2x8x8x8xf32>
    %153 = vector.broadcast %151 : vector<1x1x1x8xf32> to vector<2x8x8x8xf32>
    %154 = arith.mulf %152, %153 : vector<2x8x8x8xf32>
    %155 = arith.addf %149, %154 : vector<2x8x8x8xf32>
    %156 = vector.extract_strided_slice %22 {offsets = [22, 0], sizes = [1, 8], strides = [1, 1]} : vector<81x8xf32> to vector<1x8xf32>
    %157 = vector.shape_cast %156 : vector<1x8xf32> to vector<1x1x1x8xf32>
    %c0_112 = arith.constant 0 : index
    %c2_113 = arith.constant 2 : index
    %c4_114 = arith.constant 4 : index
    %c0_115 = arith.constant 0 : index
    %158 = vector.load %arg5[%c0_112, %c2_113, %c4_114, %c0_115] : memref<2x16x16x8xf32, #tpu.memory_space<vmem>>, vector<2x8x8x8xf32>
    %159 = vector.broadcast %157 : vector<1x1x1x8xf32> to vector<2x8x8x8xf32>
    %160 = arith.mulf %158, %159 : vector<2x8x8x8xf32>
    %161 = arith.addf %155, %160 : vector<2x8x8x8xf32>
    %162 = vector.extract_strided_slice %22 {offsets = [23, 0], sizes = [1, 8], strides = [1, 1]} : vector<81x8xf32> to vector<1x8xf32>
    %163 = vector.shape_cast %162 : vector<1x8xf32> to vector<1x1x1x8xf32>
    %c0_116 = arith.constant 0 : index
    %c2_117 = arith.constant 2 : index
    %c5_118 = arith.constant 5 : index
    %c0_119 = arith.constant 0 : index
    %164 = vector.load %arg5[%c0_116, %c2_117, %c5_118, %c0_119] : memref<2x16x16x8xf32, #tpu.memory_space<vmem>>, vector<2x8x8x8xf32>
    %165 = vector.broadcast %163 : vector<1x1x1x8xf32> to vector<2x8x8x8xf32>
    %166 = arith.mulf %164, %165 : vector<2x8x8x8xf32>
    %167 = arith.addf %161, %166 : vector<2x8x8x8xf32>
    %168 = vector.extract_strided_slice %22 {offsets = [24, 0], sizes = [1, 8], strides = [1, 1]} : vector<81x8xf32> to vector<1x8xf32>
    %169 = vector.shape_cast %168 : vector<1x8xf32> to vector<1x1x1x8xf32>
    %c0_120 = arith.constant 0 : index
    %c2_121 = arith.constant 2 : index
    %c6_122 = arith.constant 6 : index
    %c0_123 = arith.constant 0 : index
    %170 = vector.load %arg5[%c0_120, %c2_121, %c6_122, %c0_123] : memref<2x16x16x8xf32, #tpu.memory_space<vmem>>, vector<2x8x8x8xf32>
    %171 = vector.broadcast %169 : vector<1x1x1x8xf32> to vector<2x8x8x8xf32>
    %172 = arith.mulf %170, %171 : vector<2x8x8x8xf32>
    %173 = arith.addf %167, %172 : vector<2x8x8x8xf32>
    %174 = vector.extract_strided_slice %22 {offsets = [25, 0], sizes = [1, 8], strides = [1, 1]} : vector<81x8xf32> to vector<1x8xf32>
    %175 = vector.shape_cast %174 : vector<1x8xf32> to vector<1x1x1x8xf32>
    %c0_124 = arith.constant 0 : index
    %c2_125 = arith.constant 2 : index
    %c7_126 = arith.constant 7 : index
    %c0_127 = arith.constant 0 : index
    %176 = vector.load %arg5[%c0_124, %c2_125, %c7_126, %c0_127] : memref<2x16x16x8xf32, #tpu.memory_space<vmem>>, vector<2x8x8x8xf32>
    %177 = vector.broadcast %175 : vector<1x1x1x8xf32> to vector<2x8x8x8xf32>
    %178 = arith.mulf %176, %177 : vector<2x8x8x8xf32>
    %179 = arith.addf %173, %178 : vector<2x8x8x8xf32>
    %180 = vector.extract_strided_slice %22 {offsets = [26, 0], sizes = [1, 8], strides = [1, 1]} : vector<81x8xf32> to vector<1x8xf32>
    %181 = vector.shape_cast %180 : vector<1x8xf32> to vector<1x1x1x8xf32>
    %c0_128 = arith.constant 0 : index
    %c2_129 = arith.constant 2 : index
    %c8_130 = arith.constant 8 : index
    %c0_131 = arith.constant 0 : index
    %182 = vector.load %arg5[%c0_128, %c2_129, %c8_130, %c0_131] : memref<2x16x16x8xf32, #tpu.memory_space<vmem>>, vector<2x8x8x8xf32>
    %183 = vector.broadcast %181 : vector<1x1x1x8xf32> to vector<2x8x8x8xf32>
    %184 = arith.mulf %182, %183 : vector<2x8x8x8xf32>
    %185 = arith.addf %179, %184 : vector<2x8x8x8xf32>
    %186 = vector.extract_strided_slice %22 {offsets = [27, 0], sizes = [1, 8], strides = [1, 1]} : vector<81x8xf32> to vector<1x8xf32>
    %187 = vector.shape_cast %186 : vector<1x8xf32> to vector<1x1x1x8xf32>
    %c0_132 = arith.constant 0 : index
    %c3_133 = arith.constant 3 : index
    %c0_134 = arith.constant 0 : index
    %c0_135 = arith.constant 0 : index
    %188 = vector.load %arg5[%c0_132, %c3_133, %c0_134, %c0_135] : memref<2x16x16x8xf32, #tpu.memory_space<vmem>>, vector<2x8x8x8xf32>
    %189 = vector.broadcast %187 : vector<1x1x1x8xf32> to vector<2x8x8x8xf32>
    %190 = arith.mulf %188, %189 : vector<2x8x8x8xf32>
    %191 = arith.addf %185, %190 : vector<2x8x8x8xf32>
    %192 = vector.extract_strided_slice %22 {offsets = [28, 0], sizes = [1, 8], strides = [1, 1]} : vector<81x8xf32> to vector<1x8xf32>
    %193 = vector.shape_cast %192 : vector<1x8xf32> to vector<1x1x1x8xf32>
    %c0_136 = arith.constant 0 : index
    %c3_137 = arith.constant 3 : index
    %c1_138 = arith.constant 1 : index
    %c0_139 = arith.constant 0 : index
    %194 = vector.load %arg5[%c0_136, %c3_137, %c1_138, %c0_139] : memref<2x16x16x8xf32, #tpu.memory_space<vmem>>, vector<2x8x8x8xf32>
    %195 = vector.broadcast %193 : vector<1x1x1x8xf32> to vector<2x8x8x8xf32>
    %196 = arith.mulf %194, %195 : vector<2x8x8x8xf32>
    %197 = arith.addf %191, %196 : vector<2x8x8x8xf32>
    %198 = vector.extract_strided_slice %22 {offsets = [29, 0], sizes = [1, 8], strides = [1, 1]} : vector<81x8xf32> to vector<1x8xf32>
    %199 = vector.shape_cast %198 : vector<1x8xf32> to vector<1x1x1x8xf32>
    %c0_140 = arith.constant 0 : index
    %c3_141 = arith.constant 3 : index
    %c2_142 = arith.constant 2 : index
    %c0_143 = arith.constant 0 : index
    %200 = vector.load %arg5[%c0_140, %c3_141, %c2_142, %c0_143] : memref<2x16x16x8xf32, #tpu.memory_space<vmem>>, vector<2x8x8x8xf32>
    %201 = vector.broadcast %199 : vector<1x1x1x8xf32> to vector<2x8x8x8xf32>
    %202 = arith.mulf %200, %201 : vector<2x8x8x8xf32>
    %203 = arith.addf %197, %202 : vector<2x8x8x8xf32>
    %204 = vector.extract_strided_slice %22 {offsets = [30, 0], sizes = [1, 8], strides = [1, 1]} : vector<81x8xf32> to vector<1x8xf32>
    %205 = vector.shape_cast %204 : vector<1x8xf32> to vector<1x1x1x8xf32>
    %c0_144 = arith.constant 0 : index
    %c3_145 = arith.constant 3 : index
    %c3_146 = arith.constant 3 : index
    %c0_147 = arith.constant 0 : index
    %206 = vector.load %arg5[%c0_144, %c3_145, %c3_146, %c0_147] : memref<2x16x16x8xf32, #tpu.memory_space<vmem>>, vector<2x8x8x8xf32>
    %207 = vector.broadcast %205 : vector<1x1x1x8xf32> to vector<2x8x8x8xf32>
    %208 = arith.mulf %206, %207 : vector<2x8x8x8xf32>
    %209 = arith.addf %203, %208 : vector<2x8x8x8xf32>
    %210 = vector.extract_strided_slice %22 {offsets = [31, 0], sizes = [1, 8], strides = [1, 1]} : vector<81x8xf32> to vector<1x8xf32>
    %211 = vector.shape_cast %210 : vector<1x8xf32> to vector<1x1x1x8xf32>
    %c0_148 = arith.constant 0 : index
    %c3_149 = arith.constant 3 : index
    %c4_150 = arith.constant 4 : index
    %c0_151 = arith.constant 0 : index
    %212 = vector.load %arg5[%c0_148, %c3_149, %c4_150, %c0_151] : memref<2x16x16x8xf32, #tpu.memory_space<vmem>>, vector<2x8x8x8xf32>
    %213 = vector.broadcast %211 : vector<1x1x1x8xf32> to vector<2x8x8x8xf32>
    %214 = arith.mulf %212, %213 : vector<2x8x8x8xf32>
    %215 = arith.addf %209, %214 : vector<2x8x8x8xf32>
    %216 = vector.extract_strided_slice %22 {offsets = [32, 0], sizes = [1, 8], strides = [1, 1]} : vector<81x8xf32> to vector<1x8xf32>
    %217 = vector.shape_cast %216 : vector<1x8xf32> to vector<1x1x1x8xf32>
    %c0_152 = arith.constant 0 : index
    %c3_153 = arith.constant 3 : index
    %c5_154 = arith.constant 5 : index
    %c0_155 = arith.constant 0 : index
    %218 = vector.load %arg5[%c0_152, %c3_153, %c5_154, %c0_155] : memref<2x16x16x8xf32, #tpu.memory_space<vmem>>, vector<2x8x8x8xf32>
    %219 = vector.broadcast %217 : vector<1x1x1x8xf32> to vector<2x8x8x8xf32>
    %220 = arith.mulf %218, %219 : vector<2x8x8x8xf32>
    %221 = arith.addf %215, %220 : vector<2x8x8x8xf32>
    %222 = vector.extract_strided_slice %22 {offsets = [33, 0], sizes = [1, 8], strides = [1, 1]} : vector<81x8xf32> to vector<1x8xf32>
    %223 = vector.shape_cast %222 : vector<1x8xf32> to vector<1x1x1x8xf32>
    %c0_156 = arith.constant 0 : index
    %c3_157 = arith.constant 3 : index
    %c6_158 = arith.constant 6 : index
    %c0_159 = arith.constant 0 : index
    %224 = vector.load %arg5[%c0_156, %c3_157, %c6_158, %c0_159] : memref<2x16x16x8xf32, #tpu.memory_space<vmem>>, vector<2x8x8x8xf32>
    %225 = vector.broadcast %223 : vector<1x1x1x8xf32> to vector<2x8x8x8xf32>
    %226 = arith.mulf %224, %225 : vector<2x8x8x8xf32>
    %227 = arith.addf %221, %226 : vector<2x8x8x8xf32>
    %228 = vector.extract_strided_slice %22 {offsets = [34, 0], sizes = [1, 8], strides = [1, 1]} : vector<81x8xf32> to vector<1x8xf32>
    %229 = vector.shape_cast %228 : vector<1x8xf32> to vector<1x1x1x8xf32>
    %c0_160 = arith.constant 0 : index
    %c3_161 = arith.constant 3 : index
    %c7_162 = arith.constant 7 : index
    %c0_163 = arith.constant 0 : index
    %230 = vector.load %arg5[%c0_160, %c3_161, %c7_162, %c0_163] : memref<2x16x16x8xf32, #tpu.memory_space<vmem>>, vector<2x8x8x8xf32>
    %231 = vector.broadcast %229 : vector<1x1x1x8xf32> to vector<2x8x8x8xf32>
    %232 = arith.mulf %230, %231 : vector<2x8x8x8xf32>
    %233 = arith.addf %227, %232 : vector<2x8x8x8xf32>
    %234 = vector.extract_strided_slice %22 {offsets = [35, 0], sizes = [1, 8], strides = [1, 1]} : vector<81x8xf32> to vector<1x8xf32>
    %235 = vector.shape_cast %234 : vector<1x8xf32> to vector<1x1x1x8xf32>
    %c0_164 = arith.constant 0 : index
    %c3_165 = arith.constant 3 : index
    %c8_166 = arith.constant 8 : index
    %c0_167 = arith.constant 0 : index
    %236 = vector.load %arg5[%c0_164, %c3_165, %c8_166, %c0_167] : memref<2x16x16x8xf32, #tpu.memory_space<vmem>>, vector<2x8x8x8xf32>
    %237 = vector.broadcast %235 : vector<1x1x1x8xf32> to vector<2x8x8x8xf32>
    %238 = arith.mulf %236, %237 : vector<2x8x8x8xf32>
    %239 = arith.addf %233, %238 : vector<2x8x8x8xf32>
    %240 = vector.extract_strided_slice %22 {offsets = [36, 0], sizes = [1, 8], strides = [1, 1]} : vector<81x8xf32> to vector<1x8xf32>
    %241 = vector.shape_cast %240 : vector<1x8xf32> to vector<1x1x1x8xf32>
    %c0_168 = arith.constant 0 : index
    %c4_169 = arith.constant 4 : index
    %c0_170 = arith.constant 0 : index
    %c0_171 = arith.constant 0 : index
    %242 = vector.load %arg5[%c0_168, %c4_169, %c0_170, %c0_171] : memref<2x16x16x8xf32, #tpu.memory_space<vmem>>, vector<2x8x8x8xf32>
    %243 = vector.broadcast %241 : vector<1x1x1x8xf32> to vector<2x8x8x8xf32>
    %244 = arith.mulf %242, %243 : vector<2x8x8x8xf32>
    %245 = arith.addf %239, %244 : vector<2x8x8x8xf32>
    %246 = vector.extract_strided_slice %22 {offsets = [37, 0], sizes = [1, 8], strides = [1, 1]} : vector<81x8xf32> to vector<1x8xf32>
    %247 = vector.shape_cast %246 : vector<1x8xf32> to vector<1x1x1x8xf32>
    %c0_172 = arith.constant 0 : index
    %c4_173 = arith.constant 4 : index
    %c1_174 = arith.constant 1 : index
    %c0_175 = arith.constant 0 : index
    %248 = vector.load %arg5[%c0_172, %c4_173, %c1_174, %c0_175] : memref<2x16x16x8xf32, #tpu.memory_space<vmem>>, vector<2x8x8x8xf32>
    %249 = vector.broadcast %247 : vector<1x1x1x8xf32> to vector<2x8x8x8xf32>
    %250 = arith.mulf %248, %249 : vector<2x8x8x8xf32>
    %251 = arith.addf %245, %250 : vector<2x8x8x8xf32>
    %252 = vector.extract_strided_slice %22 {offsets = [38, 0], sizes = [1, 8], strides = [1, 1]} : vector<81x8xf32> to vector<1x8xf32>
    %253 = vector.shape_cast %252 : vector<1x8xf32> to vector<1x1x1x8xf32>
    %c0_176 = arith.constant 0 : index
    %c4_177 = arith.constant 4 : index
    %c2_178 = arith.constant 2 : index
    %c0_179 = arith.constant 0 : index
    %254 = vector.load %arg5[%c0_176, %c4_177, %c2_178, %c0_179] : memref<2x16x16x8xf32, #tpu.memory_space<vmem>>, vector<2x8x8x8xf32>
    %255 = vector.broadcast %253 : vector<1x1x1x8xf32> to vector<2x8x8x8xf32>
    %256 = arith.mulf %254, %255 : vector<2x8x8x8xf32>
    %257 = arith.addf %251, %256 : vector<2x8x8x8xf32>
    %258 = vector.extract_strided_slice %22 {offsets = [39, 0], sizes = [1, 8], strides = [1, 1]} : vector<81x8xf32> to vector<1x8xf32>
    %259 = vector.shape_cast %258 : vector<1x8xf32> to vector<1x1x1x8xf32>
    %c0_180 = arith.constant 0 : index
    %c4_181 = arith.constant 4 : index
    %c3_182 = arith.constant 3 : index
    %c0_183 = arith.constant 0 : index
    %260 = vector.load %arg5[%c0_180, %c4_181, %c3_182, %c0_183] : memref<2x16x16x8xf32, #tpu.memory_space<vmem>>, vector<2x8x8x8xf32>
    %261 = vector.broadcast %259 : vector<1x1x1x8xf32> to vector<2x8x8x8xf32>
    %262 = arith.mulf %260, %261 : vector<2x8x8x8xf32>
    %263 = arith.addf %257, %262 : vector<2x8x8x8xf32>
    %264 = vector.extract_strided_slice %22 {offsets = [40, 0], sizes = [1, 8], strides = [1, 1]} : vector<81x8xf32> to vector<1x8xf32>
    %265 = vector.shape_cast %264 : vector<1x8xf32> to vector<1x1x1x8xf32>
    %c0_184 = arith.constant 0 : index
    %c4_185 = arith.constant 4 : index
    %c4_186 = arith.constant 4 : index
    %c0_187 = arith.constant 0 : index
    %266 = vector.load %arg5[%c0_184, %c4_185, %c4_186, %c0_187] : memref<2x16x16x8xf32, #tpu.memory_space<vmem>>, vector<2x8x8x8xf32>
    %267 = vector.broadcast %265 : vector<1x1x1x8xf32> to vector<2x8x8x8xf32>
    %268 = arith.mulf %266, %267 : vector<2x8x8x8xf32>
    %269 = arith.addf %263, %268 : vector<2x8x8x8xf32>
    %270 = vector.extract_strided_slice %22 {offsets = [41, 0], sizes = [1, 8], strides = [1, 1]} : vector<81x8xf32> to vector<1x8xf32>
    %271 = vector.shape_cast %270 : vector<1x8xf32> to vector<1x1x1x8xf32>
    %c0_188 = arith.constant 0 : index
    %c4_189 = arith.constant 4 : index
    %c5_190 = arith.constant 5 : index
    %c0_191 = arith.constant 0 : index
    %272 = vector.load %arg5[%c0_188, %c4_189, %c5_190, %c0_191] : memref<2x16x16x8xf32, #tpu.memory_space<vmem>>, vector<2x8x8x8xf32>
    %273 = vector.broadcast %271 : vector<1x1x1x8xf32> to vector<2x8x8x8xf32>
    %274 = arith.mulf %272, %273 : vector<2x8x8x8xf32>
    %275 = arith.addf %269, %274 : vector<2x8x8x8xf32>
    %276 = vector.extract_strided_slice %22 {offsets = [42, 0], sizes = [1, 8], strides = [1, 1]} : vector<81x8xf32> to vector<1x8xf32>
    %277 = vector.shape_cast %276 : vector<1x8xf32> to vector<1x1x1x8xf32>
    %c0_192 = arith.constant 0 : index
    %c4_193 = arith.constant 4 : index
    %c6_194 = arith.constant 6 : index
    %c0_195 = arith.constant 0 : index
    %278 = vector.load %arg5[%c0_192, %c4_193, %c6_194, %c0_195] : memref<2x16x16x8xf32, #tpu.memory_space<vmem>>, vector<2x8x8x8xf32>
    %279 = vector.broadcast %277 : vector<1x1x1x8xf32> to vector<2x8x8x8xf32>
    %280 = arith.mulf %278, %279 : vector<2x8x8x8xf32>
    %281 = arith.addf %275, %280 : vector<2x8x8x8xf32>
    %282 = vector.extract_strided_slice %22 {offsets = [43, 0], sizes = [1, 8], strides = [1, 1]} : vector<81x8xf32> to vector<1x8xf32>
    %283 = vector.shape_cast %282 : vector<1x8xf32> to vector<1x1x1x8xf32>
    %c0_196 = arith.constant 0 : index
    %c4_197 = arith.constant 4 : index
    %c7_198 = arith.constant 7 : index
    %c0_199 = arith.constant 0 : index
    %284 = vector.load %arg5[%c0_196, %c4_197, %c7_198, %c0_199] : memref<2x16x16x8xf32, #tpu.memory_space<vmem>>, vector<2x8x8x8xf32>
    %285 = vector.broadcast %283 : vector<1x1x1x8xf32> to vector<2x8x8x8xf32>
    %286 = arith.mulf %284, %285 : vector<2x8x8x8xf32>
    %287 = arith.addf %281, %286 : vector<2x8x8x8xf32>
    %288 = vector.extract_strided_slice %22 {offsets = [44, 0], sizes = [1, 8], strides = [1, 1]} : vector<81x8xf32> to vector<1x8xf32>
    %289 = vector.shape_cast %288 : vector<1x8xf32> to vector<1x1x1x8xf32>
    %c0_200 = arith.constant 0 : index
    %c4_201 = arith.constant 4 : index
    %c8_202 = arith.constant 8 : index
    %c0_203 = arith.constant 0 : index
    %290 = vector.load %arg5[%c0_200, %c4_201, %c8_202, %c0_203] : memref<2x16x16x8xf32, #tpu.memory_space<vmem>>, vector<2x8x8x8xf32>
    %291 = vector.broadcast %289 : vector<1x1x1x8xf32> to vector<2x8x8x8xf32>
    %292 = arith.mulf %290, %291 : vector<2x8x8x8xf32>
    %293 = arith.addf %287, %292 : vector<2x8x8x8xf32>
    %294 = vector.extract_strided_slice %22 {offsets = [45, 0], sizes = [1, 8], strides = [1, 1]} : vector<81x8xf32> to vector<1x8xf32>
    %295 = vector.shape_cast %294 : vector<1x8xf32> to vector<1x1x1x8xf32>
    %c0_204 = arith.constant 0 : index
    %c5_205 = arith.constant 5 : index
    %c0_206 = arith.constant 0 : index
    %c0_207 = arith.constant 0 : index
    %296 = vector.load %arg5[%c0_204, %c5_205, %c0_206, %c0_207] : memref<2x16x16x8xf32, #tpu.memory_space<vmem>>, vector<2x8x8x8xf32>
    %297 = vector.broadcast %295 : vector<1x1x1x8xf32> to vector<2x8x8x8xf32>
    %298 = arith.mulf %296, %297 : vector<2x8x8x8xf32>
    %299 = arith.addf %293, %298 : vector<2x8x8x8xf32>
    %300 = vector.extract_strided_slice %22 {offsets = [46, 0], sizes = [1, 8], strides = [1, 1]} : vector<81x8xf32> to vector<1x8xf32>
    %301 = vector.shape_cast %300 : vector<1x8xf32> to vector<1x1x1x8xf32>
    %c0_208 = arith.constant 0 : index
    %c5_209 = arith.constant 5 : index
    %c1_210 = arith.constant 1 : index
    %c0_211 = arith.constant 0 : index
    %302 = vector.load %arg5[%c0_208, %c5_209, %c1_210, %c0_211] : memref<2x16x16x8xf32, #tpu.memory_space<vmem>>, vector<2x8x8x8xf32>
    %303 = vector.broadcast %301 : vector<1x1x1x8xf32> to vector<2x8x8x8xf32>
    %304 = arith.mulf %302, %303 : vector<2x8x8x8xf32>
    %305 = arith.addf %299, %304 : vector<2x8x8x8xf32>
    %306 = vector.extract_strided_slice %22 {offsets = [47, 0], sizes = [1, 8], strides = [1, 1]} : vector<81x8xf32> to vector<1x8xf32>
    %307 = vector.shape_cast %306 : vector<1x8xf32> to vector<1x1x1x8xf32>
    %c0_212 = arith.constant 0 : index
    %c5_213 = arith.constant 5 : index
    %c2_214 = arith.constant 2 : index
    %c0_215 = arith.constant 0 : index
    %308 = vector.load %arg5[%c0_212, %c5_213, %c2_214, %c0_215] : memref<2x16x16x8xf32, #tpu.memory_space<vmem>>, vector<2x8x8x8xf32>
    %309 = vector.broadcast %307 : vector<1x1x1x8xf32> to vector<2x8x8x8xf32>
    %310 = arith.mulf %308, %309 : vector<2x8x8x8xf32>
    %311 = arith.addf %305, %310 : vector<2x8x8x8xf32>
    %312 = vector.extract_strided_slice %22 {offsets = [48, 0], sizes = [1, 8], strides = [1, 1]} : vector<81x8xf32> to vector<1x8xf32>
    %313 = vector.shape_cast %312 : vector<1x8xf32> to vector<1x1x1x8xf32>
    %c0_216 = arith.constant 0 : index
    %c5_217 = arith.constant 5 : index
    %c3_218 = arith.constant 3 : index
    %c0_219 = arith.constant 0 : index
    %314 = vector.load %arg5[%c0_216, %c5_217, %c3_218, %c0_219] : memref<2x16x16x8xf32, #tpu.memory_space<vmem>>, vector<2x8x8x8xf32>
    %315 = vector.broadcast %313 : vector<1x1x1x8xf32> to vector<2x8x8x8xf32>
    %316 = arith.mulf %314, %315 : vector<2x8x8x8xf32>
    %317 = arith.addf %311, %316 : vector<2x8x8x8xf32>
    %318 = vector.extract_strided_slice %22 {offsets = [49, 0], sizes = [1, 8], strides = [1, 1]} : vector<81x8xf32> to vector<1x8xf32>
    %319 = vector.shape_cast %318 : vector<1x8xf32> to vector<1x1x1x8xf32>
    %c0_220 = arith.constant 0 : index
    %c5_221 = arith.constant 5 : index
    %c4_222 = arith.constant 4 : index
    %c0_223 = arith.constant 0 : index
    %320 = vector.load %arg5[%c0_220, %c5_221, %c4_222, %c0_223] : memref<2x16x16x8xf32, #tpu.memory_space<vmem>>, vector<2x8x8x8xf32>
    %321 = vector.broadcast %319 : vector<1x1x1x8xf32> to vector<2x8x8x8xf32>
    %322 = arith.mulf %320, %321 : vector<2x8x8x8xf32>
    %323 = arith.addf %317, %322 : vector<2x8x8x8xf32>
    %324 = vector.extract_strided_slice %22 {offsets = [50, 0], sizes = [1, 8], strides = [1, 1]} : vector<81x8xf32> to vector<1x8xf32>
    %325 = vector.shape_cast %324 : vector<1x8xf32> to vector<1x1x1x8xf32>
    %c0_224 = arith.constant 0 : index
    %c5_225 = arith.constant 5 : index
    %c5_226 = arith.constant 5 : index
    %c0_227 = arith.constant 0 : index
    %326 = vector.load %arg5[%c0_224, %c5_225, %c5_226, %c0_227] : memref<2x16x16x8xf32, #tpu.memory_space<vmem>>, vector<2x8x8x8xf32>
    %327 = vector.broadcast %325 : vector<1x1x1x8xf32> to vector<2x8x8x8xf32>
    %328 = arith.mulf %326, %327 : vector<2x8x8x8xf32>
    %329 = arith.addf %323, %328 : vector<2x8x8x8xf32>
    %330 = vector.extract_strided_slice %22 {offsets = [51, 0], sizes = [1, 8], strides = [1, 1]} : vector<81x8xf32> to vector<1x8xf32>
    %331 = vector.shape_cast %330 : vector<1x8xf32> to vector<1x1x1x8xf32>
    %c0_228 = arith.constant 0 : index
    %c5_229 = arith.constant 5 : index
    %c6_230 = arith.constant 6 : index
    %c0_231 = arith.constant 0 : index
    %332 = vector.load %arg5[%c0_228, %c5_229, %c6_230, %c0_231] : memref<2x16x16x8xf32, #tpu.memory_space<vmem>>, vector<2x8x8x8xf32>
    %333 = vector.broadcast %331 : vector<1x1x1x8xf32> to vector<2x8x8x8xf32>
    %334 = arith.mulf %332, %333 : vector<2x8x8x8xf32>
    %335 = arith.addf %329, %334 : vector<2x8x8x8xf32>
    %336 = vector.extract_strided_slice %22 {offsets = [52, 0], sizes = [1, 8], strides = [1, 1]} : vector<81x8xf32> to vector<1x8xf32>
    %337 = vector.shape_cast %336 : vector<1x8xf32> to vector<1x1x1x8xf32>
    %c0_232 = arith.constant 0 : index
    %c5_233 = arith.constant 5 : index
    %c7_234 = arith.constant 7 : index
    %c0_235 = arith.constant 0 : index
    %338 = vector.load %arg5[%c0_232, %c5_233, %c7_234, %c0_235] : memref<2x16x16x8xf32, #tpu.memory_space<vmem>>, vector<2x8x8x8xf32>
    %339 = vector.broadcast %337 : vector<1x1x1x8xf32> to vector<2x8x8x8xf32>
    %340 = arith.mulf %338, %339 : vector<2x8x8x8xf32>
    %341 = arith.addf %335, %340 : vector<2x8x8x8xf32>
    %342 = vector.extract_strided_slice %22 {offsets = [53, 0], sizes = [1, 8], strides = [1, 1]} : vector<81x8xf32> to vector<1x8xf32>
    %343 = vector.shape_cast %342 : vector<1x8xf32> to vector<1x1x1x8xf32>
    %c0_236 = arith.constant 0 : index
    %c5_237 = arith.constant 5 : index
    %c8_238 = arith.constant 8 : index
    %c0_239 = arith.constant 0 : index
    %344 = vector.load %arg5[%c0_236, %c5_237, %c8_238, %c0_239] : memref<2x16x16x8xf32, #tpu.memory_space<vmem>>, vector<2x8x8x8xf32>
    %345 = vector.broadcast %343 : vector<1x1x1x8xf32> to vector<2x8x8x8xf32>
    %346 = arith.mulf %344, %345 : vector<2x8x8x8xf32>
    %347 = arith.addf %341, %346 : vector<2x8x8x8xf32>
    %348 = vector.extract_strided_slice %22 {offsets = [54, 0], sizes = [1, 8], strides = [1, 1]} : vector<81x8xf32> to vector<1x8xf32>
    %349 = vector.shape_cast %348 : vector<1x8xf32> to vector<1x1x1x8xf32>
    %c0_240 = arith.constant 0 : index
    %c6_241 = arith.constant 6 : index
    %c0_242 = arith.constant 0 : index
    %c0_243 = arith.constant 0 : index
    %350 = vector.load %arg5[%c0_240, %c6_241, %c0_242, %c0_243] : memref<2x16x16x8xf32, #tpu.memory_space<vmem>>, vector<2x8x8x8xf32>
    %351 = vector.broadcast %349 : vector<1x1x1x8xf32> to vector<2x8x8x8xf32>
    %352 = arith.mulf %350, %351 : vector<2x8x8x8xf32>
    %353 = arith.addf %347, %352 : vector<2x8x8x8xf32>
    %354 = vector.extract_strided_slice %22 {offsets = [55, 0], sizes = [1, 8], strides = [1, 1]} : vector<81x8xf32> to vector<1x8xf32>
    %355 = vector.shape_cast %354 : vector<1x8xf32> to vector<1x1x1x8xf32>
    %c0_244 = arith.constant 0 : index
    %c6_245 = arith.constant 6 : index
    %c1_246 = arith.constant 1 : index
    %c0_247 = arith.constant 0 : index
    %356 = vector.load %arg5[%c0_244, %c6_245, %c1_246, %c0_247] : memref<2x16x16x8xf32, #tpu.memory_space<vmem>>, vector<2x8x8x8xf32>
    %357 = vector.broadcast %355 : vector<1x1x1x8xf32> to vector<2x8x8x8xf32>
    %358 = arith.mulf %356, %357 : vector<2x8x8x8xf32>
    %359 = arith.addf %353, %358 : vector<2x8x8x8xf32>
    %360 = vector.extract_strided_slice %22 {offsets = [56, 0], sizes = [1, 8], strides = [1, 1]} : vector<81x8xf32> to vector<1x8xf32>
    %361 = vector.shape_cast %360 : vector<1x8xf32> to vector<1x1x1x8xf32>
    %c0_248 = arith.constant 0 : index
    %c6_249 = arith.constant 6 : index
    %c2_250 = arith.constant 2 : index
    %c0_251 = arith.constant 0 : index
    %362 = vector.load %arg5[%c0_248, %c6_249, %c2_250, %c0_251] : memref<2x16x16x8xf32, #tpu.memory_space<vmem>>, vector<2x8x8x8xf32>
    %363 = vector.broadcast %361 : vector<1x1x1x8xf32> to vector<2x8x8x8xf32>
    %364 = arith.mulf %362, %363 : vector<2x8x8x8xf32>
    %365 = arith.addf %359, %364 : vector<2x8x8x8xf32>
    %366 = vector.extract_strided_slice %22 {offsets = [57, 0], sizes = [1, 8], strides = [1, 1]} : vector<81x8xf32> to vector<1x8xf32>
    %367 = vector.shape_cast %366 : vector<1x8xf32> to vector<1x1x1x8xf32>
    %c0_252 = arith.constant 0 : index
    %c6_253 = arith.constant 6 : index
    %c3_254 = arith.constant 3 : index
    %c0_255 = arith.constant 0 : index
    %368 = vector.load %arg5[%c0_252, %c6_253, %c3_254, %c0_255] : memref<2x16x16x8xf32, #tpu.memory_space<vmem>>, vector<2x8x8x8xf32>
    %369 = vector.broadcast %367 : vector<1x1x1x8xf32> to vector<2x8x8x8xf32>
    %370 = arith.mulf %368, %369 : vector<2x8x8x8xf32>
    %371 = arith.addf %365, %370 : vector<2x8x8x8xf32>
    %372 = vector.extract_strided_slice %22 {offsets = [58, 0], sizes = [1, 8], strides = [1, 1]} : vector<81x8xf32> to vector<1x8xf32>
    %373 = vector.shape_cast %372 : vector<1x8xf32> to vector<1x1x1x8xf32>
    %c0_256 = arith.constant 0 : index
    %c6_257 = arith.constant 6 : index
    %c4_258 = arith.constant 4 : index
    %c0_259 = arith.constant 0 : index
    %374 = vector.load %arg5[%c0_256, %c6_257, %c4_258, %c0_259] : memref<2x16x16x8xf32, #tpu.memory_space<vmem>>, vector<2x8x8x8xf32>
    %375 = vector.broadcast %373 : vector<1x1x1x8xf32> to vector<2x8x8x8xf32>
    %376 = arith.mulf %374, %375 : vector<2x8x8x8xf32>
    %377 = arith.addf %371, %376 : vector<2x8x8x8xf32>
    %378 = vector.extract_strided_slice %22 {offsets = [59, 0], sizes = [1, 8], strides = [1, 1]} : vector<81x8xf32> to vector<1x8xf32>
    %379 = vector.shape_cast %378 : vector<1x8xf32> to vector<1x1x1x8xf32>
    %c0_260 = arith.constant 0 : index
    %c6_261 = arith.constant 6 : index
    %c5_262 = arith.constant 5 : index
    %c0_263 = arith.constant 0 : index
    %380 = vector.load %arg5[%c0_260, %c6_261, %c5_262, %c0_263] : memref<2x16x16x8xf32, #tpu.memory_space<vmem>>, vector<2x8x8x8xf32>
    %381 = vector.broadcast %379 : vector<1x1x1x8xf32> to vector<2x8x8x8xf32>
    %382 = arith.mulf %380, %381 : vector<2x8x8x8xf32>
    %383 = arith.addf %377, %382 : vector<2x8x8x8xf32>
    %384 = vector.extract_strided_slice %22 {offsets = [60, 0], sizes = [1, 8], strides = [1, 1]} : vector<81x8xf32> to vector<1x8xf32>
    %385 = vector.shape_cast %384 : vector<1x8xf32> to vector<1x1x1x8xf32>
    %c0_264 = arith.constant 0 : index
    %c6_265 = arith.constant 6 : index
    %c6_266 = arith.constant 6 : index
    %c0_267 = arith.constant 0 : index
    %386 = vector.load %arg5[%c0_264, %c6_265, %c6_266, %c0_267] : memref<2x16x16x8xf32, #tpu.memory_space<vmem>>, vector<2x8x8x8xf32>
    %387 = vector.broadcast %385 : vector<1x1x1x8xf32> to vector<2x8x8x8xf32>
    %388 = arith.mulf %386, %387 : vector<2x8x8x8xf32>
    %389 = arith.addf %383, %388 : vector<2x8x8x8xf32>
    %390 = vector.extract_strided_slice %22 {offsets = [61, 0], sizes = [1, 8], strides = [1, 1]} : vector<81x8xf32> to vector<1x8xf32>
    %391 = vector.shape_cast %390 : vector<1x8xf32> to vector<1x1x1x8xf32>
    %c0_268 = arith.constant 0 : index
    %c6_269 = arith.constant 6 : index
    %c7_270 = arith.constant 7 : index
    %c0_271 = arith.constant 0 : index
    %392 = vector.load %arg5[%c0_268, %c6_269, %c7_270, %c0_271] : memref<2x16x16x8xf32, #tpu.memory_space<vmem>>, vector<2x8x8x8xf32>
    %393 = vector.broadcast %391 : vector<1x1x1x8xf32> to vector<2x8x8x8xf32>
    %394 = arith.mulf %392, %393 : vector<2x8x8x8xf32>
    %395 = arith.addf %389, %394 : vector<2x8x8x8xf32>
    %396 = vector.extract_strided_slice %22 {offsets = [62, 0], sizes = [1, 8], strides = [1, 1]} : vector<81x8xf32> to vector<1x8xf32>
    %397 = vector.shape_cast %396 : vector<1x8xf32> to vector<1x1x1x8xf32>
    %c0_272 = arith.constant 0 : index
    %c6_273 = arith.constant 6 : index
    %c8_274 = arith.constant 8 : index
    %c0_275 = arith.constant 0 : index
    %398 = vector.load %arg5[%c0_272, %c6_273, %c8_274, %c0_275] : memref<2x16x16x8xf32, #tpu.memory_space<vmem>>, vector<2x8x8x8xf32>
    %399 = vector.broadcast %397 : vector<1x1x1x8xf32> to vector<2x8x8x8xf32>
    %400 = arith.mulf %398, %399 : vector<2x8x8x8xf32>
    %401 = arith.addf %395, %400 : vector<2x8x8x8xf32>
    %402 = vector.extract_strided_slice %22 {offsets = [63, 0], sizes = [1, 8], strides = [1, 1]} : vector<81x8xf32> to vector<1x8xf32>
    %403 = vector.shape_cast %402 : vector<1x8xf32> to vector<1x1x1x8xf32>
    %c0_276 = arith.constant 0 : index
    %c7_277 = arith.constant 7 : index
    %c0_278 = arith.constant 0 : index
    %c0_279 = arith.constant 0 : index
    %404 = vector.load %arg5[%c0_276, %c7_277, %c0_278, %c0_279] : memref<2x16x16x8xf32, #tpu.memory_space<vmem>>, vector<2x8x8x8xf32>
    %405 = vector.broadcast %403 : vector<1x1x1x8xf32> to vector<2x8x8x8xf32>
    %406 = arith.mulf %404, %405 : vector<2x8x8x8xf32>
    %407 = arith.addf %401, %406 : vector<2x8x8x8xf32>
    %408 = vector.extract_strided_slice %22 {offsets = [64, 0], sizes = [1, 8], strides = [1, 1]} : vector<81x8xf32> to vector<1x8xf32>
    %409 = vector.shape_cast %408 : vector<1x8xf32> to vector<1x1x1x8xf32>
    %c0_280 = arith.constant 0 : index
    %c7_281 = arith.constant 7 : index
    %c1_282 = arith.constant 1 : index
    %c0_283 = arith.constant 0 : index
    %410 = vector.load %arg5[%c0_280, %c7_281, %c1_282, %c0_283] : memref<2x16x16x8xf32, #tpu.memory_space<vmem>>, vector<2x8x8x8xf32>
    %411 = vector.broadcast %409 : vector<1x1x1x8xf32> to vector<2x8x8x8xf32>
    %412 = arith.mulf %410, %411 : vector<2x8x8x8xf32>
    %413 = arith.addf %407, %412 : vector<2x8x8x8xf32>
    %414 = vector.extract_strided_slice %22 {offsets = [65, 0], sizes = [1, 8], strides = [1, 1]} : vector<81x8xf32> to vector<1x8xf32>
    %415 = vector.shape_cast %414 : vector<1x8xf32> to vector<1x1x1x8xf32>
    %c0_284 = arith.constant 0 : index
    %c7_285 = arith.constant 7 : index
    %c2_286 = arith.constant 2 : index
    %c0_287 = arith.constant 0 : index
    %416 = vector.load %arg5[%c0_284, %c7_285, %c2_286, %c0_287] : memref<2x16x16x8xf32, #tpu.memory_space<vmem>>, vector<2x8x8x8xf32>
    %417 = vector.broadcast %415 : vector<1x1x1x8xf32> to vector<2x8x8x8xf32>
    %418 = arith.mulf %416, %417 : vector<2x8x8x8xf32>
    %419 = arith.addf %413, %418 : vector<2x8x8x8xf32>
    %420 = vector.extract_strided_slice %22 {offsets = [66, 0], sizes = [1, 8], strides = [1, 1]} : vector<81x8xf32> to vector<1x8xf32>
    %421 = vector.shape_cast %420 : vector<1x8xf32> to vector<1x1x1x8xf32>
    %c0_288 = arith.constant 0 : index
    %c7_289 = arith.constant 7 : index
    %c3_290 = arith.constant 3 : index
    %c0_291 = arith.constant 0 : index
    %422 = vector.load %arg5[%c0_288, %c7_289, %c3_290, %c0_291] : memref<2x16x16x8xf32, #tpu.memory_space<vmem>>, vector<2x8x8x8xf32>
    %423 = vector.broadcast %421 : vector<1x1x1x8xf32> to vector<2x8x8x8xf32>
    %424 = arith.mulf %422, %423 : vector<2x8x8x8xf32>
    %425 = arith.addf %419, %424 : vector<2x8x8x8xf32>
    %426 = vector.extract_strided_slice %22 {offsets = [67, 0], sizes = [1, 8], strides = [1, 1]} : vector<81x8xf32> to vector<1x8xf32>
    %427 = vector.shape_cast %426 : vector<1x8xf32> to vector<1x1x1x8xf32>
    %c0_292 = arith.constant 0 : index
    %c7_293 = arith.constant 7 : index
    %c4_294 = arith.constant 4 : index
    %c0_295 = arith.constant 0 : index
    %428 = vector.load %arg5[%c0_292, %c7_293, %c4_294, %c0_295] : memref<2x16x16x8xf32, #tpu.memory_space<vmem>>, vector<2x8x8x8xf32>
    %429 = vector.broadcast %427 : vector<1x1x1x8xf32> to vector<2x8x8x8xf32>
    %430 = arith.mulf %428, %429 : vector<2x8x8x8xf32>
    %431 = arith.addf %425, %430 : vector<2x8x8x8xf32>
    %432 = vector.extract_strided_slice %22 {offsets = [68, 0], sizes = [1, 8], strides = [1, 1]} : vector<81x8xf32> to vector<1x8xf32>
    %433 = vector.shape_cast %432 : vector<1x8xf32> to vector<1x1x1x8xf32>
    %c0_296 = arith.constant 0 : index
    %c7_297 = arith.constant 7 : index
    %c5_298 = arith.constant 5 : index
    %c0_299 = arith.constant 0 : index
    %434 = vector.load %arg5[%c0_296, %c7_297, %c5_298, %c0_299] : memref<2x16x16x8xf32, #tpu.memory_space<vmem>>, vector<2x8x8x8xf32>
    %435 = vector.broadcast %433 : vector<1x1x1x8xf32> to vector<2x8x8x8xf32>
    %436 = arith.mulf %434, %435 : vector<2x8x8x8xf32>
    %437 = arith.addf %431, %436 : vector<2x8x8x8xf32>
    %438 = vector.extract_strided_slice %22 {offsets = [69, 0], sizes = [1, 8], strides = [1, 1]} : vector<81x8xf32> to vector<1x8xf32>
    %439 = vector.shape_cast %438 : vector<1x8xf32> to vector<1x1x1x8xf32>
    %c0_300 = arith.constant 0 : index
    %c7_301 = arith.constant 7 : index
    %c6_302 = arith.constant 6 : index
    %c0_303 = arith.constant 0 : index
    %440 = vector.load %arg5[%c0_300, %c7_301, %c6_302, %c0_303] : memref<2x16x16x8xf32, #tpu.memory_space<vmem>>, vector<2x8x8x8xf32>
    %441 = vector.broadcast %439 : vector<1x1x1x8xf32> to vector<2x8x8x8xf32>
    %442 = arith.mulf %440, %441 : vector<2x8x8x8xf32>
    %443 = arith.addf %437, %442 : vector<2x8x8x8xf32>
    %444 = vector.extract_strided_slice %22 {offsets = [70, 0], sizes = [1, 8], strides = [1, 1]} : vector<81x8xf32> to vector<1x8xf32>
    %445 = vector.shape_cast %444 : vector<1x8xf32> to vector<1x1x1x8xf32>
    %c0_304 = arith.constant 0 : index
    %c7_305 = arith.constant 7 : index
    %c7_306 = arith.constant 7 : index
    %c0_307 = arith.constant 0 : index
    %446 = vector.load %arg5[%c0_304, %c7_305, %c7_306, %c0_307] : memref<2x16x16x8xf32, #tpu.memory_space<vmem>>, vector<2x8x8x8xf32>
    %447 = vector.broadcast %445 : vector<1x1x1x8xf32> to vector<2x8x8x8xf32>
    %448 = arith.mulf %446, %447 : vector<2x8x8x8xf32>
    %449 = arith.addf %443, %448 : vector<2x8x8x8xf32>
    %450 = vector.extract_strided_slice %22 {offsets = [71, 0], sizes = [1, 8], strides = [1, 1]} : vector<81x8xf32> to vector<1x8xf32>
    %451 = vector.shape_cast %450 : vector<1x8xf32> to vector<1x1x1x8xf32>
    %c0_308 = arith.constant 0 : index
    %c7_309 = arith.constant 7 : index
    %c8_310 = arith.constant 8 : index
    %c0_311 = arith.constant 0 : index
    %452 = vector.load %arg5[%c0_308, %c7_309, %c8_310, %c0_311] : memref<2x16x16x8xf32, #tpu.memory_space<vmem>>, vector<2x8x8x8xf32>
    %453 = vector.broadcast %451 : vector<1x1x1x8xf32> to vector<2x8x8x8xf32>
    %454 = arith.mulf %452, %453 : vector<2x8x8x8xf32>
    %455 = arith.addf %449, %454 : vector<2x8x8x8xf32>
    %456 = vector.extract_strided_slice %22 {offsets = [72, 0], sizes = [1, 8], strides = [1, 1]} : vector<81x8xf32> to vector<1x8xf32>
    %457 = vector.shape_cast %456 : vector<1x8xf32> to vector<1x1x1x8xf32>
    %c0_312 = arith.constant 0 : index
    %c8_313 = arith.constant 8 : index
    %c0_314 = arith.constant 0 : index
    %c0_315 = arith.constant 0 : index
    %458 = vector.load %arg5[%c0_312, %c8_313, %c0_314, %c0_315] : memref<2x16x16x8xf32, #tpu.memory_space<vmem>>, vector<2x8x8x8xf32>
    %459 = vector.broadcast %457 : vector<1x1x1x8xf32> to vector<2x8x8x8xf32>
    %460 = arith.mulf %458, %459 : vector<2x8x8x8xf32>
    %461 = arith.addf %455, %460 : vector<2x8x8x8xf32>
    %462 = vector.extract_strided_slice %22 {offsets = [73, 0], sizes = [1, 8], strides = [1, 1]} : vector<81x8xf32> to vector<1x8xf32>
    %463 = vector.shape_cast %462 : vector<1x8xf32> to vector<1x1x1x8xf32>
    %c0_316 = arith.constant 0 : index
    %c8_317 = arith.constant 8 : index
    %c1_318 = arith.constant 1 : index
    %c0_319 = arith.constant 0 : index
    %464 = vector.load %arg5[%c0_316, %c8_317, %c1_318, %c0_319] : memref<2x16x16x8xf32, #tpu.memory_space<vmem>>, vector<2x8x8x8xf32>
    %465 = vector.broadcast %463 : vector<1x1x1x8xf32> to vector<2x8x8x8xf32>
    %466 = arith.mulf %464, %465 : vector<2x8x8x8xf32>
    %467 = arith.addf %461, %466 : vector<2x8x8x8xf32>
    %468 = vector.extract_strided_slice %22 {offsets = [74, 0], sizes = [1, 8], strides = [1, 1]} : vector<81x8xf32> to vector<1x8xf32>
    %469 = vector.shape_cast %468 : vector<1x8xf32> to vector<1x1x1x8xf32>
    %c0_320 = arith.constant 0 : index
    %c8_321 = arith.constant 8 : index
    %c2_322 = arith.constant 2 : index
    %c0_323 = arith.constant 0 : index
    %470 = vector.load %arg5[%c0_320, %c8_321, %c2_322, %c0_323] : memref<2x16x16x8xf32, #tpu.memory_space<vmem>>, vector<2x8x8x8xf32>
    %471 = vector.broadcast %469 : vector<1x1x1x8xf32> to vector<2x8x8x8xf32>
    %472 = arith.mulf %470, %471 : vector<2x8x8x8xf32>
    %473 = arith.addf %467, %472 : vector<2x8x8x8xf32>
    %474 = vector.extract_strided_slice %22 {offsets = [75, 0], sizes = [1, 8], strides = [1, 1]} : vector<81x8xf32> to vector<1x8xf32>
    %475 = vector.shape_cast %474 : vector<1x8xf32> to vector<1x1x1x8xf32>
    %c0_324 = arith.constant 0 : index
    %c8_325 = arith.constant 8 : index
    %c3_326 = arith.constant 3 : index
    %c0_327 = arith.constant 0 : index
    %476 = vector.load %arg5[%c0_324, %c8_325, %c3_326, %c0_327] : memref<2x16x16x8xf32, #tpu.memory_space<vmem>>, vector<2x8x8x8xf32>
    %477 = vector.broadcast %475 : vector<1x1x1x8xf32> to vector<2x8x8x8xf32>
    %478 = arith.mulf %476, %477 : vector<2x8x8x8xf32>
    %479 = arith.addf %473, %478 : vector<2x8x8x8xf32>
    %480 = vector.extract_strided_slice %22 {offsets = [76, 0], sizes = [1, 8], strides = [1, 1]} : vector<81x8xf32> to vector<1x8xf32>
    %481 = vector.shape_cast %480 : vector<1x8xf32> to vector<1x1x1x8xf32>
    %c0_328 = arith.constant 0 : index
    %c8_329 = arith.constant 8 : index
    %c4_330 = arith.constant 4 : index
    %c0_331 = arith.constant 0 : index
    %482 = vector.load %arg5[%c0_328, %c8_329, %c4_330, %c0_331] : memref<2x16x16x8xf32, #tpu.memory_space<vmem>>, vector<2x8x8x8xf32>
    %483 = vector.broadcast %481 : vector<1x1x1x8xf32> to vector<2x8x8x8xf32>
    %484 = arith.mulf %482, %483 : vector<2x8x8x8xf32>
    %485 = arith.addf %479, %484 : vector<2x8x8x8xf32>
    %486 = vector.extract_strided_slice %22 {offsets = [77, 0], sizes = [1, 8], strides = [1, 1]} : vector<81x8xf32> to vector<1x8xf32>
    %487 = vector.shape_cast %486 : vector<1x8xf32> to vector<1x1x1x8xf32>
    %c0_332 = arith.constant 0 : index
    %c8_333 = arith.constant 8 : index
    %c5_334 = arith.constant 5 : index
    %c0_335 = arith.constant 0 : index
    %488 = vector.load %arg5[%c0_332, %c8_333, %c5_334, %c0_335] : memref<2x16x16x8xf32, #tpu.memory_space<vmem>>, vector<2x8x8x8xf32>
    %489 = vector.broadcast %487 : vector<1x1x1x8xf32> to vector<2x8x8x8xf32>
    %490 = arith.mulf %488, %489 : vector<2x8x8x8xf32>
    %491 = arith.addf %485, %490 : vector<2x8x8x8xf32>
    %492 = vector.extract_strided_slice %22 {offsets = [78, 0], sizes = [1, 8], strides = [1, 1]} : vector<81x8xf32> to vector<1x8xf32>
    %493 = vector.shape_cast %492 : vector<1x8xf32> to vector<1x1x1x8xf32>
    %c0_336 = arith.constant 0 : index
    %c8_337 = arith.constant 8 : index
    %c6_338 = arith.constant 6 : index
    %c0_339 = arith.constant 0 : index
    %494 = vector.load %arg5[%c0_336, %c8_337, %c6_338, %c0_339] : memref<2x16x16x8xf32, #tpu.memory_space<vmem>>, vector<2x8x8x8xf32>
    %495 = vector.broadcast %493 : vector<1x1x1x8xf32> to vector<2x8x8x8xf32>
    %496 = arith.mulf %494, %495 : vector<2x8x8x8xf32>
    %497 = arith.addf %491, %496 : vector<2x8x8x8xf32>
    %498 = vector.extract_strided_slice %22 {offsets = [79, 0], sizes = [1, 8], strides = [1, 1]} : vector<81x8xf32> to vector<1x8xf32>
    %499 = vector.shape_cast %498 : vector<1x8xf32> to vector<1x1x1x8xf32>
    %c0_340 = arith.constant 0 : index
    %c8_341 = arith.constant 8 : index
    %c7_342 = arith.constant 7 : index
    %c0_343 = arith.constant 0 : index
    %500 = vector.load %arg5[%c0_340, %c8_341, %c7_342, %c0_343] : memref<2x16x16x8xf32, #tpu.memory_space<vmem>>, vector<2x8x8x8xf32>
    %501 = vector.broadcast %499 : vector<1x1x1x8xf32> to vector<2x8x8x8xf32>
    %502 = arith.mulf %500, %501 : vector<2x8x8x8xf32>
    %503 = arith.addf %497, %502 : vector<2x8x8x8xf32>
    %504 = vector.extract_strided_slice %22 {offsets = [80, 0], sizes = [1, 8], strides = [1, 1]} : vector<81x8xf32> to vector<1x8xf32>
    %505 = vector.shape_cast %504 : vector<1x8xf32> to vector<1x1x1x8xf32>
    %c0_344 = arith.constant 0 : index
    %c8_345 = arith.constant 8 : index
    %c8_346 = arith.constant 8 : index
    %c0_347 = arith.constant 0 : index
    %506 = vector.load %arg5[%c0_344, %c8_345, %c8_346, %c0_347] : memref<2x16x16x8xf32, #tpu.memory_space<vmem>>, vector<2x8x8x8xf32>
    %507 = vector.broadcast %505 : vector<1x1x1x8xf32> to vector<2x8x8x8xf32>
    %508 = arith.mulf %506, %507 : vector<2x8x8x8xf32>
    %509 = arith.addf %503, %508 : vector<2x8x8x8xf32>
    %510 = vector.shape_cast %509 : vector<2x8x8x8xf32> to vector<128x8xf32>
    %cst_348 = arith.constant dense<0.000000e+00> : vector<128x16xf32>
    %511 = tpu.matmul %510, %1, %cst_348 {dimension_numbers = #tpu.dot_dimension_numbers<[1], [0], [0], [1], [0, 0, 1, 1], [], []>, precision = #tpu.contract_precision<fp32>} : vector<128x8xf32>, vector<8x16xf32>, vector<128x16xf32> -> vector<128x16xf32>
    %512 = vector.broadcast %5 : vector<1x16xf32> to vector<128x16xf32>
    %513 = arith.addf %511, %512 : vector<128x16xf32>
    %cst_349 = arith.constant dense<0.000000e+00> : vector<16xf32>
    %514 = vector.multi_reduction <add>, %513, %cst_349 [0] : vector<128x16xf32> to vector<16xf32>
    %515 = vector.shape_cast %514 : vector<16xf32> to vector<1x16xf32>
    %cst_350 = arith.constant 1.280000e+02 : f32
    %516 = vector.broadcast %cst_350 : f32 to vector<1x16xf32>
    %517 = arith.divf %515, %516 : vector<1x16xf32>
    %518 = arith.mulf %513, %513 : vector<128x16xf32>
    %cst_351 = arith.constant dense<0.000000e+00> : vector<16xf32>
    %519 = vector.multi_reduction <add>, %518, %cst_351 [0] : vector<128x16xf32> to vector<16xf32>
    %520 = vector.shape_cast %519 : vector<16xf32> to vector<1x16xf32>
    %cst_352 = arith.constant 1.280000e+02 : f32
    %521 = vector.broadcast %cst_352 : f32 to vector<1x16xf32>
    %522 = arith.divf %520, %521 : vector<1x16xf32>
    %523 = arith.mulf %517, %517 : vector<1x16xf32>
    %524 = arith.subf %522, %523 : vector<1x16xf32>
    %525 = vector.broadcast %517 : vector<1x16xf32> to vector<128x16xf32>
    %526 = arith.subf %513, %525 : vector<128x16xf32>
    %cst_353 = arith.constant 9.99999974E-6 : f32
    %527 = vector.broadcast %cst_353 : f32 to vector<1x16xf32>
    %528 = arith.addf %524, %527 : vector<1x16xf32>
    %529 = math.rsqrt %528 : vector<1x16xf32>
    %530 = vector.broadcast %529 : vector<1x16xf32> to vector<128x16xf32>
    %531 = arith.mulf %526, %530 : vector<128x16xf32>
    %532 = vector.broadcast %6 : vector<1x16xf32> to vector<128x16xf32>
    %533 = arith.mulf %531, %532 : vector<128x16xf32>
    %534 = vector.broadcast %7 : vector<1x16xf32> to vector<128x16xf32>
    %535 = arith.addf %533, %534 : vector<128x16xf32>
    %cst_354 = arith.constant 5.000000e-01 : f32
    %536 = vector.broadcast %cst_354 : f32 to vector<128x16xf32>
    %537 = arith.mulf %536, %535 : vector<128x16xf32>
    %cst_355 = arith.constant 4.471500e-02 : f32
    %538 = vector.broadcast %cst_355 : f32 to vector<128x16xf32>
    %539 = arith.mulf %538, %535 : vector<128x16xf32>
    %540 = arith.mulf %539, %535 : vector<128x16xf32>
    %541 = arith.mulf %540, %535 : vector<128x16xf32>
    %542 = arith.addf %535, %541 : vector<128x16xf32>
    %cst_356 = arith.constant 0.797884583 : f32
    %543 = vector.broadcast %cst_356 : f32 to vector<128x16xf32>
    %544 = arith.mulf %543, %542 : vector<128x16xf32>
    %545 = math.tanh %544 : vector<128x16xf32>
    %cst_357 = arith.constant 1.000000e+00 : f32
    %546 = vector.broadcast %cst_357 : f32 to vector<128x16xf32>
    %547 = arith.addf %546, %545 : vector<128x16xf32>
    %548 = arith.mulf %537, %547 : vector<128x16xf32>
    %cst_358 = arith.constant dense<0.000000e+00> : vector<128x8xf32>
    %549 = tpu.matmul %548, %2, %cst_358 {dimension_numbers = #tpu.dot_dimension_numbers<[1], [0], [0], [1], [0, 0, 1, 1], [], []>, precision = #tpu.contract_precision<fp32>} : vector<128x16xf32>, vector<16x8xf32>, vector<128x8xf32> -> vector<128x8xf32>
    %550 = vector.broadcast %8 : vector<1x8xf32> to vector<128x8xf32>
    %551 = arith.addf %549, %550 : vector<128x8xf32>
    %552 = arith.mulf %551, %16 : vector<128x8xf32>
    %cst_359 = arith.constant dense<0.000000e+00> : vector<128x8xf32>
    %553 = tpu.matmul %552, %3, %cst_359 {dimension_numbers = #tpu.dot_dimension_numbers<[1], [0], [0], [1], [0, 0, 1, 1], [], []>, precision = #tpu.contract_precision<fp32>} : vector<128x8xf32>, vector<8x8xf32>, vector<128x8xf32> -> vector<128x8xf32>
    %554 = vector.broadcast %9 : vector<1x8xf32> to vector<128x8xf32>
    %555 = arith.addf %553, %554 : vector<128x8xf32>
    %556 = vector.shape_cast %555 : vector<128x8xf32> to vector<2x64x8xf32>
    %c0_360 = arith.constant 0 : index
    %c0_361 = arith.constant 0 : index
    %c0_362 = arith.constant 0 : index
    %557 = vector.load %arg3[%c0_360, %c0_361, %c0_362] : memref<2x64x8xf32, #tpu.memory_space<vmem>>, vector<2x64x8xf32>
    tpu.vector_store %arg3[%c0_360, %c0_361, %c0_362], %556 {strides = array<i32>} : memref<2x64x8xf32, #tpu.memory_space<vmem>>, vector<2x64x8xf32>,
    return
  }
}

</mosaic_0001>

<bundles_post_ra>
// kernel: tpu_custom_call.1
= control target key start
LH: loop header
LB: loop body
LE: loop exit
PB: predicated region body
PF: predicated region fallthrough
CT: control target
= control target key end

     0   :  { %vm45_vm0 = vcmask 64512   ;;  %vm1185_vm1 = vcmask 130048   ;;  %s10910_s24 = smov 120   ;;  %s17571_s1 = inlined_call_operand.vmem [shape: f32[46,16], index: 1, kind: input, shape index: {}]   ;;  %s17572_s0 = inlined_call_operand.vmem [shape: f32[2,64,8], index: 0, kind: input, shape index: {}]   ;;  %s17573_s2 = inlined_call_operand.vmem [shape: f32[81,8], index: 2, kind: input, shape index: {}]   ;;  %s17574_s3 = inlined_call_operand.vmem [shape: f32[2,64,8], index: 3, kind: output, shape index: {}]  }
   0x1   :  { %v14_v0 = vld [vmem:[%s17571_s1] sm:$0xff]  ;;  %v26_v2 = vld [vmem:[%s17572_s0 + $0x8] sm:$0xff]  ;;  %v27_v6 = vld [vmem:[%s17572_s0 + $0x10] sm:$0xff] }
   0x2   :  { %v25_v1 = vld [vmem:[%s17572_s0] sm:$0xff]  ;;  %v10940_v3 = vand.u32 4294901760, %v14_v0  ;;  %v50_v5 = vsel %vm45_vm0, %v26_v2, 0  ;;  %v28_v7 = vld [vmem:[%s17572_s0 + $0x18] sm:$0xff]  ;;  %v53_v11 = vsel %vm45_vm0, %v27_v6, 0  ;;  %v30_v13 = vld [vmem:[%s17572_s0 + $0x28] sm:$0xff] }
   0x3   :  { %v47_v4 = vsel %vm45_vm0, %v25_v1, 0  ;;  %v29_v8 = vld [vmem:[%s17572_s0 + $0x20] sm:$0xff]  ;;  %v10955_v10 = vand.u32 4294901760, %v50_v5  ;;  %v56_v12 = vsel %vm45_vm0, %v28_v7, 0  ;;  %v10966_v15 = vand.u32 4294901760, %v53_v11  ;;  %v31_v18 = vld [vmem:[%s17572_s0 + $0x30] sm:$0xff] }
   0x4   :  { %v10953_v9 = vand.u32 4294901760, %v47_v4  ;;  %9805 = vmatprep.subr.mxu0 %v10940_v3  ;;  %v10964_v14 = vsub.f32 %v14_v0, %v10940_v3  ;;  %v10968_v16 = vand.u32 4294901760, %v56_v12  ;;  %v59_v17 = vsel %vm45_vm0, %v29_v8, 0  ;;  %v32_v39 = vld [vmem:[%s17572_s0 + $0x38] sm:$0xff]  ;;  %v33_v44 = vld [vmem:[%s17572_s0 + $0x40] sm:$0xff]  ;;  %v34_v49 = vld [vmem:[%s17572_s0 + $0x48] sm:$0xff] }
   0x5   :  { %9806 = vmatpush3.msra.mxu0 %v10940_v3  ;;  %v10979_v20 = vsub.f32 %v50_v5, %v10955_v10  ;;  %v10981_v21 = vand.u32 4294901760, %v59_v17  ;;  %v62_v22 = vsel %vm45_vm0, %v30_v13, 0  ;;  %v10988_v24 = vsub.f32 %v53_v11, %v10966_v15  ;;  %v35_v50 = vld [vmem:[%s17572_s0 + $0x50] sm:$0xff]  ;;  %v36_v55 = vld [vmem:[%s17572_s0 + $0x58] sm:$0xff]  ;;  %v37_v60 = vld [vmem:[%s17572_s0 + $0x60] sm:$0xff] }
   0x6   :  { %v10976_v19 = vsub.f32 %v47_v4, %v10953_v9  ;;  %v10985_v23 = vand.u32 4294901760, %v10964_v14  ;;  %v10991_v25 = vsub.f32 %v56_v12, %v10968_v16  ;;  %v10993_v26 = vand.u32 4294901760, %v62_v22  ;;  %v38_v61 = vld [vmem:[%s17572_s0 + $0x68] sm:$0xff]  ;;  %v39_v13 = vld [vmem:[%s17572_s0 + $0x70] sm:$0xff] }
   0x7   :  { %v172_v28 = vand.u32 4294901760, %v10979_v20  ;;  %v10998_v29 = vsub.f32 %v59_v17, %v10981_v21  ;;  %v65_v30 = vsel %vm45_vm0, %v31_v18, 0  ;;  %v182_v32 = vand.u32 4294901760, %v10988_v24 }
   0x8   :  { %v162_v27 = vand.u32 4294901760, %v10976_v19  ;;  %v324_v31 = vsub.f32 %v10964_v14, %v10985_v23  ;;  %v192_v33 = vand.u32 4294901760, %v10991_v25  ;;  %v11006_v34 = vsub.f32 %v62_v22, %v10993_v26 }
   0x9   :  { %v173_v36 = vsub.f32 %v10979_v20, %v172_v28  ;;  %v202_v37 = vand.u32 4294901760, %v10998_v29  ;;  %v11015_v38 = vand.u32 4294901760, %v65_v30  ;;  %v183_v41 = vsub.f32 %v10988_v24, %v182_v32 }
   0xa   :  { %v163_v35 = vsub.f32 %v10976_v19, %v162_v27  ;;  %v325_v40 = vand.u32 4294901760, %v324_v31  ;;  %v193_v42 = vsub.f32 %v10991_v25, %v192_v33  ;;  %v212_v43 = vand.u32 4294901760, %v11006_v34 }
   0xb   :  { %v174_v46 = vand.u32 4294901760, %v173_v36  ;;  %v203_v47 = vsub.f32 %v10998_v29, %v202_v37  ;;  %v11034_v48 = vsub.f32 %v65_v30, %v11015_v38  ;;  %v184_v51 = vand.u32 4294901760, %v183_v41 }
   0xc   :  { %v164_v45 = vand.u32 4294901760, %v163_v35  ;;  %9831 = vmatprep.subr.mxu0 %v325_v40  ;;  %v194_v52 = vand.u32 4294901760, %v193_v42  ;;  %v213_v53 = vsub.f32 %v11006_v34, %v212_v43  ;;  %v68_v54 = vsel %vm45_vm0, %v32_v39, 0 }
   0xd   :  { %v204_v56 = vand.u32 4294901760, %v203_v47  ;;  %v222_v57 = vand.u32 4294901760, %v11034_v48  ;;  %v11050_v58 = vand.u32 4294901760, %v68_v54  ;;  %v71_v59 = vsel %vm45_vm0, %v33_v44, 0 }
   0xe   :  { %9807 = vmatprep.mubr.f32.mxu0 %v164_v45  ;;  %v214_v62 = vand.u32 4294901760, %v213_v53  ;;  %v11059_v63 = vand.u32 4294901760, %v71_v59  ;;  %v74_v0 = vsel %vm45_vm0, %v34_v49, 0  ;;  %v77_v1 = vsel %vm45_vm0, %v35_v50, 0  ;;  %v40_v49 = vld [vmem:[%s17572_s0 + $0x78] sm:$0xff] }
   0xf   :  { %9808 = vmatmul.mubr.f32.vlgmr.msra.gmra.mrb[0].mxu0 %v174_v46  ;;  %v223_v2 = vsub.f32 %v11034_v48, %v222_v57  ;;  %v11067_v4 = vsub.f32 %v68_v54, %v11050_v58  ;;  %v11069_v5 = vand.u32 4294901760, %v74_v0  ;;  %v11071_v6 = vand.u32 4294901760, %v77_v1 }
  0x10   :  { %9832 = vmatpush3.msra.mxu0 %v325_v40  ;;  %9810 = vmatprep.mubr.f32.mxu0 %v184_v51  ;;  %v11074_v7 = vsub.f32 %v71_v59, %v11059_v63  ;;  %v80_v8 = vsel %vm45_vm0, %v36_v55, 0  ;;  %v83_v11 = vsel %vm45_vm0, %v37_v60, 0  ;;  %v86_v12 = vsel %vm45_vm0, %v38_v61, 0 }
  0x11   :  { %9857 = vmatprep.subr.mxu0 %v10964_v14  ;;  %v224_v17 = vand.u32 4294901760, %v223_v2  ;;  %v232_v18 = vand.u32 4294901760, %v11067_v4  ;;  %v11085_v22 = vsub.f32 %v74_v0, %v11069_v5  ;;  %v11088_v30 = vsub.f32 %v77_v1, %v11071_v6 }
  0x12   :  { %v242_v31 = vand.u32 4294901760, %v11074_v7  ;;  %v11091_v35 = vand.u32 4294901760, %v80_v8  ;;  %v11093_v36 = vand.u32 4294901760, %v83_v11  ;;  %v11095_v39 = vand.u32 4294901760, %v86_v12 }
  0x13   :  { %9811 = vmatmul.mubr.f32.gmra.mrb[2].mxu0 %v194_v52  ;;  %v233_v40 = vsub.f32 %v11067_v4, %v232_v18  ;;  %v252_v41 = vand.u32 4294901760, %v11085_v22  ;;  %v262_v42 = vand.u32 4294901760, %v11088_v30  ;;  %v89_v44 = vsel %vm45_vm0, %v39_v13, 0 }
  0x14   :  { %9813 = vmatprep.mubr.f32.mxu0 %v204_v56  ;;  %v243_v45 = vsub.f32 %v11074_v7, %v242_v31  ;;  %v11107_v46 = vsub.f32 %v80_v8, %v11091_v35  ;;  %v11110_v47 = vsub.f32 %v83_v11, %v11093_v36  ;;  %v11116_v50 = vsub.f32 %v86_v12, %v11095_v39 }
  0x15   :  { %v11118_v51 = vand.u32 4294901760, %v89_v44  ;;  %v234_v52 = vand.u32 4294901760, %v233_v40  ;;  %v253_v53 = vsub.f32 %v11085_v22, %v252_v41  ;;  %v263_v54 = vsub.f32 %v11088_v30, %v262_v42 }
  0x16   :  { %v272_v55 = vand.u32 4294901760, %v11107_v46  ;;  %v244_v56 = vand.u32 4294901760, %v243_v45  ;;  %v282_v59 = vand.u32 4294901760, %v11110_v47  ;;  %v92_v61 = vsel %vm45_vm0, %v40_v49, 0 }
  0x17   :  { %9814 = vmatmul.mubr.f32.gmra.mrb[4].mxu0 %v214_v62  ;;  %v11129_v60 = vsub.f32 %v89_v44, %v11118_v51  ;;  %v11132_v62 = vand.u32 4294901760, %v92_v61  ;;  %v254_v0 = vand.u32 4294901760, %v253_v53  ;;  %v292_v2 = vand.u32 4294901760, %v11116_v50 }
  0x18   :  { %9816 = vmatprep.mubr.f32.mxu0 %v224_v17  ;;  %v273_v1 = vsub.f32 %v11107_v46, %v272_v55  ;;  %v264_v11 = vand.u32 4294901760, %v263_v54  ;;  %v283_v12 = vsub.f32 %v11110_v47, %v282_v59 }
  0x19   :  { %v11139_v8 = vsub.f32 %v92_v61, %v11132_v62  ;;  %v302_v13 = vand.u32 4294901760, %v11129_v60  ;;  %v293_v40 = vsub.f32 %v11116_v50, %v292_v2 }
  0x1a   :  { %v274_v17 = vand.u32 4294901760, %v273_v1  ;;  %v284_v45 = vand.u32 4294901760, %v283_v12 }
  0x1b   :  { %9817 = vmatmul.mubr.f32.gmra.mrb[6].mxu0 %v234_v52  ;;  %v312_v44 = vand.u32 4294901760, %v11139_v8  ;;  %v303_v49 = vsub.f32 %v11129_v60, %v302_v13  ;;  %v294_v52 = vand.u32 4294901760, %v293_v40 }
  0x1c   :  { %9819 = vmatprep.mubr.f32.mxu0 %v244_v56 }
  0x1d   :  { %v313_v53 = vsub.f32 %v11139_v8, %v312_v44  ;;  %v304_v54 = vand.u32 4294901760, %v303_v49 }
  0x1f   :  { %9820 = vmatmul.mubr.f32.gmra.mrb[8].mxu0 %v254_v0  ;;  %v314_v56 = vand.u32 4294901760, %v313_v53 }
  0x20   :  { %9822 = vmatprep.mubr.f32.mxu0 %v264_v11 }
  0x23   :  { %9823 = vmatmul.mubr.f32.gmra.mrb[10].mxu0 %v274_v17 }
  0x24   :  { %9825 = vmatprep.mubr.f32.mxu0 %v284_v45 }
  0x27   :  { %9826 = vmatmul.mubr.f32.gmra.mrb[12].mxu0 %v294_v52 }
  0x28   :  { %9828 = vmatprep.mubr.f32.mxu0 %v304_v54 }
  0x2b   :  { %9829 = vmatmul.mubr.f32.gmra.mrb[14].mxu0 %v314_v56 }
  0x2c   :  { %9833 = vmatprep.mubr.f32.mxu0 %v10953_v9 }
  0x2f   :  { %9834 = vmatmul.mubr.f32.vlgmr.msra.gmra.mrb[0].mxu0 %v10955_v10 }
  0x30   :  { %9858 = vmatpush3.msra.mxu0 %v10964_v14  ;;  %9836 = vmatprep.mubr.f32.mxu0 %v10966_v15 }
  0x31   :  { %9883 = vmatprep.subr.mxu0 %v10940_v3 }
  0x33   :  { %9837 = vmatmul.mubr.f32.gmra.mrb[2].mxu0 %v10968_v16 }
  0x34   :  { %9839 = vmatprep.mubr.f32.mxu0 %v10981_v21 }
  0x37   :  { %9840 = vmatmul.mubr.f32.gmra.mrb[4].mxu0 %v10993_v26 }
  0x38   :  { %9842 = vmatprep.mubr.f32.mxu0 %v11015_v38 }
  0x3b   :  { %9843 = vmatmul.mubr.f32.gmra.mrb[6].mxu0 %v11050_v58 }
  0x3c   :  { %9845 = vmatprep.mubr.f32.mxu0 %v11059_v63 }
  0x3f   :  { %9846 = vmatmul.mubr.f32.gmra.mrb[8].mxu0 %v11069_v5 }
  0x40   :  { %9848 = vmatprep.mubr.f32.mxu0 %v11071_v6 }
  0x43   :  { %9849 = vmatmul.mubr.f32.gmra.mrb[10].mxu0 %v11091_v35 }
  0x44   :  { %9851 = vmatprep.mubr.f32.mxu0 %v11093_v36 }
  0x47   :  { %9852 = vmatmul.mubr.f32.gmra.mrb[12].mxu0 %v11095_v39 }
  0x48   :  { %9854 = vmatprep.mubr.f32.mxu0 %v11118_v51 }
  0x4b   :  { %9855 = vmatmul.mubr.f32.gmra.mrb[14].mxu0 %v11132_v62 }
  0x4c   :  { %9859 = vmatprep.mubr.f32.mxu0 %v10976_v19 }
  0x4f   :  { %9860 = vmatmul.mubr.f32.vlgmr.msra.gmra.mrb[0].mxu0 %v10979_v20 }
  0x50   :  { %9884 = vmatpush3.msra.mxu0 %v10940_v3  ;;  %9862 = vmatprep.mubr.f32.mxu0 %v10988_v24 }
  0x51   :  { %9909 = vmatprep.subr.mxu0 %v10985_v23 }
  0x53   :  { %9863 = vmatmul.mubr.f32.gmra.mrb[2].mxu0 %v10991_v25 }
  0x54   :  { %9865 = vmatprep.mubr.f32.mxu0 %v10998_v29 }
  0x57   :  { %9866 = vmatmul.mubr.f32.gmra.mrb[4].mxu0 %v11006_v34 }
  0x58   :  { %9868 = vmatprep.mubr.f32.mxu0 %v11034_v48 }
  0x5b   :  { %9869 = vmatmul.mubr.f32.gmra.mrb[6].mxu0 %v11067_v4 }
  0x5c   :  { %9871 = vmatprep.mubr.f32.mxu0 %v11074_v7 }
  0x5f   :  { %9872 = vmatmul.mubr.f32.gmra.mrb[8].mxu0 %v11085_v22 }
  0x60   :  { %9874 = vmatprep.mubr.f32.mxu0 %v11088_v30 }
  0x63   :  { %9875 = vmatmul.mubr.f32.gmra.mrb[10].mxu0 %v11107_v46 }
  0x64   :  { %9877 = vmatprep.mubr.f32.mxu0 %v11110_v47 }
  0x67   :  { %9878 = vmatmul.mubr.f32.gmra.mrb[12].mxu0 %v11116_v50 }
  0x68   :  { %9880 = vmatprep.mubr.f32.mxu0 %v11129_v60 }
  0x6b   :  { %9881 = vmatmul.mubr.f32.gmra.mrb[14].mxu0 %v11139_v8 }
  0x6c   :  { %9885 = vmatprep.mubr.f32.mxu0 %v162_v27 }
  0x6f   :  { %9886 = vmatmul.mubr.f32.vlgmr.msra.gmra.mrb[0].mxu0 %v172_v28 }
  0x70   :  { %9910 = vmatpush3.msra.mxu0 %v10985_v23  ;;  %9888 = vmatprep.mubr.f32.mxu0 %v182_v32 }
  0x71   :  { %9935 = vmatprep.subr.mxu0 %v10940_v3 }
  0x73   :  { %9889 = vmatmul.mubr.f32.gmra.mrb[2].mxu0 %v192_v33 }
  0x74   :  { %9891 = vmatprep.mubr.f32.mxu0 %v202_v37 }
  0x77   :  { %9892 = vmatmul.mubr.f32.gmra.mrb[4].mxu0 %v212_v43 }
  0x78   :  { %9894 = vmatprep.mubr.f32.mxu0 %v222_v57 }
  0x7b   :  { %9895 = vmatmul.mubr.f32.gmra.mrb[6].mxu0 %v232_v18 }
  0x7c   :  { %9897 = vmatprep.mubr.f32.mxu0 %v242_v31 }
  0x7f   :  { %9898 = vmatmul.mubr.f32.gmra.mrb[8].mxu0 %v252_v41 }
  0x80   :  { %9900 = vmatprep.mubr.f32.mxu0 %v262_v42 }
  0x83   :  { %9901 = vmatmul.mubr.f32.gmra.mrb[10].mxu0 %v272_v55 }
  0x84   :  { %9903 = vmatprep.mubr.f32.mxu0 %v282_v59  ;;  %v11446_v59 = vld [vmem:[%s17573_s2 + $0x8] sm:$0xff] }
  0x87   :  { %9904 = vmatmul.mubr.f32.gmra.mrb[12].mxu0 %v292_v2 }
  0x88   :  { %9906 = vmatprep.mubr.f32.mxu0 %v302_v13 }
  0x8b   :  { %9907 = vmatmul.mubr.f32.gmra.mrb[14].mxu0 %v312_v44 }
  0x8c   :  { %9911 = vmatprep.mubr.f32.mxu0 %v10953_v9 }
  0x8f   :  { %9912 = vmatmul.mubr.f32.vlgmr.msra.gmra.mrb[0].mxu0 %v10955_v10 }
  0x90   :  { %9936 = vmatpush3.msra.mxu0 %v10940_v3  ;;  %9914 = vmatprep.mubr.f32.mxu0 %v10966_v15  ;;  %v10909_v3 = vmov 0.0  }
  0x91   :  { %1226 = vst.msk [vmem:[#allocation3 + $0x40] sm:$0xff] %vm45_vm0, %v10909_v3  ;;  %1227 = vst.msk [vmem:[#allocation3 + $0x48] sm:$0xff] %vm45_vm0, %v10909_v3 }
  0x92   :  { %1218 = vst.msk [vmem:[#allocation3] sm:$0xff] %vm45_vm0, %v10909_v3  ;;  %1219 = vst.msk [vmem:[#allocation3 + $0x8] sm:$0xff] %vm45_vm0, %v10909_v3 }
  0x93   :  { %9915 = vmatmul.mubr.f32.gmra.mrb[2].mxu0 %v10968_v16  ;;  %1220 = vst.msk [vmem:[#allocation3 + $0x10] sm:$0xff] %vm45_vm0, %v10909_v3  ;;  %1221 = vst.msk [vmem:[#allocation3 + $0x18] sm:$0xff] %vm45_vm0, %v10909_v3 }
  0x94   :  { %9917 = vmatprep.mubr.f32.mxu0 %v10981_v21  ;;  %1222 = vst.msk [vmem:[#allocation3 + $0x20] sm:$0xff] %vm45_vm0, %v10909_v3  ;;  %1223 = vst.msk [vmem:[#allocation3 + $0x28] sm:$0xff] %vm45_vm0, %v10909_v3 }
  0x95   :  { %1224 = vst.msk [vmem:[#allocation3 + $0x30] sm:$0xff] %vm45_vm0, %v10909_v3  ;;  %1225 = vst.msk [vmem:[#allocation3 + $0x38] sm:$0xff] %vm45_vm0, %v10909_v3 }
  0x96   :  { %1228 = vst.msk [vmem:[#allocation3 + $0x50] sm:$0xff] %vm45_vm0, %v10909_v3  ;;  %1229 = vst.msk [vmem:[#allocation3 + $0x58] sm:$0xff] %vm45_vm0, %v10909_v3 }
  0x97   :  { %9918 = vmatmul.mubr.f32.gmra.mrb[4].mxu0 %v10993_v26  ;;  %1230 = vst.msk [vmem:[#allocation3 + $0x60] sm:$0xff] %vm45_vm0, %v10909_v3  ;;  %1231 = vst.msk [vmem:[#allocation3 + $0x68] sm:$0xff] %vm45_vm0, %v10909_v3 }
  0x98   :  { %9920 = vmatprep.mubr.f32.mxu0 %v11015_v38  ;;  %1232 = vst.msk [vmem:[#allocation3 + $0x70] sm:$0xff] %vm45_vm0, %v10909_v3  ;;  %1233 = vst.msk [vmem:[#allocation3 + $0x78] sm:$0xff] %vm45_vm0, %v10909_v3 }
  0x99   :  { %1234 = vst.msk [vmem:[#allocation3 + $0x80] sm:$0xff] %vm45_vm0, %v10909_v3  ;;  %1235 = vst.msk [vmem:[#allocation3 + $0x88] sm:$0xff] %vm45_vm0, %v10909_v3  ;;  %v1374_v23 = vld [vmem:[#allocation3] sm:$0xff]  ;;  %v1790_v12 = vld [vmem:[#allocation3 + $0x8] sm:$0xff] }
  0x9a   :  { %1236 = vst.msk [vmem:[#allocation3 + $0x90] sm:$0xff] %vm45_vm0, %v10909_v3  ;;  %1237 = vst.msk [vmem:[#allocation3 + $0x98] sm:$0xff] %vm45_vm0, %v10909_v3  ;;  %v1426_v24 = vld [vmem:[#allocation3 + $0x1] sm:$0xff]  ;;  %v11466_v53 = vld [vmem:[#allocation3 + $0x10] sm:$0xff] }
  0x9b   :  { %9921 = vmatmul.mubr.f32.gmra.mrb[6].mxu0 %v11050_v58  ;;  %1238 = vst.msk [vmem:[#allocation3 + $0xa0] sm:$0xff] %vm45_vm0, %v10909_v3  ;;  %1239 = vst.msk [vmem:[#allocation3 + $0xa8] sm:$0xff] %vm45_vm0, %v10909_v3  ;;  %v1478_v29 = vld [vmem:[#allocation3 + $0x2] sm:$0xff] }
  0x9c   :  { %9923 = vmatprep.mubr.f32.mxu0 %v11059_v63  ;;  %1240 = vst.msk [vmem:[#allocation3 + $0xb0] sm:$0xff] %vm45_vm0, %v10909_v3  ;;  %1241 = vst.msk [vmem:[#allocation3 + $0xb8] sm:$0xff] %vm45_vm0, %v10909_v3  ;;  %v1634_v18 = vld [vmem:[#allocation3 + $0x5] sm:$0xff] }
  0x9d   :  { %1242 = vst.msk [vmem:[#allocation3 + $0xc0] sm:$0xff] %vm45_vm0, %v10909_v3  ;;  %1243 = vst.msk [vmem:[#allocation3 + $0xc8] sm:$0xff] %vm45_vm0, %v10909_v3  ;;  %v1738_v60 = vld [vmem:[#allocation3 + $0x7] sm:$0xff] }
  0x9e   :  { %1244 = vst.msk [vmem:[#allocation3 + $0xd0] sm:$0xff] %vm45_vm0, %v10909_v3  ;;  %1245 = vst.msk [vmem:[#allocation3 + $0xd8] sm:$0xff] %vm45_vm0, %v10909_v3 }
  0x9f   :  { %9924 = vmatmul.mubr.f32.gmra.mrb[8].mxu0 %v11069_v5  ;;  %1246 = vst.msk [vmem:[#allocation3 + $0xe0] sm:$0xff] %vm45_vm0, %v10909_v3  ;;  %1247 = vst.msk [vmem:[#allocation3 + $0xe8] sm:$0xff] %vm45_vm0, %v10909_v3 }
  0xa0   :  { %9926 = vmatprep.mubr.f32.mxu0 %v11071_v6  ;;  %1248 = vst.msk [vmem:[#allocation3 + $0xf0] sm:$0xff] %vm45_vm0, %v10909_v3  ;;  %1249 = vst.msk [vmem:[#allocation3 + $0xf8] sm:$0xff] %vm45_vm0, %v10909_v3 }
  0xa1   :  { %1250 = vst.msk [vmem:[#allocation3 + $0x100] sm:$0xff] %vm45_vm0, %v10909_v3  ;;  %1251 = vst.msk [vmem:[#allocation3 + $0x108] sm:$0xff] %vm45_vm0, %v10909_v3 }
  0xa2   :  { %1252 = vst.msk [vmem:[#allocation3 + $0x110] sm:$0xff] %vm45_vm0, %v10909_v3  ;;  %1253 = vst.msk [vmem:[#allocation3 + $0x118] sm:$0xff] %vm45_vm0, %v10909_v3 }
  0xa3   :  { %9927 = vmatmul.mubr.f32.gmra.mrb[10].mxu0 %v11091_v35  ;;  %1254 = vst.msk [vmem:[#allocation3 + $0x120] sm:$0xff] %vm45_vm0, %v10909_v3  ;;  %1255 = vst.msk [vmem:[#allocation3 + $0x128] sm:$0xff] %vm45_vm0, %v10909_v3 }
  0xa4   :  { %9929 = vmatprep.mubr.f32.mxu0 %v11093_v36  ;;  %1256 = vst.msk [vmem:[#allocation3 + $0x130] sm:$0xff] %vm45_vm0, %v10909_v3  ;;  %1257 = vst.msk [vmem:[#allocation3 + $0x138] sm:$0xff] %vm45_vm0, %v10909_v3 }
  0xa5   :  { %1258 = vst.msk [vmem:[#allocation3 + $0x140] sm:$0xff] %vm45_vm0, %v10909_v3  ;;  %1259 = vst.msk [vmem:[#allocation3 + $0x148] sm:$0xff] %vm45_vm0, %v10909_v3 }
  0xa6   :  { %1260 = vst.msk [vmem:[#allocation3 + $0x150] sm:$0xff] %vm45_vm0, %v10909_v3  ;;  %1261 = vst.msk [vmem:[#allocation3 + $0x158] sm:$0xff] %vm45_vm0, %v10909_v3 }
  0xa7   :  { %9930 = vmatmul.mubr.f32.gmra.mrb[12].mxu0 %v11095_v39  ;;  %1262 = vst.msk [vmem:[#allocation3 + $0x160] sm:$0xff] %vm45_vm0, %v10909_v3  ;;  %1263 = vst.msk [vmem:[#allocation3 + $0x168] sm:$0xff] %vm45_vm0, %v10909_v3 }
  0xa8   :  { %9932 = vmatprep.mubr.f32.mxu0 %v11118_v51  ;;  %1264 = vst.msk [vmem:[#allocation3 + $0x170] sm:$0xff] %vm45_vm0, %v10909_v3  ;;  %1265 = vst.msk [vmem:[#allocation3 + $0x178] sm:$0xff] %vm45_vm0, %v10909_v3 }
  0xa9   :  { %1266 = vst.msk [vmem:[#allocation3 + $0x180] sm:$0xff] %vm45_vm0, %v10909_v3  ;;  %1267 = vst.msk [vmem:[#allocation3 + $0x188] sm:$0xff] %vm45_vm0, %v10909_v3 }
  0xaa   :  { %1268 = vst.msk [vmem:[#allocation3 + $0x190] sm:$0xff] %vm45_vm0, %v10909_v3  ;;  %1269 = vst.msk [vmem:[#allocation3 + $0x198] sm:$0xff] %vm45_vm0, %v10909_v3 }
  0xab   :  { %9933 = vmatmul.mubr.f32.gmra.mrb[14].mxu0 %v11132_v62  ;;  %1270 = vst.msk [vmem:[#allocation3 + $0x1a0] sm:$0xff] %vm45_vm0, %v10909_v3  ;;  %1271 = vst.msk [vmem:[#allocation3 + $0x1a8] sm:$0xff] %vm45_vm0, %v10909_v3 }
  0xac   :  { %9937 = vmatprep.mubr.f32.mxu0 %v10953_v9  ;;  %1272 = vst.msk [vmem:[#allocation3 + $0x1b0] sm:$0xff] %vm45_vm0, %v10909_v3  ;;  %1273 = vst.msk [vmem:[#allocation3 + $0x1b8] sm:$0xff] %vm45_vm0, %v10909_v3  ;;  %v1390_v9 = vlaneseq }
  0xad   :  { %1274 = vst.msk [vmem:[#allocation3 + $0x1c0] sm:$0xff] %vm45_vm0, %v10909_v3  ;;  %1275 = vst.msk [vmem:[#allocation3 + $0x1c8] sm:$0xff] %vm45_vm0, %v10909_v3 }
  0xae   :  { %1276 = vst.msk [vmem:[#allocation3 + $0x1d0] sm:$0xff] %vm45_vm0, %v10909_v3  ;;  %1277 = vst.msk [vmem:[#allocation3 + $0x1d8] sm:$0xff] %vm45_vm0, %v10909_v3 }
  0xaf   :  { %9938 = vmatmul.mubr.f32.vlgmr.msra.gmra.mrb[0].mxu0 %v10955_v10  ;;  %1278 = vst.msk [vmem:[#allocation3 + $0x1e0] sm:$0xff] %vm45_vm0, %v10909_v3  ;;  %1279 = vst.msk [vmem:[#allocation3 + $0x1e8] sm:$0xff] %vm45_vm0, %v10909_v3  ;;  %v1391_v10 = vshrl.u32 %v1390_v9, 7 }
  0xb0   :  { %9940 = vmatprep.mubr.f32.mxu0 %v10966_v15  ;;  %1280 = vst.msk [vmem:[#allocation3 + $0x1f0] sm:$0xff] %vm45_vm0, %v10909_v3  ;;  %1281 = vst.msk [vmem:[#allocation3 + $0x1f8] sm:$0xff] %vm45_vm0, %v10909_v3 }
  0xb1   :  { %v11386_v14 = vsub.s32 0, %v1391_v10  ;;  %v11388_v15 = vsub.s32 1, %v1391_v10  ;;  %v11406_v28 = vsub.s32 3, %v1391_v10  ;;  %v11412_v37 = vsub.s32 4, %v1391_v10 }
  0xb2   :  { %v11424_v7 = vsub.s32 6, %v1391_v10 }
  0xb3   :  { %9941 = vmatmul.mubr.f32.gmra.mrb[2].mxu0 %v10968_v16  ;;  %v1363_v16 = vld [vmem:[%s17573_s2] sm:$0xff]  ;;  %v11454_v8 = vrot.slane %v11446_v59, %v11386_v14  ;;  %v11463_v49 = vrot.slane %v11446_v59, %v11388_v15 }
  0xb4   :  { %9943 = vmatprep.mubr.f32.mxu0 %v10981_v21  ;;  %v11394_v19 = vrot.slane %v1363_v16, %v11386_v14  ;;  %v11397_v20 = vrot.slane %v1363_v16, %v11388_v15  ;;  %v11399_v21 = vsub.s32 2, %v1391_v10  ;;  %v11410_v34 = vrot.slane %v1363_v16, %v11406_v28 }
  0xb5   :  { %v11416_v57 = vrot.slane %v1363_v16, %v11412_v37  ;;  %v11428_v31 = vrot.slane %v1363_v16, %v11424_v7  ;;  %18176 = vst [vmem:[#allocation12_spill] sm:$0xff] %v11454_v8  ;;  %v1810_v45 = vmul.f32 %v11454_v8, %v1790_v12  ;;  %18177 = vst [vmem:[#allocation13_spill] sm:$0xff] %v11463_v49  ;;  %v2051_v12 = vld [vmem:[#allocation3 + $0x14] sm:$0xff] }
  0xb6   :  { %18168 = vst [vmem:[#allocation4_spill] sm:$0xff] %v11394_v19  ;;  %18169 = vst [vmem:[#allocation5_spill] sm:$0xff] %v11397_v20  ;;  %v1394_v25 = vmul.f32 %v11394_v19, %v1374_v23  ;;  %v11404_v27 = vrot.slane %v1363_v16, %v11399_v21  ;;  %v11476_v23 = vrot.slane %v11446_v59, %v11399_v21 }
  0xb7   :  { %9944 = vmatmul.mubr.f32.gmra.mrb[4].mxu0 %v10993_v26  ;;  %v1446_v26 = vmul.f32 %v11397_v20, %v1426_v24  ;;  %18171 = vst [vmem:[#allocation7_spill] sm:$0xff] %v11410_v34  ;;  %18172 = vst [vmem:[#allocation8_spill] sm:$0xff] %v11416_v57 }
  0xb8   :  { %9946 = vmatprep.mubr.f32.mxu0 %v11015_v38  ;;  %18170 = vst [vmem:[#allocation6_spill] sm:$0xff] %v11404_v27  ;;  %v1498_v33 = vmul.f32 %v11404_v27, %v1478_v29  ;;  %v1530_v38 = vld [vmem:[#allocation3 + $0x3] sm:$0xff]  ;;  %18174 = vst [vmem:[#allocation10_spill] sm:$0xff] %v11428_v31 }
  0xb9   :  { %v1462_v32 = vadd.f32 %v1446_v26, %v1394_v25  ;;  %v1550_v48 = vmul.f32 %v11410_v34, %v1530_v38  ;;  %18178 = vst [vmem:[#allocation14_spill] sm:$0xff] %v11476_v23  ;;  %v11479_v25 = vld [vmem:[#allocation3 + $0x11] sm:$0xff] }
  0xbb   :  { %9947 = vmatmul.mubr.f32.gmra.mrb[6].mxu0 %v11050_v58  ;;  %v1514_v43 = vadd.f32 %v1498_v33, %v1462_v32  ;;  %v11418_v58 = vsub.s32 5, %v1391_v10 }
  0xbc   :  { %9949 = vmatprep.mubr.f32.mxu0 %v11059_v63  ;;  %v1582_v63 = vld [vmem:[#allocation3 + $0x4] sm:$0xff] }
  0xbd   :  { %v1566_v4 = vadd.f32 %v1550_v48, %v1514_v43  ;;  %v1915_v48 = vmul.f32 %v11476_v23, %v11479_v25 }
  0xbf   :  { %9950 = vmatmul.mubr.f32.gmra.mrb[8].mxu0 %v11069_v5  ;;  %v1602_v5 = vmul.f32 %v11416_v57, %v1582_v63  ;;  %v11490_v63 = vrot.slane %v11446_v59, %v11406_v28 }
  0xc0   :  { %9952 = vmatprep.mubr.f32.mxu0 %v11071_v6  ;;  %v11422_v6 = vrot.slane %v1363_v16, %v11418_v58 }
  0xc1   :  { %v1618_v22 = vadd.f32 %v1602_v5, %v1566_v4  ;;  %18179 = vst [vmem:[#allocation15_spill] sm:$0xff] %v11490_v63  ;;  %v1947_v5 = vld [vmem:[#allocation3 + $0x12] sm:$0xff] }
  0xc2   :  { %18173 = vst [vmem:[#allocation9_spill] sm:$0xff] %v11422_v6  ;;  %v1654_v30 = vmul.f32 %v11422_v6, %v1634_v18 }
  0xc3   :  { %9953 = vmatmul.mubr.f32.gmra.mrb[10].mxu0 %v11091_v35  ;;  %v11430_v35 = vsub.s32 7, %v1391_v10 }
  0xc4   :  { %9955 = vmatprep.mubr.f32.mxu0 %v11093_v36  ;;  %v11435_v36 = vld [vmem:[%s17571_s1 + $0x28] ss:$0 sm:$0xff]  ;;  %v1670_v47 = vadd.f32 %v1654_v30, %v1618_v22 }
  0xc7   :  { %9956 = vmatmul.mubr.f32.gmra.mrb[12].mxu0 %v11095_v39  ;;  %v1686_v39 = vld [vmem:[#allocation3 + $0x6] sm:$0xff] }
  0xc8   :  { %9958 = vmatprep.mubr.f32.mxu0 %v11118_v51  ;;  %v1706_v50 = vmul.f32 %v11428_v31, %v1686_v39  ;;  %v11440_v51 = vrot.slane %v1363_v16, %v11430_v35  ;;  %v1863_v16 = vmul.f32 %v11463_v49, %v11466_v53 }
  0xca   :  { %18175 = vst [vmem:[#allocation11_spill] sm:$0xff] %v11440_v51  ;;  %v1722_v1 = vadd.f32 %v1706_v50, %v1670_v47  ;;  %v1758_v2 = vmul.f32 %v11440_v51, %v1738_v60  ;;  %v1999_v50 = vld [vmem:[#allocation3 + $0x13] sm:$0xff] }
  0xcb   :  { %9959 = vmatmul.mubr.f32.gmra.mrb[14].mxu0 %v11132_v62 }
  0xcc   :  { %v1774_v44 = vadd.f32 %v1758_v2, %v1722_v1  ;;  %v11509_v1 = vrot.slane %v11446_v59, %v11418_v58 }
  0xce   :  { %v1826_v10 = vadd.f32 %v1810_v45, %v1774_v44  ;;  %18181 = vst [vmem:[#allocation17_spill] sm:$0xff] %v11509_v1 }
  0xd0   :  { %v1879_v43 = vadd.f32 %v1863_v16, %v1826_v10 }
 0x182   :  { %v9939_v41 = vpop.f32.mrb[0].mxu0 }
 0x183   :  { %v10465_v42 = vadd.f32 %v9939_v41, %v11435_v36  ;;  %v1091_v46 = vpop.f32.mrb[1].mxu0  ;;  %v1931_v41 = vadd.f32 %v1915_v48, %v1879_v43  ;;  %v1447_v43 = vmul.f32 %v11479_v25, %v11397_v20 }
 0x184   :  { %v10466_v55 = vadd.f32 %v11435_v36, %v1091_v46  ;;  %v11500_v46 = vrot.slane %v11446_v59, %v11412_v37 }
 0x185   :  { %1187 = vst.msk [vmem:[#allocation2 + $0x8] sm:$0xff] %vm1185_vm1, %v10465_v42  ;;  %v1967_v42 = vmul.f32 %v11490_v63, %v1947_v5 }
 0x186   :  { %1186 = vst.msk [vmem:[#allocation2] sm:$0xff] %vm1185_vm1, %v10466_v55  ;;  %v9942_v61 = vpop.f32.mrb[2].mxu0  ;;  %18180 = vst [vmem:[#allocation16_spill] sm:$0xff] %v11500_v46 }
 0x187   :  { %v10467_v62 = vadd.f32 %v9942_v61, %v11435_v36  ;;  %v1103_v0 = vpop.f32.mrb[3].mxu0 }
 0x188   :  { %v10468_v11 = vadd.f32 %v11435_v36, %v1103_v0  ;;  %v2019_v0 = vmul.f32 %v11500_v46, %v1999_v50 }
 0x189   :  { %1189 = vst.msk [vmem:[#allocation2 + $0x18] sm:$0xff] %vm1185_vm1, %v10467_v62  ;;  %v1983_v62 = vadd.f32 %v1967_v42, %v1931_v41 }
 0x18a   :  { %1188 = vst.msk [vmem:[#allocation2 + $0x10] sm:$0xff] %vm1185_vm1, %v10468_v11  ;;  %v9945_v13 = vpop.f32.mrb[4].mxu0 }
 0x18b   :  { %v10469_v17 = vadd.f32 %v9945_v13, %v11435_v36  ;;  %v1115_v40 = vpop.f32.mrb[5].mxu0  ;;  %v2035_v45 = vadd.f32 %v2019_v0, %v1983_v62  ;;  %v1551_v62 = vmul.f32 %v1999_v50, %v11410_v34 }
 0x18c   :  { %v10470_v52 = vadd.f32 %v11435_v36, %v1115_v40  ;;  %v1203_v29 = vld [vmem:[#allocation2 + $0x8] sm:$0xff] }
 0x18d   :  { %1191 = vst.msk [vmem:[#allocation2 + $0x28] sm:$0xff] %vm1185_vm1, %v10469_v17  ;;  %v1202_v54 = vld [vmem:[#allocation2] sm:$0xff] }
 0x18e   :  { %1190 = vst.msk [vmem:[#allocation2 + $0x20] sm:$0xff] %vm1185_vm1, %v10470_v52  ;;  %v9948_v56 = vpop.f32.mrb[6].mxu0  ;;  %1298 = vrot.lane.b32.xlu0 %v1202_v54, %s10910_s24  ;;  %v2071_v52 = vmul.f32 %v11509_v1, %v2051_v12  ;;  %v11520_v54 = vrot.slane %v11446_v59, %v11424_v7 }
 0x18f   :  { %v10471_v3 = vadd.f32 %v9948_v56, %v11435_v36  ;;  %v1127_v9 = vpop.f32.mrb[7].mxu0 }
 0x190   :  { %v10472_v24 = vadd.f32 %v11435_v36, %v1127_v9  ;;  %v1205_v18 = vld [vmem:[#allocation2 + $0x18] sm:$0xff]  ;;  %18182 = vst [vmem:[#allocation18_spill] sm:$0xff] %v11520_v54  ;;  %v2087_v16 = vadd.f32 %v2071_v52, %v2035_v45 }
 0x191   :  { %1193 = vst.msk [vmem:[#allocation2 + $0x38] sm:$0xff] %vm1185_vm1, %v10471_v3  ;;  %v1204_v26 = vld [vmem:[#allocation2 + $0x10] sm:$0xff] }
 0x192   :  { %1192 = vst.msk [vmem:[#allocation2 + $0x30] sm:$0xff] %vm1185_vm1, %v10472_v24  ;;  %v9951_v32 = vpop.f32.mrb[8].mxu0  ;;  %1302 = vrot.lane.b32.xlu1 %v1204_v26, %s10910_s24  ;;  %1300 = vrot.lane.b32.xlu0 %v1203_v29, %s10910_s24  ;;  %v2103_v9 = vld [vmem:[#allocation3 + $0x15] sm:$0xff]  ;;  %v11530_v26 = vrot.slane %v11446_v59, %v11430_v35 }
 0x193   :  { %v10473_v33 = vadd.f32 %v9951_v32, %v11435_v36  ;;  %v1139_v38 = vpop.f32.mrb[9].mxu0  ;;  %v2123_v24 = vmul.f32 %v11520_v54, %v2103_v9  ;;  %v2155_v29 = vld [vmem:[#allocation3 + $0x16] sm:$0xff] }
 0x194   :  { %v10474_v4 = vadd.f32 %v11435_v36, %v1139_v38  ;;  %18183 = vst [vmem:[#allocation19_spill] sm:$0xff] %v11530_v26  ;;  %v1395_v38 = vmul.f32 %v11466_v53, %v11394_v19  ;;  %v2175_v48 = vmul.f32 %v11530_v26, %v2155_v29  ;;  %v1499_v53 = vmul.f32 %v1947_v5, %v11404_v27 }
 0x195   :  { %1195 = vst.msk [vmem:[#allocation2 + $0x48] sm:$0xff] %vm1185_vm1, %v10473_v33  ;;  %v1206_v3 = vld [vmem:[#allocation2 + $0x20] sm:$0xff]  ;;  %v2139_v59 = vadd.f32 %v2123_v24, %v2087_v16 }
 0x196   :  { %1194 = vst.msk [vmem:[#allocation2 + $0x40] sm:$0xff] %vm1185_vm1, %v10474_v4  ;;  %v9954_v22 = vpop.f32.mrb[10].mxu0  ;;  %1304 = vrot.lane.b32.xlu1 %v1205_v18, %s10910_s24  ;;  %v2207_v18 = vld [vmem:[#allocation3 + $0x17] sm:$0xff] }
 0x197   :  { %v10475_v30 = vadd.f32 %v9954_v22, %v11435_v36  ;;  %v1151_v39 = vpop.f32.mrb[11].mxu0  ;;  %v2191_v25 = vadd.f32 %v2175_v48, %v2139_v59 }
 0x198   :  { %v10476_v47 = vadd.f32 %v11435_v36, %v1151_v39  ;;  %v1463_v39 = vadd.f32 %v1447_v43, %v1395_v38  ;;  %v1707_v38 = vmul.f32 %v2155_v29, %v11428_v31 }
 0x199   :  { %1197 = vst.msk [vmem:[#allocation2 + $0x58] sm:$0xff] %vm1185_vm1, %v10475_v30  ;;  %v1207_v30 = vld [vmem:[#allocation2 + $0x28] sm:$0xff] }
 0x19a   :  { %1196 = vst.msk [vmem:[#allocation2 + $0x50] sm:$0xff] %vm1185_vm1, %v10476_v47  ;;  %v9957_v55 = vpop.f32.mrb[12].mxu0  ;;  %v2259_v47 = vld [vmem:[#allocation3 + $0x18] sm:$0xff] }
 0x19b   :  { %v10477_v60 = vadd.f32 %v9957_v55, %v11435_v36  ;;  %v1163_v61 = vpop.f32.mrb[13].mxu0 }
 0x19c   :  { %v10478_v2 = vadd.f32 %v11435_v36, %v1163_v61  ;;  %v1211_v11 = vld [vmem:[#allocation2 + $0x48] sm:$0xff]  ;;  %v1515_v61 = vadd.f32 %v1499_v53, %v1463_v39 }
 0x19d   :  { %1199 = vst.msk [vmem:[#allocation2 + $0x68] sm:$0xff] %vm1185_vm1, %v10477_v60  ;;  %1316 = vrot.lane.b32.xlu1 %v1211_v11, %s10910_s24  ;;  %v1210_v13 = vld [vmem:[#allocation2 + $0x40] sm:$0xff]  ;;  %v1208_v60 = vld [vmem:[#allocation2 + $0x30] sm:$0xff] }
 0x19e   :  { %1198 = vst.msk [vmem:[#allocation2 + $0x60] sm:$0xff] %vm1185_vm1, %v10478_v2  ;;  %v9960_v17 = vpop.f32.mrb[14].mxu0  ;;  %1314 = vrot.lane.b32.xlu0 %v1210_v13, %s10910_s24  ;;  %v2312_v11 = vld [vmem:[#allocation3 + $0x20] sm:$0xff] }
 0x19f   :  { %v10479_v40 = vadd.f32 %v9960_v17, %v11435_v36  ;;  %v1175_v44 = vpop.f32.mrb[15].mxu0  ;;  %v1209_v17 = vld [vmem:[#allocation2 + $0x38] sm:$0xff] }
 0x1a0   :  { %v10480_v56 = vadd.f32 %v11435_v36, %v1175_v44  ;;  %v11535_v36 = vld [vmem:[%s17573_s2 + $0x10] sm:$0xff]  ;;  %v1213_v33 = vld [vmem:[#allocation2 + $0x58] sm:$0xff]  ;;  %v1603_v44 = vmul.f32 %v2051_v12, %v11416_v57 }
 0x1a1   :  { %1201 = vst.msk [vmem:[#allocation2 + $0x78] sm:$0xff] %vm1185_vm1, %v10479_v40  ;;  %1306 = vrot.lane.b32.xlu1 %v1206_v3, %s10910_s24  ;;  %v1212_v10 = vld [vmem:[#allocation2 + $0x50] sm:$0xff]  ;;  %v11546_v4 = vrot.slane %v11535_v36, %v11386_v14  ;;  %v11554_v42 = vrot.slane %v11535_v36, %v11388_v15  ;;  %v11562_v2 = vrot.slane %v11535_v36, %v11399_v21 }
 0x1a2   :  { %1200 = vst.msk [vmem:[#allocation2 + $0x70] sm:$0xff] %vm1185_vm1, %v10480_v56  ;;  %1318 = vrot.lane.b32.xlu0 %v1212_v10, %s10910_s24  ;;  %v1567_v40 = vadd.f32 %v1551_v62, %v1515_v61  ;;  %v11570_v52 = vrot.slane %v11535_v36, %v11406_v28  ;;  %v2364_v56 = vld [vmem:[#allocation3 + $0x21] sm:$0xff]  ;;  %v1655_v10 = vmul.f32 %v2103_v9, %v11422_v6 }
 0x1a3   :  { %18184 = vst [vmem:[#allocation20_spill] sm:$0xff] %v11546_v4  ;;  %v2227_v41 = vmul.f32 %v11546_v4, %v2207_v18  ;;  %18185 = vst [vmem:[#allocation21_spill] sm:$0xff] %v11554_v42  ;;  %v2279_v0 = vmul.f32 %v11554_v42, %v2259_v47  ;;  %v2332_v45 = vmul.f32 %v11562_v2, %v2312_v11 }
 0x1a4   :  { %v1215_v22 = vld [vmem:[#allocation2 + $0x68] sm:$0xff]  ;;  %18186 = vst [vmem:[#allocation22_spill] sm:$0xff] %v11562_v2  ;;  %18187 = vst [vmem:[#allocation23_spill] sm:$0xff] %v11570_v52  ;;  %v1619_v3 = vadd.f32 %v1603_v44, %v1567_v40  ;;  %v2384_v24 = vmul.f32 %v11570_v52, %v2364_v56  ;;  %v11576_v12 = vrot.slane %v11535_v36, %v11412_v37  ;;  %v1376_v44 = vld [vmem:[#allocation3 + $0x20] sm:$0xff] }
 0x1a5   :  { %v1214_v32 = vld [vmem:[#allocation2 + $0x60] sm:$0xff]  ;;  %v2243_v5 = vadd.f32 %v2227_v41, %v2191_v25  ;;  %v11582_v48 = vrot.slane %v11535_v36, %v11418_v58  ;;  %v11588_v25 = vrot.slane %v11535_v36, %v11424_v7  ;;  %v11594_v62 = vrot.slane %v11535_v36, %v11430_v35 }
 0x1a6   :  { %1322 = vrot.lane.b32.xlu1 %v1214_v32, %s10910_s24  ;;  %1320 = vrot.lane.b32.xlu0 %v1213_v33, %s10910_s24  ;;  %18188 = vst [vmem:[#allocation24_spill] sm:$0xff] %v11576_v12  ;;  %v2416_v32 = vld [vmem:[#allocation3 + $0x22] sm:$0xff]  ;;  %v1671_v33 = vadd.f32 %v1655_v10, %v1619_v3  ;;  %v1916_v3 = vmul.f32 %v2364_v56, %v11476_v23 }
 0x1a7   :  { %v2295_v50 = vadd.f32 %v2279_v0, %v2243_v5  ;;  %v2436_v59 = vmul.f32 %v11576_v12, %v2416_v32  ;;  %18189 = vst [vmem:[#allocation25_spill] sm:$0xff] %v11582_v48  ;;  %18190 = vst [vmem:[#allocation26_spill] sm:$0xff] %v11588_v25  ;;  %v2520_v41 = vld [vmem:[#allocation3 + $0x24] sm:$0xff]  ;;  %v1396_v10 = vmul.f32 %v11394_v19, %v1376_v44 }
 0x1a8   :  { %v1217_v13 = vld [vmem:[#allocation2 + $0x78] sm:$0xff]  ;;  %v1723_v9 = vadd.f32 %v1707_v38, %v1671_v33  ;;  %v2540_v61 = vmul.f32 %v11588_v25, %v2520_v41  ;;  %18191 = vst [vmem:[#allocation27_spill] sm:$0xff] %v11594_v62  ;;  %v2572_v5 = vld [vmem:[#allocation3 + $0x25] sm:$0xff] }
 0x1a9   :  { %v1216_v55 = vld [vmem:[#allocation2 + $0x70] sm:$0xff]  ;;  %v2348_v16 = vadd.f32 %v2332_v45, %v2295_v50  ;;  %v2592_v40 = vmul.f32 %v11594_v62, %v2572_v5  ;;  %v1428_v50 = vld [vmem:[#allocation3 + $0x21] sm:$0xff] }
 0x1aa   :  { %1324 = vrot.lane.b32.xlu1 %v1215_v22, %s10910_s24  ;;  %1308 = vrot.lane.b32.xlu0 %v1207_v30, %s10910_s24  ;;  %v2468_v22 = vld [vmem:[#allocation3 + $0x23] sm:$0xff]  ;;  %v1759_v30 = vmul.f32 %v2207_v18, %v11440_v51  ;;  %v11599_v18 = vld [vmem:[%s17573_s2 + $0x18] sm:$0xff] }
 0x1ab   :  { %v2400_v43 = vadd.f32 %v2384_v24, %v2348_v16  ;;  %v2488_v53 = vmul.f32 %v11582_v48, %v2468_v22  ;;  %v2624_v36 = vld [vmem:[#allocation3 + $0x26] sm:$0xff]  ;;  %v1448_v16 = vmul.f32 %v11397_v20, %v1428_v50  ;;  %v11613_v33 = vrot.slane %v11599_v18, %v11388_v15 }
 0x1ac   :  { %v1775_v29 = vadd.f32 %v1759_v30, %v1723_v9  ;;  %v1480_v38 = vld [vmem:[#allocation3 + $0x22] sm:$0xff]  ;;  %v1968_v9 = vmul.f32 %v2416_v32, %v11490_v63  ;;  %v11627_v44 = vrot.slane %v11599_v18, %v11406_v28 }
 0x1ad   :  { %v2452_v39 = vadd.f32 %v2436_v59, %v2400_v43  ;;  %18193 = vst [vmem:[#allocation29_spill] sm:$0xff] %v11613_v33  ;;  %v2676_v43 = vld [vmem:[#allocation3 + $0x27] sm:$0xff]  ;;  %v1464_v30 = vadd.f32 %v1448_v16, %v1396_v10  ;;  %v2072_v10 = vmul.f32 %v2520_v41, %v11509_v1 }
 0x1ae   :  { %1326 = vrot.lane.b32.xlu1 %v1216_v55, %s10910_s24  ;;  %1310 = vrot.lane.b32.xlu0 %v1208_v60, %s10910_s24  ;;  %v1811_v55 = vmul.f32 %v2259_v47, %v11454_v8  ;;  %v11605_v47 = vrot.slane %v11599_v18, %v11386_v14  ;;  %18195 = vst [vmem:[#allocation31_spill] sm:$0xff] %v11627_v44  ;;  %v1584_v50 = vld [vmem:[#allocation3 + $0x24] sm:$0xff] }
 0x1af   :  { %v2504_v60 = vadd.f32 %v2488_v53, %v2452_v39  ;;  %v1500_v39 = vmul.f32 %v11404_v27, %v1480_v38  ;;  %v2696_v53 = vmul.f32 %v11613_v33, %v2676_v43  ;;  %v11634_v38 = vrot.slane %v11599_v18, %v11412_v37 }
 0x1b0   :  { %v1827_v0 = vadd.f32 %v1811_v55, %v1775_v29  ;;  %18192 = vst [vmem:[#allocation28_spill] sm:$0xff] %v11605_v47  ;;  %v11620_v29 = vrot.slane %v11599_v18, %v11399_v21  ;;  %v1532_v55 = vld [vmem:[#allocation3 + $0x23] sm:$0xff] }
 0x1b1   :  { %18196 = vst [vmem:[#allocation32_spill] sm:$0xff] %v11634_v38 }
 0x1b2   :  { %1328 = vrot.lane.b32.xlu1 %v1217_v13, %s10910_s24  ;;  %1312 = vrot.lane.b32.xlu0 %v1209_v17, %s10910_s24  ;;  %v1864_v13 = vmul.f32 %v2312_v11, %v11463_v49  ;;  %v2556_v17 = vadd.f32 %v2540_v61, %v2504_v60  ;;  %v2644_v11 = vmul.f32 %v11605_v47, %v2624_v36  ;;  %v2728_v60 = vld [vmem:[#allocation3 + $0x28] sm:$0xff] }
 0x1b3   :  { %18194 = vst [vmem:[#allocation30_spill] sm:$0xff] %v11620_v29  ;;  %v2748_v32 = vmul.f32 %v11620_v29, %v2728_v60 }
 0x1b4   :  { %v1880_v45 = vadd.f32 %v1864_v13, %v1827_v0  ;;  %v2608_v24 = vadd.f32 %v2592_v40, %v2556_v17  ;;  %v2020_v0 = vmul.f32 %v2468_v22, %v11500_v46  ;;  %v1516_v13 = vadd.f32 %v1500_v39, %v1464_v30 }
 0x1b5   :  { %v1552_v17 = vmul.f32 %v11410_v34, %v1532_v55  ;;  %v2124_v39 = vmul.f32 %v2572_v5, %v11520_v54 }
 0x1b6   :  { %v1932_v59 = vadd.f32 %v1916_v3, %v1880_v45  ;;  %v2660_v56 = vadd.f32 %v2644_v11, %v2608_v24  ;;  %v2781_v45 = vld [vmem:[#allocation3 + $0x30] sm:$0xff]  ;;  %v1604_v24 = vmul.f32 %v11416_v57, %v1584_v50 }
 0x1b7   :  { %v1568_v16 = vadd.f32 %v1552_v17, %v1516_v13  ;;  %v2801_v22 = vmul.f32 %v11627_v44, %v2781_v45  ;;  %v2885_v13 = vld [vmem:[#allocation3 + $0x32] sm:$0xff] }
 0x1b8   :  { %v1984_v61 = vadd.f32 %v1968_v9, %v1932_v59  ;;  %v2712_v40 = vadd.f32 %v2696_v53, %v2660_v56  ;;  %v1636_v59 = vld [vmem:[#allocation3 + $0x25] sm:$0xff]  ;;  %v2833_v9 = vld [vmem:[#allocation3 + $0x31] sm:$0xff] }
 0x1b9   :  { %v1620_v56 = vadd.f32 %v1604_v24, %v1568_v16  ;;  %v1656_v53 = vmul.f32 %v11422_v6, %v1636_v59  ;;  %v2853_v41 = vmul.f32 %v11634_v38, %v2833_v9  ;;  %v1740_v16 = vld [vmem:[#allocation3 + $0x27] sm:$0xff]  ;;  %v2937_v24 = vld [vmem:[#allocation3 + $0x33] sm:$0xff] }
 0x1ba   :  { %v2036_v3 = vadd.f32 %v2020_v0, %v1984_v61  ;;  %v2764_v11 = vadd.f32 %v2748_v32, %v2712_v40  ;;  %v11641_v61 = vrot.slane %v11599_v18, %v11418_v58  ;;  %v1688_v0 = vld [vmem:[#allocation3 + $0x26] sm:$0xff]  ;;  %v2176_v40 = vmul.f32 %v2624_v36, %v11530_v26 }
 0x1bb   :  { %v1672_v32 = vadd.f32 %v1656_v53, %v1620_v56  ;;  %v1708_v50 = vmul.f32 %v11428_v31, %v1688_v0  ;;  %v11655_v56 = vrot.slane %v11599_v18, %v11430_v35  ;;  %v1792_v53 = vld [vmem:[#allocation3 + $0x28] sm:$0xff] }
 0x1bc   :  { %v2088_v30 = vadd.f32 %v2072_v10, %v2036_v3  ;;  %v2817_v55 = vadd.f32 %v2801_v22, %v2764_v11  ;;  %18197 = vst [vmem:[#allocation33_spill] sm:$0xff] %v11641_v61  ;;  %v2905_v5 = vmul.f32 %v11641_v61, %v2885_v13  ;;  %v11648_v10 = vrot.slane %v11599_v18, %v11424_v7  ;;  %v1845_v18 = vld [vmem:[#allocation3 + $0x30] sm:$0xff] }
 0x1bd   :  { %v2228_v22 = vmul.f32 %v2676_v43, %v11546_v4  ;;  %v1724_v59 = vadd.f32 %v1708_v50, %v1672_v32  ;;  %18199 = vst [vmem:[#allocation35_spill] sm:$0xff] %v11655_v56 }
 0x1be   :  { %v2140_v17 = vadd.f32 %v2124_v39, %v2088_v30  ;;  %v2869_v3 = vadd.f32 %v2853_v41, %v2817_v55  ;;  %18198 = vst [vmem:[#allocation34_spill] sm:$0xff] %v11648_v10  ;;  %v1760_v30 = vmul.f32 %v11440_v51, %v1740_v16  ;;  %v2957_v36 = vmul.f32 %v11648_v10, %v2937_v24  ;;  %v1367_v55 = vld [vmem:[%s17573_s2 + $0x20] sm:$0xff]  ;;  %v2989_v41 = vld [vmem:[#allocation3 + $0x34] sm:$0xff] }
 0x1bf   :  { %v3009_v50 = vmul.f32 %v11655_v56, %v2989_v41  ;;  %v2333_v10 = vmul.f32 %v2781_v45, %v11562_v2 }
 0x1c0   :  { %v2192_v11 = vadd.f32 %v2176_v40, %v2140_v17  ;;  %v2921_v39 = vadd.f32 %v2905_v5, %v2869_v3  ;;  %v2280_v17 = vmul.f32 %v2728_v60, %v11554_v42  ;;  %v1776_v43 = vadd.f32 %v1760_v30, %v1724_v59  ;;  %v11666_v5 = vld [vmem:[#allocation3 + $0x35] sm:$0xff] }
 0x1c1   :  { %v1812_v40 = vmul.f32 %v11454_v8, %v1792_v53  ;;  %v11664_v3 = vrot.slane %v1367_v55, %v11386_v14  ;;  %v11673_v59 = vrot.slane %v1367_v55, %v11388_v15  ;;  %v1897_v30 = vld [vmem:[#allocation3 + $0x31] sm:$0xff]  ;;  %v2385_v53 = vmul.f32 %v2833_v9, %v11570_v52 }
 0x1c2   :  { %v2244_v0 = vadd.f32 %v2228_v22, %v2192_v11  ;;  %v2973_v32 = vadd.f32 %v2957_v36, %v2921_v39  ;;  %v1865_v11 = vmul.f32 %v11463_v49, %v1845_v18  ;;  %v11675_v39 = vld [vmem:[#allocation3 + $0x36] sm:$0xff] }
 0x1c3   :  { %18200 = vst [vmem:[#allocation36_spill] sm:$0xff] %v11664_v3  ;;  %v1828_v61 = vadd.f32 %v1812_v40, %v1776_v43  ;;  %v3061_v60 = vmul.f32 %v11664_v3, %v11666_v5  ;;  %18201 = vst [vmem:[#allocation37_spill] sm:$0xff] %v11673_v59  ;;  %v11682_v43 = vrot.slane %v1367_v55, %v11399_v21  ;;  %v1949_v40 = vld [vmem:[#allocation3 + $0x32] sm:$0xff] }
 0x1c4   :  { %v2296_v16 = vadd.f32 %v2280_v17, %v2244_v0  ;;  %v3025_v22 = vadd.f32 %v3009_v50, %v2973_v32  ;;  %v1917_v0 = vmul.f32 %v11476_v23, %v1897_v30  ;;  %v3113_v17 = vmul.f32 %v11673_v59, %v11675_v39  ;;  %v11684_v32 = vld [vmem:[#allocation3 + $0x37] sm:$0xff] }
 0x1c5   :  { %v1881_v56 = vadd.f32 %v1865_v11, %v1828_v61  ;;  %18202 = vst [vmem:[#allocation38_spill] sm:$0xff] %v11682_v43  ;;  %v2437_v3 = vmul.f32 %v2885_v13, %v11576_v12  ;;  %v3165_v61 = vmul.f32 %v11682_v43, %v11684_v32  ;;  %v2001_v11 = vld [vmem:[#allocation3 + $0x33] sm:$0xff]  ;;  %v2489_v59 = vmul.f32 %v2937_v24, %v11582_v48  ;;  %v1368_v13 = vld [vmem:[%s17573_s2 + $0x28] sm:$0xff] }
 0x1c6   :  { %v2349_v36 = vadd.f32 %v2333_v10, %v2296_v16  ;;  %v3077_v45 = vadd.f32 %v3061_v60, %v3025_v22  ;;  %v1969_v10 = vmul.f32 %v11490_v63, %v1949_v40  ;;  %v11691_v16 = vrot.slane %v1367_v55, %v11406_v28  ;;  %v11693_v22 = vld [vmem:[#allocation3 + $0x38] sm:$0xff] }
 0x1c7   :  { %v1933_v38 = vadd.f32 %v1917_v0, %v1881_v56  ;;  %v1449_v0 = vmul.f32 %v1897_v30, %v11397_v20  ;;  %v11705_v43 = vrot.slane %v1367_v55, %v11412_v37  ;;  %v11708_v24 = vrot.slane %v1367_v55, %v11418_v58 }
 0x1c8   :  { %v2401_v50 = vadd.f32 %v2385_v53, %v2349_v36  ;;  %v3129_v9 = vadd.f32 %v3113_v17, %v3077_v45  ;;  %18203 = vst [vmem:[#allocation39_spill] sm:$0xff] %v11691_v16  ;;  %v2021_v36 = vmul.f32 %v11500_v46, %v2001_v11  ;;  %v1397_v53 = vmul.f32 %v1845_v18, %v11394_v19 }
 0x1c9   :  { %v1985_v56 = vadd.f32 %v1969_v10, %v1933_v38  ;;  %v3217_v17 = vmul.f32 %v11691_v16, %v11693_v22  ;;  %18204 = vst [vmem:[#allocation40_spill] sm:$0xff] %v11705_v43  ;;  %18205 = vst [vmem:[#allocation41_spill] sm:$0xff] %v11708_v24  ;;  %v1501_v10 = vmul.f32 %v1949_v40, %v11404_v27 }
 0x1ca   :  { %v2453_v60 = vadd.f32 %v2437_v3, %v2401_v50  ;;  %v3181_v45 = vadd.f32 %v3165_v61, %v3129_v9  ;;  %v2053_v3 = vld [vmem:[#allocation3 + $0x34] sm:$0xff]  ;;  %v11711_v50 = vrot.slane %v1367_v55, %v11424_v7  ;;  %v1465_v38 = vadd.f32 %v1449_v0, %v1397_v53 }
 0x1cb   :  { %v11715_v18 = vrot.slane %v1367_v55, %v11430_v35  ;;  %v11718_v30 = vrot.slane %v1368_v13, %v11386_v14  ;;  %v2541_v61 = vmul.f32 %v2989_v41, %v11588_v25  ;;  %v2037_v16 = vadd.f32 %v2021_v36, %v1985_v56  ;;  %v1369_v41 = vld [vmem:[%s17573_s2 + $0x30] sm:$0xff] }
 0x1cc   :  { %18206 = vst [vmem:[#allocation42_spill] sm:$0xff] %v11711_v50  ;;  %v2505_v9 = vadd.f32 %v2489_v59, %v2453_v60  ;;  %v2073_v44 = vmul.f32 %v11509_v1, %v2053_v3  ;;  %v1517_v48 = vadd.f32 %v1501_v10, %v1465_v38  ;;  %v1553_v12 = vmul.f32 %v2001_v11, %v11410_v34  ;;  %v2105_v59 = vld [vmem:[#allocation3 + $0x35] sm:$0xff] }
 0x1cd   :  { %18207 = vst [vmem:[#allocation43_spill] sm:$0xff] %v11715_v18  ;;  %18208 = vst [vmem:[#allocation44_spill] sm:$0xff] %v11718_v30  ;;  %v11723_v52 = vadd.f32 %v3217_v17, %v3181_v45  ;;  %v11726_v53 = vrot.slane %v1368_v13, %v11388_v15  ;;  %v11729_v55 = vrot.slane %v1368_v13, %v11399_v21  ;;  %v1370_v10 = vld [vmem:[%s17573_s2 + $0x38] sm:$0xff] }
 0x1ce   :  { %v11732_v40 = vrot.slane %v1368_v13, %v11406_v28  ;;  %v11738_v60 = vrot.slane %v1368_v13, %v11412_v37  ;;  %v11741_v11 = vrot.slane %v1368_v13, %v11418_v58  ;;  %v1569_v56 = vadd.f32 %v1553_v12, %v1517_v48 }
 0x1cf   :  { %18209 = vst [vmem:[#allocation45_spill] sm:$0xff] %v11726_v53  ;;  %18210 = vst [vmem:[#allocation46_spill] sm:$0xff] %v11729_v55  ;;  %v1605_v36 = vmul.f32 %v2053_v3, %v11416_v57  ;;  %v11745_v0 = vrot.slane %v1368_v13, %v11424_v7  ;;  %v11748_v45 = vrot.slane %v1368_v13, %v11430_v35 }
 0x1d0   :  { %18211 = vst [vmem:[#allocation47_spill] sm:$0xff] %v11732_v40  ;;  %18212 = vst [vmem:[#allocation48_spill] sm:$0xff] %v11738_v60  ;;  %v2557_v17 = vadd.f32 %v2541_v61, %v2505_v9  ;;  %v2593_v38 = vmul.f32 %v11666_v5, %v11594_v62  ;;  %v2089_v60 = vadd.f32 %v2073_v44, %v2037_v16  ;;  %v2157_v61 = vld [vmem:[#allocation3 + $0x36] sm:$0xff] }
 0x1d1   :  { %18213 = vst [vmem:[#allocation49_spill] sm:$0xff] %v11741_v11  ;;  %18214 = vst [vmem:[#allocation50_spill] sm:$0xff] %v11745_v0  ;;  %v2125_v11 = vmul.f32 %v11520_v54, %v2105_v59  ;;  %v1621_v12 = vadd.f32 %v1605_v36, %v1569_v56  ;;  %v1657_v48 = vmul.f32 %v2105_v59, %v11422_v6  ;;  %v1371_v36 = vld [vmem:[%s17573_s2 + $0x40] sm:$0xff] }
 0x1d2   :  { %18215 = vst [vmem:[#allocation51_spill] sm:$0xff] %v11748_v45  ;;  %v11758_v3 = vrot.slane %v1369_v41, %v11386_v14  ;;  %v11761_v13 = vrot.slane %v1369_v41, %v11388_v15  ;;  %v11764_v9 = vrot.slane %v1369_v41, %v11399_v21  ;;  %v11767_v5 = vrot.slane %v1369_v41, %v11406_v28 }
 0x1d3   :  { %v11770_v44 = vrot.slane %v1369_v41, %v11412_v37  ;;  %v11773_v16 = vrot.slane %v1369_v41, %v11418_v58  ;;  %v11776_v59 = vrot.slane %v1369_v41, %v11424_v7  ;;  %v11779_v56 = vrot.slane %v1369_v41, %v11430_v35 }
 0x1d4   :  { %18216 = vst [vmem:[#allocation52_spill] sm:$0xff] %v11758_v3  ;;  %18217 = vst [vmem:[#allocation53_spill] sm:$0xff] %v11761_v13  ;;  %v2177_v41 = vmul.f32 %v11530_v26, %v2157_v61  ;;  %v11796_v13 = vrot.slane %v1370_v10, %v11399_v21  ;;  %v11799_v3 = vrot.slane %v1370_v10, %v11406_v28 }
 0x1d5   :  { %18218 = vst [vmem:[#allocation54_spill] sm:$0xff] %v11764_v9  ;;  %18219 = vst [vmem:[#allocation55_spill] sm:$0xff] %v11767_v5  ;;  %v11786_v5 = vrot.slane %v1370_v10, %v11386_v14  ;;  %v2609_v9 = vadd.f32 %v2593_v38, %v2557_v17  ;;  %v11805_v17 = vrot.slane %v1370_v10, %v11418_v58  ;;  %v2209_v38 = vld [vmem:[#allocation3 + $0x37] sm:$0xff] }
 0x1d6   :  { %18220 = vst [vmem:[#allocation56_spill] sm:$0xff] %v11770_v44  ;;  %18221 = vst [vmem:[#allocation57_spill] sm:$0xff] %v11773_v16  ;;  %v11789_v44 = vrot.slane %v1370_v10, %v11388_v15  ;;  %v2645_v16 = vmul.f32 %v11675_v39, %v11605_v47 }
 0x1d7   :  { %18222 = vst [vmem:[#allocation58_spill] sm:$0xff] %v11776_v59  ;;  %18223 = vst [vmem:[#allocation59_spill] sm:$0xff] %v11779_v56  ;;  %v2141_v59 = vadd.f32 %v2125_v11, %v2089_v60  ;;  %v1673_v56 = vadd.f32 %v1657_v48, %v1621_v12  ;;  %v11808_v11 = vrot.slane %v1370_v10, %v11424_v7 }
 0x1d8   :  { %18224 = vst [vmem:[#allocation60_spill] sm:$0xff] %v11786_v5  ;;  %18225 = vst [vmem:[#allocation61_spill] sm:$0xff] %v11789_v44  ;;  %v11802_v5 = vrot.slane %v1370_v10, %v11412_v37  ;;  %v11811_v12 = vrot.slane %v1370_v10, %v11430_v35  ;;  %v11814_v48 = vrot.slane %v1371_v36, %v11386_v14 }
 0x1d9   :  { %18226 = vst [vmem:[#allocation62_spill] sm:$0xff] %v11796_v13  ;;  %18227 = vst [vmem:[#allocation63_spill] sm:$0xff] %v11799_v3  ;;  %v11828_v10 = vrot.slane %v1371_v36, %v11399_v21  ;;  %v2229_v3 = vmul.f32 %v11546_v4, %v2209_v38  ;;  %v11840_v44 = vrot.slane %v1371_v36, %v11412_v37 }
 0x1da   :  { %18228 = vst [vmem:[#allocation64_spill] sm:$0xff] %v11802_v5  ;;  %18229 = vst [vmem:[#allocation65_spill] sm:$0xff] %v11805_v17  ;;  %v15_v5 = vld [vmem:[%s17571_s1 + $0x8] sm:$0xff]  ;;  %v2193_v17 = vadd.f32 %v2177_v41, %v2141_v59  ;;  %v11854_v41 = vrot.slane %v1371_v36, %v11430_v35 }
 0x1db   :  { %18230 = vst [vmem:[#allocation66_spill] sm:$0xff] %v11808_v11  ;;  %18231 = vst [vmem:[#allocation67_spill] sm:$0xff] %v11811_v12  ;;  %v1372_v11 = vld [vmem:[%s17573_s2 + $0x48] sm:$0xff]  ;;  %v11830_v12 = vand.u32 4294901760, %v15_v5 }
 0x1dc   :  { %18232 = vst [vmem:[#allocation68_spill] sm:$0xff] %v11814_v48  ;;  %18234 = vst [vmem:[#allocation70_spill] sm:$0xff] %v11828_v10  ;;  %v2661_v48 = vadd.f32 %v2645_v16, %v2609_v9  ;;  %v11843_v10 = vrot.slane %v1371_v36, %v11418_v58  ;;  %v11846_v9 = vrot.slane %v1371_v36, %v11424_v7 }
 0x1dd   :  { %18235 = vst [vmem:[#allocation71_spill] sm:$0xff] %v11830_v12  ;;  %18237 = vst [vmem:[#allocation73_spill] sm:$0xff] %v11840_v44  ;;  %9961 = vmatprep.subr.mxu1 %v11830_v12  ;;  %v11883_v0 = vrot.slane %v1372_v11, %v11406_v28 }
 0x1de   :  { %18238 = vst [vmem:[#allocation74_spill] sm:$0xff] %v11843_v10  ;;  %18239 = vst [vmem:[#allocation75_spill] sm:$0xff] %v11846_v9  ;;  %v11863_v9 = vrot.slane %v1372_v11, %v11399_v21  ;;  %9962 = vmatpush3.msra.mxu1 %v11830_v12 }
 0x1df   :  { %18240 = vst [vmem:[#allocation76_spill] sm:$0xff] %v11854_v41  ;;  %18244 = vst [vmem:[#allocation80_spill] sm:$0xff] %v11883_v0 }
 0x1e0   :  { %18243 = vst [vmem:[#allocation79_spill] sm:$0xff] %v11863_v9 }
 0x200   :  { %v1299_v45 = vpop.permute.xlu0 %1298 }
 0x201   :  { %1347 = vst.msk [vmem:[#allocation3 + $0x44] sm:$0xff] %vm45_vm0, %v1299_v45  ;;  %v1709_v45 = vmul.f32 %v2157_v61, %v11428_v31  ;;  %v11817_v61 = vrot.slane %v1371_v36, %v11388_v15 }
 0x203   :  { %18233 = vst [vmem:[#allocation69_spill] sm:$0xff] %v11817_v61  ;;  %v2697_v61 = vmul.f32 %v11684_v32, %v11613_v33  ;;  %v1725_v13 = vadd.f32 %v1709_v45, %v1673_v56  ;;  %v2261_v32 = vld [vmem:[#allocation3 + $0x38] sm:$0xff]  ;;  %v11857_v45 = vrot.slane %v1372_v11, %v11386_v14  ;;  %v2749_v14 = vmul.f32 %v11693_v22, %v11620_v29 }
 0x204   :  { %v1303_v39 = vpop.permute.xlu1 %1302  ;;  %v1301_v60 = vpop.permute.xlu0 %1300  ;;  %v1813_v9 = vmul.f32 %v2261_v32, %v11454_v8 }
 0x205   :  { %1349 = vst.msk [vmem:[#allocation3 + $0x64] sm:$0xff] %vm45_vm0, %v1303_v39  ;;  %1348 = vst.msk [vmem:[#allocation3 + $0x54] sm:$0xff] %vm45_vm0, %v1301_v60  ;;  %v1761_v39 = vmul.f32 %v2209_v38, %v11440_v51  ;;  %v11837_v60 = vrot.slane %v1371_v36, %v11406_v28  ;;  %v11860_v38 = vrot.slane %v1372_v11, %v11388_v15 }
 0x206   :  { %18241 = vst [vmem:[#allocation77_spill] sm:$0xff] %v11857_v45  ;;  %v2713_v41 = vadd.f32 %v2697_v61, %v2661_v48  ;;  %v2245_v15 = vadd.f32 %v2229_v3, %v2193_v17  ;;  %v11886_v48 = vrot.slane %v1372_v11, %v11412_v37  ;;  %v11897_v17 = vrot.slane %v1372_v11, %v11418_v58 }
 0x207   :  { %18236 = vst [vmem:[#allocation72_spill] sm:$0xff] %v11837_v60  ;;  %18242 = vst [vmem:[#allocation78_spill] sm:$0xff] %v11860_v38  ;;  %v2281_v38 = vmul.f32 %v11554_v42, %v2261_v32  ;;  %v1777_v21 = vadd.f32 %v1761_v39, %v1725_v13  ;;  %v11900_v61 = vrot.slane %v1372_v11, %v11424_v7 }
 0x208   :  { %v1305_v5 = vpop.permute.xlu1 %1304  ;;  %v1378_v16 = vld [vmem:[#allocation3 + $0x40] sm:$0xff]  ;;  %18245 = vst [vmem:[#allocation81_spill] sm:$0xff] %v11886_v48  ;;  %18248 = vst [vmem:[#allocation84_spill] sm:$0xff] %v11897_v17  ;;  %v11903_v28 = vrot.slane %v1372_v11, %v11430_v35 }
 0x209   :  { %v11849_v59 = vld [vmem:[#allocation3 + $0x41] sm:$0xff]  ;;  %1350 = vst.msk [vmem:[#allocation3 + $0x74] sm:$0xff] %vm45_vm0, %v1305_v5  ;;  %v1398_v10 = vmul.f32 %v11394_v19, %v1378_v16  ;;  %18249 = vst [vmem:[#allocation85_spill] sm:$0xff] %v11900_v61  ;;  %v11923_v61 = vadd.f32 %v2281_v38, %v2245_v15  ;;  %v11925_v17 = vadd.f32 %v1813_v9, %v1777_v21 }
 0x20a   :  { %v11851_v56 = vld [vmem:[#allocation3 + $0x42] sm:$0xff]  ;;  %v1450_v44 = vmul.f32 %v11397_v20, %v11849_v59  ;;  %18250 = vst [vmem:[#allocation86_spill] sm:$0xff] %v11903_v28  ;;  %v11921_v28 = vadd.f32 %v2749_v14, %v2713_v41 }
 0x20b   :  { %v11870_v36 = vld [vmem:[#allocation3 + $0x43] sm:$0xff]  ;;  %v1502_v5 = vmul.f32 %v11404_v27, %v11851_v56  ;;  %18252 = vst [vmem:[#allocation88_spill] sm:$0xff] %v11923_v61  ;;  %18253 = vst [vmem:[#allocation89_spill] sm:$0xff] %v11925_v17 }
 0x20c   :  { %v1466_v12 = vadd.f32 %v1450_v44, %v1398_v10  ;;  %v11878_v45 = vld [vmem:[#allocation3 + $0x44] sm:$0xff]  ;;  %v11888_v22 = vld [vmem:[#allocation3 + $0x50] sm:$0xff]  ;;  %v1554_v44 = vmul.f32 %v11410_v34, %v11870_v36  ;;  %18251 = vst [vmem:[#allocation87_spill] sm:$0xff] %v11921_v28 }
 0x20d   :  { %v11880_v60 = vld [vmem:[#allocation3 + $0x45] sm:$0xff]  ;;  %18246 = vst [vmem:[#allocation82_spill] sm:$0xff] %v11888_v22  ;;  %v11892_v13 = vld [vmem:[#allocation3 + $0x51] sm:$0xff]  ;;  %v1399_v37 = vmul.f32 %v11394_v19, %v11888_v22 }
 0x20e   :  { %v11890_v3 = vld [vmem:[#allocation3 + $0x60] sm:$0xff]  ;;  %18247 = vst [vmem:[#allocation83_spill] sm:$0xff] %v11892_v13  ;;  %v1451_v32 = vmul.f32 %v11397_v20, %v11892_v13  ;;  %v11913_v48 = vld [vmem:[#allocation3 + $0x52] sm:$0xff]  ;;  %v1518_v7 = vadd.f32 %v1502_v5, %v1466_v12  ;;  %v1606_v12 = vmul.f32 %v11416_v57, %v11878_v45  ;;  %v1658_v15 = vmul.f32 %v11422_v6, %v11880_v60  ;;  %v11944_v21 = vld [vmem:[#allocation3 + $0x48] sm:$0xff] }
 0x20f   :  { %v1400_v10 = vmul.f32 %v11394_v19, %v11890_v3  ;;  %v11909_v39 = vld [vmem:[#allocation3 + $0x61] sm:$0xff]  ;;  %v11919_v11 = vld [vmem:[#allocation3 + $0x53] sm:$0xff]  ;;  %v1317_v0 = vpop.permute.xlu1 %1316  ;;  %v1503_v40 = vmul.f32 %v11404_v27, %v11913_v48 }
 0x210   :  { %v11915_v58 = vld [vmem:[#allocation3 + $0x62] sm:$0xff]  ;;  %v1452_v35 = vmul.f32 %v11397_v20, %v11909_v39  ;;  %v1467_v19 = vadd.f32 %v1451_v32, %v1399_v37  ;;  %v1570_v53 = vadd.f32 %v1554_v44, %v1518_v7  ;;  %1356 = vst.msk [vmem:[#allocation3 + $0x154] sm:$0xff] %vm45_vm0, %v1317_v0  ;;  %v1315_v41 = vpop.permute.xlu0 %1314  ;;  %v11940_v14 = vld [vmem:[#allocation3 + $0x54] sm:$0xff]  ;;  %v3269_v44 = vmul.f32 %v11705_v43, %v1378_v16 }
 0x211   :  { %v11929_v55 = vld [vmem:[#allocation3 + $0x63] sm:$0xff]  ;;  %v1504_v38 = vmul.f32 %v11404_v27, %v11915_v58  ;;  %1355 = vst.msk [vmem:[#allocation3 + $0x144] sm:$0xff] %vm45_vm0, %v1315_v41  ;;  %v1555_v0 = vmul.f32 %v11410_v34, %v11919_v11  ;;  %v11954_v7 = vmul.f32 %v11708_v24, %v11849_v59  ;;  %v11958_v61 = vld [vmem:[#allocation3 + $0x55] sm:$0xff] }
 0x212   :  { %v11933_v5 = vld [vmem:[#allocation3 + $0x46] sm:$0xff]  ;;  %v1468_v9 = vadd.f32 %v1452_v35, %v1400_v10  ;;  %v1519_v37 = vadd.f32 %v1503_v40, %v1467_v19  ;;  %v1622_v10 = vadd.f32 %v1606_v12, %v1570_v53  ;;  %v1556_v17 = vmul.f32 %v11410_v34, %v11929_v55  ;;  %v11973_v28 = vld [vmem:[#allocation3 + $0x56] sm:$0xff] }
 0x213   :  { %v11935_v20 = vld [vmem:[#allocation3 + $0x47] sm:$0xff]  ;;  %v1710_v16 = vmul.f32 %v11428_v31, %v11933_v5  ;;  %v1307_v40 = vpop.permute.xlu1 %1306  ;;  %v1607_v53 = vmul.f32 %v11416_v57, %v11940_v14 }
 0x214   :  { %v11950_v32 = vld [vmem:[#allocation3 + $0x64] sm:$0xff]  ;;  %v1520_v35 = vadd.f32 %v1504_v38, %v1468_v9  ;;  %v1762_v19 = vmul.f32 %v11440_v51, %v11935_v20  ;;  %v1571_v41 = vadd.f32 %v1555_v0, %v1519_v37  ;;  %v1674_v59 = vadd.f32 %v1658_v15, %v1622_v10  ;;  %1351 = vst.msk [vmem:[#allocation3 + $0x84] sm:$0xff] %vm45_vm0, %v1307_v40  ;;  %v1319_v38 = vpop.permute.xlu0 %1318 }
 0x215   :  { %v11966_v12 = vld [vmem:[#allocation3 + $0x65] sm:$0xff]  ;;  %v1814_v9 = vmul.f32 %v11454_v8, %v11944_v21  ;;  %v1608_v43 = vmul.f32 %v11416_v57, %v11950_v32  ;;  %v11978_v37 = vadd.f32 %v3269_v44, %v11723_v52  ;;  %v11982_v15 = vmul.f32 %v11711_v50, %v11851_v56  ;;  %1357 = vst.msk [vmem:[#allocation3 + $0x164] sm:$0xff] %vm45_vm0, %v1319_v38  ;;  %v11991_v57 = vld [vmem:[#allocation3 + $0x58] sm:$0xff] }
 0x216   :  { %v1572_v24 = vadd.f32 %v1556_v17, %v1520_v35  ;;  %v11975_v34 = vld [vmem:[#allocation3 + $0x66] sm:$0xff]  ;;  %v1623_v0 = vadd.f32 %v1607_v53, %v1571_v41  ;;  %v1659_v17 = vmul.f32 %v11422_v6, %v11958_v61  ;;  %v1726_v10 = vadd.f32 %v1710_v16, %v1674_v59  ;;  %v11987_v35 = vld [vmem:[#allocation3 + $0x57] sm:$0xff] }
 0x217   :  { %v11989_v40 = vld [vmem:[#allocation3 + $0x67] sm:$0xff]  ;;  %v11995_v52 = vmul.f32 %v11715_v18, %v11870_v36  ;;  %v1660_v56 = vmul.f32 %v11422_v6, %v11966_v12  ;;  %v1867_v41 = vmul.f32 %v11463_v49, %v11888_v22  ;;  %v12005_v16 = vmul.f32 %v11718_v30, %v11878_v45  ;;  %v12027_v30 = vld [vmem:[#allocation3 + $0x72] sm:$0xff] }
 0x218   :  { %v1624_v44 = vadd.f32 %v1608_v43, %v1572_v24  ;;  %v11999_v38 = vld [vmem:[#allocation3 + $0x68] sm:$0xff]  ;;  %v1675_v53 = vadd.f32 %v1659_v17, %v1623_v0  ;;  %v1711_v59 = vmul.f32 %v11428_v31, %v11973_v28  ;;  %v1712_v36 = vmul.f32 %v11428_v31, %v11975_v34  ;;  %v12011_v24 = vld [vmem:[#allocation3 + $0x70] sm:$0xff]  ;;  %v1323_v18 = vpop.permute.xlu1 %1322  ;;  %v1321_v50 = vpop.permute.xlu0 %1320 }
 0x219   :  { %v1778_v43 = vadd.f32 %v1762_v19, %v1726_v10  ;;  %v1763_v27 = vmul.f32 %v11440_v51, %v11987_v35  ;;  %v1764_v45 = vmul.f32 %v11440_v51, %v11989_v40  ;;  %v1815_v0 = vmul.f32 %v11454_v8, %v11991_v57  ;;  %v12019_v17 = vld [vmem:[#allocation3 + $0x71] sm:$0xff]  ;;  %1359 = vst.msk [vmem:[#allocation3 + $0x184] sm:$0xff] %vm45_vm0, %v1323_v18 }
 0x21a   :  { %v1676_v6 = vadd.f32 %v1660_v56, %v1624_v44  ;;  %1358 = vst.msk [vmem:[#allocation3 + $0x174] sm:$0xff] %vm45_vm0, %v1321_v50  ;;  %v1727_v19 = vadd.f32 %v1711_v59, %v1675_v53  ;;  %v1816_v10 = vmul.f32 %v11454_v8, %v11999_v38  ;;  %v1868_v56 = vmul.f32 %v11463_v49, %v11890_v3 }
 0x21b   :  { %v1830_v44 = vadd.f32 %v1814_v9, %v1778_v43  ;;  %v1869_v31 = vmul.f32 %v11463_v49, %v12011_v24  ;;  %v1919_v22 = vmul.f32 %v11476_v23, %v11892_v13  ;;  %v1920_v50 = vmul.f32 %v11476_v23, %v11909_v39 }
 0x21c   :  { %v1728_v51 = vadd.f32 %v1712_v36, %v1676_v6  ;;  %v1779_v18 = vadd.f32 %v1763_v27, %v1727_v19  ;;  %v1921_v9 = vmul.f32 %v11476_v23, %v12019_v17  ;;  %v1971_v59 = vmul.f32 %v11490_v63, %v11913_v48  ;;  %v1325_v43 = vpop.permute.xlu1 %1324  ;;  %v1309_v8 = vpop.permute.xlu0 %1308 }
 0x21d   :  { %v1883_v53 = vadd.f32 %v1867_v41, %v1830_v44  ;;  %v1972_v36 = vmul.f32 %v11490_v63, %v11915_v58  ;;  %v1973_v49 = vmul.f32 %v11490_v63, %v12027_v30  ;;  %v2023_v13 = vmul.f32 %v11500_v46, %v11919_v11  ;;  %1360 = vst.msk [vmem:[#allocation3 + $0x194] sm:$0xff] %vm45_vm0, %v1325_v43 }
 0x21e   :  { %v1780_v6 = vadd.f32 %v1764_v45, %v1728_v51  ;;  %1352 = vst.msk [vmem:[#allocation3 + $0x94] sm:$0xff] %vm45_vm0, %v1309_v8  ;;  %v1831_v27 = vadd.f32 %v1815_v0, %v1779_v18  ;;  %v2024_v19 = vmul.f32 %v11500_v46, %v11929_v55  ;;  %v2075_v51 = vmul.f32 %v11509_v1, %v11940_v14 }
 0x21f   :  { %v1935_v41 = vadd.f32 %v1919_v22, %v1883_v53  ;;  %v2076_v44 = vmul.f32 %v11509_v1, %v11950_v32  ;;  %v2127_v63 = vmul.f32 %v11520_v54, %v11958_v61  ;;  %v2128_v43 = vmul.f32 %v11520_v54, %v11966_v12 }
 0x220   :  { %v1832_v45 = vadd.f32 %v1816_v10, %v1780_v6  ;;  %v1884_v23 = vadd.f32 %v1868_v56, %v1831_v27  ;;  %v2179_v22 = vmul.f32 %v11530_v26, %v11973_v28  ;;  %v2180_v0 = vmul.f32 %v11530_v26, %v11975_v34  ;;  %v1327_v18 = vpop.permute.xlu1 %1326  ;;  %v1311_v53 = vpop.permute.xlu0 %1310 }
 0x221   :  { %v1987_v8 = vadd.f32 %v1971_v59, %v1935_v41  ;;  %v2231_v6 = vmul.f32 %v11546_v4, %v11987_v35  ;;  %v2232_v1 = vmul.f32 %v11546_v4, %v11989_v40  ;;  %v2283_v54 = vmul.f32 %v11554_v42, %v11991_v57  ;;  %1361 = vst.msk [vmem:[#allocation3 + $0x1a4] sm:$0xff] %vm45_vm0, %v1327_v18  ;;  %v18254_v18 = vld [vmem:[#allocation23_spill] sm:$0xff] }
 0x222   :  { %v1885_v10 = vadd.f32 %v1869_v31, %v1832_v45  ;;  %1353 = vst.msk [vmem:[#allocation3 + $0xa4] sm:$0xff] %vm45_vm0, %v1311_v53  ;;  %v1936_v56 = vadd.f32 %v1920_v50, %v1884_v23  ;;  %v2284_v27 = vmul.f32 %v11554_v42, %v11999_v38  ;;  %v3337_v31 = vadd.f32 %v11954_v7, %v11978_v37 }
 0x223   :  { %v2039_v59 = vadd.f32 %v2023_v13, %v1987_v8  ;;  %v2336_v45 = vmul.f32 %v11562_v2, %v11890_v3  ;;  %v12077_v4 = vmul.f32 %v11562_v2, %v12011_v24  ;;  %v2388_v26 = vmul.f32 %v18254_v18, %v11909_v39  ;;  %v18255_v8 = vld [vmem:[#allocation24_spill] sm:$0xff] }
 0x224   :  { %v1937_v41 = vadd.f32 %v1921_v9, %v1885_v10  ;;  %v1988_v53 = vadd.f32 %v1972_v36, %v1936_v56  ;;  %v12083_v13 = vmul.f32 %v18254_v18, %v12019_v17  ;;  %v3389_v50 = vadd.f32 %v11982_v15, %v3337_v31  ;;  %v1329_v7 = vpop.permute.xlu1 %1328  ;;  %v1313_v37 = vpop.permute.xlu0 %1312  ;;  %v18256_v36 = vld [vmem:[#allocation25_spill] sm:$0xff] }
 0x225   :  { %v2091_v23 = vadd.f32 %v2075_v51, %v2039_v59  ;;  %v2440_v10 = vmul.f32 %v18255_v8, %v11915_v58  ;;  %v12092_v2 = vmul.f32 %v18255_v8, %v12027_v30  ;;  %v12096_v51 = vmul.f32 %v18256_v36, %v11929_v55  ;;  %1362 = vst.msk [vmem:[#allocation3 + $0x1b4] sm:$0xff] %vm45_vm0, %v1329_v7 }
 0x226   :  { %v12086_v9 = vadd.f32 %v1973_v49, %v1937_v41  ;;  %1354 = vst.msk [vmem:[#allocation3 + $0xb4] sm:$0xff] %vm45_vm0, %v1313_v37  ;;  %v2040_v15 = vadd.f32 %v2024_v19, %v1988_v53  ;;  %v12102_v49 = vmul.f32 %v11588_v25, %v11950_v32  ;;  %v3441_v59 = vadd.f32 %v11995_v52, %v3389_v50  ;;  %v18258_v37 = vld [vmem:[#allocation31_spill] sm:$0xff] }
 0x227   :  { %v2143_v56 = vadd.f32 %v2127_v63, %v2091_v23  ;;  %v12107_v31 = vmul.f32 %v11594_v62, %v11966_v12  ;;  %v12111_v41 = vmul.f32 %v11605_v47, %v11975_v34  ;;  %v12115_v7 = vmul.f32 %v11613_v33, %v11989_v40  ;;  %v18257_v23 = vld [vmem:[#allocation45_spill] sm:$0xff]  ;;  %v18259_v47 = vld [vmem:[#allocation46_spill] sm:$0xff]  ;;  %v18260_v33 = vld [vmem:[#allocation47_spill] sm:$0xff] }
 0x228   :  { %v12119_v63 = vmul.f32 %v11620_v29, %v11999_v38  ;;  %v2092_v19 = vadd.f32 %v2076_v44, %v2040_v15  ;;  %v3493_v52 = vadd.f32 %v12005_v16, %v3441_v59  ;;  %v3529_v50 = vmul.f32 %v18257_v23, %v11880_v60  ;;  %v18261_v29 = vld [vmem:[#allocation48_spill] sm:$0xff]  ;;  %v18262_v16 = vld [vmem:[#allocation82_spill] sm:$0xff]  ;;  %v18264_v60 = vld [vmem:[#allocation83_spill] sm:$0xff] }
 0x229   :  { %v2195_v53 = vadd.f32 %v2179_v22, %v2143_v56  ;;  %v12126_v8 = vmul.f32 %v18258_v37, %v12011_v24  ;;  %v3581_v62 = vmul.f32 %v18259_v47, %v11933_v5  ;;  %v3633_v18 = vmul.f32 %v18260_v33, %v11935_v20  ;;  %v18263_v56 = vld [vmem:[#allocation49_spill] sm:$0xff]  ;;  %v18265_v23 = vld [vmem:[#allocation50_spill] sm:$0xff]  ;;  %v18266_v37 = vld [vmem:[#allocation51_spill] sm:$0xff] }
 0x22a   :  { %v3685_v25 = vmul.f32 %v18261_v29, %v11944_v21  ;;  %v2144_v44 = vadd.f32 %v2128_v43, %v2092_v19  ;;  %v3545_v15 = vadd.f32 %v3529_v50, %v3493_v52  ;;  %v3738_v59 = vmul.f32 %v18263_v56, %v18262_v16  ;;  %v18267_v5 = vld [vmem:[#allocation52_spill] sm:$0xff]  ;;  %v18268_v20 = vld [vmem:[#allocation53_spill] sm:$0xff]  ;;  %v18269_v19 = vld [vmem:[#allocation54_spill] sm:$0xff] }
 0x22b   :  { %v2247_v22 = vadd.f32 %v2231_v6, %v2195_v53  ;;  %v3790_v42 = vmul.f32 %v18265_v23, %v18264_v60  ;;  %v3842_v36 = vmul.f32 %v18266_v37, %v11913_v48  ;;  %v3894_v47 = vmul.f32 %v18267_v5, %v11919_v11  ;;  %v18270_v52 = vld [vmem:[#allocation55_spill] sm:$0xff]  ;;  %v18271_v48 = vld [vmem:[#allocation56_spill] sm:$0xff]  ;;  %v18272_v11 = vld [vmem:[#allocation57_spill] sm:$0xff] }
 0x22c   :  { %v12144_v33 = vmul.f32 %v18268_v20, %v11940_v14  ;;  %v2196_v21 = vadd.f32 %v2180_v0, %v2144_v44  ;;  %v3597_v6 = vadd.f32 %v3581_v62, %v3545_v15  ;;  %v12148_v53 = vmul.f32 %v18269_v19, %v11958_v61  ;;  %v18273_v14 = vld [vmem:[#allocation58_spill] sm:$0xff]  ;;  %v18274_v44 = vld [vmem:[#allocation59_spill] sm:$0xff]  ;;  %v12265_v20 = vld [vmem:[#allocation3 + $0x84] sm:$0xff] }
 0x22d   :  { %v2299_v43 = vadd.f32 %v2283_v54, %v2247_v22  ;;  %v12152_v50 = vmul.f32 %v18270_v52, %v11973_v28  ;;  %v12156_v16 = vmul.f32 %v18271_v48, %v11987_v35  ;;  %v12160_v60 = vmul.f32 %v18272_v11, %v11991_v57  ;;  %v18275_v28 = vld [vmem:[#allocation60_spill] sm:$0xff]  ;;  %v18276_v35 = vld [vmem:[#allocation61_spill] sm:$0xff]  ;;  %v18277_v57 = vld [vmem:[#allocation62_spill] sm:$0xff] }
 0x22e   :  { %v12164_v54 = vmul.f32 %v18273_v14, %v11890_v3  ;;  %v2248_v62 = vadd.f32 %v2232_v1, %v2196_v21  ;;  %v3649_v61 = vadd.f32 %v3633_v18, %v3597_v6  ;;  %v12168_v22 = vmul.f32 %v18274_v44, %v11909_v39  ;;  %v18278_v1 = vld [vmem:[#allocation63_spill] sm:$0xff]  ;;  %v18279_v21 = vld [vmem:[#allocation64_spill] sm:$0xff]  ;;  %v18295_v52 = vld [vmem:[#allocation74_spill] sm:$0xff] }
 0x22f   :  { %v2352_v0 = vadd.f32 %v2336_v45, %v2299_v43  ;;  %v12172_v15 = vmul.f32 %v18275_v28, %v11915_v58  ;;  %v12176_v48 = vmul.f32 %v18276_v35, %v11929_v55  ;;  %v12180_v11 = vmul.f32 %v18277_v57, %v11950_v32  ;;  %v12190_v58 = vld [vmem:[#allocation3 + $0x73] sm:$0xff]  ;;  %v18282_v55 = vld [vmem:[#allocation65_spill] sm:$0xff]  ;;  %v12241_v14 = vld [vmem:[#allocation3 + $0x80] sm:$0xff] }
 0x230   :  { %v12184_v3 = vmul.f32 %v18278_v1, %v11966_v12  ;;  %v2300_v45 = vadd.f32 %v2284_v27, %v2248_v62  ;;  %v3701_v39 = vadd.f32 %v3685_v25, %v3649_v61  ;;  %v12188_v43 = vmul.f32 %v18279_v21, %v11975_v34  ;;  %18280 = vst [vmem:[#allocation82_spill] sm:$0xff] %v12190_v58  ;;  %v12192_v6 = vld [vmem:[#allocation3 + $0x74] sm:$0xff]  ;;  %v18285_v25 = vld [vmem:[#allocation68_spill] sm:$0xff] }
 0x231   :  { %v2404_v18 = vadd.f32 %v2388_v26, %v2352_v0  ;;  %18281 = vst [vmem:[#allocation83_spill] sm:$0xff] %v12192_v6  ;;  %v12196_v35 = vmul.f32 %v18282_v55, %v11989_v40  ;;  %v18283_v32 = vld [vmem:[#allocation66_spill] sm:$0xff]  ;;  %v18284_v12 = vld [vmem:[#allocation67_spill] sm:$0xff]  ;;  %v12208_v34 = vmul.f32 %v18285_v25, %v12019_v17  ;;  %v18287_v40 = vld [vmem:[#allocation69_spill] sm:$0xff] }
 0x232   :  { %v12200_v57 = vmul.f32 %v18283_v32, %v11999_v38  ;;  %v12204_v26 = vmul.f32 %v18284_v12, %v12011_v24  ;;  %v12210_v27 = vld [vmem:[#allocation3 + $0x75] sm:$0xff]  ;;  %v2353_v62 = vadd.f32 %v12077_v4, %v2300_v45  ;;  %v3754_v61 = vadd.f32 %v3738_v59, %v3701_v39  ;;  %v18291_v25 = vld [vmem:[#allocation72_spill] sm:$0xff]  ;;  %v18293_v59 = vld [vmem:[#allocation5_spill] sm:$0xff] }
 0x233   :  { %18286 = vst [vmem:[#allocation90_spill] sm:$0xff] %v12210_v27  ;;  %v2456_v0 = vadd.f32 %v2440_v10, %v2404_v18  ;;  %v12215_v55 = vmul.f32 %v18287_v40, %v12027_v30  ;;  %v12217_v38 = vld [vmem:[#allocation3 + $0x76] sm:$0xff]  ;;  %v12227_v1 = vmul.f32 %v18291_v25, %v12192_v6  ;;  %v18292_v4 = vld [vmem:[#allocation4_spill] sm:$0xff]  ;;  %v1453_v45 = vmul.f32 %v12019_v17, %v18293_v59 }
 0x234   :  { %18288 = vst [vmem:[#allocation91_spill] sm:$0xff] %v12217_v38  ;;  %v12219_v32 = vld [vmem:[#allocation3 + $0x77] sm:$0xff]  ;;  %v1401_v10 = vmul.f32 %v12011_v24, %v18292_v4  ;;  %v2405_v18 = vadd.f32 %v12083_v13, %v2353_v62  ;;  %v3806_v40 = vadd.f32 %v3790_v42, %v3754_v61  ;;  %v12243_v25 = vld [vmem:[#allocation3 + $0x81] sm:$0xff]  ;;  %v12247_v19 = vmul.f32 %v18295_v52, %v12217_v38 }
 0x235   :  { %18289 = vst [vmem:[#allocation92_spill] sm:$0xff] %v12219_v32  ;;  %v18290_v12 = vld [vmem:[#allocation70_spill] sm:$0xff]  ;;  %v12229_v28 = vld [vmem:[#allocation3 + $0x78] sm:$0xff]  ;;  %v2508_v39 = vadd.f32 %v12096_v51, %v2456_v0  ;;  %v12253_v13 = vld [vmem:[#allocation3 + $0x82] sm:$0xff] }
 0x236   :  { %v12223_v21 = vmul.f32 %v18290_v12, %v12190_v58  ;;  %v18294_v12 = vld [vmem:[#allocation73_spill] sm:$0xff]  ;;  %18296 = vst [vmem:[#allocation93_spill] sm:$0xff] %v12247_v19  ;;  %v18297_v24 = vld [vmem:[#allocation75_spill] sm:$0xff]  ;;  %v1469_v51 = vadd.f32 %v1453_v45, %v1401_v10  ;;  %v18299_v42 = vld [vmem:[#allocation6_spill] sm:$0xff]  ;;  %v2457_v0 = vadd.f32 %v12092_v2, %v2405_v18  ;;  %v3858_v59 = vadd.f32 %v3842_v36, %v3806_v40 }
 0x237   :  { %v12239_v44 = vmul.f32 %v18294_v12, %v12210_v27  ;;  %v12251_v17 = vmul.f32 %v18297_v24, %v12219_v32  ;;  %v1505_v62 = vmul.f32 %v12027_v30, %v18299_v42  ;;  %v2560_v61 = vadd.f32 %v12102_v49, %v2508_v39  ;;  %v18300_v4 = vld [vmem:[#allocation76_spill] sm:$0xff]  ;;  %v18302_v24 = vld [vmem:[#allocation77_spill] sm:$0xff]  ;;  %v18304_v10 = vld [vmem:[#allocation78_spill] sm:$0xff] }
 0x238   :  { %v12261_v12 = vmul.f32 %v18300_v4, %v12229_v28  ;;  %v12263_v52 = vld [vmem:[#allocation3 + $0x83] sm:$0xff]  ;;  %v12269_v5 = vmul.f32 %v18302_v24, %v12241_v14  ;;  %v12273_v30 = vmul.f32 %v18304_v10, %v12243_v25  ;;  %v18306_v45 = vld [vmem:[#allocation7_spill] sm:$0xff]  ;;  %v3910_v40 = vadd.f32 %v3894_v47, %v3858_v59  ;;  %v18316_v56 = vld [vmem:[#allocation10_spill] sm:$0xff] }
 0x239   :  { %18298 = vst [vmem:[#allocation94_spill] sm:$0xff] %v12251_v17  ;;  %v1521_v2 = vadd.f32 %v1505_v62, %v1469_v51  ;;  %v1557_v36 = vmul.f32 %v12190_v58, %v18306_v45  ;;  %v2612_v49 = vadd.f32 %v12107_v31, %v2560_v61  ;;  %v18307_v18 = vld [vmem:[#allocation79_spill] sm:$0xff]  ;;  %v2025_v42 = vmul.f32 %v12190_v58, %v11500_v46  ;;  %v18309_v24 = vld [vmem:[#allocation80_spill] sm:$0xff]  ;;  %v18311_v10 = vld [vmem:[#allocation81_spill] sm:$0xff] }
 0x23a   :  { %18301 = vst [vmem:[#allocation95_spill] sm:$0xff] %v12261_v12  ;;  %18303 = vst [vmem:[#allocation96_spill] sm:$0xff] %v12269_v5  ;;  %v12280_v39 = vmul.f32 %v18307_v18, %v12253_v13  ;;  %v12286_v4 = vmul.f32 %v18309_v24, %v12263_v52  ;;  %v12290_v51 = vmul.f32 %v18311_v10, %v12265_v20  ;;  %v18313_v45 = vld [vmem:[#allocation8_spill] sm:$0xff]  ;;  %v18314_v18 = vld [vmem:[#allocation17_spill] sm:$0xff] }
 0x23b   :  { %18305 = vst [vmem:[#allocation97_spill] sm:$0xff] %v12273_v30  ;;  %v1573_v62 = vadd.f32 %v1557_v36, %v1521_v2  ;;  %v1609_v31 = vmul.f32 %v12192_v6, %v18313_v45  ;;  %v2664_v47 = vadd.f32 %v12111_v41, %v2612_v49  ;;  %v3962_v59 = vadd.f32 %v12144_v33, %v3910_v40  ;;  %v18315_v24 = vld [vmem:[#allocation9_spill] sm:$0xff]  ;;  %v18317_v2 = vld [vmem:[#allocation11_spill] sm:$0xff]  ;;  %v18318_v49 = vld [vmem:[#allocation18_spill] sm:$0xff] }
 0x23c   :  { %18308 = vst [vmem:[#allocation98_spill] sm:$0xff] %v12280_v39  ;;  %18310 = vst [vmem:[#allocation99_spill] sm:$0xff] %v12286_v4  ;;  %v2041_v61 = vadd.f32 %v2025_v42, %v12086_v9  ;;  %v2077_v37 = vmul.f32 %v12192_v6, %v18314_v18  ;;  %v1661_v4 = vmul.f32 %v12210_v27, %v18315_v24  ;;  %v18319_v40 = vld [vmem:[#allocation12_spill] sm:$0xff]  ;;  %v18328_v29 = vld [vmem:[#allocation26_spill] sm:$0xff] }
 0x23d   :  { %18312 = vst [vmem:[#allocation100_spill] sm:$0xff] %v12290_v51  ;;  %v1625_v23 = vadd.f32 %v1609_v31, %v1573_v62  ;;  %v1713_v10 = vmul.f32 %v12217_v38, %v18316_v56  ;;  %v1765_v36 = vmul.f32 %v12219_v32, %v18317_v2  ;;  %v2716_v45 = vadd.f32 %v12115_v7, %v2664_v47  ;;  %v18320_v31 = vld [vmem:[#allocation13_spill] sm:$0xff]  ;;  %v18321_v51 = vld [vmem:[#allocation14_spill] sm:$0xff] }
 0x23e   :  { %v4014_v41 = vadd.f32 %v12148_v53, %v3962_v59  ;;  %v2093_v33 = vadd.f32 %v2077_v37, %v2041_v61  ;;  %v2129_v9 = vmul.f32 %v12210_v27, %v18318_v49  ;;  %v1817_v62 = vmul.f32 %v12229_v28, %v18319_v40  ;;  %v12317_v47 = vld [vmem:[#allocation3 + $0x85] sm:$0xff]  ;;  %v18322_v59 = vld [vmem:[#allocation19_spill] sm:$0xff] }
 0x23f   :  { %v1677_v42 = vadd.f32 %v1661_v4, %v1625_v23  ;;  %v1870_v24 = vmul.f32 %v12241_v14, %v18320_v31  ;;  %v1922_v56 = vmul.f32 %v12243_v25, %v18321_v51  ;;  %v2768_v2 = vadd.f32 %v12119_v63, %v2716_v45  ;;  %v12319_v37 = vld [vmem:[#allocation3 + $0x86] sm:$0xff]  ;;  %v18323_v40 = vld [vmem:[#allocation15_spill] sm:$0xff] }
 0x240   :  { %v4066_v7 = vadd.f32 %v12152_v50, %v4014_v41  ;;  %v2145_v53 = vadd.f32 %v2129_v9, %v2093_v33  ;;  %v2181_v23 = vmul.f32 %v12217_v38, %v18322_v59  ;;  %v12323_v4 = vld [vmem:[#allocation3 + $0x87] sm:$0xff]  ;;  %v1974_v31 = vmul.f32 %v12253_v13, %v18323_v40  ;;  %v12394_v5 = vld [vmem:[#allocation3 + $0x94] sm:$0xff] }
 0x241   :  { %v1729_v61 = vadd.f32 %v1713_v10, %v1677_v42  ;;  %v2026_v51 = vmul.f32 %v12263_v52, %v11500_v46  ;;  %v12331_v63 = vmul.f32 %v12265_v20, %v18314_v18  ;;  %v12334_v50 = vadd.f32 %v12126_v8, %v2768_v2  ;;  %v12337_v41 = vld [vmem:[#allocation3 + $0x88] sm:$0xff]  ;;  %v18325_v9 = vld [vmem:[#allocation20_spill] sm:$0xff]  ;;  %v12349_v46 = vld [vmem:[#allocation3 + $0x90] sm:$0xff] }
 0x242   :  { %v4118_v45 = vadd.f32 %v12156_v16, %v4066_v7  ;;  %v2197_v33 = vadd.f32 %v2181_v23, %v2145_v53  ;;  %v2233_v10 = vmul.f32 %v12219_v32, %v18325_v9  ;;  %v12343_v40 = vmul.f32 %v12317_v47, %v18318_v49  ;;  %v18326_v8 = vld [vmem:[#allocation25_spill] sm:$0xff] }
 0x243   :  { %18324 = vst [vmem:[#allocation101_spill] sm:$0xff] %v12334_v50  ;;  %v1781_v42 = vadd.f32 %v1765_v36, %v1729_v61  ;;  %v12347_v18 = vmul.f32 %v12319_v37, %v18322_v59  ;;  %v2493_v16 = vmul.f32 %v12190_v58, %v18326_v8  ;;  %v12356_v7 = vmul.f32 %v12323_v4, %v18325_v9  ;;  %v18327_v53 = vld [vmem:[#allocation21_spill] sm:$0xff]  ;;  %v12364_v59 = vld [vmem:[#allocation3 + $0x91] sm:$0xff] }
 0x244   :  { %v4170_v2 = vadd.f32 %v12160_v60, %v4118_v45  ;;  %v2249_v36 = vadd.f32 %v2233_v10, %v2197_v33  ;;  %v2285_v23 = vmul.f32 %v12229_v28, %v18327_v53  ;;  %v12362_v50 = vmul.f32 %v12337_v41, %v18327_v53  ;;  %v18329_v9 = vld [vmem:[#allocation22_spill] sm:$0xff]  ;;  %v18330_v53 = vld [vmem:[#allocation23_spill] sm:$0xff]  ;;  %v12426_v17 = vld [vmem:[#allocation3 + $0x42] sm:$0xff] }
 0x245   :  { %v1833_v61 = vadd.f32 %v1817_v62, %v1781_v42  ;;  %v2509_v49 = vadd.f32 %v2493_v16, %v2457_v0  ;;  %v2545_v58 = vmul.f32 %v12192_v6, %v18328_v29  ;;  %v2338_v33 = vmul.f32 %v12241_v14, %v18329_v9  ;;  %v12375_v62 = vld [vmem:[#allocation3 + $0x92] sm:$0xff] }
 0x246   :  { %v4223_v60 = vadd.f32 %v12164_v54, %v4170_v2  ;;  %v2301_v45 = vadd.f32 %v2285_v23, %v2249_v36  ;;  %v12373_v10 = vmul.f32 %v18329_v9, %v12349_v46  ;;  %v2390_v39 = vmul.f32 %v12243_v25, %v18330_v53  ;;  %v12379_v0 = vld [vmem:[#allocation3 + $0x93] sm:$0xff]  ;;  %v18332_v9 = vld [vmem:[#allocation24_spill] sm:$0xff] }
 0x247   :  { %v1886_v42 = vadd.f32 %v1870_v24, %v1833_v61  ;;  %v2561_v16 = vadd.f32 %v2545_v58, %v2509_v49  ;;  %v18331_v6 = vld [vmem:[#allocation27_spill] sm:$0xff]  ;;  %v12386_v23 = vmul.f32 %v18330_v53, %v12364_v59  ;;  %v2442_v30 = vmul.f32 %v12253_v13, %v18332_v9  ;;  %v18333_v49 = vld [vmem:[#allocation28_spill] sm:$0xff] }
 0x248   :  { %v2597_v54 = vmul.f32 %v12210_v27, %v18331_v6  ;;  %v4275_v2 = vadd.f32 %v12168_v22, %v4223_v60  ;;  %v2354_v36 = vadd.f32 %v2338_v33, %v2301_v45  ;;  %v12392_v61 = vmul.f32 %v18332_v9, %v12375_v62  ;;  %v12398_v22 = vld [vmem:[#allocation3 + $0x40] sm:$0xff] }
 0x249   :  { %v1938_v24 = vadd.f32 %v1922_v56, %v1886_v42  ;;  %v2649_v27 = vmul.f32 %v12217_v38, %v18333_v49  ;;  %18334 = vst [vmem:[#allocation102_spill] sm:$0xff] %v12398_v22  ;;  %v2494_v33 = vmul.f32 %v12263_v52, %v18326_v8  ;;  %v12405_v56 = vmul.f32 %v18326_v8, %v12379_v0  ;;  %v12411_v38 = vld [vmem:[#allocation3 + $0x41] sm:$0xff] }
 0x24a   :  { %v2613_v58 = vadd.f32 %v2597_v54, %v2561_v16  ;;  %v4327_v60 = vadd.f32 %v12172_v15, %v4275_v2  ;;  %v2406_v45 = vadd.f32 %v2390_v39, %v2354_v36  ;;  %v2546_v9 = vmul.f32 %v12265_v20, %v18328_v29  ;;  %v18335_v54 = vld [vmem:[#allocation29_spill] sm:$0xff]  ;;  %18336 = vst [vmem:[#allocation103_spill] sm:$0xff] %v12411_v38  ;;  %v12418_v36 = vld [vmem:[#allocation3 + $0x95] sm:$0xff] }
 0x24b   :  { %v1990_v42 = vadd.f32 %v1974_v31, %v1938_v24  ;;  %v2701_v53 = vmul.f32 %v12219_v32, %v18335_v54  ;;  %v12416_v2 = vmul.f32 %v18328_v29, %v12394_v5  ;;  %v18337_v31 = vld [vmem:[#allocation31_spill] sm:$0xff]  ;;  %v18338_v32 = vld [vmem:[#allocation30_spill] sm:$0xff]  ;;  %v18340_v29 = vld [vmem:[#allocation32_spill] sm:$0xff] }
 0x24c   :  { %v2665_v16 = vadd.f32 %v2649_v27, %v2613_v58  ;;  %v4379_v15 = vadd.f32 %v12176_v48, %v4327_v60  ;;  %v2458_v39 = vadd.f32 %v2442_v30, %v2406_v45  ;;  %v2802_v24 = vmul.f32 %v18337_v31, %v12398_v22  ;;  %v18339_v60 = vld [vmem:[#allocation87_spill] sm:$0xff] }
 0x24d   :  { %v2042_v8 = vadd.f32 %v2026_v51, %v1990_v42  ;;  %v2598_v27 = vmul.f32 %v12317_v47, %v18331_v6  ;;  %v2753_v12 = vmul.f32 %v12229_v28, %v18338_v32  ;;  %v2854_v19 = vmul.f32 %v18340_v29, %v12411_v38 }
 0x24e   :  { %v2717_v58 = vadd.f32 %v2701_v53, %v2665_v16  ;;  %v4431_v48 = vadd.f32 %v12180_v11, %v4379_v15  ;;  %v2510_v30 = vadd.f32 %v2494_v33, %v2458_v39  ;;  %v2818_v45 = vadd.f32 %v2802_v24, %v18339_v60  ;;  %v12439_v16 = vld [vmem:[#allocation3 + $0x43] sm:$0xff] }
 0x24f   :  { %v2094_v22 = vadd.f32 %v12331_v63, %v2042_v8  ;;  %v12435_v51 = vmul.f32 %v18331_v6, %v12418_v36  ;;  %v2806_v42 = vmul.f32 %v12241_v14, %v18337_v31  ;;  %v18341_v39 = vld [vmem:[#allocation33_spill] sm:$0xff]  ;;  %v2650_v63 = vmul.f32 %v12319_v37, %v18333_v49 }
 0x250   :  { %v2769_v53 = vadd.f32 %v2753_v12, %v2717_v58  ;;  %v4483_v11 = vadd.f32 %v12184_v3, %v4431_v48  ;;  %v2562_v33 = vadd.f32 %v2546_v9, %v2510_v30  ;;  %v2870_v15 = vadd.f32 %v2854_v19, %v2818_v45  ;;  %v12449_v58 = vld [vmem:[#allocation3 + $0x44] sm:$0xff]  ;;  %v18342_v19 = vld [vmem:[#allocation34_spill] sm:$0xff] }
 0x251   :  { %v2906_v24 = vmul.f32 %v18341_v39, %v12426_v17  ;;  %v2146_v60 = vadd.f32 %v12343_v40, %v2094_v22  ;;  %v2858_v12 = vmul.f32 %v12243_v25, %v18340_v29  ;;  %v2958_v9 = vmul.f32 %v18342_v19, %v12439_v16  ;;  %v12459_v45 = vld [vmem:[#allocation3 + $0x45] sm:$0xff] }
 0x252   :  { %v2822_v8 = vadd.f32 %v2806_v42, %v2769_v53  ;;  %v4535_v6 = vadd.f32 %v12188_v43, %v4483_v11  ;;  %v2614_v38 = vadd.f32 %v2598_v27, %v2562_v33  ;;  %v2702_v40 = vmul.f32 %v12323_v4, %v18335_v54  ;;  %v18343_v27 = vld [vmem:[#allocation35_spill] sm:$0xff] }
 0x253   :  { %v2922_v3 = vadd.f32 %v2906_v24, %v2870_v15  ;;  %v2198_v48 = vadd.f32 %v12347_v18, %v2146_v60  ;;  %v2910_v30 = vmul.f32 %v12253_v13, %v18341_v39  ;;  %v3010_v11 = vmul.f32 %v18343_v27, %v12449_v58  ;;  %v12469_v60 = vld [vmem:[#allocation3 + $0x46] sm:$0xff] }
 0x254   :  { %v2874_v22 = vadd.f32 %v2858_v12, %v2822_v8  ;;  %v4587_v53 = vadd.f32 %v12196_v35, %v4535_v6  ;;  %v2666_v42 = vadd.f32 %v2650_v63, %v2614_v38  ;;  %v2754_v18 = vmul.f32 %v12337_v41, %v18338_v32  ;;  %18344 = vst [vmem:[#allocation87_spill] sm:$0xff] %v12469_v60  ;;  %v18345_v6 = vld [vmem:[#allocation36_spill] sm:$0xff] }
 0x255   :  { %v2974_v43 = vadd.f32 %v2958_v9, %v2922_v3  ;;  %v2250_v33 = vadd.f32 %v12356_v7, %v2198_v48  ;;  %v2962_v24 = vmul.f32 %v12263_v52, %v18342_v19  ;;  %v3062_v38 = vmul.f32 %v18345_v6, %v12459_v45  ;;  %v12479_v48 = vld [vmem:[#allocation3 + $0x47] sm:$0xff] }
 0x256   :  { %v2926_v15 = vadd.f32 %v2910_v30, %v2874_v22  ;;  %v4639_v8 = vadd.f32 %v12200_v57, %v4587_v53  ;;  %v2718_v12 = vadd.f32 %v2702_v40, %v2666_v42  ;;  %v2807_v7 = vmul.f32 %v18337_v31, %v12349_v46  ;;  %18346 = vst [vmem:[#allocation104_spill] sm:$0xff] %v12479_v48  ;;  %v18347_v40 = vld [vmem:[#allocation37_spill] sm:$0xff] }
 0x257   :  { %v3026_v35 = vadd.f32 %v3010_v11, %v2974_v43  ;;  %v2302_v63 = vadd.f32 %v12362_v50, %v2250_v33  ;;  %v3014_v9 = vmul.f32 %v12265_v20, %v18343_v27  ;;  %v3114_v53 = vmul.f32 %v18347_v40, %v12469_v60  ;;  %v12489_v33 = vld [vmem:[#allocation3 + $0x48] sm:$0xff]  ;;  %v18393_v60 = vld [vmem:[#allocation50_spill] sm:$0xff] }
 0x258   :  { %v2978_v3 = vadd.f32 %v2962_v24, %v2926_v15  ;;  %v4692_v22 = vadd.f32 %v12204_v26, %v4639_v8  ;;  %v2770_v30 = vadd.f32 %v2754_v18, %v2718_v12  ;;  %v2859_v50 = vmul.f32 %v18340_v29, %v12364_v59  ;;  %18348 = vst [vmem:[#allocation105_spill] sm:$0xff] %v12489_v33  ;;  %v18349_v18 = vld [vmem:[#allocation38_spill] sm:$0xff] }
 0x259   :  { %v3078_v57 = vadd.f32 %v3062_v38, %v3026_v35  ;;  %v2355_v42 = vadd.f32 %v12373_v10, %v2302_v63  ;;  %v3066_v11 = vmul.f32 %v12317_v47, %v18345_v6  ;;  %v3166_v8 = vmul.f32 %v18349_v18, %v12479_v48  ;;  %v12499_v63 = vld [vmem:[#allocation3 + $0x50] sm:$0xff] }
 0x25a   :  { %v3030_v43 = vadd.f32 %v3014_v9, %v2978_v3  ;;  %v4744_v15 = vadd.f32 %v12208_v34, %v4692_v22  ;;  %v2823_v24 = vadd.f32 %v2807_v7, %v2770_v30  ;;  %v2911_v10 = vmul.f32 %v18341_v39, %v12375_v62  ;;  %18350 = vst [vmem:[#allocation106_spill] sm:$0xff] %v12499_v63  ;;  %v18351_v7 = vld [vmem:[#allocation39_spill] sm:$0xff] }
 0x25b   :  { %v3130_v26 = vadd.f32 %v3114_v53, %v3078_v57  ;;  %v2407_v12 = vadd.f32 %v12386_v23, %v2355_v42  ;;  %v3118_v38 = vmul.f32 %v12319_v37, %v18347_v40  ;;  %v3218_v22 = vmul.f32 %v18351_v7, %v12489_v33  ;;  %v12509_v42 = vld [vmem:[#allocation3 + $0x51] sm:$0xff] }
 0x25c   :  { %v3082_v35 = vadd.f32 %v3066_v11, %v3030_v43  ;;  %v4796_v3 = vadd.f32 %v12215_v55, %v4744_v15  ;;  %v2875_v9 = vadd.f32 %v2859_v50, %v2823_v24  ;;  %v2963_v23 = vmul.f32 %v18342_v19, %v12379_v0  ;;  %18352 = vst [vmem:[#allocation107_spill] sm:$0xff] %v12509_v42  ;;  %v18353_v50 = vld [vmem:[#allocation40_spill] sm:$0xff] }
 0x25d   :  { %v3182_v34 = vadd.f32 %v3166_v8, %v3130_v26  ;;  %v2459_v30 = vadd.f32 %v12392_v61, %v2407_v12  ;;  %v3170_v53 = vmul.f32 %v12323_v4, %v18349_v18  ;;  %v3270_v15 = vmul.f32 %v18353_v50, %v12499_v63  ;;  %v12519_v12 = vld [vmem:[#allocation3 + $0x52] sm:$0xff] }
 0x25e   :  { %v3134_v57 = vadd.f32 %v3118_v38, %v3082_v35  ;;  %v4848_v43 = vadd.f32 %v12223_v21, %v4796_v3  ;;  %v2927_v11 = vadd.f32 %v2911_v10, %v2875_v9  ;;  %v3015_v61 = vmul.f32 %v18343_v27, %v12394_v5  ;;  %18354 = vst [vmem:[#allocation108_spill] sm:$0xff] %v12519_v12  ;;  %v12522_v38 = vld [vmem:[#allocation3 + $0x96] sm:$0xff]  ;;  %v18355_v3 = vld [vmem:[#allocation41_spill] sm:$0xff] }
 0x25f   :  { %v3234_v55 = vadd.f32 %v3218_v22, %v3182_v34  ;;  %v2511_v24 = vadd.f32 %v12405_v56, %v2459_v30  ;;  %v3222_v8 = vmul.f32 %v12337_v41, %v18351_v7  ;;  %v3322_v9 = vmul.f32 %v18355_v3, %v12509_v42 }
 0x260   :  { %v3186_v26 = vadd.f32 %v3170_v53, %v3134_v57  ;;  %v4900_v35 = vadd.f32 %v12227_v1, %v4848_v43  ;;  %v2979_v21 = vadd.f32 %v2963_v23, %v2927_v11  ;;  %v3067_v34 = vmul.f32 %v18345_v6, %v12418_v36  ;;  %v12531_v57 = vld [vmem:[#allocation3 + $0x53] sm:$0xff] }
 0x261   :  { %v3286_v10 = vadd.f32 %v3270_v15, %v3234_v55  ;;  %v2563_v56 = vadd.f32 %v12416_v2, %v2511_v24  ;;  %v3274_v30 = vmul.f32 %v18353_v50, %v12349_v46  ;;  %18356 = vst [vmem:[#allocation109_spill] sm:$0xff] %v12531_v57  ;;  %v18357_v23 = vld [vmem:[#allocation42_spill] sm:$0xff]  ;;  %v2651_v2 = vmul.f32 %v18333_v49, %v12522_v38 }
 0x262   :  { %v3238_v22 = vadd.f32 %v3222_v8, %v3186_v26  ;;  %v4952_v1 = vadd.f32 %v12239_v44, %v4900_v35  ;;  %v3031_v53 = vadd.f32 %v3015_v61, %v2979_v21  ;;  %v3374_v11 = vmul.f32 %v18357_v23, %v12519_v12  ;;  %v12541_v26 = vld [vmem:[#allocation3 + $0x54] sm:$0xff]  ;;  %v18359_v8 = vld [vmem:[#allocation93_spill] sm:$0xff]  ;;  %v18361_v21 = vld [vmem:[#allocation84_spill] sm:$0xff] }
 0x263   :  { %v3338_v43 = vadd.f32 %v3322_v9, %v3286_v10  ;;  %v2615_v55 = vadd.f32 %v12435_v51, %v2563_v56  ;;  %v3326_v24 = vmul.f32 %v18355_v3, %v12364_v59  ;;  %18358 = vst [vmem:[#allocation110_spill] sm:$0xff] %v12541_v26  ;;  %v18360_v61 = vld [vmem:[#allocation43_spill] sm:$0xff]  ;;  %v12548_v10 = vmul.f32 %v18361_v21, %v12317_v47 }
 0x264   :  { %v3290_v15 = vadd.f32 %v3274_v30, %v3238_v22  ;;  %v5004_v42 = vadd.f32 %v18359_v8, %v4952_v1  ;;  %v3083_v63 = vadd.f32 %v3067_v34, %v3031_v53  ;;  %v3426_v35 = vmul.f32 %v18360_v61, %v12531_v57  ;;  %v12550_v51 = vld [vmem:[#allocation3 + $0x97] sm:$0xff]  ;;  %v18366_v57 = vld [vmem:[#allocation85_spill] sm:$0xff] }
 0x265   :  { %v3390_v44 = vadd.f32 %v3374_v11, %v3338_v43  ;;  %18362 = vst [vmem:[#allocation93_spill] sm:$0xff] %v12550_v51  ;;  %v3119_v9 = vmul.f32 %v18347_v40, %v12522_v38  ;;  %v3378_v22 = vmul.f32 %v18357_v23, %v12375_v62  ;;  %v12556_v30 = vld [vmem:[#allocation3 + $0x55] sm:$0xff]  ;;  %v2667_v53 = vadd.f32 %v2651_v2, %v2615_v55  ;;  %v18365_v11 = vld [vmem:[#allocation44_spill] sm:$0xff] }
 0x266   :  { %v3342_v56 = vadd.f32 %v3326_v24, %v3290_v15  ;;  %18363 = vst [vmem:[#allocation111_spill] sm:$0xff] %v12556_v30  ;;  %v18364_v34 = vld [vmem:[#allocation94_spill] sm:$0xff]  ;;  %v3478_v8 = vmul.f32 %v18365_v11, %v12541_v26  ;;  %v12563_v12 = vmul.f32 %v18366_v57, %v12319_v37  ;;  %v3430_v15 = vmul.f32 %v18360_v61, %v12379_v0  ;;  %v18369_v55 = vld [vmem:[#allocation95_spill] sm:$0xff]  ;;  %v18374_v23 = vld [vmem:[#allocation96_spill] sm:$0xff] }
 0x267   :  { %v5056_v1 = vadd.f32 %v18364_v34, %v5004_v42  ;;  %v3442_v43 = vadd.f32 %v3426_v35, %v3390_v44  ;;  %v3135_v3 = vadd.f32 %v3119_v9, %v3083_v63  ;;  %v12567_v24 = vld [vmem:[#allocation3 + $0x56] sm:$0xff]  ;;  %v12572_v42 = vld [vmem:[%s17573_s2 + $0x50] ss:$0 sm:$0xff]  ;;  %v2703_v44 = vmul.f32 %v18335_v54, %v12550_v51  ;;  %v18370_v34 = vld [vmem:[#allocation45_spill] sm:$0xff] }
 0x268   :  { %v3394_v6 = vadd.f32 %v3378_v22, %v3342_v56  ;;  %18367 = vst [vmem:[#allocation94_spill] sm:$0xff] %v12567_v24  ;;  %18368 = vst [vmem:[#allocation112_spill] sm:$0xff] %v12572_v42  ;;  %v3530_v63 = vmul.f32 %v18370_v34, %v12556_v30  ;;  %v18371_v9 = vld [vmem:[#allocation86_spill] sm:$0xff]  ;;  %v12583_v22 = vld [vmem:[#allocation3 + $0x98] sm:$0xff]  ;;  %v3171_v61 = vmul.f32 %v18349_v18, %v12550_v51 }
 0x269   :  { %v5108_v2 = vadd.f32 %v18369_v55, %v5056_v1  ;;  %v3494_v35 = vadd.f32 %v3478_v8, %v3442_v43  ;;  %v12581_v56 = vmul.f32 %v18371_v9, %v12323_v4  ;;  %18372 = vst [vmem:[#allocation95_spill] sm:$0xff] %v12583_v22  ;;  %v3482_v1 = vmul.f32 %v18365_v11, %v12394_v5  ;;  %v12589_v55 = vld [vmem:[#allocation3 + $0x57] sm:$0xff]  ;;  %v18377_v11 = vld [vmem:[#allocation97_spill] sm:$0xff] }
 0x26a   :  { %v3446_v26 = vadd.f32 %v3430_v15, %v3394_v6  ;;  %18373 = vst [vmem:[#allocation113_spill] sm:$0xff] %v12589_v55  ;;  %v2719_v8 = vadd.f32 %v2703_v44, %v2667_v53  ;;  %v18375_v30 = vld [vmem:[#allocation46_spill] sm:$0xff]  ;;  %v12596_v33 = vmul.f32 %v12572_v42, %v12337_v41  ;;  %v3187_v48 = vadd.f32 %v3171_v61, %v3135_v3  ;;  %v12600_v15 = vld [vmem:[#allocation3 + $0x58] sm:$0xff]  ;;  %v18404_v9 = vld [vmem:[#allocation57_spill] sm:$0xff] }
 0x26b   :  { %v5161_v43 = vadd.f32 %v18374_v23, %v5108_v2  ;;  %v3546_v40 = vadd.f32 %v3530_v63, %v3494_v35  ;;  %v3582_v50 = vmul.f32 %v18375_v30, %v12567_v24  ;;  %v3534_v6 = vmul.f32 %v18370_v34, %v12418_v36  ;;  %18376 = vst [vmem:[#allocation96_spill] sm:$0xff] %v12600_v15  ;;  %v18378_v2 = vld [vmem:[#allocation47_spill] sm:$0xff]  ;;  %v12607_v35 = vld [vmem:[#allocation3 + $0x60] sm:$0xff] }
 0x26c   :  { %v3498_v54 = vadd.f32 %v3482_v1, %v3446_v26  ;;  %v2755_v23 = vmul.f32 %v18338_v32, %v12583_v22  ;;  %v3634_v44 = vmul.f32 %v18378_v2, %v12589_v55  ;;  %18379 = vst [vmem:[#allocation97_spill] sm:$0xff] %v12607_v35  ;;  %v3223_v3 = vmul.f32 %v18351_v7, %v12583_v22  ;;  %v12617_v1 = vld [vmem:[#allocation3 + $0x62] sm:$0xff] }
 0x26d   :  { %v5213_v18 = vadd.f32 %v18377_v11, %v5161_v43  ;;  %v3598_v53 = vadd.f32 %v3582_v50, %v3546_v40  ;;  %v3586_v61 = vmul.f32 %v18375_v30, %v12522_v38  ;;  %v3638_v63 = vmul.f32 %v18378_v2, %v12550_v51  ;;  %v12615_v11 = vld [vmem:[#allocation3 + $0x61] sm:$0xff]  ;;  %18381 = vst [vmem:[#allocation115_spill] sm:$0xff] %v12617_v1  ;;  %v18383_v50 = vld [vmem:[#allocation98_spill] sm:$0xff] }
 0x26e   :  { %v3550_v26 = vadd.f32 %v3534_v6, %v3498_v54  ;;  %18380 = vst [vmem:[#allocation114_spill] sm:$0xff] %v12615_v11  ;;  %v12619_v40 = vld [vmem:[#allocation3 + $0x63] sm:$0xff]  ;;  %v12622_v34 = vadd.f32 %v2755_v23, %v2719_v8  ;;  %v12632_v2 = vadd.f32 %v3223_v3, %v3187_v48  ;;  %v3791_v49 = vmul.f32 %v18393_v60, %v12615_v11  ;;  %v18394_v48 = vld [vmem:[#allocation51_spill] sm:$0xff] }
 0x26f   :  { %18382 = vst [vmem:[#allocation116_spill] sm:$0xff] %v12619_v40  ;;  %v5265_v43 = vadd.f32 %v18383_v50, %v5213_v18  ;;  %v3650_v55 = vadd.f32 %v3634_v44, %v3598_v53  ;;  %v18384_v7 = vld [vmem:[#allocation48_spill] sm:$0xff]  ;;  %v18389_v18 = vld [vmem:[#allocation49_spill] sm:$0xff]  ;;  %v18392_v44 = vld [vmem:[#allocation99_spill] sm:$0xff]  ;;  %v3843_v3 = vmul.f32 %v18394_v48, %v12617_v1 }
 0x270   :  { %v3686_v54 = vmul.f32 %v18384_v7, %v12600_v15  ;;  %v12626_v6 = vld [vmem:[#allocation3 + $0x64] sm:$0xff]  ;;  %18388 = vst [vmem:[#allocation119_spill] sm:$0xff] %v12632_v2  ;;  %v3602_v32 = vadd.f32 %v3586_v61, %v3550_v26  ;;  %v3690_v27 = vmul.f32 %v18384_v7, %v12583_v22  ;;  %v3739_v8 = vmul.f32 %v18389_v18, %v12607_v35  ;;  %v12647_v26 = vld [vmem:[#allocation3 + $0x70] sm:$0xff] }
 0x271   :  { %18385 = vst [vmem:[#allocation98_spill] sm:$0xff] %v12626_v6  ;;  %v12628_v30 = vld [vmem:[#allocation3 + $0x65] sm:$0xff]  ;;  %v5317_v50 = vadd.f32 %v18392_v44, %v5265_v43  ;;  %18395 = vst [vmem:[#allocation99_spill] sm:$0xff] %v12647_v26  ;;  %v12649_v61 = vld [vmem:[#allocation3 + $0x71] sm:$0xff] }
 0x272   :  { %18386 = vst [vmem:[#allocation117_spill] sm:$0xff] %v12628_v30  ;;  %v12630_v24 = vld [vmem:[#allocation3 + $0x66] sm:$0xff]  ;;  %v3702_v15 = vadd.f32 %v3686_v54, %v3650_v55  ;;  %18396 = vst [vmem:[#allocation122_spill] sm:$0xff] %v12649_v61  ;;  %v12651_v7 = vld [vmem:[#allocation3 + $0x72] sm:$0xff] }
 0x273   :  { %18387 = vst [vmem:[#allocation118_spill] sm:$0xff] %v12630_v24  ;;  %v12638_v23 = vld [vmem:[#allocation3 + $0x67] sm:$0xff]  ;;  %18397 = vst [vmem:[#allocation123_spill] sm:$0xff] %v12651_v7  ;;  %v18400_v55 = vld [vmem:[#allocation54_spill] sm:$0xff] }
 0x274   :  { %18390 = vst [vmem:[#allocation120_spill] sm:$0xff] %v12638_v23  ;;  %v12640_v53 = vld [vmem:[#allocation3 + $0x68] sm:$0xff]  ;;  %v18398_v18 = vld [vmem:[#allocation52_spill] sm:$0xff]  ;;  %v3999_v43 = vmul.f32 %v18400_v55, %v12628_v30  ;;  %v18401_v54 = vld [vmem:[#allocation55_spill] sm:$0xff]  ;;  %v3755_v1 = vadd.f32 %v3739_v8, %v3702_v15 }
 0x275   :  { %18391 = vst [vmem:[#allocation121_spill] sm:$0xff] %v12640_v53  ;;  %v3895_v35 = vmul.f32 %v18398_v18, %v12619_v40  ;;  %v18399_v2 = vld [vmem:[#allocation53_spill] sm:$0xff]  ;;  %v4051_v44 = vmul.f32 %v18401_v54, %v12630_v24  ;;  %v18402_v60 = vld [vmem:[#allocation100_spill] sm:$0xff]  ;;  %v12666_v51 = vmul.f32 %v18404_v9, %v12640_v53  ;;  %v3654_v18 = vadd.f32 %v3638_v63, %v3602_v32  ;;  %v18405_v40 = vld [vmem:[#allocation58_spill] sm:$0xff] }
 0x276   :  { %v3947_v42 = vmul.f32 %v18399_v2, %v12626_v6  ;;  %v5369_v48 = vadd.f32 %v18402_v60, %v5317_v50  ;;  %v18403_v11 = vld [vmem:[#allocation56_spill] sm:$0xff]  ;;  %v12670_v2 = vmul.f32 %v18405_v40, %v12647_v26  ;;  %v18406_v55 = vld [vmem:[#allocation59_spill] sm:$0xff]  ;;  %v3807_v8 = vadd.f32 %v3791_v49, %v3755_v1  ;;  %v18408_v50 = vld [vmem:[#allocation61_spill] sm:$0xff] }
 0x277   :  { %v4103_v22 = vmul.f32 %v18403_v11, %v12638_v23  ;;  %v12674_v30 = vmul.f32 %v18406_v55, %v12649_v61  ;;  %v18407_v54 = vld [vmem:[#allocation60_spill] sm:$0xff]  ;;  %v18409_v11 = vld [vmem:[#allocation82_spill] sm:$0xff]  ;;  %v18411_v63 = vld [vmem:[#allocation83_spill] sm:$0xff] }
 0x278   :  { %v12678_v60 = vmul.f32 %v18407_v54, %v12651_v7  ;;  %v5421_v15 = vadd.f32 %v12548_v10, %v5369_v48  ;;  %v12683_v9 = vmul.f32 %v18409_v11, %v18408_v50  ;;  %v18410_v32 = vld [vmem:[#allocation62_spill] sm:$0xff]  ;;  %v18412_v40 = vld [vmem:[#allocation63_spill] sm:$0xff]  ;;  %v18414_v55 = vld [vmem:[#allocation64_spill] sm:$0xff]  ;;  %v3859_v48 = vadd.f32 %v3843_v3, %v3807_v8 }
 0x279   :  { %v12687_v53 = vmul.f32 %v18411_v63, %v18410_v32  ;;  %v18413_v26 = vld [vmem:[#allocation90_spill] sm:$0xff]  ;;  %v18415_v61 = vld [vmem:[#allocation91_spill] sm:$0xff]  ;;  %v18416_v54 = vld [vmem:[#allocation65_spill] sm:$0xff] }
 0x27a   :  { %v12691_v23 = vmul.f32 %v18413_v26, %v18412_v40  ;;  %v12695_v24 = vmul.f32 %v18415_v61, %v18414_v55  ;;  %v18417_v7 = vld [vmem:[#allocation92_spill] sm:$0xff]  ;;  %v18418_v49 = vld [vmem:[#allocation66_spill] sm:$0xff]  ;;  %v5473_v1 = vadd.f32 %v12563_v12, %v5421_v15  ;;  %v18419_v63 = vld [vmem:[#allocation67_spill] sm:$0xff]  ;;  %v12714_v61 = vadd.f32 %v3690_v27, %v3654_v18 }
 0x27b   :  { %v12699_v10 = vmul.f32 %v18417_v7, %v18416_v54  ;;  %v12703_v11 = vmul.f32 %v12229_v28, %v18418_v49  ;;  %v12708_v32 = vmul.f32 %v12241_v14, %v18419_v63  ;;  %v18420_v26 = vld [vmem:[#allocation68_spill] sm:$0xff]  ;;  %v18422_v55 = vld [vmem:[#allocation69_spill] sm:$0xff]  ;;  %v18423_v54 = vld [vmem:[#allocation70_spill] sm:$0xff]  ;;  %v3911_v8 = vadd.f32 %v3895_v35, %v3859_v48 }
 0x27c   :  { %v12712_v40 = vmul.f32 %v12243_v25, %v18420_v26  ;;  %18421 = vst [vmem:[#allocation100_spill] sm:$0xff] %v12714_v61  ;;  %v12718_v7 = vmul.f32 %v12253_v13, %v18422_v55  ;;  %v12722_v28 = vmul.f32 %v12263_v52, %v18423_v54  ;;  %v18425_v12 = vld [vmem:[#allocation22_spill] sm:$0xff]  ;;  %v5525_v14 = vadd.f32 %v12581_v56, %v5473_v1  ;;  %v18427_v63 = vld [vmem:[#allocation72_spill] sm:$0xff]  ;;  %v18429_v27 = vld [vmem:[#allocation73_spill] sm:$0xff] }
 0x27d   :  { %v18426_v3 = vld [vmem:[#allocation102_spill] sm:$0xff]  ;;  %v12729_v25 = vmul.f32 %v12265_v20, %v18427_v63  ;;  %v12733_v18 = vmul.f32 %v12317_v47, %v18429_v27  ;;  %v12735_v13 = vld [vmem:[#allocation3 + $0xa0] sm:$0xff]  ;;  %v18436_v1 = vld [vmem:[#allocation23_spill] sm:$0xff] }
 0x27e   :  { %18424 = vst [vmem:[#allocation82_spill] sm:$0xff] %v12722_v28  ;;  %v2334_v15 = vmul.f32 %v18426_v3, %v18425_v12  ;;  %v18431_v61 = vld [vmem:[#allocation74_spill] sm:$0xff]  ;;  %v18433_v28 = vld [vmem:[#allocation75_spill] sm:$0xff]  ;;  %v18435_v56 = vld [vmem:[#allocation88_spill] sm:$0xff]  ;;  %v5577_v12 = vadd.f32 %v12596_v33, %v5525_v14  ;;  %v2808_v33 = vmul.f32 %v18337_v31, %v12735_v13 }
 0x27f   :  { %18428 = vst [vmem:[#allocation83_spill] sm:$0xff] %v12729_v25  ;;  %18430 = vst [vmem:[#allocation90_spill] sm:$0xff] %v12733_v18  ;;  %v12739_v52 = vmul.f32 %v12319_v37, %v18431_v61  ;;  %v12743_v3 = vmul.f32 %v12323_v4, %v18433_v28  ;;  %v18437_v48 = vld [vmem:[#allocation103_spill] sm:$0xff]  ;;  %v3963_v25 = vadd.f32 %v3947_v42, %v3911_v8  ;;  %v18438_v47 = vld [vmem:[#allocation76_spill] sm:$0xff] }
 0x280   :  { %v2350_v35 = vadd.f32 %v2334_v15, %v18435_v56  ;;  %v2386_v20 = vmul.f32 %v18437_v48, %v18436_v1  ;;  %v12751_v18 = vmul.f32 %v12337_v41, %v18438_v47  ;;  %v18440_v27 = vld [vmem:[#allocation77_spill] sm:$0xff]  ;;  %v18442_v4 = vld [vmem:[#allocation78_spill] sm:$0xff]  ;;  %v18444_v56 = vld [vmem:[#allocation24_spill] sm:$0xff]  ;;  %v5598_v41 = vsel %vm45_vm0, %v5577_v12, 0 }
 0x281   :  { %18432 = vst [vmem:[#allocation91_spill] sm:$0xff] %v12739_v52  ;;  %18434 = vst [vmem:[#allocation92_spill] sm:$0xff] %v12743_v3  ;;  %v12755_v37 = vmul.f32 %v18440_v27, %v12349_v46  ;;  %v12757_v52 = vld [vmem:[#allocation3 + $0xa1] sm:$0xff]  ;;  %v12761_v3 = vmul.f32 %v18442_v4, %v12364_v59  ;;  %v2438_v48 = vmul.f32 %v12426_v17, %v18444_v56  ;;  %v18445_v14 = vld [vmem:[#allocation79_spill] sm:$0xff]  ;;  %v12776_v59 = vand.u32 4294901760, %v5598_v41 }
 0x282   :  { %18439 = vst [vmem:[#allocation102_spill] sm:$0xff] %v12751_v18  ;;  %v2402_v15 = vadd.f32 %v2386_v20, %v2350_v35  ;;  %v4015_v42 = vadd.f32 %v3999_v43, %v3963_v25  ;;  %v12770_v46 = vmul.f32 %v18445_v14, %v12375_v62  ;;  %v18447_v8 = vld [vmem:[#allocation25_spill] sm:$0xff]  ;;  %v2824_v17 = vadd.f32 %v2808_v33, %v12622_v34  ;;  %v18449_v43 = vld [vmem:[#allocation80_spill] sm:$0xff] }
 0x283   :  { %18441 = vst [vmem:[#allocation88_spill] sm:$0xff] %v12755_v37  ;;  %18443 = vst [vmem:[#allocation103_spill] sm:$0xff] %v12761_v3  ;;  %v2490_v37 = vmul.f32 %v12439_v16, %v18447_v8  ;;  %v12774_v18 = vld [vmem:[#allocation3 + $0xa2] sm:$0xff]  ;;  %v2860_v20 = vmul.f32 %v18340_v29, %v12757_v52  ;;  %v12783_v12 = vmul.f32 %v18449_v43, %v12379_v0  ;;  %v18453_v16 = vld [vmem:[#allocation26_spill] sm:$0xff] }
 0x284   :  { %18446 = vst [vmem:[#allocation124_spill] sm:$0xff] %v12770_v46  ;;  %18448 = vst [vmem:[#allocation125_spill] sm:$0xff] %v12776_v59  ;;  %v2454_v35 = vadd.f32 %v2438_v48, %v2402_v15  ;;  %v4067_v3 = vadd.f32 %v4051_v44, %v4015_v42  ;;  %v18451_v62 = vld [vmem:[#allocation81_spill] sm:$0xff]  ;;  %v2542_v46 = vmul.f32 %v12449_v58, %v18453_v16  ;;  %v18457_v58 = vld [vmem:[#allocation27_spill] sm:$0xff] }
 0x285   :  { %18450 = vst [vmem:[#allocation126_spill] sm:$0xff] %v12783_v12  ;;  %v12787_v25 = vmul.f32 %v18451_v62, %v12394_v5  ;;  %v12791_v8 = vld [vmem:[#allocation3 + $0xa3] sm:$0xff]  ;;  %v12794_v15 = vsub.f32 %v5598_v41, %v12776_v59  ;;  %v2876_v48 = vadd.f32 %v2860_v20, %v2824_v17  ;;  %v2912_v44 = vmul.f32 %v18341_v39, %v12774_v18  ;;  %v18459_v17 = vld [vmem:[#allocation86_spill] sm:$0xff] }
 0x286   :  { %v2506_v34 = vadd.f32 %v2490_v37, %v2454_v35  ;;  %v4119_v33 = vadd.f32 %v4103_v22, %v4067_v3  ;;  %v12800_v0 = vmul.f32 %v18361_v21, %v12418_v36  ;;  %v12804_v5 = vmul.f32 %v18366_v57, %v12522_v38  ;;  %v18458_v36 = vld [vmem:[#allocation93_spill] sm:$0xff]  ;;  %v18461_v38 = vld [vmem:[#allocation95_spill] sm:$0xff]  ;;  %v18462_v59 = vld [vmem:[#allocation112_spill] sm:$0xff] }
 0x287   :  { %18452 = vst [vmem:[#allocation127_spill] sm:$0xff] %v12787_v25  ;;  %18454 = vst [vmem:[#allocation128_spill] sm:$0xff] %v12794_v15  ;;  %v2594_v42 = vmul.f32 %v12459_v45, %v18457_v58  ;;  %v12808_v25 = vld [vmem:[#allocation3 + $0xa4] sm:$0xff]  ;;  %v17781_v37 = vand.u32 4294901760, %v12794_v15  ;;  %v2928_v35 = vadd.f32 %v2912_v44, %v2876_v48  ;;  %v2964_v22 = vmul.f32 %v18342_v19, %v12791_v8 }
 0x288   :  { %18455 = vst [vmem:[#allocation129_spill] sm:$0xff] %v12800_v0  ;;  %18456 = vst [vmem:[#allocation130_spill] sm:$0xff] %v12804_v5  ;;  %v2558_v41 = vadd.f32 %v2542_v46, %v2506_v34  ;;  %v4171_v3 = vadd.f32 %v12666_v51, %v4119_v33  ;;  %v12816_v20 = vmul.f32 %v18459_v17, %v18458_v36  ;;  %v18464_v45 = vld [vmem:[#allocation28_spill] sm:$0xff]  ;;  %v18465_v0 = vld [vmem:[#allocation87_spill] sm:$0xff] }
 0x289   :  { %v12820_v5 = vmul.f32 %v18462_v59, %v18461_v38  ;;  %v2646_v12 = vmul.f32 %v18465_v0, %v18464_v45  ;;  %v12824_v58 = vld [vmem:[#allocation3 + $0xa5] sm:$0xff]  ;;  %v5714_v46 = vsub.f32 %v12794_v15, %v17781_v37  ;;  %v2980_v48 = vadd.f32 %v2964_v22, %v2928_v35  ;;  %v18467_v51 = vld [vmem:[#allocation35_spill] sm:$0xff] }
 0x28a   :  { %18460 = vst [vmem:[#allocation93_spill] sm:$0xff] %v12816_v20  ;;  %18466 = vst [vmem:[#allocation87_spill] sm:$0xff] %v12824_v58  ;;  %v2610_v34 = vadd.f32 %v2594_v42, %v2558_v41  ;;  %v3016_v44 = vmul.f32 %v18467_v51, %v12808_v25  ;;  %v4224_v33 = vadd.f32 %v12670_v2, %v4171_v3  ;;  %v18468_v36 = vld [vmem:[#allocation29_spill] sm:$0xff]  ;;  %v18469_v20 = vld [vmem:[#allocation104_spill] sm:$0xff] }
 0x28b   :  { %18463 = vst [vmem:[#allocation95_spill] sm:$0xff] %v12820_v5  ;;  %v2698_v38 = vmul.f32 %v18469_v20, %v18468_v36  ;;  %v18470_v5 = vld [vmem:[#allocation30_spill] sm:$0xff]  ;;  %v18471_v16 = vld [vmem:[#allocation105_spill] sm:$0xff]  ;;  %v18472_v0 = vld [vmem:[#allocation40_spill] sm:$0xff]  ;;  %v5715_v1 = vand.u32 4294901760, %v5714_v46 }
 0x28c   :  { %v2750_v56 = vmul.f32 %v18471_v16, %v18470_v5  ;;  %v3275_v45 = vmul.f32 %v18472_v0, %v12735_v13  ;;  %v2662_v59 = vadd.f32 %v2646_v12, %v2610_v34  ;;  %v3032_v17 = vadd.f32 %v3016_v44, %v2980_v48  ;;  %v18473_v42 = vld [vmem:[#allocation36_spill] sm:$0xff]  ;;  %v18475_v2 = vld [vmem:[#allocation106_spill] sm:$0xff]  ;;  %v18476_v20 = vld [vmem:[#allocation119_spill] sm:$0xff] }
 0x28d   :  { %v3068_v41 = vmul.f32 %v18473_v42, %v12824_v58  ;;  %v12840_v35 = vld [vmem:[#allocation3 + $0xa6] sm:$0xff]  ;;  %v4276_v22 = vadd.f32 %v12674_v30, %v4224_v33  ;;  %v2803_v3 = vmul.f32 %v18475_v2, %v18337_v31  ;;  %9963 = vmatprep.mubr.f32.mxu1 %v5715_v1  ;;  %v18478_v12 = vld [vmem:[#allocation107_spill] sm:$0xff] }
 0x28e   :  { %18474 = vst [vmem:[#allocation104_spill] sm:$0xff] %v12840_v35  ;;  %v3291_v37 = vadd.f32 %v3275_v45, %v18476_v20  ;;  %v18477_v16 = vld [vmem:[#allocation41_spill] sm:$0xff]  ;;  %v2714_v5 = vadd.f32 %v2698_v38, %v2662_v59  ;;  %v2855_v46 = vmul.f32 %v18478_v12, %v18340_v29  ;;  %v18479_v34 = vld [vmem:[#allocation108_spill] sm:$0xff]  ;;  %v18482_v20 = vld [vmem:[#allocation42_spill] sm:$0xff] }
 0x28f   :  { %v3327_v15 = vmul.f32 %v18477_v16, %v12757_v52  ;;  %v2907_v48 = vmul.f32 %v18479_v34, %v18341_v39  ;;  %v3084_v44 = vadd.f32 %v3068_v41, %v3032_v17  ;;  %v4328_v36 = vadd.f32 %v12678_v60, %v4276_v22  ;;  %v18480_v30 = vld [vmem:[#allocation37_spill] sm:$0xff]  ;;  %v18484_v12 = vld [vmem:[#allocation110_spill] sm:$0xff]  ;;  %v18485_v17 = vld [vmem:[#allocation111_spill] sm:$0xff] }
 0x290   :  { %v3120_v33 = vmul.f32 %v18480_v30, %v12840_v35  ;;  %v12855_v2 = vld [vmem:[#allocation3 + $0xa7] sm:$0xff]  ;;  %v3379_v31 = vmul.f32 %v18482_v20, %v12774_v18  ;;  %v2766_v1 = vadd.f32 %v2750_v56, %v2714_v5  ;;  %v3011_v29 = vmul.f32 %v18484_v12, %v18467_v51  ;;  %v18488_v56 = vld [vmem:[#allocation94_spill] sm:$0xff] }
 0x291   :  { %18481 = vst [vmem:[#allocation105_spill] sm:$0xff] %v12855_v2  ;;  %v3343_v45 = vadd.f32 %v3327_v15, %v3291_v37  ;;  %v18483_v59 = vld [vmem:[#allocation109_spill] sm:$0xff]  ;;  %v3063_v41 = vmul.f32 %v18485_v17, %v18473_v42  ;;  %v4380_v60 = vadd.f32 %v12683_v9, %v4328_v36  ;;  %v18487_v15 = vld [vmem:[#allocation43_spill] sm:$0xff]  ;;  %v12872_v5 = vmul.f32 %v18488_v56, %v18480_v30 }
 0x292   :  { %v2959_v38 = vmul.f32 %v18483_v59, %v18342_v19  ;;  %v3136_v22 = vadd.f32 %v3120_v33, %v3084_v44  ;;  %v12866_v34 = vld [vmem:[#allocation3 + $0xa8] sm:$0xff]  ;;  %v3431_v37 = vmul.f32 %v18487_v15, %v12791_v8  ;;  %v2819_v57 = vadd.f32 %v2803_v3, %v2766_v1  ;;  %v18489_v59 = vld [vmem:[#allocation38_spill] sm:$0xff]  ;;  %v18491_v36 = vld [vmem:[#allocation39_spill] sm:$0xff] }
 0x293   :  { %18486 = vst [vmem:[#allocation106_spill] sm:$0xff] %v12866_v34  ;;  %v3395_v39 = vadd.f32 %v3379_v31, %v3343_v45  ;;  %v18490_v19 = vld [vmem:[#allocation113_spill] sm:$0xff]  ;;  %v3172_v42 = vmul.f32 %v18489_v59, %v12855_v2  ;;  %v4432_v9 = vadd.f32 %v12687_v53, %v4380_v60  ;;  %v18492_v44 = vld [vmem:[#allocation96_spill] sm:$0xff]  ;;  %v3224_v30 = vmul.f32 %v18491_v36, %v12866_v34 }
 0x294   :  { %v12876_v12 = vmul.f32 %v18490_v19, %v18489_v59  ;;  %v12883_v31 = vmul.f32 %v18492_v44, %v18491_v36  ;;  %v18493_v3 = vld [vmem:[#allocation44_spill] sm:$0xff]  ;;  %v2871_v1 = vadd.f32 %v2855_v46, %v2819_v57  ;;  %v18494_v51 = vld [vmem:[#allocation97_spill] sm:$0xff]  ;;  %v18495_v59 = vld [vmem:[#allocation114_spill] sm:$0xff] }
 0x295   :  { %v3447_v33 = vadd.f32 %v3431_v37, %v3395_v39  ;;  %v3483_v45 = vmul.f32 %v18493_v3, %v12808_v25  ;;  %v12891_v19 = vmul.f32 %v18494_v51, %v18472_v0  ;;  %v12895_v56 = vmul.f32 %v18495_v59, %v18477_v16  ;;  %v18496_v39 = vld [vmem:[#allocation45_spill] sm:$0xff]  ;;  %v18497_v57 = vld [vmem:[#allocation115_spill] sm:$0xff]  ;;  %v18498_v36 = vld [vmem:[#allocation116_spill] sm:$0xff] }
 0x296   :  { %v4484_v53 = vadd.f32 %v12691_v23, %v4432_v9  ;;  %v3188_v60 = vadd.f32 %v3172_v42, %v3136_v22  ;;  %v3535_v37 = vmul.f32 %v18496_v39, %v12824_v58  ;;  %v2923_v17 = vadd.f32 %v2907_v48, %v2871_v1  ;;  %v18499_v42 = vld [vmem:[#allocation117_spill] sm:$0xff]  ;;  %v18500_v48 = vld [vmem:[#allocation46_spill] sm:$0xff]  ;;  %v18521_v16 = vld [vmem:[#allocation123_spill] sm:$0xff] }
 0x297   :  { %v3499_v44 = vadd.f32 %v3483_v45, %v3447_v33  ;;  %v12902_v46 = vmul.f32 %v18497_v57, %v18482_v20  ;;  %v12906_v51 = vmul.f32 %v18498_v36, %v18487_v15  ;;  %v12910_v59 = vmul.f32 %v12626_v6, %v18493_v3  ;;  %v18501_v1 = vld [vmem:[#allocation118_spill] sm:$0xff]  ;;  %v18503_v15 = vld [vmem:[#allocation47_spill] sm:$0xff]  ;;  %v18504_v36 = vld [vmem:[#allocation120_spill] sm:$0xff] }
 0x298   :  { %v4536_v23 = vadd.f32 %v12695_v24, %v4484_v53  ;;  %v12915_v22 = vmul.f32 %v18499_v42, %v18496_v39  ;;  %v3587_v33 = vmul.f32 %v18500_v48, %v12840_v35  ;;  %v2975_v45 = vadd.f32 %v2959_v38, %v2923_v17  ;;  %v12929_v53 = vld [vmem:[#allocation3 + $0x73] sm:$0xff]  ;;  %v18507_v17 = vld [vmem:[#allocation48_spill] sm:$0xff]  ;;  %v18508_v3 = vld [vmem:[#allocation121_spill] sm:$0xff] }
 0x299   :  { %v3551_v9 = vadd.f32 %v3535_v37, %v3499_v44  ;;  %v12921_v20 = vmul.f32 %v18501_v1, %v18500_v48  ;;  %v12925_v57 = vmul.f32 %v18504_v36, %v18503_v15  ;;  %v3639_v24 = vmul.f32 %v18503_v15, %v12855_v2  ;;  %v12931_v39 = vld [vmem:[#allocation3 + $0x74] sm:$0xff] }
 0x29a   :  { %18506 = vst [vmem:[#allocation108_spill] sm:$0xff] %v12931_v39  ;;  %v4588_v44 = vadd.f32 %v12699_v10, %v4536_v23  ;;  %v12934_v37 = vadd.f32 %v3224_v30, %v3188_v60  ;;  %v12938_v48 = vmul.f32 %v18508_v3, %v18507_v17  ;;  %v12940_v1 = vld [vmem:[#allocation3 + $0x75] sm:$0xff]  ;;  %v3027_v15 = vadd.f32 %v3011_v29, %v2975_v45  ;;  %v18523_v45 = vld [vmem:[#allocation52_spill] sm:$0xff] }
 0x29b   :  { %18502 = vst [vmem:[#allocation119_spill] sm:$0xff] %v12921_v20  ;;  %18505 = vst [vmem:[#allocation107_spill] sm:$0xff] %v12925_v57  ;;  %v3603_v38 = vadd.f32 %v3587_v33, %v3551_v9  ;;  %v12942_v36 = vld [vmem:[#allocation3 + $0x76] sm:$0xff]  ;;  %v3691_v6 = vmul.f32 %v18507_v17, %v12866_v34  ;;  %v18513_v57 = vld [vmem:[#allocation49_spill] sm:$0xff]  ;;  %v12967_v17 = vmul.f32 %v18523_v45, %v12929_v53 }
 0x29c   :  { %18509 = vst [vmem:[#allocation109_spill] sm:$0xff] %v12938_v48  ;;  %18510 = vst [vmem:[#allocation110_spill] sm:$0xff] %v12940_v1  ;;  %v12944_v42 = vld [vmem:[#allocation3 + $0x77] sm:$0xff]  ;;  %v12958_v33 = vld [vmem:[#allocation3 + $0x80] sm:$0xff]  ;;  %v4640_v3 = vadd.f32 %v12703_v11, %v4588_v44 }
 0x29d   :  { %18511 = vst [vmem:[#allocation131_spill] sm:$0xff] %v12942_v36  ;;  %18512 = vst [vmem:[#allocation132_spill] sm:$0xff] %v12944_v42  ;;  %v18514_v20 = vld [vmem:[#allocation99_spill] sm:$0xff]  ;;  %v18516_v30 = vld [vmem:[#allocation50_spill] sm:$0xff] }
 0x29e   :  { %v12950_v10 = vmul.f32 %v18514_v20, %v18513_v57  ;;  %v18517_v60 = vld [vmem:[#allocation122_spill] sm:$0xff]  ;;  %v12956_v9 = vld [vmem:[#allocation3 + $0x78] sm:$0xff]  ;;  %18524 = vst [vmem:[#allocation136_spill] sm:$0xff] %v12967_v17  ;;  %v18525_v57 = vld [vmem:[#allocation53_spill] sm:$0xff] }
 0x29f   :  { %v12954_v23 = vmul.f32 %v18517_v60, %v18516_v30  ;;  %18519 = vst [vmem:[#allocation135_spill] sm:$0xff] %v12956_v9  ;;  %v18520_v48 = vld [vmem:[#allocation51_spill] sm:$0xff]  ;;  %v12971_v20 = vmul.f32 %v18525_v57, %v12931_v39  ;;  %v12973_v30 = vld [vmem:[#allocation3 + $0x81] sm:$0xff]  ;;  %v18528_v11 = vld [vmem:[#allocation54_spill] sm:$0xff] }
 0x2a0   :  { %18515 = vst [vmem:[#allocation133_spill] sm:$0xff] %v12950_v10  ;;  %v12963_v29 = vmul.f32 %v18521_v16, %v18520_v48  ;;  %v12977_v60 = vld [vmem:[#allocation3 + $0x83] sm:$0xff]  ;;  %v3079_v10 = vadd.f32 %v3063_v41, %v3027_v15  ;;  %v12981_v44 = vmul.f32 %v18528_v11, %v12940_v1  ;;  %v18530_v48 = vld [vmem:[#allocation55_spill] sm:$0xff]  ;;  %v4693_v41 = vadd.f32 %v12708_v32, %v4640_v3 }
 0x2a1   :  { %18518 = vst [vmem:[#allocation134_spill] sm:$0xff] %v12954_v23  ;;  %18526 = vst [vmem:[#allocation137_spill] sm:$0xff] %v12971_v20  ;;  %v12975_v23 = vld [vmem:[#allocation3 + $0x82] sm:$0xff]  ;;  %v3655_v15 = vadd.f32 %v3639_v24, %v3603_v38  ;;  %v18538_v1 = vld [vmem:[#allocation59_spill] sm:$0xff]  ;;  %v13023_v38 = vmul.f32 %v18408_v50, %v12977_v60 }
 0x2a2   :  { %18522 = vst [vmem:[#allocation123_spill] sm:$0xff] %v12963_v29  ;;  %18527 = vst [vmem:[#allocation138_spill] sm:$0xff] %v12977_v60  ;;  %v12985_v29 = vmul.f32 %v18530_v48, %v12942_v36  ;;  %v18532_v45 = vld [vmem:[#allocation56_spill] sm:$0xff]  ;;  %v18534_v11 = vld [vmem:[#allocation57_spill] sm:$0xff]  ;;  %v13015_v32 = vmul.f32 %v18538_v1, %v12973_v30 }
 0x2a3   :  { %18529 = vst [vmem:[#allocation139_spill] sm:$0xff] %v12981_v44  ;;  %v12989_v17 = vmul.f32 %v18532_v45, %v12944_v42  ;;  %v12991_v57 = vld [vmem:[#allocation3 + $0x84] sm:$0xff]  ;;  %v13000_v44 = vmul.f32 %v18534_v11, %v12956_v9  ;;  %v18536_v48 = vld [vmem:[#allocation58_spill] sm:$0xff]  ;;  %v3131_v42 = vadd.f32 %v12872_v5, %v3079_v10  ;;  %18542 = vst [vmem:[#allocation146_spill] sm:$0xff] %v13023_v38 }
 0x2a4   :  { %18531 = vst [vmem:[#allocation140_spill] sm:$0xff] %v12985_v29  ;;  %v12993_v20 = vld [vmem:[#allocation3 + $0x85] sm:$0xff]  ;;  %v13004_v29 = vmul.f32 %v18536_v48, %v12958_v33  ;;  %v13010_v45 = vld [vmem:[#allocation3 + $0x90] sm:$0xff]  ;;  %18539 = vst [vmem:[#allocation144_spill] sm:$0xff] %v13015_v32  ;;  %v4745_v48 = vadd.f32 %v12712_v40, %v4693_v41 }
 0x2a5   :  { %18533 = vst [vmem:[#allocation141_spill] sm:$0xff] %v12989_v17  ;;  %v12995_v39 = vld [vmem:[#allocation3 + $0x86] sm:$0xff]  ;;  %18535 = vst [vmem:[#allocation142_spill] sm:$0xff] %v13000_v44  ;;  %v13027_v44 = vld [vmem:[#allocation3 + $0x92] sm:$0xff]  ;;  %v3183_v60 = vadd.f32 %v12876_v12, %v3131_v42  ;;  %v13066_v42 = vadd.f32 %v3691_v6, %v3655_v15 }
 0x2a6   :  { %18537 = vst [vmem:[#allocation143_spill] sm:$0xff] %v13004_v29  ;;  %v13006_v36 = vld [vmem:[#allocation3 + $0x87] sm:$0xff]  ;;  %v13025_v29 = vld [vmem:[#allocation3 + $0x91] sm:$0xff]  ;;  %v4797_v12 = vadd.f32 %v12718_v7, %v4745_v48 }
 0x2a7   :  { %v13008_v17 = vld [vmem:[#allocation3 + $0x88] sm:$0xff]  ;;  %v18540_v3 = vld [vmem:[#allocation60_spill] sm:$0xff]  ;;  %v18543_v5 = vld [vmem:[#allocation62_spill] sm:$0xff]  ;;  %18554 = vst [vmem:[#allocation153_spill] sm:$0xff] %v13066_v42 }
 0x2a8   :  { %v13019_v24 = vmul.f32 %v18540_v3, %v12975_v23  ;;  %v13032_v10 = vmul.f32 %v18543_v5, %v12991_v57  ;;  %v18545_v32 = vld [vmem:[#allocation63_spill] sm:$0xff]  ;;  %v1846_v11 = vld [vmem:[#allocation3 + $0x40] sm:$0xff]  ;;  %v18549_v40 = vld [vmem:[#allocation65_spill] sm:$0xff] }
 0x2a9   :  { %v13036_v1 = vmul.f32 %v18545_v32, %v12993_v20  ;;  %v13042_v50 = vld [vmem:[#allocation3 + $0x93] sm:$0xff]  ;;  %v13049_v41 = vmul.f32 %v18549_v40, %v13006_v36  ;;  %v18559_v7 = vld [vmem:[#allocation13_spill] sm:$0xff] }
 0x2aa   :  { %18541 = vst [vmem:[#allocation145_spill] sm:$0xff] %v13019_v24  ;;  %18544 = vst [vmem:[#allocation147_spill] sm:$0xff] %v13032_v10  ;;  %v18547_v24 = vld [vmem:[#allocation64_spill] sm:$0xff]  ;;  %v13044_v38 = vld [vmem:[#allocation3 + $0x94] sm:$0xff]  ;;  %v13053_v10 = vmul.f32 %v18418_v49, %v13008_v17  ;;  %v3235_v49 = vadd.f32 %v12883_v31, %v3183_v60  ;;  %v13081_v40 = vmul.f32 %v18423_v54, %v13042_v50 }
 0x2ab   :  { %18546 = vst [vmem:[#allocation148_spill] sm:$0xff] %v13036_v1  ;;  %v13040_v3 = vmul.f32 %v18547_v24, %v12995_v39  ;;  %18550 = vst [vmem:[#allocation150_spill] sm:$0xff] %v13049_v41  ;;  %v18552_v1 = vld [vmem:[#allocation67_spill] sm:$0xff]  ;;  %v13070_v41 = vmul.f32 %v18420_v26, %v13025_v29  ;;  %v13085_v6 = vmul.f32 %v18427_v63, %v13044_v38  ;;  %v18560_v15 = vld [vmem:[#allocation82_spill] sm:$0xff] }
 0x2ac   :  { %18551 = vst [vmem:[#allocation151_spill] sm:$0xff] %v13053_v10  ;;  %v13057_v32 = vmul.f32 %v18552_v1, %v13010_v45  ;;  %v13061_v24 = vld [vmem:[#allocation3 + $0x96] sm:$0xff]  ;;  %v13074_v10 = vmul.f32 %v18422_v55, %v13027_v44  ;;  %18557 = vst [vmem:[#allocation156_spill] sm:$0xff] %v13081_v40  ;;  %v1866_v48 = vmul.f32 %v18559_v7, %v1846_v11  ;;  %v1950_v60 = vld [vmem:[#allocation3 + $0x42] sm:$0xff] }
 0x2ad   :  { %18548 = vst [vmem:[#allocation149_spill] sm:$0xff] %v13040_v3  ;;  %v13059_v3 = vld [vmem:[#allocation3 + $0x95] sm:$0xff]  ;;  %18555 = vst [vmem:[#allocation154_spill] sm:$0xff] %v13070_v41  ;;  %v4849_v42 = vadd.f32 %v18560_v15, %v4797_v12  ;;  %v18561_v41 = vld [vmem:[#allocation73_spill] sm:$0xff]  ;;  %v13095_v55 = vmul.f32 %v18431_v61, %v13061_v24  ;;  %v3287_v40 = vadd.f32 %v12891_v19, %v3235_v49 }
 0x2ae   :  { %18553 = vst [vmem:[#allocation152_spill] sm:$0xff] %v13057_v32  ;;  %v13063_v5 = vld [vmem:[#allocation3 + $0x97] sm:$0xff]  ;;  %18556 = vst [vmem:[#allocation155_spill] sm:$0xff] %v13074_v10  ;;  %v1898_v32 = vld [vmem:[#allocation3 + $0x41] sm:$0xff]  ;;  %v13091_v10 = vmul.f32 %v18561_v41, %v13059_v3  ;;  %v13119_v19 = vmul.f32 %v18445_v14, %v12774_v18 }
 0x2af   :  { %v13076_v1 = vld [vmem:[#allocation3 + $0x98] sm:$0xff]  ;;  %18558 = vst [vmem:[#allocation157_spill] sm:$0xff] %v13085_v6  ;;  %18563 = vst [vmem:[#allocation158_spill] sm:$0xff] %v13095_v55  ;;  %v13099_v31 = vmul.f32 %v18433_v28, %v13063_v5  ;;  %v18566_v12 = vld [vmem:[#allocation89_spill] sm:$0xff]  ;;  %v13111_v55 = vmul.f32 %v18440_v27, %v12735_v13 }
 0x2b0   :  { %18562 = vst [vmem:[#allocation82_spill] sm:$0xff] %v13091_v10  ;;  %v13104_v11 = vmul.f32 %v18438_v47, %v13076_v1  ;;  %v1882_v15 = vadd.f32 %v1866_v48, %v18566_v12  ;;  %v18567_v7 = vld [vmem:[#allocation14_spill] sm:$0xff]  ;;  %v18568_v10 = vld [vmem:[#allocation83_spill] sm:$0xff]  ;;  %18571 = vst [vmem:[#allocation161_spill] sm:$0xff] %v13119_v19  ;;  %v13134_v19 = vmul.f32 %v18361_v21, %v12824_v58 }
 0x2b1   :  { %18564 = vst [vmem:[#allocation159_spill] sm:$0xff] %v13099_v31  ;;  %v1918_v6 = vmul.f32 %v18567_v7, %v1898_v32  ;;  %v4901_v41 = vadd.f32 %v18568_v10, %v4849_v42  ;;  %18569 = vst [vmem:[#allocation89_spill] sm:$0xff] %v13111_v55  ;;  %v13115_v31 = vmul.f32 %v18442_v4, %v12757_v52  ;;  %v2002_v49 = vld [vmem:[#allocation3 + $0x43] sm:$0xff]  ;;  %v18573_v42 = vld [vmem:[#allocation15_spill] sm:$0xff] }
 0x2b2   :  { %18565 = vst [vmem:[#allocation160_spill] sm:$0xff] %v13104_v11  ;;  %v3339_v11 = vadd.f32 %v12895_v56, %v3287_v40  ;;  %v13124_v32 = vmul.f32 %v18449_v43, %v12791_v8  ;;  %v1970_v48 = vmul.f32 %v18573_v42, %v1950_v60  ;;  %v2054_v12 = vld [vmem:[#allocation3 + $0x44] sm:$0xff]  ;;  %v18574_v55 = vld [vmem:[#allocation90_spill] sm:$0xff]  ;;  %18576 = vst [vmem:[#allocation163_spill] sm:$0xff] %v13134_v19 }
 0x2b3   :  { %18570 = vst [vmem:[#allocation83_spill] sm:$0xff] %v13115_v31  ;;  %v1934_v10 = vadd.f32 %v1918_v6, %v1882_v15  ;;  %v2106_v7 = vld [vmem:[#allocation3 + $0x45] sm:$0xff]  ;;  %v4953_v27 = vadd.f32 %v18574_v55, %v4901_v41  ;;  %v13130_v31 = vmul.f32 %v18451_v62, %v12808_v25  ;;  %v18579_v15 = vld [vmem:[#allocation86_spill] sm:$0xff]  ;;  %v18582_v21 = vld [vmem:[#allocation91_spill] sm:$0xff] }
 0x2b4   :  { %18572 = vst [vmem:[#allocation162_spill] sm:$0xff] %v13124_v32  ;;  %v18577_v56 = vld [vmem:[#allocation85_spill] sm:$0xff]  ;;  %v3391_v60 = vadd.f32 %v12902_v46, %v3339_v11  ;;  %v13143_v42 = vmul.f32 %v18579_v15, %v12855_v2  ;;  %v18581_v41 = vld [vmem:[#allocation16_spill] sm:$0xff]  ;;  %v2315_v43 = vld [vmem:[#allocation3 + $0x50] sm:$0xff] }
 0x2b5   :  { %18575 = vst [vmem:[#allocation90_spill] sm:$0xff] %v13130_v31  ;;  %v13138_v40 = vmul.f32 %v18577_v56, %v12840_v35  ;;  %v2158_v32 = vld [vmem:[#allocation3 + $0x46] sm:$0xff]  ;;  %v1986_v55 = vadd.f32 %v1970_v48, %v1934_v10  ;;  %v2022_v62 = vmul.f32 %v18581_v41, %v2002_v49  ;;  %v2367_v14 = vld [vmem:[#allocation3 + $0x51] sm:$0xff]  ;;  %v5005_v19 = vadd.f32 %v18582_v21, %v4953_v27 }
 0x2b6   :  { %v2210_v6 = vld [vmem:[#allocation3 + $0x47] sm:$0xff]  ;;  %18580 = vst [vmem:[#allocation165_spill] sm:$0xff] %v13143_v42  ;;  %v18586_v28 = vld [vmem:[#allocation18_spill] sm:$0xff]  ;;  %v3443_v42 = vadd.f32 %v12906_v51, %v3391_v60  ;;  %v18587_v48 = vld [vmem:[#allocation19_spill] sm:$0xff] }
 0x2b7   :  { %18578 = vst [vmem:[#allocation164_spill] sm:$0xff] %v13138_v40  ;;  %v2262_v31 = vld [vmem:[#allocation3 + $0x48] sm:$0xff]  ;;  %v18583_v4 = vld [vmem:[#allocation112_spill] sm:$0xff]  ;;  %v2126_v46 = vmul.f32 %v18586_v28, %v2106_v7  ;;  %v2419_v11 = vld [vmem:[#allocation3 + $0x52] sm:$0xff]  ;;  %v2038_v10 = vadd.f32 %v2022_v62, %v1986_v55  ;;  %v2178_v49 = vmul.f32 %v18587_v48, %v2158_v32 }
 0x2b8   :  { %v13149_v56 = vmul.f32 %v18583_v4, %v12866_v34  ;;  %v18585_v40 = vld [vmem:[#allocation17_spill] sm:$0xff]  ;;  %v2471_v61 = vld [vmem:[#allocation3 + $0x53] sm:$0xff]  ;;  %v18588_v41 = vld [vmem:[#allocation20_spill] sm:$0xff]  ;;  %v3495_v28 = vadd.f32 %v12910_v59, %v3443_v42 }
 0x2b9   :  { %v2074_v47 = vmul.f32 %v18585_v40, %v2054_v12  ;;  %v2230_v15 = vmul.f32 %v18588_v41, %v2210_v6  ;;  %v2523_v2 = vld [vmem:[#allocation3 + $0x54] sm:$0xff]  ;;  %v18590_v21 = vld [vmem:[#allocation92_spill] sm:$0xff]  ;;  %v18591_v4 = vld [vmem:[#allocation21_spill] sm:$0xff] }
 0x2ba   :  { %18584 = vst [vmem:[#allocation91_spill] sm:$0xff] %v13149_v56  ;;  %v13156_v35 = vld [vmem:[#allocation3 + $0xb0] sm:$0xff]  ;;  %v5057_v27 = vadd.f32 %v18590_v21, %v5005_v19  ;;  %v2282_v56 = vmul.f32 %v18591_v4, %v2262_v31  ;;  %v18593_v40 = vld [vmem:[#allocation23_spill] sm:$0xff]  ;;  %v18594_v51 = vld [vmem:[#allocation24_spill] sm:$0xff] }
 0x2bb   :  { %18589 = vst [vmem:[#allocation166_spill] sm:$0xff] %v13156_v35  ;;  %v18592_v34 = vld [vmem:[#allocation22_spill] sm:$0xff]  ;;  %v2387_v7 = vmul.f32 %v18593_v40, %v2367_v14  ;;  %v2090_v58 = vadd.f32 %v2074_v47, %v2038_v10  ;;  %v13164_v62 = vmul.f32 %v18594_v51, %v2419_v11  ;;  %v18595_v32 = vld [vmem:[#allocation25_spill] sm:$0xff]  ;;  %v18599_v31 = vld [vmem:[#allocation27_spill] sm:$0xff]  ;;  %v3276_v47 = vmul.f32 %v18472_v0, %v13156_v35 }
 0x2bc   :  { %v2335_v12 = vmul.f32 %v18592_v34, %v2315_v43  ;;  %v13167_v60 = vmul.f32 %v18595_v32, %v2471_v61  ;;  %v13169_v6 = vld [vmem:[#allocation3 + $0xb1] sm:$0xff]  ;;  %v3547_v14 = vadd.f32 %v12915_v22, %v3495_v28  ;;  %v18601_v42 = vld [vmem:[#allocation28_spill] sm:$0xff]  ;;  %v18603_v10 = vld [vmem:[#allocation29_spill] sm:$0xff] }
 0x2bd   :  { %18596 = vst [vmem:[#allocation92_spill] sm:$0xff] %v13169_v6  ;;  %v18597_v55 = vld [vmem:[#allocation102_spill] sm:$0xff]  ;;  %v18600_v43 = vld [vmem:[#allocation111_spill] sm:$0xff]  ;;  %v2142_v59 = vadd.f32 %v2126_v46, %v2090_v58  ;;  %v18604_v32 = vld [vmem:[#allocation113_spill] sm:$0xff]  ;;  %v3292_v40 = vadd.f32 %v3276_v47, %v12934_v37 }
 0x2be   :  { %v5109_v41 = vadd.f32 %v18597_v55, %v5057_v27  ;;  %v18598_v19 = vld [vmem:[#allocation26_spill] sm:$0xff]  ;;  %v13177_v34 = vmul.f32 %v18600_v43, %v18599_v31  ;;  %v13188_v27 = vmul.f32 %v18604_v32, %v18603_v10  ;;  %v18606_v55 = vld [vmem:[#allocation88_spill] sm:$0xff]  ;;  %v18609_v28 = vld [vmem:[#allocation41_spill] sm:$0xff] }
 0x2bf   :  { %v13173_v21 = vmul.f32 %v18598_v19, %v2523_v2  ;;  %v18602_v61 = vld [vmem:[#allocation94_spill] sm:$0xff]  ;;  %v18608_v31 = vld [vmem:[#allocation96_spill] sm:$0xff]  ;;  %v3328_v58 = vmul.f32 %v18609_v28, %v13169_v6  ;;  %v18610_v22 = vld [vmem:[#allocation119_spill] sm:$0xff] }
 0x2c0   :  { %v13184_v11 = vmul.f32 %v18602_v61, %v18601_v42  ;;  %v13190_v2 = vld [vmem:[#allocation3 + $0xb2] sm:$0xff]  ;;  %v5162_v19 = vadd.f32 %v18606_v55, %v5109_v41  ;;  %v3599_v46 = vadd.f32 %v18610_v22, %v3547_v14  ;;  %v2194_v61 = vadd.f32 %v2178_v49, %v2142_v59  ;;  %v18612_v4 = vld [vmem:[#allocation97_spill] sm:$0xff]  ;;  %v18614_v10 = vld [vmem:[#allocation32_spill] sm:$0xff] }
 0x2c1   :  { %18605 = vst [vmem:[#allocation102_spill] sm:$0xff] %v13190_v2  ;;  %v18607_v43 = vld [vmem:[#allocation30_spill] sm:$0xff]  ;;  %v18611_v42 = vld [vmem:[#allocation31_spill] sm:$0xff]  ;;  %v3344_v6 = vadd.f32 %v3328_v58, %v3292_v40  ;;  %v18631_v40 = vld [vmem:[#allocation117_spill] sm:$0xff] }
 0x2c2   :  { %v13195_v51 = vmul.f32 %v18608_v31, %v18607_v43  ;;  %v13203_v32 = vmul.f32 %v18612_v4, %v18611_v42  ;;  %v18615_v48 = vld [vmem:[#allocation114_spill] sm:$0xff]  ;;  %v18617_v31 = vld [vmem:[#allocation103_spill] sm:$0xff]  ;;  %v18618_v43 = vld [vmem:[#allocation33_spill] sm:$0xff]  ;;  %v2246_v4 = vadd.f32 %v2230_v15, %v2194_v61 }
 0x2c3   :  { %v13207_v35 = vmul.f32 %v18615_v48, %v18614_v10  ;;  %v13209_v41 = vld [vmem:[#allocation3 + $0xb3] sm:$0xff]  ;;  %v5214_v55 = vadd.f32 %v18617_v31, %v5162_v19  ;;  %v18629_v31 = vld [vmem:[#allocation124_spill] sm:$0xff]  ;;  %v18634_v61 = vld [vmem:[#allocation109_spill] sm:$0xff] }
 0x2c4   :  { %18613 = vst [vmem:[#allocation111_spill] sm:$0xff] %v13203_v32  ;;  %v18619_v37 = vld [vmem:[#allocation115_spill] sm:$0xff]  ;;  %v18621_v14 = vld [vmem:[#allocation42_spill] sm:$0xff]  ;;  %v18624_v32 = vld [vmem:[#allocation116_spill] sm:$0xff] }
 0x2c5   :  { %18616 = vst [vmem:[#allocation94_spill] sm:$0xff] %v13207_v35  ;;  %v13214_v47 = vmul.f32 %v18619_v37, %v18618_v43  ;;  %v3380_v49 = vmul.f32 %v18621_v14, %v13190_v2  ;;  %v18622_v59 = vld [vmem:[#allocation107_spill] sm:$0xff]  ;;  %v18623_v42 = vld [vmem:[#allocation34_spill] sm:$0xff]  ;;  %v5266_v37 = vadd.f32 %v18629_v31, %v5214_v55 }
 0x2c6   :  { %v3651_v22 = vadd.f32 %v18622_v59, %v3599_v46  ;;  %v13221_v63 = vmul.f32 %v18624_v32, %v18623_v42  ;;  %v18626_v48 = vld [vmem:[#allocation35_spill] sm:$0xff]  ;;  %v18627_v35 = vld [vmem:[#allocation98_spill] sm:$0xff]  ;;  %v2298_v32 = vadd.f32 %v2282_v56, %v2246_v4  ;;  %v18646_v4 = vld [vmem:[#allocation133_spill] sm:$0xff] }
 0x2c7   :  { %18620 = vst [vmem:[#allocation113_spill] sm:$0xff] %v13214_v47  ;;  %v13225_v10 = vmul.f32 %v18627_v35, %v18626_v48  ;;  %v13227_v19 = vld [vmem:[#allocation3 + $0xb4] sm:$0xff]  ;;  %v18630_v47 = vld [vmem:[#allocation36_spill] sm:$0xff]  ;;  %v3396_v2 = vadd.f32 %v3380_v49, %v3344_v6  ;;  %v18643_v6 = vld [vmem:[#allocation121_spill] sm:$0xff] }
 0x2c8   :  { %18625 = vst [vmem:[#allocation88_spill] sm:$0xff] %v13221_v63  ;;  %v13232_v58 = vmul.f32 %v18631_v40, %v18630_v47  ;;  %v18633_v46 = vld [vmem:[#allocation43_spill] sm:$0xff]  ;;  %v3703_v59 = vadd.f32 %v18634_v61, %v3651_v22  ;;  %v18635_v63 = vld [vmem:[#allocation37_spill] sm:$0xff]  ;;  %v18636_v42 = vld [vmem:[#allocation118_spill] sm:$0xff] }
 0x2c9   :  { %18628 = vst [vmem:[#allocation96_spill] sm:$0xff] %v13225_v10  ;;  %v3432_v15 = vmul.f32 %v18633_v46, %v13209_v41  ;;  %v13239_v43 = vmul.f32 %v18636_v42, %v18635_v63  ;;  %v18638_v35 = vld [vmem:[#allocation38_spill] sm:$0xff]  ;;  %v18639_v10 = vld [vmem:[#allocation120_spill] sm:$0xff]  ;;  %v2351_v42 = vadd.f32 %v2335_v12, %v2298_v32 }
 0x2ca   :  { %18632 = vst [vmem:[#allocation119_spill] sm:$0xff] %v13232_v58  ;;  %v13243_v48 = vmul.f32 %v18639_v10, %v18638_v35  ;;  %v13245_v55 = vld [vmem:[#allocation3 + $0xb5] sm:$0xff]  ;;  %v18645_v22 = vld [vmem:[#allocation44_spill] sm:$0xff]  ;;  %v3756_v61 = vadd.f32 %v18646_v4, %v3703_v59  ;;  %v13275_v4 = vmul.f32 %v12929_v53, %v18633_v46 }
 0x2cb   :  { %18637 = vst [vmem:[#allocation97_spill] sm:$0xff] %v13239_v43  ;;  %v18641_v31 = vld [vmem:[#allocation126_spill] sm:$0xff]  ;;  %v18642_v58 = vld [vmem:[#allocation39_spill] sm:$0xff]  ;;  %v3448_v47 = vadd.f32 %v3432_v15, %v3396_v2  ;;  %v3484_v56 = vmul.f32 %v18645_v22, %v13227_v19  ;;  %v18653_v15 = vld [vmem:[#allocation45_spill] sm:$0xff] }
 0x2cc   :  { %18640 = vst [vmem:[#allocation114_spill] sm:$0xff] %v13243_v48  ;;  %v5318_v40 = vadd.f32 %v18641_v31, %v5266_v37  ;;  %v13250_v49 = vmul.f32 %v18643_v6, %v18642_v58  ;;  %v18647_v43 = vld [vmem:[#allocation99_spill] sm:$0xff]  ;;  %v18649_v10 = vld [vmem:[#allocation122_spill] sm:$0xff]  ;;  %v13266_v6 = vmul.f32 %v18521_v16, %v18621_v14  ;;  %18655 = vst [vmem:[#allocation98_spill] sm:$0xff] %v13275_v4 }
 0x2cd   :  { %v13257_v63 = vmul.f32 %v18647_v43, %v18472_v0  ;;  %v13261_v48 = vmul.f32 %v18649_v10, %v18609_v28  ;;  %v18651_v37 = vld [vmem:[#allocation127_spill] sm:$0xff]  ;;  %v3500_v2 = vadd.f32 %v3484_v56, %v3448_v47  ;;  %v18654_v12 = vld [vmem:[#allocation134_spill] sm:$0xff]  ;;  %v2403_v43 = vadd.f32 %v2387_v7, %v2351_v42  ;;  %v18656_v10 = vld [vmem:[#allocation108_spill] sm:$0xff] }
 0x2ce   :  { %18644 = vst [vmem:[#allocation103_spill] sm:$0xff] %v13250_v49  ;;  %v5370_v31 = vadd.f32 %v18651_v37, %v5318_v40  ;;  %18652 = vst [vmem:[#allocation116_spill] sm:$0xff] %v13266_v6  ;;  %v3536_v49 = vmul.f32 %v18653_v15, %v13245_v55  ;;  %v13270_v59 = vld [vmem:[#allocation3 + $0xb6] sm:$0xff]  ;;  %v3808_v32 = vadd.f32 %v18654_v12, %v3756_v61  ;;  %v18658_v47 = vld [vmem:[#allocation129_spill] sm:$0xff] }
 0x2cf   :  { %18648 = vst [vmem:[#allocation115_spill] sm:$0xff] %v13257_v63  ;;  %18650 = vst [vmem:[#allocation107_spill] sm:$0xff] %v13261_v48  ;;  %v13279_v40 = vmul.f32 %v18656_v10, %v18645_v22  ;;  %v13281_v37 = vld [vmem:[#allocation3 + $0xb7] sm:$0xff]  ;;  %v2455_v22 = vadd.f32 %v13164_v62, %v2403_v43  ;;  %v18666_v14 = vld [vmem:[#allocation132_spill] sm:$0xff] }
 0x2d0   :  { %v13283_v16 = vld [vmem:[#allocation3 + $0xb8] sm:$0xff]  ;;  %v5422_v56 = vadd.f32 %v18658_v47, %v5370_v31  ;;  %v18659_v6 = vld [vmem:[#allocation110_spill] sm:$0xff]  ;;  %v3552_v61 = vadd.f32 %v3536_v49, %v3500_v2  ;;  %v18669_v2 = vld [vmem:[#allocation48_spill] sm:$0xff] }
 0x2d1   :  { %18657 = vst [vmem:[#allocation124_spill] sm:$0xff] %v13279_v40  ;;  %v13288_v48 = vmul.f32 %v18659_v6, %v18653_v15  ;;  %v18661_v7 = vld [vmem:[#allocation46_spill] sm:$0xff]  ;;  %v18662_v42 = vld [vmem:[#allocation131_spill] sm:$0xff]  ;;  %v18671_v62 = vld [vmem:[#allocation136_spill] sm:$0xff] }
 0x2d2   :  { %v13292_v12 = vmul.f32 %v18662_v42, %v18661_v7  ;;  %v18664_v4 = vld [vmem:[#allocation123_spill] sm:$0xff]  ;;  %v3588_v40 = vmul.f32 %v18661_v7, %v13270_v59  ;;  %v18668_v31 = vld [vmem:[#allocation130_spill] sm:$0xff] }
 0x2d3   :  { %18660 = vst [vmem:[#allocation117_spill] sm:$0xff] %v13288_v48  ;;  %v3860_v63 = vadd.f32 %v18664_v4, %v3808_v32  ;;  %v18665_v46 = vld [vmem:[#allocation47_spill] sm:$0xff]  ;;  %v5474_v47 = vadd.f32 %v18668_v31, %v5422_v56  ;;  %v13307_v48 = vmul.f32 %v12956_v9, %v18669_v2  ;;  %v3692_v32 = vmul.f32 %v18669_v2, %v13283_v16  ;;  %v18676_v31 = vld [vmem:[#allocation93_spill] sm:$0xff]  ;;  %v18679_v2 = vld [vmem:[#allocation52_spill] sm:$0xff] }
 0x2d4   :  { %18663 = vst [vmem:[#allocation109_spill] sm:$0xff] %v13292_v12  ;;  %v13300_v28 = vmul.f32 %v18666_v14, %v18665_v46  ;;  %v3640_v49 = vmul.f32 %v18665_v46, %v13281_v37  ;;  %v2507_v4 = vadd.f32 %v13167_v60, %v2455_v22  ;;  %v18672_v12 = vld [vmem:[#allocation49_spill] sm:$0xff]  ;;  %v3604_v15 = vadd.f32 %v3588_v40, %v3552_v61  ;;  %v18677_v0 = vld [vmem:[#allocation51_spill] sm:$0xff]  ;;  %v18680_v9 = vld [vmem:[#allocation138_spill] sm:$0xff] }
 0x2d5   :  { %18670 = vst [vmem:[#allocation120_spill] sm:$0xff] %v13307_v48  ;;  %v3912_v43 = vadd.f32 %v18671_v62, %v3860_v63  ;;  %v13315_v7 = vmul.f32 %v12958_v33, %v18672_v12  ;;  %v5526_v46 = vadd.f32 %v18676_v31, %v5474_v47  ;;  %v13324_v48 = vmul.f32 %v12975_v23, %v18677_v0  ;;  %v18682_v60 = vld [vmem:[#allocation137_spill] sm:$0xff]  ;;  %v18687_v40 = vld [vmem:[#allocation95_spill] sm:$0xff] }
 0x2d6   :  { %18667 = vst [vmem:[#allocation118_spill] sm:$0xff] %v13300_v28  ;;  %v18674_v28 = vld [vmem:[#allocation50_spill] sm:$0xff]  ;;  %v13328_v63 = vmul.f32 %v18680_v9, %v18679_v2  ;;  %v2559_v62 = vadd.f32 %v13173_v21, %v2507_v4  ;;  %v18688_v31 = vld [vmem:[#allocation55_spill] sm:$0xff]  ;;  %v18690_v2 = vld [vmem:[#allocation56_spill] sm:$0xff] }
 0x2d7   :  { %18673 = vst [vmem:[#allocation126_spill] sm:$0xff] %v13315_v7  ;;  %v13319_v56 = vmul.f32 %v12973_v30, %v18674_v28  ;;  %18678 = vst [vmem:[#allocation133_spill] sm:$0xff] %v13324_v48  ;;  %v3964_v22 = vadd.f32 %v18682_v60, %v3912_v43  ;;  %v18683_v7 = vld [vmem:[#allocation53_spill] sm:$0xff]  ;;  %v5578_v61 = vadd.f32 %v18687_v40, %v5526_v46  ;;  %v18694_v4 = vld [vmem:[#allocation139_spill] sm:$0xff] }
 0x2d8   :  { %18681 = vst [vmem:[#allocation99_spill] sm:$0xff] %v13328_v63  ;;  %v13334_v12 = vmul.f32 %v12991_v57, %v18683_v7  ;;  %v13343_v48 = vmul.f32 %v12995_v39, %v18688_v31  ;;  %v13347_v63 = vmul.f32 %v13006_v36, %v18690_v2  ;;  %v18692_v43 = vld [vmem:[#allocation57_spill] sm:$0xff]  ;;  %v18697_v46 = vld [vmem:[#allocation59_spill] sm:$0xff]  ;;  %v3656_v2 = vadd.f32 %v3640_v49, %v3604_v15  ;;  %v18709_v49 = vld [vmem:[#allocation64_spill] sm:$0xff] }
 0x2d9   :  { %18675 = vst [vmem:[#allocation121_spill] sm:$0xff] %v13319_v56  ;;  %v18685_v56 = vld [vmem:[#allocation54_spill] sm:$0xff]  ;;  %v13351_v21 = vmul.f32 %v13008_v17, %v18692_v43  ;;  %v4016_v60 = vadd.f32 %v18694_v4, %v3964_v22  ;;  %v13361_v40 = vmul.f32 %v13025_v29, %v18697_v46 }
 0x2da   :  { %18684 = vst [vmem:[#allocation122_spill] sm:$0xff] %v13334_v12  ;;  %v13338_v47 = vmul.f32 %v12993_v20, %v18685_v56  ;;  %18689 = vst [vmem:[#allocation134_spill] sm:$0xff] %v13343_v48  ;;  %v2611_v12 = vadd.f32 %v13177_v34, %v2559_v62  ;;  %v18695_v56 = vld [vmem:[#allocation58_spill] sm:$0xff]  ;;  %v5601_v48 = vsel %vm45_vm0, %v5578_v61, 0  ;;  %v18704_v62 = vld [vmem:[#allocation140_spill] sm:$0xff] }
 0x2db   :  { %18691 = vst [vmem:[#allocation108_spill] sm:$0xff] %v13347_v63  ;;  %18693 = vst [vmem:[#allocation129_spill] sm:$0xff] %v13351_v21  ;;  %v18699_v63 = vld [vmem:[#allocation60_spill] sm:$0xff]  ;;  %v18701_v21 = vld [vmem:[#allocation61_spill] sm:$0xff]  ;;  %v13372_v34 = vand.u32 4294901760, %v5601_v48  ;;  %v4068_v4 = vadd.f32 %v18704_v62, %v4016_v60 }
 0x2dc   :  { %18686 = vst [vmem:[#allocation127_spill] sm:$0xff] %v13338_v47  ;;  %v13357_v47 = vmul.f32 %v13010_v45, %v18695_v56  ;;  %18698 = vst [vmem:[#allocation131_spill] sm:$0xff] %v13361_v40  ;;  %v13366_v31 = vmul.f32 %v13027_v44, %v18699_v63  ;;  %v13370_v22 = vmul.f32 %v13042_v50, %v18701_v21  ;;  %v18705_v56 = vld [vmem:[#allocation62_spill] sm:$0xff]  ;;  %v18707_v61 = vld [vmem:[#allocation63_spill] sm:$0xff] }
 0x2dd   :  { %18703 = vst [vmem:[#allocation130_spill] sm:$0xff] %v13372_v34  ;;  %v13378_v40 = vmul.f32 %v13044_v38, %v18705_v56  ;;  %v13382_v15 = vmul.f32 %v13059_v3, %v18707_v61  ;;  %v18711_v21 = vld [vmem:[#allocation65_spill] sm:$0xff]  ;;  %v18713_v63 = vld [vmem:[#allocation66_spill] sm:$0xff] }
 0x2de   :  { %18696 = vst [vmem:[#allocation110_spill] sm:$0xff] %v13357_v47  ;;  %18700 = vst [vmem:[#allocation123_spill] sm:$0xff] %v13366_v31  ;;  %v2663_v47 = vadd.f32 %v13184_v11, %v2611_v12  ;;  %v13386_v31 = vmul.f32 %v13061_v24, %v18709_v49  ;;  %v13394_v60 = vmul.f32 %v13076_v1, %v18713_v63  ;;  %v18716_v12 = vld [vmem:[#allocation141_spill] sm:$0xff] }
 0x2df   :  { %18702 = vst [vmem:[#allocation132_spill] sm:$0xff] %v13370_v22  ;;  %18706 = vst [vmem:[#allocation136_spill] sm:$0xff] %v13378_v40  ;;  %v13390_v22 = vmul.f32 %v13063_v5, %v18711_v21  ;;  %v13397_v11 = vsub.f32 %v5601_v48, %v13372_v34  ;;  %v4120_v62 = vadd.f32 %v18716_v12, %v4068_v4  ;;  %v2889_v12 = vld [vmem:[#allocation3 + $0x72] sm:$0xff] }
 0x2e0   :  { %18708 = vst [vmem:[#allocation93_spill] sm:$0xff] %v13382_v15  ;;  %18710 = vst [vmem:[#allocation138_spill] sm:$0xff] %v13386_v31  ;;  %v2715_v40 = vadd.f32 %v13188_v27, %v2663_v47  ;;  %v18717_v15 = vld [vmem:[#allocation67_spill] sm:$0xff]  ;;  %v13405_v49 = vadd.f32 %v3692_v32, %v3656_v2  ;;  %v13417_v48 = vmul.f32 %v18423_v54, %v12791_v8  ;;  %v18724_v47 = vld [vmem:[#allocation142_spill] sm:$0xff] }
 0x2e1   :  { %18712 = vst [vmem:[#allocation137_spill] sm:$0xff] %v13390_v22  ;;  %18714 = vst [vmem:[#allocation95_spill] sm:$0xff] %v13394_v60  ;;  %v13403_v61 = vmul.f32 %v18717_v15, %v12735_v13  ;;  %v2837_v31 = vld [vmem:[#allocation3 + $0x71] sm:$0xff]  ;;  %v13409_v22 = vmul.f32 %v18420_v26, %v12757_v52  ;;  %v18721_v60 = vld [vmem:[#allocation69_spill] sm:$0xff]  ;;  %v4172_v13 = vadd.f32 %v18724_v47, %v4120_v62 }
 0x2e2   :  { %18715 = vst [vmem:[#allocation139_spill] sm:$0xff] %v13397_v11  ;;  %18719 = vst [vmem:[#allocation141_spill] sm:$0xff] %v13405_v49  ;;  %v13413_v63 = vmul.f32 %v18721_v60, %v12774_v18  ;;  %v2767_v4 = vadd.f32 %v13195_v51, %v2715_v40  ;;  %v10885_v2 = vld [vmem:[%s17571_s1 + $0x8] sm:$0xff]  ;;  %v18725_v52 = vld [vmem:[#allocation71_spill] sm:$0xff] }
 0x2e3   :  { %18718 = vst [vmem:[#allocation140_spill] sm:$0xff] %v13403_v61  ;;  %18720 = vst [vmem:[#allocation167_spill] sm:$0xff] %v13409_v22  ;;  %v13426_v32 = vsub.f32 %v10885_v2, %v18725_v52  ;;  %v18727_v18 = vld [vmem:[#allocation72_spill] sm:$0xff]  ;;  %v18729_v8 = vld [vmem:[#allocation87_spill] sm:$0xff]  ;;  %v18736_v22 = vand.u32 4294901760, %v13397_v11 }
 0x2e4   :  { %18722 = vst [vmem:[#allocation168_spill] sm:$0xff] %v13413_v63  ;;  %18723 = vst [vmem:[#allocation169_spill] sm:$0xff] %v13417_v48  ;;  %v13430_v34 = vmul.f32 %v18727_v18, %v12808_v25  ;;  %v18730_v48 = vld [vmem:[#allocation73_spill] sm:$0xff]  ;;  %v18732_v27 = vld [vmem:[#allocation104_spill] sm:$0xff] }
 0x2e5   :  { %18726 = vst [vmem:[#allocation142_spill] sm:$0xff] %v13426_v32  ;;  %v13434_v63 = vmul.f32 %v18730_v48, %v18729_v8  ;;  %v18733_v62 = vld [vmem:[#allocation74_spill] sm:$0xff]  ;;  %v18735_v51 = vld [vmem:[#allocation32_spill] sm:$0xff]  ;;  %v5724_v2 = vsub.f32 %v13397_v11, %v18736_v22  ;;  %v18737_v52 = vld [vmem:[#allocation143_spill] sm:$0xff]  ;;  %v13447_v25 = vand.u32 4294901760, %v13426_v32 }
 0x2e6   :  { %18728 = vst [vmem:[#allocation170_spill] sm:$0xff] %v13430_v34  ;;  %v13438_v47 = vmul.f32 %v18733_v62, %v18732_v27  ;;  %v2857_v40 = vmul.f32 %v18735_v51, %v2837_v31  ;;  %v4225_v61 = vadd.f32 %v18737_v52, %v4172_v13  ;;  %v18738_v49 = vld [vmem:[#allocation111_spill] sm:$0xff]  ;;  %v18740_v34 = vld [vmem:[#allocation105_spill] sm:$0xff]  ;;  %v18743_v48 = vld [vmem:[#allocation106_spill] sm:$0xff] }
 0x2e7   :  { %18731 = vst [vmem:[#allocation87_spill] sm:$0xff] %v13434_v63  ;;  %v2820_v54 = vadd.f32 %v18738_v49, %v2767_v4  ;;  %18739 = vst [vmem:[#allocation143_spill] sm:$0xff] %v13447_v25  ;;  %v18741_v8 = vld [vmem:[#allocation75_spill] sm:$0xff]  ;;  %v18744_v27 = vld [vmem:[#allocation76_spill] sm:$0xff]  ;;  %v5725_v22 = vand.u32 4294901760, %v5724_v2  ;;  %v5875_v4 = vsub.f32 %v13426_v32, %v13447_v25 }
 0x2e8   :  { %18734 = vst [vmem:[#allocation104_spill] sm:$0xff] %v13438_v47  ;;  %v13451_v63 = vmul.f32 %v18741_v8, %v18740_v34  ;;  %v13455_v47 = vmul.f32 %v18744_v27, %v18743_v48  ;;  %v18746_v31 = vld [vmem:[#allocation101_spill] sm:$0xff]  ;;  %v18748_v11 = vld [vmem:[#allocation144_spill] sm:$0xff]  ;;  %v18749_v52 = vld [vmem:[#allocation94_spill] sm:$0xff] }
 0x2e9   :  { %v2873_v51 = vadd.f32 %v2857_v40, %v18746_v31  ;;  %v18747_v62 = vld [vmem:[#allocation33_spill] sm:$0xff]  ;;  %v4277_v13 = vadd.f32 %v18748_v11, %v4225_v61  ;;  %v2872_v49 = vadd.f32 %v18749_v52, %v2820_v54  ;;  %v18750_v60 = vld [vmem:[#allocation166_spill] sm:$0xff]  ;;  %9964 = vmatmul.mubr.f32.vlgmr.msra.gmra.mrb[0].mxu1 %v5725_v22  ;;  %v18760_v52 = vld [vmem:[#allocation79_spill] sm:$0xff] }
 0x2ea   :  { %18742 = vst [vmem:[#allocation111_spill] sm:$0xff] %v13451_v63  ;;  %18745 = vst [vmem:[#allocation105_spill] sm:$0xff] %v13455_v47  ;;  %v2909_v18 = vmul.f32 %v18747_v62, %v2889_v12  ;;  %v18751_v26 = vld [vmem:[#allocation77_spill] sm:$0xff]  ;;  %v18753_v63 = vld [vmem:[#allocation92_spill] sm:$0xff]  ;;  %v5876_v62 = vand.u32 4294901760, %v5875_v4 }
 0x2eb   :  { %v13465_v34 = vmul.f32 %v18751_v26, %v18750_v60  ;;  %v18754_v8 = vld [vmem:[#allocation78_spill] sm:$0xff]  ;;  %v18757_v2 = vld [vmem:[#allocation145_spill] sm:$0xff] }
 0x2ec   :  { %v13469_v48 = vmul.f32 %v18754_v8, %v18753_v63  ;;  %v2925_v47 = vadd.f32 %v2909_v18, %v2873_v51  ;;  %v18756_v40 = vld [vmem:[#allocation34_spill] sm:$0xff]  ;;  %v4329_v61 = vadd.f32 %v18757_v2, %v4277_v13  ;;  %v18758_v11 = vld [vmem:[#allocation113_spill] sm:$0xff]  ;;  %9987 = vmatprep.subr.mxu1 %v5876_v62 }
 0x2ed   :  { %18752 = vst [vmem:[#allocation106_spill] sm:$0xff] %v13465_v34  ;;  %v2961_v12 = vmul.f32 %v12929_v53, %v18756_v40  ;;  %v2924_v54 = vadd.f32 %v18758_v11, %v2872_v49  ;;  %v18759_v31 = vld [vmem:[#allocation102_spill] sm:$0xff]  ;;  %v18762_v34 = vld [vmem:[#allocation80_spill] sm:$0xff]  ;;  %v18766_v53 = vld [vmem:[#allocation35_spill] sm:$0xff]  ;;  %9988 = vmatpush3.msra.mxu1 %v5876_v62 }
 0x2ee   :  { %18755 = vst [vmem:[#allocation101_spill] sm:$0xff] %v13469_v48  ;;  %v13477_v25 = vmul.f32 %v18760_v52, %v18759_v31  ;;  %v13481_v26 = vmul.f32 %v18762_v34, %v13209_v41  ;;  %v18764_v48 = vld [vmem:[#allocation81_spill] sm:$0xff]  ;;  %v3013_v22 = vmul.f32 %v18656_v10, %v18766_v53  ;;  %v18767_v13 = vld [vmem:[#allocation146_spill] sm:$0xff]  ;;  %v18768_v49 = vld [vmem:[#allocation88_spill] sm:$0xff]  ;;  %10013 = vmatprep.subr.mxu1 %v13426_v32 }
 0x2ef   :  { %v13485_v18 = vmul.f32 %v18764_v48, %v13227_v19  ;;  %v2977_v51 = vadd.f32 %v2961_v12, %v2925_v47  ;;  %v4381_v2 = vadd.f32 %v18767_v13, %v4329_v61  ;;  %v2976_v11 = vadd.f32 %v18768_v49, %v2924_v54  ;;  %v18769_v40 = vld [vmem:[#allocation84_spill] sm:$0xff]  ;;  %v18771_v4 = vld [vmem:[#allocation85_spill] sm:$0xff]  ;;  %v18778_v13 = vld [vmem:[#allocation147_spill] sm:$0xff] }
 0x2f0   :  { %18761 = vst [vmem:[#allocation144_spill] sm:$0xff] %v13477_v25  ;;  %18763 = vst [vmem:[#allocation94_spill] sm:$0xff] %v13481_v26  ;;  %v13493_v25 = vmul.f32 %v18769_v40, %v13245_v55  ;;  %v13497_v34 = vmul.f32 %v18771_v4, %v13270_v59  ;;  %v18773_v26 = vld [vmem:[#allocation86_spill] sm:$0xff]  ;;  %v18775_v47 = vld [vmem:[#allocation112_spill] sm:$0xff] }
 0x2f1   :  { %18765 = vst [vmem:[#allocation166_spill] sm:$0xff] %v13485_v18  ;;  %v13501_v18 = vmul.f32 %v18773_v26, %v13281_v37  ;;  %v13505_v10 = vmul.f32 %v18775_v47, %v13283_v16  ;;  %v3029_v12 = vadd.f32 %v3013_v22, %v2977_v51  ;;  %v18777_v61 = vld [vmem:[#allocation36_spill] sm:$0xff]  ;;  %v4433_v49 = vadd.f32 %v18778_v13, %v4381_v2  ;;  %v18780_v4 = vld [vmem:[#allocation37_spill] sm:$0xff]  ;;  %v18781_v47 = vld [vmem:[#allocation135_spill] sm:$0xff] }
 0x2f2   :  { %18770 = vst [vmem:[#allocation92_spill] sm:$0xff] %v13493_v25  ;;  %18772 = vst [vmem:[#allocation145_spill] sm:$0xff] %v13497_v34  ;;  %v3065_v54 = vmul.f32 %v18659_v6, %v18777_v61  ;;  %v18779_v53 = vld [vmem:[#allocation96_spill] sm:$0xff]  ;;  %v3117_v34 = vmul.f32 %v18662_v42, %v18780_v4  ;;  %v3169_v26 = vmul.f32 %v18666_v14, %v18638_v35  ;;  %v18783_v6 = vld [vmem:[#allocation41_spill] sm:$0xff] }
 0x2f3   :  { %18774 = vst [vmem:[#allocation113_spill] sm:$0xff] %v13501_v18  ;;  %18776 = vst [vmem:[#allocation102_spill] sm:$0xff] %v13505_v10  ;;  %v3028_v25 = vadd.f32 %v18779_v53, %v2976_v11  ;;  %v3221_v62 = vmul.f32 %v18781_v47, %v18642_v58  ;;  %v18782_v51 = vld [vmem:[#allocation40_spill] sm:$0xff]  ;;  %v3325_v2 = vmul.f32 %v12973_v30, %v18783_v6  ;;  %v18785_v11 = vld [vmem:[#allocation119_spill] sm:$0xff] }
 0x2f4   :  { %v3081_v18 = vadd.f32 %v3065_v54, %v3029_v12  ;;  %v3273_v22 = vmul.f32 %v12958_v33, %v18782_v51  ;;  %v18784_v13 = vld [vmem:[#allocation148_spill] sm:$0xff]  ;;  %v18786_v42 = vld [vmem:[#allocation42_spill] sm:$0xff]  ;;  %v18787_v14 = vld [vmem:[#allocation43_spill] sm:$0xff] }
 0x2f5   :  { %v4485_v53 = vadd.f32 %v18784_v13, %v4433_v49  ;;  %v3080_v61 = vadd.f32 %v18785_v11, %v3028_v25  ;;  %v3377_v4 = vmul.f32 %v12975_v23, %v18786_v42  ;;  %v3429_v32 = vmul.f32 %v18680_v9, %v18787_v14  ;;  %v18788_v54 = vld [vmem:[#allocation44_spill] sm:$0xff]  ;;  %v18789_v58 = vld [vmem:[#allocation45_spill] sm:$0xff]  ;;  %v18790_v30 = vld [vmem:[#allocation46_spill] sm:$0xff] }
 0x2f6   :  { %v3133_v12 = vadd.f32 %v3117_v34, %v3081_v18  ;;  %v13530_v47 = vmul.f32 %v12991_v57, %v18788_v54  ;;  %v13534_v33 = vmul.f32 %v12993_v20, %v18789_v58  ;;  %v13538_v49 = vmul.f32 %v12995_v39, %v18790_v30  ;;  %v18791_v25 = vld [vmem:[#allocation149_spill] sm:$0xff]  ;;  %v18793_v42 = vld [vmem:[#allocation47_spill] sm:$0xff]  ;;  %v18794_v34 = vld [vmem:[#allocation48_spill] sm:$0xff] }
 0x2f7   :  { %v4537_v13 = vadd.f32 %v18791_v25, %v4485_v53  ;;  %v18792_v11 = vld [vmem:[#allocation97_spill] sm:$0xff]  ;;  %v13544_v9 = vmul.f32 %v13006_v36, %v18793_v42  ;;  %v13548_v57 = vmul.f32 %v13008_v17, %v18794_v34  ;;  %v13556_v39 = vmul.f32 %v13025_v29, %v18674_v28  ;;  %v4191_v53 = vld [vmem:[#allocation3 + $0xa0] sm:$0xff]  ;;  %v18798_v36 = vld [vmem:[#allocation150_spill] sm:$0xff] }
 0x2f8   :  { %v3132_v23 = vadd.f32 %v18792_v11, %v3080_v61  ;;  %v3185_v18 = vadd.f32 %v3169_v26, %v3133_v12  ;;  %v18795_v54 = vld [vmem:[#allocation49_spill] sm:$0xff]  ;;  %v13560_v61 = vmul.f32 %v13027_v44, %v18677_v0  ;;  %v18799_v11 = vld [vmem:[#allocation114_spill] sm:$0xff]  ;;  %v18800_v17 = vld [vmem:[#allocation52_spill] sm:$0xff] }
 0x2f9   :  { %v13552_v20 = vmul.f32 %v13010_v45, %v18795_v54  ;;  %18796 = vst [vmem:[#allocation146_spill] sm:$0xff] %v13556_v39  ;;  %v4589_v25 = vadd.f32 %v18798_v36, %v4537_v13  ;;  %v13566_v26 = vmul.f32 %v13042_v50, %v18800_v17  ;;  %v13570_v45 = vmul.f32 %v13044_v38, %v18683_v7  ;;  %v4243_v12 = vld [vmem:[#allocation3 + $0xa1] sm:$0xff]  ;;  %v18803_v44 = vld [vmem:[#allocation54_spill] sm:$0xff]  ;;  %v18805_v13 = vld [vmem:[#allocation55_spill] sm:$0xff] }
 0x2fa   :  { %18797 = vst [vmem:[#allocation88_spill] sm:$0xff] %v13560_v61  ;;  %v3184_v42 = vadd.f32 %v18799_v11, %v3132_v23  ;;  %v4295_v29 = vld [vmem:[#allocation3 + $0xa2] sm:$0xff]  ;;  %v3237_v30 = vadd.f32 %v3221_v62, %v3185_v18  ;;  %v13576_v58 = vmul.f32 %v13059_v3, %v18803_v44  ;;  %v13580_v23 = vmul.f32 %v13061_v24, %v18805_v13  ;;  %v18809_v14 = vld [vmem:[#allocation151_spill] sm:$0xff]  ;;  %v18812_v18 = vld [vmem:[#allocation58_spill] sm:$0xff] }
 0x2fb   :  { %18801 = vst [vmem:[#allocation112_spill] sm:$0xff] %v13566_v26  ;;  %18802 = vst [vmem:[#allocation147_spill] sm:$0xff] %v13570_v45  ;;  %v13572_v34 = vld [vmem:[#allocation3 + $0xa3] sm:$0xff]  ;;  %v4641_v6 = vadd.f32 %v18809_v14, %v4589_v25  ;;  %v18810_v51 = vld [vmem:[#allocation103_spill] sm:$0xff]  ;;  %v13594_v3 = vmul.f32 %v13076_v1, %v18692_v43  ;;  %v13597_v35 = vmul.f32 %v18812_v18, %v4191_v53 }
 0x2fc   :  { %18804 = vst [vmem:[#allocation96_spill] sm:$0xff] %v13576_v58  ;;  %18806 = vst [vmem:[#allocation135_spill] sm:$0xff] %v13580_v23  ;;  %v18807_v36 = vld [vmem:[#allocation56_spill] sm:$0xff]  ;;  %v3236_v62 = vadd.f32 %v18810_v51, %v3184_v42  ;;  %v13606_v23 = vmul.f32 %v18697_v46, %v4243_v12  ;;  %v18817_v51 = vld [vmem:[#allocation61_spill] sm:$0xff] }
 0x2fd   :  { %v13584_v50 = vmul.f32 %v13063_v5, %v18807_v36  ;;  %v13586_v11 = vld [vmem:[#allocation3 + $0xa4] sm:$0xff]  ;;  %18811 = vst [vmem:[#allocation119_spill] sm:$0xff] %v13594_v3  ;;  %18813 = vst [vmem:[#allocation149_spill] sm:$0xff] %v13597_v35  ;;  %v13613_v1 = vmul.f32 %v18817_v51, %v13572_v34  ;;  %v18820_v35 = vld [vmem:[#allocation115_spill] sm:$0xff] }
 0x2fe   :  { %v13588_v38 = vld [vmem:[#allocation3 + $0xa5] sm:$0xff]  ;;  %18814 = vst [vmem:[#allocation97_spill] sm:$0xff] %v13606_v23  ;;  %v3288_v58 = vadd.f32 %v18820_v35, %v3236_v62  ;;  %v13619_v45 = vmul.f32 %v18705_v56, %v13586_v11  ;;  %v18829_v62 = vld [vmem:[#allocation154_spill] sm:$0xff] }
 0x2ff   :  { %18808 = vst [vmem:[#allocation148_spill] sm:$0xff] %v13584_v50  ;;  %v13599_v24 = vld [vmem:[#allocation3 + $0xa6] sm:$0xff]  ;;  %v3289_v50 = vadd.f32 %v3273_v22, %v3237_v30  ;;  %18818 = vst [vmem:[#allocation114_spill] sm:$0xff] %v13613_v1  ;;  %v18822_v22 = vld [vmem:[#allocation63_spill] sm:$0xff] }
 0x300   :  { %v13601_v10 = vld [vmem:[#allocation3 + $0xa7] sm:$0xff]  ;;  %18821 = vst [vmem:[#allocation151_spill] sm:$0xff] %v13619_v45  ;;  %v13623_v30 = vmul.f32 %v18822_v22, %v13588_v38  ;;  %v18830_v45 = vld [vmem:[#allocation107_spill] sm:$0xff] }
 0x301   :  { %v13603_v5 = vld [vmem:[#allocation3 + $0xa8] sm:$0xff]  ;;  %v18815_v14 = vld [vmem:[#allocation60_spill] sm:$0xff]  ;;  %v3341_v23 = vadd.f32 %v3325_v2, %v3289_v50  ;;  %v13631_v1 = vmul.f32 %v18711_v21, %v13601_v10  ;;  %v3340_v61 = vadd.f32 %v18830_v45, %v3288_v58  ;;  %v18838_v58 = vld [vmem:[#allocation155_spill] sm:$0xff] }
 0x302   :  { %v13609_v25 = vmul.f32 %v18815_v14, %v4295_v29  ;;  %v18819_v42 = vld [vmem:[#allocation152_spill] sm:$0xff]  ;;  %18823 = vst [vmem:[#allocation103_spill] sm:$0xff] %v13623_v30  ;;  %v13641_v30 = vmul.f32 %v18717_v15, %v18750_v60  ;;  %v18834_v39 = vld [vmem:[#allocation69_spill] sm:$0xff] }
 0x303   :  { %v4694_v3 = vadd.f32 %v18819_v42, %v4641_v6  ;;  %v18824_v26 = vld [vmem:[#allocation64_spill] sm:$0xff]  ;;  %18826 = vst [vmem:[#allocation115_spill] sm:$0xff] %v13631_v1  ;;  %v18827_v6 = vld [vmem:[#allocation66_spill] sm:$0xff]  ;;  %v13649_v1 = vmul.f32 %v18834_v39, %v18759_v31 }
 0x304   :  { %18816 = vst [vmem:[#allocation150_spill] sm:$0xff] %v13609_v25  ;;  %v13627_v25 = vmul.f32 %v18824_v26, %v13599_v24  ;;  %v13635_v35 = vmul.f32 %v18827_v6, %v13603_v5  ;;  %18831 = vst [vmem:[#allocation154_spill] sm:$0xff] %v13641_v30  ;;  %v18832_v2 = vld [vmem:[#allocation68_spill] sm:$0xff]  ;;  %v18836_v6 = vld [vmem:[#allocation70_spill] sm:$0xff] }
 0x305   :  { %v4746_v42 = vadd.f32 %v18829_v62, %v4694_v3  ;;  %v13645_v50 = vmul.f32 %v18832_v2, %v18753_v63  ;;  %18835 = vst [vmem:[#allocation172_spill] sm:$0xff] %v13649_v1  ;;  %v3743_v3 = vmul.f32 %v4191_v53, %v18795_v54  ;;  %v18839_v62 = vld [vmem:[#allocation116_spill] sm:$0xff]  ;;  %v18844_v1 = vld [vmem:[#allocation74_spill] sm:$0xff]  ;;  %v3795_v53 = vmul.f32 %v4243_v12, %v18674_v28 }
 0x306   :  { %18825 = vst [vmem:[#allocation152_spill] sm:$0xff] %v13627_v25  ;;  %18828 = vst [vmem:[#allocation171_spill] sm:$0xff] %v13635_v35  ;;  %v3393_v25 = vadd.f32 %v3377_v4, %v3341_v23  ;;  %v13653_v35 = vmul.f32 %v18836_v6, %v13209_v41  ;;  %v3392_v15 = vadd.f32 %v18839_v62, %v3340_v61  ;;  %v18840_v30 = vld [vmem:[#allocation72_spill] sm:$0xff]  ;;  %v18842_v4 = vld [vmem:[#allocation73_spill] sm:$0xff] }
 0x307   :  { %18833 = vst [vmem:[#allocation107_spill] sm:$0xff] %v13645_v50  ;;  %v4798_v45 = vadd.f32 %v18838_v58, %v4746_v42  ;;  %v13660_v21 = vmul.f32 %v18840_v30, %v13227_v19  ;;  %v13664_v23 = vmul.f32 %v18842_v4, %v13245_v55  ;;  %v13668_v39 = vmul.f32 %v18844_v1, %v13270_v59  ;;  %v18847_v42 = vld [vmem:[#allocation156_spill] sm:$0xff]  ;;  %v18848_v61 = vld [vmem:[#allocation98_spill] sm:$0xff]  ;;  %v18849_v30 = vld [vmem:[#allocation75_spill] sm:$0xff] }
 0x308   :  { %18837 = vst [vmem:[#allocation173_spill] sm:$0xff] %v13653_v35  ;;  %v3445_v50 = vadd.f32 %v3429_v32, %v3393_v25  ;;  %v18846_v35 = vld [vmem:[#allocation100_spill] sm:$0xff]  ;;  %v3444_v62 = vadd.f32 %v18848_v61, %v3392_v15  ;;  %v18854_v61 = vld [vmem:[#allocation157_spill] sm:$0xff] }
 0x309   :  { %18841 = vst [vmem:[#allocation155_spill] sm:$0xff] %v13660_v21  ;;  %18843 = vst [vmem:[#allocation116_spill] sm:$0xff] %v13664_v23  ;;  %v3759_v6 = vadd.f32 %v3743_v3, %v18846_v35  ;;  %v4850_v58 = vadd.f32 %v18847_v42, %v4798_v45  ;;  %v13676_v21 = vmul.f32 %v18849_v30, %v13281_v37  ;;  %v13682_v32 = vld [vmem:[#allocation3 + $0xc0] sm:$0xff]  ;;  %v18852_v35 = vld [vmem:[#allocation77_spill] sm:$0xff] }
 0x30a   :  { %18845 = vst [vmem:[#allocation174_spill] sm:$0xff] %v13668_v39  ;;  %v13680_v23 = vmul.f32 %v18744_v27, %v13283_v16  ;;  %v3497_v25 = vadd.f32 %v13530_v47, %v3445_v50  ;;  %v13687_v3 = vmul.f32 %v18852_v35, %v13682_v32  ;;  %v13689_v12 = vld [vmem:[#allocation3 + $0xc1] sm:$0xff]  ;;  %v3847_v42 = vmul.f32 %v4295_v29, %v18677_v0 }
 0x30b   :  { %18850 = vst [vmem:[#allocation100_spill] sm:$0xff] %v13676_v21  ;;  %v13691_v45 = vld [vmem:[#allocation3 + $0xc2] sm:$0xff]  ;;  %v3811_v15 = vadd.f32 %v3795_v53, %v3759_v6  ;;  %v4902_v21 = vadd.f32 %v18854_v61, %v4850_v58  ;;  %v18860_v61 = vld [vmem:[#allocation82_spill] sm:$0xff] }
 0x30c   :  { %18851 = vst [vmem:[#allocation156_spill] sm:$0xff] %v13680_v23  ;;  %18853 = vst [vmem:[#allocation98_spill] sm:$0xff] %v13687_v3  ;;  %v18855_v39 = vld [vmem:[#allocation124_spill] sm:$0xff]  ;;  %v13698_v23 = vmul.f32 %v18754_v8, %v13689_v12  ;;  %v13702_v47 = vmul.f32 %v18760_v52, %v13691_v45  ;;  %v3549_v3 = vadd.f32 %v13534_v33, %v3497_v25  ;;  %v18861_v52 = vld [vmem:[#allocation117_spill] sm:$0xff] }
 0x30d   :  { %v3496_v27 = vadd.f32 %v18855_v39, %v3444_v62  ;;  %v13704_v50 = vld [vmem:[#allocation3 + $0xc3] sm:$0xff]  ;;  %v3863_v39 = vadd.f32 %v3847_v42, %v3811_v15  ;;  %v3899_v62 = vmul.f32 %v13572_v34, %v18800_v17 }
 0x30e   :  { %18856 = vst [vmem:[#allocation157_spill] sm:$0xff] %v13698_v23  ;;  %18857 = vst [vmem:[#allocation124_spill] sm:$0xff] %v13702_v47  ;;  %v18858_v6 = vld [vmem:[#allocation80_spill] sm:$0xff]  ;;  %v4954_v23 = vadd.f32 %v18860_v61, %v4902_v21  ;;  %v18864_v15 = vld [vmem:[#allocation85_spill] sm:$0xff] }
 0x30f   :  { %v13709_v53 = vmul.f32 %v18858_v6, %v13704_v50  ;;  %v13711_v29 = vld [vmem:[#allocation3 + $0xc4] sm:$0xff]  ;;  %v3548_v47 = vadd.f32 %v18861_v52, %v3496_v27  ;;  %v3915_v27 = vadd.f32 %v3899_v62, %v3863_v39  ;;  %v3951_v52 = vmul.f32 %v13586_v11, %v18683_v7  ;;  %v18866_v61 = vld [vmem:[#allocation158_spill] sm:$0xff] }
 0x310   :  { %v13713_v58 = vld [vmem:[#allocation3 + $0xc5] sm:$0xff]  ;;  %v13721_v8 = vmul.f32 %v18764_v48, %v13711_v29  ;;  %v18868_v48 = vld [vmem:[#allocation86_spill] sm:$0xff] }
 0x311   :  { %18859 = vst [vmem:[#allocation175_spill] sm:$0xff] %v13709_v53  ;;  %v13725_v33 = vmul.f32 %v18769_v40, %v13713_v58  ;;  %v13727_v25 = vld [vmem:[#allocation3 + $0xc6] sm:$0xff]  ;;  %v3601_v53 = vadd.f32 %v13538_v49, %v3549_v3  ;;  %v13749_v49 = vld [vmem:[%s17573_s2 + $0x50] ss:$0 sm:$0xff]  ;;  %v3967_v11 = vadd.f32 %v3951_v52, %v3915_v27 }
 0x312   :  { %18862 = vst [vmem:[#allocation82_spill] sm:$0xff] %v13721_v8  ;;  %v13732_v42 = vmul.f32 %v18864_v15, %v13727_v25  ;;  %v13734_v34 = vld [vmem:[#allocation3 + $0xc7] sm:$0xff]  ;;  %v5006_v8 = vadd.f32 %v18866_v61, %v4954_v23  ;;  %v4003_v23 = vmul.f32 %v13588_v38, %v18803_v44  ;;  %v18873_v61 = vld [vmem:[#allocation118_spill] sm:$0xff]  ;;  %v4264_v38 = vmul.f32 %v18697_v46, %v18753_v63 }
 0x313   :  { %18863 = vst [vmem:[#allocation117_spill] sm:$0xff] %v13725_v33  ;;  %v13736_v21 = vld [vmem:[#allocation3 + $0xc8] sm:$0xff]  ;;  %v13744_v6 = vmul.f32 %v18868_v48, %v13734_v34  ;;  %v3653_v39 = vadd.f32 %v13544_v9, %v3601_v53  ;;  %v4212_v53 = vmul.f32 %v18812_v18, %v18750_v60 }
 0x314   :  { %18865 = vst [vmem:[#allocation176_spill] sm:$0xff] %v13732_v42  ;;  %v18867_v40 = vld [vmem:[#allocation109_spill] sm:$0xff]  ;;  %v13753_v3 = vmul.f32 %v13749_v49, %v13736_v21  ;;  %v4107_v42 = vmul.f32 %v13601_v10, %v18807_v36  ;;  %v4019_v9 = vadd.f32 %v4003_v23, %v3967_v11  ;;  %v4368_v10 = vmul.f32 %v18817_v51, %v13209_v41 }
 0x315   :  { %v3600_v33 = vadd.f32 %v18867_v40, %v3548_v47  ;;  %18869 = vst [vmem:[#allocation158_spill] sm:$0xff] %v13744_v6  ;;  %18870 = vst [vmem:[#allocation109_spill] sm:$0xff] %v13749_v49  ;;  %v4055_v40 = vmul.f32 %v13599_v24, %v18805_v13  ;;  %v18872_v47 = vld [vmem:[#allocation159_spill] sm:$0xff]  ;;  %v4159_v49 = vmul.f32 %v13603_v5, %v18692_v43  ;;  %v18874_v24 = vld [vmem:[#allocation160_spill] sm:$0xff] }
 0x316   :  { %18871 = vst [vmem:[#allocation177_spill] sm:$0xff] %v13753_v3  ;;  %v5058_v62 = vadd.f32 %v18872_v47, %v5006_v8  ;;  %v3705_v3 = vadd.f32 %v13548_v57, %v3653_v39  ;;  %v18875_v8 = vld [vmem:[#allocation120_spill] sm:$0xff]  ;;  %v4420_v39 = vmul.f32 %v18705_v56, %v13227_v19  ;;  %v13782_v11 = vmul.f32 %v18822_v22, %v13245_v55  ;;  %v18876_v23 = vld [vmem:[#allocation89_spill] sm:$0xff]  ;;  %v18882_v22 = vld [vmem:[#allocation67_spill] sm:$0xff] }
 0x317   :  { %v3652_v6 = vadd.f32 %v18873_v61, %v3600_v33  ;;  %v4316_v33 = vmul.f32 %v18815_v14, %v18759_v31  ;;  %v4071_v57 = vadd.f32 %v4055_v40, %v4019_v9  ;;  %v13788_v61 = vmul.f32 %v18824_v26, %v13270_v59  ;;  %v18880_v9 = vld [vmem:[#allocation66_spill] sm:$0xff] }
 0x318   :  { %v5110_v27 = vadd.f32 %v18874_v24, %v5058_v62  ;;  %v3758_v5 = vadd.f32 %v13552_v20, %v3705_v3  ;;  %v18877_v62 = vld [vmem:[#allocation126_spill] sm:$0xff]  ;;  %v18878_v24 = vld [vmem:[#allocation65_spill] sm:$0xff]  ;;  %v13797_v56 = vmul.f32 %v18880_v9, %v13283_v16  ;;  %v13807_v51 = vmul.f32 %v13689_v12, %v18832_v2  ;;  %v18893_v2 = vld [vmem:[#allocation72_spill] sm:$0xff] }
 0x319   :  { %v3704_v52 = vadd.f32 %v18875_v8, %v3652_v6  ;;  %v13792_v8 = vmul.f32 %v18878_v24, %v13281_v37  ;;  %v18879_v20 = vld [vmem:[#allocation146_spill] sm:$0xff]  ;;  %v4123_v40 = vadd.f32 %v4107_v42, %v4071_v57  ;;  %v18886_v24 = vld [vmem:[#allocation69_spill] sm:$0xff]  ;;  %v18888_v42 = vld [vmem:[#allocation88_spill] sm:$0xff] }
 0x31a   :  { %v5163_v47 = vadd.f32 %v18876_v23, %v5110_v27  ;;  %v3810_v3 = vadd.f32 %v18879_v20, %v3758_v5  ;;  %18881 = vst [vmem:[#allocation159_spill] sm:$0xff] %v13797_v56  ;;  %v13801_v27 = vmul.f32 %v13682_v32, %v18882_v22  ;;  %18885 = vst [vmem:[#allocation118_spill] sm:$0xff] %v13807_v51  ;;  %v18889_v9 = vld [vmem:[#allocation70_spill] sm:$0xff] }
 0x31b   :  { %v3757_v6 = vadd.f32 %v18877_v62, %v3704_v52  ;;  %v18883_v52 = vld [vmem:[#allocation83_spill] sm:$0xff]  ;;  %v18884_v62 = vld [vmem:[#allocation121_spill] sm:$0xff]  ;;  %v13811_v5 = vmul.f32 %v13691_v45, %v18886_v24  ;;  %v4175_v20 = vadd.f32 %v4159_v49, %v4123_v40  ;;  %v13816_v56 = vmul.f32 %v13704_v50, %v18889_v9  ;;  %v18896_v49 = vld [vmem:[#allocation112_spill] sm:$0xff] }
 0x31c   :  { %v5215_v23 = vadd.f32 %v18883_v52, %v5163_v47  ;;  %v3862_v57 = vadd.f32 %v18888_v42, %v3810_v3  ;;  %v3744_v47 = vmul.f32 %v18795_v54, %v18750_v60  ;;  %v18891_v52 = vld [vmem:[#allocation161_spill] sm:$0xff]  ;;  %v13824_v51 = vmul.f32 %v13711_v29, %v18893_v2  ;;  %v18898_v54 = vld [vmem:[#allocation162_spill] sm:$0xff] }
 0x31d   :  { %v3809_v26 = vadd.f32 %v18884_v62, %v3757_v6  ;;  %18887 = vst [vmem:[#allocation160_spill] sm:$0xff] %v13811_v5  ;;  %18890 = vst [vmem:[#allocation120_spill] sm:$0xff] %v13816_v56  ;;  %v18892_v62 = vld [vmem:[#allocation133_spill] sm:$0xff]  ;;  %v13828_v5 = vmul.f32 %v13713_v58, %v18842_v4  ;;  %v4228_v40 = vadd.f32 %v4212_v53, %v4175_v20  ;;  %v13845_v20 = vld [vmem:[#allocation3 + $0xd0] sm:$0xff] }
 0x31e   :  { %v5267_v6 = vadd.f32 %v18891_v52, %v5215_v23  ;;  %18894 = vst [vmem:[#allocation89_spill] sm:$0xff] %v13824_v51  ;;  %v3914_v3 = vadd.f32 %v18896_v49, %v3862_v57  ;;  %v18897_v42 = vld [vmem:[#allocation153_spill] sm:$0xff]  ;;  %v3796_v60 = vmul.f32 %v18674_v28, %v18753_v63  ;;  %v18899_v52 = vld [vmem:[#allocation99_spill] sm:$0xff]  ;;  %v13842_v51 = vmul.f32 %v13734_v34, %v18849_v30 }
 0x31f   :  { %v3861_v22 = vadd.f32 %v18892_v62, %v3809_v26  ;;  %18895 = vst [vmem:[#allocation126_spill] sm:$0xff] %v13828_v5  ;;  %v3760_v56 = vadd.f32 %v3744_v47, %v18897_v42  ;;  %v13838_v62 = vmul.f32 %v13727_v25, %v18844_v1  ;;  %v18902_v5 = vld [vmem:[#allocation147_spill] sm:$0xff]  ;;  %v4280_v53 = vadd.f32 %v4264_v38, %v4228_v40  ;;  %v18905_v42 = vld [vmem:[#allocation76_spill] sm:$0xff] }
 0x320   :  { %v5319_v23 = vadd.f32 %v18898_v54, %v5267_v6  ;;  %18901 = vst [vmem:[#allocation83_spill] sm:$0xff] %v13842_v51  ;;  %v3966_v57 = vadd.f32 %v18902_v5, %v3914_v3  ;;  %v3848_v63 = vmul.f32 %v18677_v0, %v18759_v31  ;;  %v18903_v54 = vld [vmem:[#allocation90_spill] sm:$0xff]  ;;  %v13857_v51 = vmul.f32 %v18852_v35, %v13845_v20  ;;  %v18908_v5 = vld [vmem:[#allocation96_spill] sm:$0xff] }
 0x321   :  { %v3913_v26 = vadd.f32 %v18899_v52, %v3861_v22  ;;  %18900 = vst [vmem:[#allocation146_spill] sm:$0xff] %v13838_v62  ;;  %v3812_v47 = vadd.f32 %v3796_v60, %v3760_v56  ;;  %v18904_v22 = vld [vmem:[#allocation122_spill] sm:$0xff]  ;;  %v13853_v52 = vmul.f32 %v13736_v21, %v18905_v42  ;;  %v4332_v3 = vadd.f32 %v4316_v33, %v4280_v53  ;;  %v18915_v33 = vld [vmem:[#allocation135_spill] sm:$0xff] }
 0x322   :  { %v5371_v6 = vadd.f32 %v18903_v54, %v5319_v23  ;;  %18907 = vst [vmem:[#allocation88_spill] sm:$0xff] %v13857_v51  ;;  %v4018_v38 = vadd.f32 %v18908_v5, %v3966_v57  ;;  %v13860_v40 = vld [vmem:[#allocation3 + $0xd1] sm:$0xff]  ;;  %v3900_v60 = vmul.f32 %v18800_v17, %v13209_v41 }
 0x323   :  { %v3965_v49 = vadd.f32 %v18904_v22, %v3913_v26  ;;  %18906 = vst [vmem:[#allocation121_spill] sm:$0xff] %v13853_v52  ;;  %v13862_v56 = vld [vmem:[#allocation3 + $0xd2] sm:$0xff]  ;;  %v3864_v31 = vadd.f32 %v3848_v63, %v3812_v47  ;;  %v4384_v5 = vadd.f32 %v4368_v10, %v4332_v3  ;;  %v3952_v63 = vmul.f32 %v18683_v7, %v13227_v19  ;;  %v18922_v10 = vld [vmem:[#allocation148_spill] sm:$0xff] }
 0x324   :  { %v18909_v23 = vld [vmem:[#allocation163_spill] sm:$0xff]  ;;  %v18911_v52 = vld [vmem:[#allocation78_spill] sm:$0xff]  ;;  %v4070_v53 = vadd.f32 %v18915_v33, %v4018_v38 }
 0x325   :  { %v5423_v26 = vadd.f32 %v18909_v23, %v5371_v6  ;;  %v18910_v54 = vld [vmem:[#allocation127_spill] sm:$0xff]  ;;  %v13870_v62 = vmul.f32 %v18911_v52, %v13860_v40  ;;  %v3916_v41 = vadd.f32 %v3900_v60, %v3864_v31  ;;  %v18916_v6 = vld [vmem:[#allocation164_spill] sm:$0xff]  ;;  %v18917_v23 = vld [vmem:[#allocation134_spill] sm:$0xff]  ;;  %v4436_v33 = vadd.f32 %v4420_v39, %v4384_v5 }
 0x326   :  { %v4017_v22 = vadd.f32 %v18910_v54, %v3965_v49  ;;  %v18913_v51 = vld [vmem:[#allocation79_spill] sm:$0xff]  ;;  %v4122_v3 = vadd.f32 %v18922_v10, %v4070_v53  ;;  %v4004_v60 = vmul.f32 %v18803_v44, %v13245_v55 }
 0x327   :  { %18912 = vst [vmem:[#allocation161_spill] sm:$0xff] %v13870_v62  ;;  %v13874_v57 = vmul.f32 %v18913_v51, %v13862_v56  ;;  %v13877_v35 = vld [vmem:[#allocation3 + $0xd3] sm:$0xff]  ;;  %v5475_v49 = vadd.f32 %v18916_v6, %v5423_v26  ;;  %v18918_v62 = vld [vmem:[#allocation80_spill] sm:$0xff]  ;;  %v3968_v19 = vadd.f32 %v3952_v63, %v3916_v41  ;;  %v18923_v26 = vld [vmem:[#allocation165_spill] sm:$0xff]  ;;  %v4488_v10 = vadd.f32 %v13782_v11, %v4436_v33 }
 0x328   :  { %v13879_v47 = vld [vmem:[#allocation3 + $0xd4] sm:$0xff]  ;;  %v4069_v54 = vadd.f32 %v18917_v23, %v4017_v22  ;;  %v13887_v52 = vmul.f32 %v18918_v62, %v13877_v35  ;;  %v18924_v6 = vld [vmem:[#allocation108_spill] sm:$0xff]  ;;  %v18934_v11 = vld [vmem:[#allocation149_spill] sm:$0xff] }
 0x329   :  { %18914 = vst [vmem:[#allocation133_spill] sm:$0xff] %v13874_v57  ;;  %v18920_v57 = vld [vmem:[#allocation81_spill] sm:$0xff]  ;;  %v13894_v51 = vld [vmem:[#allocation3 + $0xd5] sm:$0xff]  ;;  %v5527_v22 = vadd.f32 %v18923_v26, %v5475_v49  ;;  %v4020_v55 = vadd.f32 %v4004_v60, %v3968_v19  ;;  %v4056_v49 = vmul.f32 %v18805_v13, %v13270_v59  ;;  %v4108_v59 = vmul.f32 %v18807_v36, %v13281_v37 }
 0x32a   :  { %18919 = vst [vmem:[#allocation112_spill] sm:$0xff] %v13887_v52  ;;  %v13891_v38 = vmul.f32 %v18920_v57, %v13879_v47  ;;  %v13896_v31 = vld [vmem:[#allocation3 + $0xd6] sm:$0xff]  ;;  %v4121_v23 = vadd.f32 %v18924_v6, %v4069_v54  ;;  %v18925_v52 = vld [vmem:[#allocation84_spill] sm:$0xff]  ;;  %v18930_v6 = vld [vmem:[#allocation129_spill] sm:$0xff]  ;;  %v4265_v37 = vmul.f32 %v13689_v12, %v18697_v46 }
 0x32b   :  { %v13904_v62 = vmul.f32 %v18925_v52, %v13894_v51  ;;  %v13908_v53 = vmul.f32 %v18864_v15, %v13896_v31  ;;  %v18928_v39 = vld [vmem:[#allocation119_spill] sm:$0xff]  ;;  %v4072_v19 = vadd.f32 %v4056_v49, %v4020_v55 }
 0x32c   :  { %18921 = vst [vmem:[#allocation153_spill] sm:$0xff] %v13891_v38  ;;  %v4174_v5 = vadd.f32 %v18928_v39, %v4122_v3  ;;  %v13912_v41 = vld [vmem:[#allocation3 + $0xd7] sm:$0xff]  ;;  %v18932_v3 = vld [vmem:[#allocation109_spill] sm:$0xff] }
 0x32d   :  { %18926 = vst [vmem:[#allocation162_spill] sm:$0xff] %v13904_v62  ;;  %18927 = vst [vmem:[#allocation99_spill] sm:$0xff] %v13908_v53  ;;  %v13914_v63 = vld [vmem:[#allocation3 + $0xd8] sm:$0xff]  ;;  %v4173_v62 = vadd.f32 %v18930_v6, %v4121_v23  ;;  %v13922_v38 = vmul.f32 %v18868_v48, %v13912_v41  ;;  %v4540_v53 = vadd.f32 %v13788_v61, %v4488_v10 }
 0x32e   :  { %v18929_v54 = vld [vmem:[#allocation91_spill] sm:$0xff]  ;;  %v13926_v39 = vmul.f32 %v18932_v3, %v13914_v63  ;;  %v4227_v33 = vadd.f32 %v18934_v11, %v4174_v5  ;;  %v4213_v6 = vmul.f32 %v13682_v32, %v18812_v18  ;;  %v4124_v10 = vadd.f32 %v4108_v59, %v4072_v19  ;;  %v18944_v59 = vld [vmem:[#allocation62_spill] sm:$0xff] }
 0x32f   :  { %v5579_v26 = vadd.f32 %v18929_v54, %v5527_v22  ;;  %18931 = vst [vmem:[#allocation147_spill] sm:$0xff] %v13922_v38  ;;  %v18935_v22 = vld [vmem:[#allocation110_spill] sm:$0xff]  ;;  %v4160_v54 = vmul.f32 %v18692_v43, %v13283_v16  ;;  %v4592_v61 = vadd.f32 %v13792_v8, %v4540_v53  ;;  %v18938_v55 = vld [vmem:[#allocation131_spill] sm:$0xff] }
 0x330   :  { %18933 = vst [vmem:[#allocation90_spill] sm:$0xff] %v13926_v39  ;;  %v4226_v23 = vadd.f32 %v18935_v22, %v4173_v62  ;;  %v18937_v39 = vld [vmem:[#allocation97_spill] sm:$0xff]  ;;  %v4317_v62 = vmul.f32 %v13691_v45, %v18815_v14  ;;  %v18941_v22 = vld [vmem:[#allocation150_spill] sm:$0xff]  ;;  %v18943_v53 = vld [vmem:[#allocation123_spill] sm:$0xff] }
 0x331   :  { %v5604_v60 = vsel %vm45_vm0, %v5579_v26, 0  ;;  %v4279_v5 = vadd.f32 %v18937_v39, %v4227_v33  ;;  %v18939_v26 = vld [vmem:[#allocation61_spill] sm:$0xff]  ;;  %v18942_v39 = vld [vmem:[#allocation159_spill] sm:$0xff]  ;;  %v4176_v8 = vadd.f32 %v4160_v54, %v4124_v10  ;;  %v18946_v14 = vld [vmem:[#allocation64_spill] sm:$0xff] }
 0x332   :  { %v13938_v38 = vand.u32 4294901760, %v5604_v60  ;;  %v4278_v49 = vadd.f32 %v18938_v55, %v4226_v23  ;;  %v4369_v16 = vmul.f32 %v13704_v50, %v18939_v26  ;;  %v4644_v33 = vadd.f32 %v18942_v39, %v4592_v61  ;;  %v18945_v55 = vld [vmem:[#allocation63_spill] sm:$0xff]  ;;  %v18948_v61 = vld [vmem:[#allocation132_spill] sm:$0xff]  ;;  %v18949_v10 = vld [vmem:[#allocation65_spill] sm:$0xff] }
 0x333   :  { %v4331_v18 = vadd.f32 %v18941_v22, %v4279_v5  ;;  %v4421_v23 = vmul.f32 %v13711_v29, %v18944_v59  ;;  %v4473_v46 = vmul.f32 %v13713_v58, %v18945_v55  ;;  %v4525_v43 = vmul.f32 %v13727_v25, %v18946_v14  ;;  %v18950_v39 = vld [vmem:[#allocation66_spill] sm:$0xff]  ;;  %v18951_v55 = vld [vmem:[#allocation67_spill] sm:$0xff] }
 0x334   :  { %18936 = vst [vmem:[#allocation122_spill] sm:$0xff] %v13938_v38  ;;  %v13950_v11 = vsub.f32 %v5604_v60, %v13938_v38  ;;  %v4330_v19 = vadd.f32 %v18943_v53, %v4278_v49  ;;  %v18947_v60 = vld [vmem:[#allocation114_spill] sm:$0xff]  ;;  %v4697_v5 = vadd.f32 %v13801_v27, %v4644_v33  ;;  %v4229_v22 = vadd.f32 %v4213_v6, %v4176_v8 }
 0x335   :  { %v4383_v38 = vadd.f32 %v18947_v60, %v4331_v18  ;;  %v4577_v49 = vmul.f32 %v13734_v34, %v18949_v10  ;;  %v13969_v53 = vmul.f32 %v13736_v21, %v18950_v39  ;;  %v13973_v59 = vmul.f32 %v13845_v20, %v18951_v55  ;;  %v18952_v60 = vld [vmem:[#allocation151_spill] sm:$0xff]  ;;  %v18953_v6 = vld [vmem:[#allocation118_spill] sm:$0xff]  ;;  %v18955_v10 = vld [vmem:[#allocation68_spill] sm:$0xff] }
 0x336   :  { %18940 = vst [vmem:[#allocation96_spill] sm:$0xff] %v13950_v11  ;;  %v17879_v26 = vand.u32 4294901760, %v13950_v11  ;;  %v4382_v54 = vadd.f32 %v18948_v61, %v4330_v19  ;;  %v4749_v33 = vadd.f32 %v18953_v6, %v4697_v5  ;;  %v4281_v8 = vadd.f32 %v4265_v37, %v4229_v22  ;;  %v18954_v19 = vld [vmem:[#allocation136_spill] sm:$0xff]  ;;  %v18959_v22 = vld [vmem:[#allocation93_spill] sm:$0xff] }
 0x337   :  { %v4435_v27 = vadd.f32 %v18952_v60, %v4383_v38  ;;  %v13983_v14 = vmul.f32 %v13860_v40, %v18955_v10  ;;  %v13987_v39 = vmul.f32 %v13862_v56, %v18886_v24  ;;  %v13991_v55 = vmul.f32 %v13877_v35, %v18889_v9  ;;  %v18958_v60 = vld [vmem:[#allocation160_spill] sm:$0xff] }
 0x338   :  { %v5734_v18 = vsub.f32 %v13950_v11, %v17879_v26  ;;  %v4434_v61 = vadd.f32 %v18954_v19, %v4382_v54  ;;  %v18957_v11 = vld [vmem:[#allocation103_spill] sm:$0xff]  ;;  %v4801_v5 = vadd.f32 %v18958_v60, %v4749_v33  ;;  %v4333_v37 = vadd.f32 %v4317_v62, %v4281_v8  ;;  %v18960_v19 = vld [vmem:[#allocation49_spill] sm:$0xff]  ;;  %v18961_v9 = vld [vmem:[#allocation152_spill] sm:$0xff] }
 0x339   :  { %18956 = vst [vmem:[#allocation163_spill] sm:$0xff] %v13991_v55  ;;  %v4487_v38 = vadd.f32 %v18957_v11, %v4435_v27  ;;  %v13998_v6 = vmul.f32 %v13879_v47, %v18893_v2  ;;  %v3745_v24 = vmul.f32 %v13682_v32, %v18960_v19  ;;  %v3797_v10 = vmul.f32 %v13689_v12, %v18674_v28  ;;  %v18962_v55 = vld [vmem:[#allocation120_spill] sm:$0xff]  ;;  %v18963_v33 = vld [vmem:[#allocation138_spill] sm:$0xff]  ;;  %v18964_v32 = vld [vmem:[#allocation141_spill] sm:$0xff] }
 0x33a   :  { %v5735_v26 = vand.u32 4294901760, %v5734_v18  ;;  %v4486_v54 = vadd.f32 %v18959_v22, %v4434_v61  ;;  %v4853_v11 = vadd.f32 %v18962_v55, %v4801_v5  ;;  %v4385_v27 = vadd.f32 %v4369_v16, %v4333_v37  ;;  %v18967_v37 = vld [vmem:[#allocation137_spill] sm:$0xff]  ;;  %v18972_v28 = vld [vmem:[#allocation78_spill] sm:$0xff] }
 0x33b   :  { %v4539_v18 = vadd.f32 %v18961_v9, %v4487_v38  ;;  %v14008_v62 = vmul.f32 %v13894_v51, %v18842_v4  ;;  %v14013_v61 = vmul.f32 %v13896_v31, %v18844_v1  ;;  %v3761_v60 = vadd.f32 %v3745_v24, %v18964_v32  ;;  %v18966_v38 = vld [vmem:[#allocation89_spill] sm:$0xff] }
 0x33c   :  { %9966 = vmatprep.mubr.f32.mxu1 %v5735_v26  ;;  %v4538_v8 = vadd.f32 %v18963_v33, %v4486_v54  ;;  %v3849_v12 = vmul.f32 %v13691_v45, %v18677_v0  ;;  %v18965_v26 = vld [vmem:[#allocation115_spill] sm:$0xff]  ;;  %v4905_v55 = vadd.f32 %v18966_v38, %v4853_v11  ;;  %v4437_v16 = vadd.f32 %v4421_v23, %v4385_v27  ;;  %v14029_v33 = vld [vmem:[#allocation3 + $0xe0] sm:$0xff]  ;;  %v18969_v11 = vld [vmem:[#allocation126_spill] sm:$0xff] }
 0x33d   :  { %v4591_v9 = vadd.f32 %v18965_v26, %v4539_v18  ;;  %v14022_v5 = vmul.f32 %v13912_v41, %v18849_v30  ;;  %v14027_v54 = vmul.f32 %v13914_v63, %v18905_v42  ;;  %v3813_v24 = vadd.f32 %v3797_v10, %v3761_v60  ;;  %v18968_v18 = vld [vmem:[#allocation171_spill] sm:$0xff]  ;;  %v18970_v26 = vld [vmem:[#allocation77_spill] sm:$0xff] }
 0x33e   :  { %v4590_v22 = vadd.f32 %v18967_v37, %v4538_v8  ;;  %v3901_v45 = vmul.f32 %v13704_v50, %v18800_v17  ;;  %v4957_v23 = vadd.f32 %v18969_v11, %v4905_v55  ;;  %v4489_v27 = vadd.f32 %v4473_v46, %v4437_v16  ;;  %v14039_v8 = vld [vmem:[#allocation3 + $0xe1] sm:$0xff]  ;;  %v18971_v37 = vld [vmem:[#allocation95_spill] sm:$0xff]  ;;  %v18974_v55 = vld [vmem:[#allocation146_spill] sm:$0xff] }
 0x33f   :  { %v4643_v32 = vadd.f32 %v18968_v18, %v4591_v9  ;;  %v14037_v38 = vmul.f32 %v18970_v26, %v14029_v33  ;;  %v14044_v19 = vmul.f32 %v18972_v28, %v14039_v8  ;;  %v14046_v10 = vld [vmem:[#allocation3 + $0xe2] sm:$0xff]  ;;  %v3865_v50 = vadd.f32 %v3849_v12, %v3813_v24  ;;  %v18973_v9 = vld [vmem:[#allocation154_spill] sm:$0xff]  ;;  %v18975_v11 = vld [vmem:[#allocation79_spill] sm:$0xff] }
 0x340   :  { %v4642_v0 = vadd.f32 %v18971_v37, %v4590_v22  ;;  %v3953_v60 = vmul.f32 %v13711_v29, %v18683_v7  ;;  %v5009_v16 = vadd.f32 %v18974_v55, %v4957_v23  ;;  %v4541_v18 = vadd.f32 %v4525_v43, %v4489_v27  ;;  %v14056_v22 = vld [vmem:[#allocation3 + $0xe3] sm:$0xff]  ;;  %v18979_v23 = vld [vmem:[#allocation83_spill] sm:$0xff] }
 0x341   :  { %v4696_v46 = vadd.f32 %v18973_v9, %v4643_v32  ;;  %v14054_v17 = vmul.f32 %v18975_v11, %v14046_v10  ;;  %v18976_v37 = vld [vmem:[#allocation140_spill] sm:$0xff]  ;;  %v3917_v29 = vadd.f32 %v3901_v45, %v3865_v50  ;;  %v4005_v24 = vmul.f32 %v13713_v58, %v18803_v44  ;;  %v18978_v32 = vld [vmem:[#allocation107_spill] sm:$0xff] }
 0x342   :  { %v4695_v28 = vadd.f32 %v18976_v37, %v4642_v0  ;;  %v18977_v26 = vld [vmem:[#allocation80_spill] sm:$0xff]  ;;  %v5061_v27 = vadd.f32 %v18979_v23, %v5009_v16  ;;  %v4593_v9 = vadd.f32 %v4577_v49, %v4541_v18  ;;  %v18980_v37 = vld [vmem:[#allocation167_spill] sm:$0xff]  ;;  %v4057_v50 = vmul.f32 %v13727_v25, %v18805_v13  ;;  %v18982_v16 = vld [vmem:[#allocation121_spill] sm:$0xff] }
 0x343   :  { %v14061_v42 = vmul.f32 %v18977_v26, %v14056_v22  ;;  %v14063_v12 = vld [vmem:[#allocation3 + $0xe4] sm:$0xff]  ;;  %v4748_v43 = vadd.f32 %v18978_v32, %v4696_v46  ;;  %v3969_v58 = vadd.f32 %v3953_v60, %v3917_v29 }
 0x344   :  { %v14071_v55 = vmul.f32 %v18920_v57, %v14063_v12  ;;  %v14073_v0 = vld [vmem:[#allocation3 + $0xe5] sm:$0xff]  ;;  %v4747_v7 = vadd.f32 %v18980_v37, %v4695_v28  ;;  %v5113_v18 = vadd.f32 %v18982_v16, %v5061_v27  ;;  %v4645_v32 = vadd.f32 %v13969_v53, %v4593_v9 }
 0x345   :  { %v14078_v26 = vmul.f32 %v18925_v52, %v14073_v0  ;;  %v14080_v45 = vld [vmem:[#allocation3 + $0xe6] sm:$0xff]  ;;  %v4021_v25 = vadd.f32 %v4005_v24, %v3969_v58  ;;  %v18988_v24 = vld [vmem:[#allocation58_spill] sm:$0xff] }
 0x346   :  { %v18981_v46 = vld [vmem:[#allocation172_spill] sm:$0xff]  ;;  %v14089_v23 = vmul.f32 %v18864_v15, %v14080_v45  ;;  %v14098_v29 = vld [vmem:[#allocation3 + $0xe8] sm:$0xff]  ;;  %v4698_v16 = vadd.f32 %v13973_v59, %v4645_v32  ;;  %v4214_v58 = vmul.f32 %v13845_v20, %v18988_v24  ;;  %v18991_v59 = vld [vmem:[#allocation59_spill] sm:$0xff] }
 0x347   :  { %v4800_v49 = vadd.f32 %v18981_v46, %v4748_v43  ;;  %v14091_v28 = vld [vmem:[#allocation3 + $0xe7] sm:$0xff]  ;;  %v4109_v43 = vmul.f32 %v13734_v34, %v18807_v36  ;;  %v14107_v13 = vmul.f32 %v18932_v3, %v14098_v29  ;;  %v18989_v34 = vld [vmem:[#allocation155_spill] sm:$0xff]  ;;  %v4266_v32 = vmul.f32 %v13860_v40, %v18991_v59 }
 0x348   :  { %v18983_v37 = vld [vmem:[#allocation168_spill] sm:$0xff]  ;;  %v14096_v60 = vmul.f32 %v18868_v48, %v14091_v28  ;;  %v18984_v27 = vld [vmem:[#allocation173_spill] sm:$0xff]  ;;  %v4073_v48 = vadd.f32 %v4057_v50, %v4021_v25 }
 0x349   :  { %v4799_v44 = vadd.f32 %v18983_v37, %v4747_v7  ;;  %v4852_v53 = vadd.f32 %v18984_v27, %v4800_v49  ;;  %v18985_v9 = vld [vmem:[#allocation88_spill] sm:$0xff]  ;;  %v18986_v7 = vld [vmem:[#allocation169_spill] sm:$0xff] }
 0x34a   :  { %v5166_v46 = vadd.f32 %v18985_v9, %v5113_v18  ;;  %v18987_v15 = vld [vmem:[#allocation57_spill] sm:$0xff]  ;;  %v4750_v18 = vadd.f32 %v13983_v14, %v4698_v16  ;;  %v18992_v9 = vld [vmem:[#allocation170_spill] sm:$0xff]  ;;  %v4125_v57 = vadd.f32 %v4109_v43, %v4073_v48  ;;  %v18998_v16 = vld [vmem:[#allocation87_spill] sm:$0xff] }
 0x34b   :  { %v4851_v37 = vadd.f32 %v18986_v7, %v4799_v44  ;;  %v4161_v52 = vmul.f32 %v13736_v21, %v18987_v15  ;;  %v4904_v36 = vadd.f32 %v18989_v34, %v4852_v53  ;;  %v18990_v49 = vld [vmem:[#allocation161_spill] sm:$0xff]  ;;  %v18993_v44 = vld [vmem:[#allocation60_spill] sm:$0xff]  ;;  %v18997_v34 = vld [vmem:[#allocation62_spill] sm:$0xff] }
 0x34c   :  { %v5218_v27 = vadd.f32 %v18990_v49, %v5166_v46  ;;  %v4318_v50 = vmul.f32 %v13862_v56, %v18993_v44  ;;  %v18994_v25 = vld [vmem:[#allocation61_spill] sm:$0xff]  ;;  %v18995_v7 = vld [vmem:[#allocation116_spill] sm:$0xff]  ;;  %v4802_v46 = vadd.f32 %v13987_v39, %v4750_v18  ;;  %v4422_v14 = vmul.f32 %v13879_v47, %v18997_v34  ;;  %v19020_v34 = vld [vmem:[#allocation99_spill] sm:$0xff] }
 0x34d   :  { %v4903_v3 = vadd.f32 %v18992_v9, %v4851_v37  ;;  %v4370_v21 = vmul.f32 %v13877_v35, %v18994_v25  ;;  %v4956_v20 = vadd.f32 %v18995_v7, %v4904_v36  ;;  %v18996_v24 = vld [vmem:[#allocation133_spill] sm:$0xff]  ;;  %v4177_v49 = vadd.f32 %v4161_v52, %v4125_v57  ;;  %v18999_v37 = vld [vmem:[#allocation63_spill] sm:$0xff]  ;;  %v19000_v43 = vld [vmem:[#allocation64_spill] sm:$0xff] }
 0x34e   :  { %v5270_v53 = vadd.f32 %v18996_v24, %v5218_v27  ;;  %v4474_v48 = vmul.f32 %v13894_v51, %v18999_v37  ;;  %v14134_v56 = vmul.f32 %v13896_v31, %v19000_v43  ;;  %v19001_v35 = vld [vmem:[#allocation174_spill] sm:$0xff]  ;;  %v19002_v36 = vld [vmem:[#allocation112_spill] sm:$0xff]  ;;  %v19003_v24 = vld [vmem:[#allocation163_spill] sm:$0xff] }
 0x34f   :  { %v4955_v40 = vadd.f32 %v18998_v16, %v4903_v3  ;;  %v5008_v9 = vadd.f32 %v19001_v35, %v4956_v20  ;;  %v4854_v27 = vadd.f32 %v19003_v24, %v4802_v46  ;;  %v19004_v39 = vld [vmem:[#allocation65_spill] sm:$0xff]  ;;  %v19005_v47 = vld [vmem:[#allocation104_spill] sm:$0xff]  ;;  %v4230_v52 = vadd.f32 %v4214_v58, %v4177_v49  ;;  %v19006_v57 = vld [vmem:[#allocation66_spill] sm:$0xff] }
 0x350   :  { %v5322_v7 = vadd.f32 %v19002_v36, %v5270_v53  ;;  %v14141_v18 = vmul.f32 %v13912_v41, %v19004_v39  ;;  %v14146_v51 = vmul.f32 %v13914_v63, %v19006_v57  ;;  %v19007_v16 = vld [vmem:[#allocation67_spill] sm:$0xff]  ;;  %v1382_v20 = vld [vmem:[#allocation3 + $0x100] sm:$0xff]  ;;  %v19009_v36 = vld [vmem:[#allocation153_spill] sm:$0xff] }
 0x351   :  { %v5007_v3 = vadd.f32 %v19005_v47, %v4955_v40  ;;  %v14150_v31 = vmul.f32 %v14029_v33, %v19007_v16  ;;  %v19008_v35 = vld [vmem:[#allocation100_spill] sm:$0xff]  ;;  %v4906_v24 = vadd.f32 %v13998_v6, %v4854_v27  ;;  %v19011_v63 = vld [vmem:[#allocation111_spill] sm:$0xff]  ;;  %v4282_v47 = vadd.f32 %v4266_v32, %v4230_v52  ;;  %v19012_v57 = vld [vmem:[#allocation69_spill] sm:$0xff] }
 0x352   :  { %v5060_v53 = vadd.f32 %v19008_v35, %v5008_v9  ;;  %v5374_v46 = vadd.f32 %v19009_v36, %v5322_v7  ;;  %v19010_v41 = vld [vmem:[#allocation68_spill] sm:$0xff]  ;;  %v14164_v33 = vmul.f32 %v14046_v10, %v19012_v57  ;;  %v19013_v16 = vld [vmem:[#allocation70_spill] sm:$0xff]  ;;  %v19017_v32 = vld [vmem:[#allocation105_spill] sm:$0xff] }
 0x353   :  { %v14157_v39 = vmul.f32 %v14039_v8, %v19010_v41  ;;  %v14159_v58 = vld [vmem:[#allocation3 + $0x140] sm:$0xff]  ;;  %v5059_v49 = vadd.f32 %v19011_v63, %v5007_v3  ;;  %v14168_v9 = vmul.f32 %v14056_v22, %v19013_v16  ;;  %v19015_v8 = vld [vmem:[#allocation162_spill] sm:$0xff]  ;;  %v4958_v36 = vadd.f32 %v14008_v62, %v4906_v24  ;;  %v19018_v57 = vld [vmem:[#allocation5_spill] sm:$0xff] }
 0x354   :  { %v1434_v40 = vld [vmem:[#allocation3 + $0x101] sm:$0xff]  ;;  %v5426_v35 = vadd.f32 %v19015_v8, %v5374_v46  ;;  %v4334_v63 = vadd.f32 %v4318_v50, %v4282_v47  ;;  %v19019_v16 = vld [vmem:[#allocation98_spill] sm:$0xff]  ;;  %v19024_v44 = vld [vmem:[#allocation147_spill] sm:$0xff] }
 0x355   :  { %v14170_v7 = vld [vmem:[#allocation3 + $0x141] sm:$0xff]  ;;  %v5111_v52 = vadd.f32 %v19017_v32, %v5059_v49  ;;  %v1454_v22 = vmul.f32 %v19018_v57, %v1434_v40  ;;  %v19022_v47 = vld [vmem:[#allocation6_spill] sm:$0xff] }
 0x356   :  { %v19014_v6 = vld [vmem:[#allocation156_spill] sm:$0xff]  ;;  %v5478_v25 = vadd.f32 %v19020_v34, %v5426_v35  ;;  %v1458_v62 = vmul.f32 %v19018_v57, %v14170_v7  ;;  %v4386_v49 = vadd.f32 %v4370_v21, %v4334_v63  ;;  %v19023_v32 = vld [vmem:[#allocation157_spill] sm:$0xff] }
 0x357   :  { %v5112_v27 = vadd.f32 %v19014_v6, %v5060_v53  ;;  %v19016_v41 = vld [vmem:[#allocation4_spill] sm:$0xff]  ;;  %v5010_v53 = vadd.f32 %v14013_v61, %v4958_v36  ;;  %v19026_v35 = vld [vmem:[#allocation101_spill] sm:$0xff] }
 0x358   :  { %v1402_v43 = vmul.f32 %v19016_v41, %v1382_v20  ;;  %v1486_v3 = vld [vmem:[#allocation3 + $0x102] sm:$0xff]  ;;  %v1406_v10 = vmul.f32 %v19016_v41, %v14159_v58  ;;  %v19021_v20 = vld [vmem:[#allocation106_spill] sm:$0xff]  ;;  %v4438_v59 = vadd.f32 %v4422_v14, %v4386_v49  ;;  %v19032_v49 = vld [vmem:[#allocation175_spill] sm:$0xff] }
 0x359   :  { %v5165_v37 = vadd.f32 %v19019_v16, %v5112_v27  ;;  %v14185_v46 = vld [vmem:[#allocation3 + $0x142] sm:$0xff]  ;;  %v5164_v24 = vadd.f32 %v19021_v20, %v5111_v52  ;;  %v1506_v6 = vmul.f32 %v19022_v47, %v1486_v3  ;;  %v5530_v16 = vadd.f32 %v19024_v44, %v5478_v25  ;;  %v19028_v3 = vld [vmem:[#allocation90_spill] sm:$0xff]  ;;  %v19029_v20 = vld [vmem:[#allocation7_spill] sm:$0xff] }
 0x35a   :  { %v1470_v50 = vadd.f32 %v1454_v22, %v1402_v43  ;;  %v1538_v8 = vld [vmem:[#allocation3 + $0x103] sm:$0xff]  ;;  %v5062_v34 = vadd.f32 %v14022_v5, %v5010_v53  ;;  %v1474_v27 = vadd.f32 %v1458_v62, %v1406_v10  ;;  %v1510_v52 = vmul.f32 %v19022_v47, %v14185_v46 }
 0x35b   :  { %v5217_v40 = vadd.f32 %v19023_v32, %v5165_v37  ;;  %v14192_v61 = vld [vmem:[#allocation3 + $0x143] sm:$0xff]  ;;  %v5216_v36 = vadd.f32 %v19026_v35, %v5164_v24  ;;  %v5582_v22 = vadd.f32 %v19028_v3, %v5530_v16  ;;  %v1558_v44 = vmul.f32 %v19029_v20, %v1538_v8 }
 0x35c   :  { %19025 = vst [vmem:[#allocation127_spill] sm:$0xff] %v14192_v61  ;;  %v1522_v21 = vadd.f32 %v1506_v6, %v1470_v50  ;;  %v19027_v43 = vld [vmem:[#allocation124_spill] sm:$0xff]  ;;  %v5114_v37 = vadd.f32 %v14027_v54, %v5062_v34  ;;  %v4490_v10 = vadd.f32 %v4474_v48, %v4438_v59  ;;  %v1526_v53 = vadd.f32 %v1510_v52, %v1474_v27  ;;  %v19034_v27 = vld [vmem:[#allocation82_spill] sm:$0xff] }
 0x35d   :  { %v5269_v63 = vadd.f32 %v19027_v43, %v5217_v40  ;;  %v19030_v25 = vld [vmem:[#allocation144_spill] sm:$0xff]  ;;  %v1562_v62 = vmul.f32 %v19029_v20, %v14192_v61  ;;  %v14210_v32 = vmul.f32 %v14063_v12, %v18893_v2  ;;  %v19033_v40 = vld [vmem:[#allocation94_spill] sm:$0xff]  ;;  %v5613_v59 = vsel %vm45_vm0, %v5582_v22, 0 }
 0x35e   :  { %v5268_v5 = vadd.f32 %v19030_v25, %v5216_v36  ;;  %v1590_v14 = vld [vmem:[#allocation3 + $0x104] sm:$0xff]  ;;  %v5167_v6 = vadd.f32 %v14037_v38, %v5114_v37  ;;  %v1574_v54 = vadd.f32 %v1558_v44, %v1522_v21  ;;  %v4542_v48 = vadd.f32 %v14134_v56, %v4490_v10  ;;  %v19037_v21 = vld [vmem:[#allocation166_spill] sm:$0xff] }
 0x35f   :  { %v14204_v24 = vld [vmem:[#allocation3 + $0x144] sm:$0xff]  ;;  %v5321_v50 = vadd.f32 %v19032_v49, %v5269_v63  ;;  %v1578_v34 = vadd.f32 %v1562_v62, %v1526_v53  ;;  %v14226_v22 = vmul.f32 %v14073_v0, %v18842_v4  ;;  %v14232_v49 = vand.u32 4294901760, %v5613_v59  ;;  %v5548_v4 = vld [vmem:[#allocation3 + $0xf8] sm:$0xff] }
 0x360   :  { %19031 = vst [vmem:[#allocation135_spill] sm:$0xff] %v14204_v24  ;;  %v1642_v8 = vld [vmem:[#allocation3 + $0x105] sm:$0xff]  ;;  %v5320_v16 = vadd.f32 %v19033_v40, %v5268_v5  ;;  %v5219_v36 = vadd.f32 %v14044_v19, %v5167_v6  ;;  %v4594_v3 = vadd.f32 %v14141_v18, %v4542_v48  ;;  %v19044_v48 = vld [vmem:[#allocation10_spill] sm:$0xff] }
 0x361   :  { %v5373_v35 = vadd.f32 %v19034_v27, %v5321_v50  ;;  %v19035_v52 = vld [vmem:[#allocation8_spill] sm:$0xff]  ;;  %v19038_v56 = vld [vmem:[#allocation9_spill] sm:$0xff]  ;;  %19041 = vst [vmem:[#allocation134_spill] sm:$0xff] %v14232_v49 }
 0x362   :  { %v1610_v43 = vmul.f32 %v19035_v52, %v1590_v14  ;;  %v1614_v38 = vmul.f32 %v19035_v52, %v14204_v24  ;;  %v14220_v12 = vld [vmem:[#allocation3 + $0x145] sm:$0xff]  ;;  %v5372_v63 = vadd.f32 %v19037_v21, %v5320_v16  ;;  %v1662_v37 = vmul.f32 %v19038_v56, %v1642_v8 }
 0x363   :  { %19036 = vst [vmem:[#allocation164_spill] sm:$0xff] %v14220_v12  ;;  %v1694_v44 = vld [vmem:[#allocation3 + $0x106] sm:$0xff]  ;;  %v5271_v5 = vadd.f32 %v14054_v17, %v5219_v36  ;;  %v4646_v50 = vadd.f32 %v14146_v51, %v4594_v3  ;;  %v1666_v18 = vmul.f32 %v19038_v56, %v14220_v12  ;;  %v4995_v51 = vmul.f32 %v14080_v45, %v18844_v1  ;;  %v19050_v45 = vld [vmem:[#allocation11_spill] sm:$0xff] }
 0x364   :  { %v19039_v25 = vld [vmem:[#allocation117_spill] sm:$0xff]  ;;  %v1626_v10 = vadd.f32 %v1610_v43, %v1574_v54  ;;  %v1630_v53 = vadd.f32 %v1614_v38, %v1578_v34  ;;  %v19040_v62 = vld [vmem:[#allocation92_spill] sm:$0xff]  ;;  %v1714_v17 = vmul.f32 %v19044_v48, %v1694_v44  ;;  %v19047_v38 = vld [vmem:[#allocation158_spill] sm:$0xff] }
 0x365   :  { %v5425_v19 = vadd.f32 %v19039_v25, %v5373_v35  ;;  %v5424_v14 = vadd.f32 %v19040_v62, %v5372_v63  ;;  %v14237_v0 = vld [vmem:[#allocation3 + $0x146] sm:$0xff]  ;;  %v5323_v40 = vadd.f32 %v14061_v42, %v5271_v5  ;;  %v4699_v35 = vadd.f32 %v14150_v31, %v4646_v50  ;;  %v19078_v1 = vld [vmem:[#allocation23_spill] sm:$0xff] }
 0x366   :  { %19042 = vst [vmem:[#allocation148_spill] sm:$0xff] %v14237_v0  ;;  %v19043_v6 = vld [vmem:[#allocation176_spill] sm:$0xff]  ;;  %v1678_v16 = vadd.f32 %v1662_v37, %v1626_v10  ;;  %v19045_v34 = vld [vmem:[#allocation145_spill] sm:$0xff]  ;;  %v1682_v36 = vadd.f32 %v1666_v18, %v1630_v53  ;;  %v1718_v42 = vmul.f32 %v19044_v48, %v14237_v0  ;;  %v19053_v18 = vld [vmem:[#allocation102_spill] sm:$0xff] }
 0x367   :  { %v5477_v8 = vadd.f32 %v19043_v6, %v5425_v19  ;;  %v1746_v54 = vld [vmem:[#allocation3 + $0x107] sm:$0xff]  ;;  %v5476_v27 = vadd.f32 %v19045_v34, %v5424_v14  ;;  %v5375_v63 = vadd.f32 %v14071_v55, %v5323_v40  ;;  %v14254_v19 = vsub.f32 %v5613_v59, %v14232_v49  ;;  %v14334_v49 = vld [vmem:[#allocation3 + $0x116] sm:$0xff] }
 0x368   :  { %v14246_v43 = vld [vmem:[#allocation3 + $0x147] sm:$0xff]  ;;  %v1730_v3 = vadd.f32 %v1714_v17, %v1678_v16  ;;  %v4751_v31 = vadd.f32 %v14157_v39, %v4699_v35  ;;  %v1766_v5 = vmul.f32 %v19050_v45, %v1746_v54  ;;  %v1734_v14 = vadd.f32 %v1718_v42, %v1682_v36  ;;  %v14267_v39 = vld [vmem:[#allocation3 + $0x110] sm:$0xff] }
 0x369   :  { %19046 = vst [vmem:[#allocation165_spill] sm:$0xff] %v14246_v43  ;;  %v5529_v21 = vadd.f32 %v19047_v38, %v5477_v8  ;;  %v1798_v37 = vld [vmem:[#allocation3 + $0x108] sm:$0xff]  ;;  %19049 = vst [vmem:[#allocation108_spill] sm:$0xff] %v14254_v19  ;;  %v5427_v55 = vadd.f32 %v14078_v26, %v5375_v63  ;;  %v1770_v50 = vmul.f32 %v19050_v45, %v14246_v43  ;;  %v19054_v40 = vld [vmem:[#allocation12_spill] sm:$0xff] }
 0x36a   :  { %v19048_v44 = vld [vmem:[#allocation113_spill] sm:$0xff]  ;;  %v4803_v8 = vadd.f32 %v14164_v33, %v4751_v31  ;;  %v1782_v59 = vadd.f32 %v1766_v5, %v1730_v3  ;;  %v1818_v16 = vmul.f32 %v19054_v40, %v1798_v37  ;;  %v19105_v43 = vld [vmem:[#allocation32_spill] sm:$0xff]  ;;  %v14467_v0 = vld [vmem:[#allocation3 + $0x152] sm:$0xff] }
 0x36b   :  { %v5528_v25 = vadd.f32 %v19048_v44, %v5476_v27  ;;  %v14258_v10 = vld [vmem:[#allocation3 + $0x148] sm:$0xff]  ;;  %v5479_v54 = vadd.f32 %v14089_v23, %v5427_v55  ;;  %v1786_v34 = vadd.f32 %v1770_v50, %v1734_v14  ;;  %v14273_v27 = vld [vmem:[#allocation3 + $0x111] sm:$0xff]  ;;  %v1511_v61 = vmul.f32 %v14467_v0, %v19022_v47 }
 0x36c   :  { %19051 = vst [vmem:[#allocation119_spill] sm:$0xff] %v14258_v10  ;;  %v19052_v53 = vld [vmem:[#allocation177_spill] sm:$0xff]  ;;  %v1822_v26 = vmul.f32 %v19054_v40, %v14258_v10  ;;  %v4855_v33 = vadd.f32 %v14168_v9, %v4803_v8  ;;  %v1834_v38 = vadd.f32 %v1818_v16, %v1782_v59  ;;  %v19060_v9 = vld [vmem:[#allocation14_spill] sm:$0xff]  ;;  %v19062_v14 = vld [vmem:[#allocation15_spill] sm:$0xff] }
 0x36d   :  { %v5581_v62 = vadd.f32 %v19052_v53, %v5529_v21  ;;  %v5580_v6 = vadd.f32 %v19053_v18, %v5528_v25  ;;  %v14279_v21 = vld [vmem:[#allocation3 + $0x112] sm:$0xff]  ;;  %v5531_v42 = vadd.f32 %v14096_v60, %v5479_v54  ;;  %v19058_v3 = vld [vmem:[#allocation13_spill] sm:$0xff]  ;;  %v17909_v25 = vand.u32 4294901760, %v14254_v19 }
 0x36e   :  { %v14284_v23 = vadd.f32 %v1822_v26, %v1786_v34  ;;  %v1871_v37 = vmul.f32 %v19058_v3, %v14267_v39  ;;  %v4907_v31 = vadd.f32 %v14210_v32, %v4855_v33  ;;  %v1923_v5 = vmul.f32 %v19060_v9, %v14273_v27  ;;  %v14295_v53 = vld [vmem:[#allocation3 + $0x113] sm:$0xff]  ;;  %v19065_v33 = vld [vmem:[#allocation76_spill] sm:$0xff] }
 0x36f   :  { %v5610_v17 = vsel %vm45_vm0, %v5581_v62, 0  ;;  %v5607_v35 = vsel %vm45_vm0, %v5580_v6, 0  ;;  %v5583_v60 = vadd.f32 %v14107_v13, %v5531_v42  ;;  %v1975_v50 = vmul.f32 %v19062_v14, %v14279_v21  ;;  %v14307_v8 = vld [vmem:[#allocation3 + $0x114] sm:$0xff]  ;;  %v19063_v13 = vld [vmem:[#allocation16_spill] sm:$0xff] }
 0x370   :  { %v14276_v36 = vand.u32 4294901760, %v5610_v17  ;;  %v14281_v63 = vand.u32 4294901760, %v5607_v35  ;;  %19057 = vst [vmem:[#allocation149_spill] sm:$0xff] %v14284_v23  ;;  %v1887_v55 = vadd.f32 %v1871_v37, %v1834_v38  ;;  %v4959_v6 = vadd.f32 %v14226_v22, %v4907_v31  ;;  %v14320_v38 = vld [vmem:[#allocation3 + $0x115] sm:$0xff] }
 0x371   :  { %v5047_v32 = vmul.f32 %v14091_v28, %v18849_v30  ;;  %v5616_v16 = vsel %vm45_vm0, %v5583_v60, 0  ;;  %v2027_v34 = vmul.f32 %v19063_v13, %v14295_v53  ;;  %v5099_v28 = vmul.f32 %v14098_v29, %v19065_v33  ;;  %v5184_v31 = vld [vmem:[#allocation3 + $0xf1] sm:$0xff]  ;;  %v19066_v60 = vld [vmem:[#allocation17_spill] sm:$0xff]  ;;  %v14353_v33 = vld [vmem:[#allocation3 + $0x120] sm:$0xff] }
 0x372   :  { %19055 = vst [vmem:[#allocation91_spill] sm:$0xff] %v14276_v36  ;;  %19056 = vst [vmem:[#allocation129_spill] sm:$0xff] %v14281_v63  ;;  %v14289_v44 = vsub.f32 %v5610_v17, %v14276_v36  ;;  %v14298_v62 = vsub.f32 %v5607_v35, %v14281_v63  ;;  %v5132_v17 = vld [vmem:[#allocation3 + $0xf0] sm:$0xff]  ;;  %v1939_v54 = vadd.f32 %v1923_v5, %v1887_v55  ;;  %v14316_v35 = vand.u32 4294901760, %v5616_v16 }
 0x373   :  { %v5011_v22 = vadd.f32 %v4995_v51, %v4959_v6  ;;  %v5764_v37 = vsub.f32 %v14254_v19, %v17909_v25  ;;  %v2079_v55 = vmul.f32 %v19066_v60, %v14307_v8  ;;  %v19068_v6 = vld [vmem:[#allocation77_spill] sm:$0xff]  ;;  %v19069_v63 = vld [vmem:[#allocation18_spill] sm:$0xff] }
 0x374   :  { %19059 = vst [vmem:[#allocation110_spill] sm:$0xff] %v14289_v44  ;;  %19061 = vst [vmem:[#allocation97_spill] sm:$0xff] %v14298_v62  ;;  %v17897_v18 = vand.u32 4294901760, %v14289_v44  ;;  %v17904_v59 = vand.u32 4294901760, %v14298_v62  ;;  %v1991_v5 = vadd.f32 %v1975_v50, %v1939_v54  ;;  %v14331_v51 = vsub.f32 %v5616_v16, %v14316_v35  ;;  %v19070_v19 = vld [vmem:[#allocation78_spill] sm:$0xff] }
 0x375   :  { %19064 = vst [vmem:[#allocation131_spill] sm:$0xff] %v14316_v35  ;;  %v5063_v29 = vadd.f32 %v5047_v32, %v5011_v22  ;;  %v2131_v25 = vmul.f32 %v19069_v63, %v14320_v38  ;;  %v5204_v23 = vmul.f32 %v19070_v19, %v5184_v31  ;;  %v5765_v16 = vand.u32 4294901760, %v5764_v37  ;;  %v5288_v32 = vld [vmem:[#allocation3 + $0xf3] sm:$0xff] }
 0x376   :  { %v5754_v26 = vsub.f32 %v14289_v44, %v17897_v18  ;;  %v5744_v42 = vsub.f32 %v14298_v62, %v17904_v59  ;;  %19067 = vst [vmem:[#allocation150_spill] sm:$0xff] %v14331_v51  ;;  %v5152_v44 = vmul.f32 %v19068_v6, %v5132_v17  ;;  %v5236_v59 = vld [vmem:[#allocation3 + $0xf2] sm:$0xff]  ;;  %v2043_v62 = vadd.f32 %v2027_v34, %v1991_v5 }
 0x377   :  { %v17915_v50 = vand.u32 4294901760, %v14331_v51  ;;  %v5115_v54 = vadd.f32 %v5099_v28, %v5063_v29  ;;  %v19071_v17 = vld [vmem:[#allocation19_spill] sm:$0xff]  ;;  %v5256_v5 = vmul.f32 %v18975_v11, %v5236_v59 }
 0x378   :  { %v5755_v18 = vand.u32 4294901760, %v5754_v26  ;;  %v5745_v36 = vand.u32 4294901760, %v5744_v42  ;;  %v14340_v26 = vld [vmem:[#allocation3 + $0x117] sm:$0xff]  ;;  %v2095_v22 = vadd.f32 %v2079_v55, %v2043_v62  ;;  %v2183_v35 = vmul.f32 %v19071_v17, %v14334_v49  ;;  %v19073_v55 = vld [vmem:[#allocation80_spill] sm:$0xff] }
 0x379   :  { %v5774_v34 = vsub.f32 %v14331_v51, %v17915_v50  ;;  %v5168_v42 = vadd.f32 %v5152_v44, %v5115_v54  ;;  %v14348_v28 = vld [vmem:[#allocation3 + $0x118] sm:$0xff]  ;;  %v5308_v6 = vmul.f32 %v19073_v55, %v5288_v32  ;;  %v19074_v44 = vld [vmem:[#allocation21_spill] sm:$0xff]  ;;  %v19101_v17 = vld [vmem:[#allocation30_spill] sm:$0xff] }
 0x37a   :  { %9967 = vmatmul.mubr.f32.gmra.mrb[2].mxu1 %v5745_v36  ;;  %v5340_v31 = vld [vmem:[#allocation3 + $0xf4] sm:$0xff]  ;;  %v2147_v29 = vadd.f32 %v2131_v25, %v2095_v22  ;;  %v19072_v36 = vld [vmem:[#allocation20_spill] sm:$0xff]  ;;  %v2287_v54 = vmul.f32 %v19074_v44, %v14348_v28  ;;  %v19075_v50 = vld [vmem:[#allocation81_spill] sm:$0xff] }
 0x37b   :  { %9969 = vmatprep.mubr.f32.mxu1 %v5755_v18  ;;  %v2235_v37 = vmul.f32 %v19072_v36, %v14340_v26  ;;  %v5775_v19 = vand.u32 4294901760, %v5774_v34  ;;  %v5220_v62 = vadd.f32 %v5204_v23, %v5168_v42  ;;  %v5392_v18 = vld [vmem:[#allocation3 + $0xf5] sm:$0xff]  ;;  %v5360_v51 = vmul.f32 %v19075_v50, %v5340_v31  ;;  %v14358_v25 = vld [vmem:[#allocation3 + $0x121] sm:$0xff] }
 0x37c   :  { %v2199_v30 = vadd.f32 %v2183_v35, %v2147_v29  ;;  %v5444_v22 = vld [vmem:[#allocation3 + $0xf6] sm:$0xff]  ;;  %v19077_v42 = vld [vmem:[#allocation84_spill] sm:$0xff] }
 0x37d   :  { %v5272_v59 = vadd.f32 %v5256_v5, %v5220_v62  ;;  %v19076_v23 = vld [vmem:[#allocation22_spill] sm:$0xff]  ;;  %v5412_v55 = vmul.f32 %v19077_v42, %v5392_v18  ;;  %v19079_v62 = vld [vmem:[#allocation85_spill] sm:$0xff] }
 0x37e   :  { %9970 = vmatmul.mubr.f32.gmra.mrb[4].mxu1 %v5765_v16  ;;  %v2251_v11 = vadd.f32 %v2235_v37, %v2199_v30  ;;  %v2340_v34 = vmul.f32 %v19076_v23, %v14353_v33  ;;  %v14363_v16 = vld [vmem:[#allocation3 + $0x122] sm:$0xff]  ;;  %v5496_v35 = vld [vmem:[#allocation3 + $0xf7] sm:$0xff]  ;;  %v5464_v31 = vmul.f32 %v19079_v62, %v5444_v22 }
 0x37f   :  { %9972 = vmatprep.mubr.f32.mxu1 %v5775_v19  ;;  %v5324_v32 = vadd.f32 %v5308_v6, %v5272_v59  ;;  %v2392_v19 = vmul.f32 %v19078_v1, %v14358_v25  ;;  %v14368_v50 = vld [vmem:[#allocation3 + $0x123] sm:$0xff]  ;;  %v19082_v59 = vld [vmem:[#allocation86_spill] sm:$0xff] }
 0x380   :  { %v2303_v29 = vadd.f32 %v2287_v54, %v2251_v11  ;;  %19080 = vst [vmem:[#allocation159_spill] sm:$0xff] %v14368_v50  ;;  %v19081_v37 = vld [vmem:[#allocation24_spill] sm:$0xff]  ;;  %v5516_v18 = vmul.f32 %v19082_v59, %v5496_v35  ;;  %v19084_v11 = vld [vmem:[#allocation25_spill] sm:$0xff]  ;;  %v14392_v59 = vld [vmem:[#allocation3 + $0x132] sm:$0xff] }
 0x381   :  { %v5376_v5 = vadd.f32 %v5360_v51, %v5324_v32  ;;  %v2444_v2 = vmul.f32 %v19081_v37, %v14363_v16  ;;  %v14373_v42 = vld [vmem:[#allocation3 + $0x124] sm:$0xff]  ;;  %v2496_v54 = vmul.f32 %v19084_v11, %v14368_v50  ;;  %19093 = vst [vmem:[#allocation160_spill] sm:$0xff] %v14392_v59  ;;  %v14394_v11 = vld [vmem:[#allocation3 + $0x133] sm:$0xff] }
 0x382   :  { %v2356_v30 = vadd.f32 %v2340_v34, %v2303_v29  ;;  %19083 = vst [vmem:[#allocation123_spill] sm:$0xff] %v14373_v42  ;;  %v14377_v1 = vld [vmem:[#allocation3 + $0x125] sm:$0xff]  ;;  %19094 = vst [vmem:[#allocation93_spill] sm:$0xff] %v14394_v11  ;;  %v14400_v23 = vld [vmem:[#allocation3 + $0x134] sm:$0xff] }
 0x383   :  { %v5428_v6 = vadd.f32 %v5412_v55, %v5376_v5  ;;  %19085 = vst [vmem:[#allocation114_spill] sm:$0xff] %v14377_v1  ;;  %v14379_v51 = vld [vmem:[#allocation3 + $0x126] sm:$0xff]  ;;  %v14386_v55 = vld [vmem:[#allocation3 + $0x130] sm:$0xff]  ;;  %19097 = vst [vmem:[#allocation152_spill] sm:$0xff] %v14400_v23 }
 0x384   :  { %v2408_v15 = vadd.f32 %v2392_v19, %v2356_v30  ;;  %19086 = vst [vmem:[#allocation132_spill] sm:$0xff] %v14379_v51  ;;  %v19087_v32 = vld [vmem:[#allocation109_spill] sm:$0xff]  ;;  %19090 = vst [vmem:[#allocation136_spill] sm:$0xff] %v14386_v55  ;;  %v19091_v5 = vld [vmem:[#allocation26_spill] sm:$0xff] }
 0x385   :  { %v5480_v22 = vadd.f32 %v5464_v31, %v5428_v6  ;;  %v5568_v62 = vmul.f32 %v19087_v32, %v5548_v4  ;;  %v14382_v34 = vld [vmem:[#allocation3 + $0x127] sm:$0xff]  ;;  %v2548_v19 = vmul.f32 %v19091_v5, %v14373_v42  ;;  %v14390_v30 = vld [vmem:[#allocation3 + $0x131] sm:$0xff] }
 0x386   :  { %19088 = vst [vmem:[#allocation151_spill] sm:$0xff] %v14382_v34  ;;  %v14384_v29 = vld [vmem:[#allocation3 + $0x128] sm:$0xff]  ;;  %v2460_v35 = vadd.f32 %v2444_v2, %v2408_v15  ;;  %19092 = vst [vmem:[#allocation103_spill] sm:$0xff] %v14390_v30  ;;  %v19095_v31 = vld [vmem:[#allocation27_spill] sm:$0xff] }
 0x387   :  { %19089 = vst [vmem:[#allocation118_spill] sm:$0xff] %v14384_v29  ;;  %v5532_v37 = vadd.f32 %v5516_v18, %v5480_v22  ;;  %v2600_v4 = vmul.f32 %v19095_v31, %v14377_v1  ;;  %v19096_v6 = vld [vmem:[#allocation28_spill] sm:$0xff]  ;;  %v14402_v44 = vld [vmem:[#allocation3 + $0x135] sm:$0xff]  ;;  %v19100_v5 = vld [vmem:[#allocation29_spill] sm:$0xff]  ;;  %v2756_v10 = vmul.f32 %v19101_v17, %v14384_v29  ;;  %v14420_v1 = vmul.f32 %v19105_v43, %v14390_v30 }
 0x388   :  { %v2652_v32 = vmul.f32 %v19096_v6, %v14379_v51  ;;  %19098 = vst [vmem:[#allocation120_spill] sm:$0xff] %v14402_v44  ;;  %v14404_v2 = vld [vmem:[#allocation3 + $0x136] sm:$0xff]  ;;  %v2512_v15 = vadd.f32 %v2496_v54, %v2460_v35  ;;  %v2704_v36 = vmul.f32 %v19100_v5, %v14382_v34  ;;  %v19106_v54 = vld [vmem:[#allocation33_spill] sm:$0xff] }
 0x389   :  { %19099 = vst [vmem:[#allocation138_spill] sm:$0xff] %v14404_v2  ;;  %v19102_v18 = vld [vmem:[#allocation31_spill] sm:$0xff]  ;;  %v5584_v51 = vadd.f32 %v5568_v62, %v5532_v37  ;;  %v14424_v35 = vmul.f32 %v19106_v54, %v14392_v59  ;;  %v19107_v5 = vld [vmem:[#allocation34_spill] sm:$0xff]  ;;  %v19110_v37 = vld [vmem:[#allocation36_spill] sm:$0xff] }
 0x38a   :  { %v14412_v22 = vmul.f32 %v19102_v18, %v14386_v55  ;;  %v14414_v31 = vld [vmem:[#allocation3 + $0x137] sm:$0xff]  ;;  %v14428_v17 = vmul.f32 %v19107_v5, %v14394_v11  ;;  %v14432_v18 = vld [vmem:[#allocation3 + $0x160] sm:$0xff]  ;;  %v2564_v55 = vadd.f32 %v2548_v19, %v2512_v15  ;;  %v14440_v43 = vmul.f32 %v19110_v37, %v14402_v44  ;;  %v19111_v54 = vld [vmem:[#allocation37_spill] sm:$0xff] }
 0x38b   :  { %19103 = vst [vmem:[#allocation141_spill] sm:$0xff] %v14414_v31  ;;  %v14416_v6 = vld [vmem:[#allocation3 + $0x138] sm:$0xff]  ;;  %v14430_v29 = vld [vmem:[#allocation3 + $0x150] sm:$0xff]  ;;  %v14444_v59 = vmul.f32 %v19111_v54, %v14404_v2  ;;  %v14448_v5 = vld [vmem:[#allocation3 + $0x161] sm:$0xff]  ;;  %v5619_v19 = vsel %vm45_vm0, %v5584_v51, 0  ;;  %v1403_v54 = vmul.f32 %v14267_v39, %v19016_v41 }
 0x38c   :  { %19104 = vst [vmem:[#allocation115_spill] sm:$0xff] %v14416_v6  ;;  %19108 = vst [vmem:[#allocation89_spill] sm:$0xff] %v14430_v29  ;;  %v19109_v34 = vld [vmem:[#allocation35_spill] sm:$0xff]  ;;  %v14450_v11 = vld [vmem:[#allocation3 + $0x170] sm:$0xff]  ;;  %v14465_v2 = vand.u32 4294901760, %v5619_v19  ;;  %v2616_v63 = vadd.f32 %v2600_v4, %v2564_v55  ;;  %v1407_v51 = vmul.f32 %v14430_v29, %v19016_v41  ;;  %v1460_v55 = vmul.f32 %v14448_v5, %v19018_v57 }
 0x38d   :  { %v14436_v62 = vmul.f32 %v19109_v34, %v14400_v23  ;;  %v14446_v30 = vld [vmem:[#allocation3 + $0x151] sm:$0xff] }
 0x38e   :  { %19112 = vst [vmem:[#allocation137_spill] sm:$0xff] %v14446_v30  ;;  %v19113_v15 = vld [vmem:[#allocation38_spill] sm:$0xff]  ;;  %v19114_v23 = vld [vmem:[#allocation39_spill] sm:$0xff]  ;;  %19115 = vst [vmem:[#allocation171_spill] sm:$0xff] %v14465_v2  ;;  %v1459_v39 = vmul.f32 %v14446_v30, %v19018_v57  ;;  %v14484_v4 = vsub.f32 %v5619_v19, %v14465_v2  ;;  %v2668_v29 = vadd.f32 %v2652_v32, %v2616_v63 }
 0x38f   :  { %v14455_v34 = vmul.f32 %v19113_v15, %v14414_v31  ;;  %v14459_v37 = vmul.f32 %v19114_v23, %v14416_v6  ;;  %v14461_v44 = vld [vmem:[#allocation3 + $0x171] sm:$0xff]  ;;  %v1408_v15 = vmul.f32 %v14432_v18, %v19016_v41  ;;  %v14473_v31 = vld [vmem:[#allocation3 + $0x162] sm:$0xff]  ;;  %v1409_v23 = vmul.f32 %v14450_v11, %v19016_v41 }
 0x390   :  { %v1455_v6 = vmul.f32 %v14273_v27, %v19018_v57  ;;  %19116 = vst [vmem:[#allocation126_spill] sm:$0xff] %v14484_v4  ;;  %v14486_v12 = vld [vmem:[#allocation3 + $0x172] sm:$0xff]  ;;  %v1461_v42 = vmul.f32 %v14461_v44, %v19018_v57  ;;  %v1507_v41 = vmul.f32 %v14279_v21, %v19022_v47  ;;  %v1475_v24 = vadd.f32 %v1459_v39, %v1407_v51  ;;  %v14497_v63 = vld [vmem:[#allocation3 + $0x163] sm:$0xff] }
 0x391   :  { %v14492_v60 = vld [vmem:[#allocation3 + $0x153] sm:$0xff]  ;;  %v1476_v30 = vadd.f32 %v1460_v55, %v1408_v15  ;;  %v17949_v19 = vand.u32 4294901760, %v14484_v4  ;;  %v2720_v2 = vadd.f32 %v2704_v36, %v2668_v29  ;;  %v1512_v57 = vmul.f32 %v14473_v31, %v19022_v47  ;;  %v14512_v39 = vld [vmem:[#allocation3 + $0x164] sm:$0xff] }
 0x392   :  { %v1471_v27 = vadd.f32 %v1455_v6, %v1403_v54  ;;  %v14499_v32 = vld [vmem:[#allocation3 + $0x173] sm:$0xff]  ;;  %v1477_v50 = vadd.f32 %v1461_v42, %v1409_v23  ;;  %v1513_v21 = vmul.f32 %v14486_v12, %v19022_v47  ;;  %v1527_v54 = vadd.f32 %v1511_v61, %v1475_v24 }
 0x393   :  { %v1559_v15 = vmul.f32 %v14295_v53, %v19029_v20  ;;  %v5784_v36 = vsub.f32 %v14484_v4, %v17949_v19  ;;  %v2772_v29 = vadd.f32 %v2756_v10, %v2720_v2  ;;  %v14510_v51 = vld [vmem:[#allocation3 + $0x154] sm:$0xff]  ;;  %v1528_v23 = vadd.f32 %v1512_v57, %v1476_v30  ;;  %v14525_v19 = vld [vmem:[#allocation3 + $0x165] sm:$0xff] }
 0x394   :  { %v1523_v6 = vadd.f32 %v1507_v41, %v1471_v27  ;;  %v1563_v42 = vmul.f32 %v14492_v60, %v19029_v20  ;;  %v14516_v55 = vld [vmem:[#allocation3 + $0x174] sm:$0xff]  ;;  %v1529_v41 = vadd.f32 %v1513_v21, %v1477_v50  ;;  %v1564_v61 = vmul.f32 %v14497_v63, %v19029_v20 }
 0x395   :  { %v1565_v24 = vmul.f32 %v14499_v32, %v19029_v20  ;;  %v5785_v27 = vand.u32 4294901760, %v5784_v36  ;;  %v2825_v10 = vadd.f32 %v14412_v22, %v2772_v29  ;;  %v14523_v2 = vld [vmem:[#allocation3 + $0x155] sm:$0xff]  ;;  %v1611_v30 = vmul.f32 %v14307_v8, %v19035_v52  ;;  %v14542_v29 = vld [vmem:[#allocation3 + $0x166] sm:$0xff] }
 0x396   :  { %v1575_v53 = vadd.f32 %v1559_v15, %v1523_v6  ;;  %v1579_v57 = vadd.f32 %v1563_v42, %v1527_v54  ;;  %v14529_v4 = vld [vmem:[#allocation3 + $0x175] sm:$0xff]  ;;  %v1580_v50 = vadd.f32 %v1564_v61, %v1528_v23  ;;  %v1615_v47 = vmul.f32 %v14510_v51, %v19035_v52 }
 0x397   :  { %v1581_v21 = vadd.f32 %v1565_v24, %v1529_v41  ;;  %v1616_v6 = vmul.f32 %v14512_v39, %v19035_v52  ;;  %9973 = vmatmul.mubr.f32.gmra.mrb[6].mxu1 %v5785_v27  ;;  %v2877_v22 = vadd.f32 %v14420_v1, %v2825_v10  ;;  %v14536_v15 = vld [vmem:[#allocation3 + $0x156] sm:$0xff]  ;;  %v1617_v54 = vmul.f32 %v14516_v55, %v19035_v52 }
 0x398   :  { %v1627_v36 = vadd.f32 %v1611_v30, %v1575_v53  ;;  %v1663_v8 = vmul.f32 %v14320_v38, %v19038_v56  ;;  %v14544_v23 = vld [vmem:[#allocation3 + $0x176] sm:$0xff]  ;;  %v1631_v42 = vadd.f32 %v1615_v47, %v1579_v57  ;;  %v1667_v61 = vmul.f32 %v14523_v2, %v19038_v56  ;;  %v14555_v30 = vld [vmem:[#allocation3 + $0x167] sm:$0xff] }
 0x399   :  { %v1632_v41 = vadd.f32 %v1616_v6, %v1580_v50  ;;  %v1668_v1 = vmul.f32 %v14525_v19, %v19038_v56  ;;  %v2929_v24 = vadd.f32 %v14424_v35, %v2877_v22  ;;  %v14551_v27 = vld [vmem:[#allocation3 + $0x157] sm:$0xff]  ;;  %v1633_v53 = vadd.f32 %v1617_v54, %v1581_v21 }
 0x39a   :  { %v1669_v38 = vmul.f32 %v14529_v4, %v19038_v56  ;;  %v1679_v10 = vadd.f32 %v1663_v8, %v1627_v36  ;;  %v1683_v52 = vadd.f32 %v1667_v61, %v1631_v42  ;;  %v1715_v57 = vmul.f32 %v14334_v49, %v19044_v48  ;;  %v14562_v35 = vld [vmem:[#allocation3 + $0x177] sm:$0xff]  ;;  %v14570_v8 = vld [vmem:[#allocation3 + $0x168] sm:$0xff]  ;;  %v19136_v56 = vld [vmem:[#allocation48_spill] sm:$0xff] }
 0x39b   :  { %v1684_v47 = vadd.f32 %v1668_v1, %v1632_v41  ;;  %v1719_v50 = vmul.f32 %v14536_v15, %v19044_v48  ;;  %v2981_v6 = vadd.f32 %v14428_v17, %v2929_v24  ;;  %v1720_v21 = vmul.f32 %v14542_v29, %v19044_v48  ;;  %v14568_v36 = vld [vmem:[#allocation3 + $0x158] sm:$0xff] }
 0x39c   :  { %v1685_v22 = vadd.f32 %v1669_v38, %v1633_v53  ;;  %v1721_v54 = vmul.f32 %v14544_v23, %v19044_v48  ;;  %v1731_v42 = vadd.f32 %v1715_v57, %v1679_v10  ;;  %v1767_v41 = vmul.f32 %v14340_v26, %v19050_v45  ;;  %v14577_v1 = vld [vmem:[#allocation3 + $0x178] sm:$0xff] }
 0x39d   :  { %v1735_v49 = vadd.f32 %v1719_v50, %v1683_v52  ;;  %v1771_v17 = vmul.f32 %v14551_v27, %v19050_v45  ;;  %v3033_v61 = vadd.f32 %v14436_v62, %v2981_v6  ;;  %v1736_v24 = vadd.f32 %v1720_v21, %v1684_v47 }
 0x39e   :  { %v1737_v53 = vadd.f32 %v1721_v54, %v1685_v22  ;;  %v1772_v38 = vmul.f32 %v14555_v30, %v19050_v45  ;;  %v1773_v48 = vmul.f32 %v14562_v35, %v19050_v45  ;;  %v1783_v10 = vadd.f32 %v1767_v41, %v1731_v42  ;;  %v19117_v41 = vld [vmem:[#allocation40_spill] sm:$0xff] }
 0x39f   :  { %v1787_v52 = vadd.f32 %v1771_v17, %v1735_v49  ;;  %v1819_v26 = vmul.f32 %v14348_v28, %v19054_v40  ;;  %v3085_v57 = vadd.f32 %v14440_v43, %v3033_v61  ;;  %v1823_v62 = vmul.f32 %v14568_v36, %v19054_v40 }
 0x3a0   :  { %v1788_v50 = vadd.f32 %v1772_v38, %v1736_v24  ;;  %v1824_v47 = vmul.f32 %v14570_v8, %v19054_v40  ;;  %v1789_v6 = vadd.f32 %v1773_v48, %v1737_v53  ;;  %v1825_v22 = vmul.f32 %v14577_v1, %v19054_v40 }
 0x3a1   :  { %v1835_v21 = vadd.f32 %v1819_v26, %v1783_v10  ;;  %v1872_v54 = vmul.f32 %v14353_v33, %v19058_v3  ;;  %v3137_v42 = vadd.f32 %v14444_v59, %v3085_v57  ;;  %v1839_v28 = vadd.f32 %v1823_v62, %v1787_v52 }
 0x3a2   :  { %v1840_v49 = vadd.f32 %v1824_v47, %v1788_v50  ;;  %v1876_v43 = vmul.f32 %v14432_v18, %v19058_v3  ;;  %v3277_v17 = vmul.f32 %v19117_v41, %v14159_v58  ;;  %v14599_v61 = vadd.f32 %v1825_v22, %v1789_v6 }
 0x3a3   :  { %v1877_v48 = vmul.f32 %v14450_v11, %v19058_v3  ;;  %v1888_v24 = vadd.f32 %v1872_v54, %v1835_v21  ;;  %v3189_v53 = vadd.f32 %v14455_v34, %v3137_v42  ;;  %v1924_v33 = vmul.f32 %v14358_v25, %v19060_v9  ;;  %v19118_v34 = vld [vmem:[#allocation41_spill] sm:$0xff]  ;;  %v19119_v21 = vld [vmem:[#allocation42_spill] sm:$0xff]  ;;  %v19120_v42 = vld [vmem:[#allocation159_spill] sm:$0xff] }
 0x3a4   :  { %v1892_v38 = vadd.f32 %v1876_v43, %v1839_v28  ;;  %v1928_v59 = vmul.f32 %v14448_v5, %v19060_v9  ;;  %v1929_v52 = vmul.f32 %v14461_v44, %v19060_v9  ;;  %v1976_v50 = vmul.f32 %v14363_v16, %v19062_v14 }
 0x3a5   :  { %v1893_v10 = vadd.f32 %v1877_v48, %v1840_v49  ;;  %v3241_v58 = vadd.f32 %v14459_v37, %v3189_v53  ;;  %v1940_v26 = vadd.f32 %v1924_v33, %v1888_v24  ;;  %v3329_v62 = vmul.f32 %v19118_v34, %v14170_v7  ;;  %v19121_v24 = vld [vmem:[#allocation127_spill] sm:$0xff]  ;;  %v19124_v33 = vld [vmem:[#allocation44_spill] sm:$0xff] }
 0x3a6   :  { %v1944_v57 = vadd.f32 %v1928_v59, %v1892_v38  ;;  %v1980_v25 = vmul.f32 %v14473_v31, %v19062_v14  ;;  %v1981_v6 = vmul.f32 %v14486_v12, %v19062_v14  ;;  %v3381_v54 = vmul.f32 %v19119_v21, %v14185_v46  ;;  %v19122_v53 = vld [vmem:[#allocation43_spill] sm:$0xff] }
 0x3a7   :  { %v1945_v47 = vadd.f32 %v1929_v52, %v1893_v10  ;;  %v3293_v22 = vadd.f32 %v3277_v17, %v3241_v58  ;;  %v1992_v37 = vadd.f32 %v1976_v50, %v1940_v26  ;;  %v2028_v28 = vmul.f32 %v19120_v42, %v19063_v13  ;;  %v19123_v17 = vld [vmem:[#allocation135_spill] sm:$0xff]  ;;  %v19125_v58 = vld [vmem:[#allocation17_spill] sm:$0xff] }
 0x3a8   :  { %v1996_v49 = vadd.f32 %v1980_v25, %v1944_v57  ;;  %v2032_v7 = vmul.f32 %v14497_v63, %v19063_v13  ;;  %v2033_v43 = vmul.f32 %v14499_v32, %v19063_v13  ;;  %v3433_v38 = vmul.f32 %v19122_v53, %v19121_v24  ;;  %v19126_v26 = vld [vmem:[#allocation123_spill] sm:$0xff]  ;;  %v19127_v25 = vld [vmem:[#allocation164_spill] sm:$0xff] }
 0x3a9   :  { %v1997_v16 = vadd.f32 %v1981_v6, %v1945_v47  ;;  %v3345_v48 = vadd.f32 %v3329_v62, %v3293_v22  ;;  %v3485_v59 = vmul.f32 %v19124_v33, %v19123_v17  ;;  %v2044_v46 = vadd.f32 %v2028_v28, %v1992_v37  ;;  %v19128_v6 = vld [vmem:[#allocation45_spill] sm:$0xff]  ;;  %v19129_v62 = vld [vmem:[#allocation148_spill] sm:$0xff]  ;;  %v19130_v22 = vld [vmem:[#allocation46_spill] sm:$0xff] }
 0x3aa   :  { %v2048_v10 = vadd.f32 %v2032_v7, %v1996_v49  ;;  %v2080_v57 = vmul.f32 %v19126_v26, %v19125_v58  ;;  %v2084_v50 = vmul.f32 %v14512_v39, %v19125_v58  ;;  %v3537_v42 = vmul.f32 %v19128_v6, %v19127_v25  ;;  %v19131_v28 = vld [vmem:[#allocation18_spill] sm:$0xff]  ;;  %v19133_v26 = vld [vmem:[#allocation165_spill] sm:$0xff] }
 0x3ab   :  { %v2049_v52 = vadd.f32 %v2033_v43, %v1997_v16  ;;  %v3397_v47 = vadd.f32 %v3381_v54, %v3345_v48  ;;  %v3589_v40 = vmul.f32 %v19130_v22, %v19129_v62  ;;  %v2085_v24 = vmul.f32 %v14516_v55, %v19125_v58  ;;  %v19132_v49 = vld [vmem:[#allocation114_spill] sm:$0xff]  ;;  %v19134_v54 = vld [vmem:[#allocation47_spill] sm:$0xff] }
 0x3ac   :  { %v2096_v17 = vadd.f32 %v2080_v57, %v2044_v46  ;;  %v2100_v37 = vadd.f32 %v2084_v50, %v2048_v10  ;;  %v2132_v16 = vmul.f32 %v19132_v49, %v19131_v28  ;;  %v2136_v7 = vmul.f32 %v14525_v19, %v19131_v28  ;;  %v19135_v62 = vld [vmem:[#allocation119_spill] sm:$0xff]  ;;  %v19138_v57 = vld [vmem:[#allocation132_spill] sm:$0xff]  ;;  %v19142_v33 = vld [vmem:[#allocation50_spill] sm:$0xff] }
 0x3ad   :  { %v3449_v43 = vadd.f32 %v3433_v38, %v3397_v47  ;;  %v3641_v48 = vmul.f32 %v19134_v54, %v19133_v26  ;;  %v2101_v45 = vadd.f32 %v2085_v24, %v2049_v52  ;;  %v2137_v25 = vmul.f32 %v14529_v4, %v19131_v28  ;;  %v19137_v10 = vld [vmem:[#allocation19_spill] sm:$0xff]  ;;  %v19139_v52 = vld [vmem:[#allocation89_spill] sm:$0xff] }
 0x3ae   :  { %v3693_v20 = vmul.f32 %v19136_v56, %v19135_v62  ;;  %v2148_v22 = vadd.f32 %v2132_v16, %v2096_v17  ;;  %v2152_v46 = vadd.f32 %v2136_v7, %v2100_v37  ;;  %v2184_v50 = vmul.f32 %v19138_v57, %v19137_v10  ;;  %v19140_v24 = vld [vmem:[#allocation49_spill] sm:$0xff]  ;;  %v19143_v17 = vld [vmem:[#allocation20_spill] sm:$0xff]  ;;  %v19144_v37 = vld [vmem:[#allocation151_spill] sm:$0xff] }
 0x3af   :  { %v3501_v49 = vadd.f32 %v3485_v59, %v3449_v43  ;;  %v2153_v6 = vadd.f32 %v2137_v25, %v2101_v45  ;;  %v2188_v38 = vmul.f32 %v14542_v29, %v19137_v10  ;;  %v2189_v47 = vmul.f32 %v14544_v23, %v19137_v10  ;;  %v19141_v54 = vld [vmem:[#allocation137_spill] sm:$0xff]  ;;  %v19145_v43 = vld [vmem:[#allocation51_spill] sm:$0xff]  ;;  %v19146_v56 = vld [vmem:[#allocation52_spill] sm:$0xff] }
 0x3b0   :  { %v3746_v26 = vmul.f32 %v19140_v24, %v19139_v52  ;;  %v3798_v53 = vmul.f32 %v19142_v33, %v19141_v54  ;;  %v2200_v62 = vadd.f32 %v2184_v50, %v2148_v22  ;;  %v2236_v16 = vmul.f32 %v19144_v37, %v19143_v17  ;;  %v14671_v50 = vld [vmem:[#allocation3 + $0x180] sm:$0xff]  ;;  %v19153_v33 = vld [vmem:[#allocation55_spill] sm:$0xff] }
 0x3b1   :  { %v3553_v7 = vadd.f32 %v3537_v42, %v3501_v49  ;;  %v2204_v57 = vadd.f32 %v2188_v38, %v2152_v46  ;;  %v2205_v59 = vadd.f32 %v2189_v47, %v2153_v6  ;;  %v2240_v45 = vmul.f32 %v14555_v30, %v19143_v17  ;;  %v19147_v42 = vld [vmem:[#allocation21_spill] sm:$0xff]  ;;  %v19148_v46 = vld [vmem:[#allocation118_spill] sm:$0xff] }
 0x3b2   :  { %v3850_v25 = vmul.f32 %v19145_v43, %v14467_v0  ;;  %v3902_v21 = vmul.f32 %v19146_v56, %v14492_v60  ;;  %v2241_v52 = vmul.f32 %v14562_v35, %v19143_v17  ;;  %v2252_v54 = vadd.f32 %v2236_v16, %v2200_v62  ;;  %v19149_v38 = vld [vmem:[#allocation53_spill] sm:$0xff]  ;;  %v19150_v47 = vld [vmem:[#allocation54_spill] sm:$0xff] }
 0x3b3   :  { %v3605_v22 = vadd.f32 %v3589_v40, %v3553_v7  ;;  %v2256_v37 = vadd.f32 %v2240_v45, %v2204_v57  ;;  %v2288_v6 = vmul.f32 %v19148_v46, %v19147_v42  ;;  %v2292_v49 = vmul.f32 %v14570_v8, %v19147_v42  ;;  %v14685_v16 = vld [vmem:[#allocation3 + $0x181] sm:$0xff]  ;;  %v19151_v45 = vld [vmem:[#allocation22_spill] sm:$0xff] }
 0x3b4   :  { %v3954_v0 = vmul.f32 %v19149_v38, %v14510_v51  ;;  %v14681_v60 = vmul.f32 %v19150_v47, %v14523_v2  ;;  %v2257_v56 = vadd.f32 %v2241_v52, %v2205_v59  ;;  %v2293_v40 = vmul.f32 %v14577_v1, %v19147_v42  ;;  %v19152_v46 = vld [vmem:[#allocation136_spill] sm:$0xff] }
 0x3b5   :  { %v3657_v62 = vadd.f32 %v3641_v48, %v3605_v22  ;;  %v2304_v7 = vadd.f32 %v2288_v6, %v2252_v54  ;;  %v2308_v57 = vadd.f32 %v2292_v49, %v2256_v37  ;;  %v2341_v43 = vmul.f32 %v19152_v46, %v19151_v45  ;;  %v19154_v48 = vld [vmem:[#allocation56_spill] sm:$0xff]  ;;  %v19155_v37 = vld [vmem:[#allocation23_spill] sm:$0xff] }
 0x3b6   :  { %v14691_v24 = vmul.f32 %v19153_v33, %v14536_v15  ;;  %v2309_v51 = vadd.f32 %v2293_v40, %v2257_v56  ;;  %v2345_v2 = vmul.f32 %v14450_v11, %v19151_v45  ;;  %v2346_v59 = vmul.f32 %v14671_v50, %v19151_v45  ;;  %v19156_v6 = vld [vmem:[#allocation103_spill] sm:$0xff]  ;;  %v14703_v46 = vld [vmem:[#allocation3 + $0x182] sm:$0xff] }
 0x3b7   :  { %v3709_v52 = vadd.f32 %v3693_v20, %v3657_v62  ;;  %v14699_v22 = vmul.f32 %v19154_v48, %v14551_v27  ;;  %v2357_v54 = vadd.f32 %v2341_v43, %v2304_v7  ;;  %v2393_v49 = vmul.f32 %v19156_v6, %v19155_v37  ;;  %v19157_v20 = vld [vmem:[#allocation57_spill] sm:$0xff]  ;;  %v19158_v27 = vld [vmem:[#allocation58_spill] sm:$0xff] }
 0x3b8   :  { %v2361_v15 = vadd.f32 %v2345_v2, %v2308_v57  ;;  %v2362_v33 = vadd.f32 %v2346_v59, %v2309_v51  ;;  %v2397_v56 = vmul.f32 %v14461_v44, %v19155_v37  ;;  %v2398_v40 = vmul.f32 %v14685_v16, %v19155_v37  ;;  %v14717_v6 = vld [vmem:[#allocation3 + $0x183] sm:$0xff] }
 0x3b9   :  { %v3762_v47 = vadd.f32 %v3746_v26, %v3709_v52  ;;  %v14711_v62 = vmul.f32 %v19157_v20, %v14568_v36  ;;  %v14715_v43 = vmul.f32 %v19158_v27, %v14432_v18  ;;  %v2409_v7 = vadd.f32 %v2393_v49, %v2357_v54  ;;  %v19159_v2 = vld [vmem:[#allocation24_spill] sm:$0xff]  ;;  %v19161_v52 = vld [vmem:[#allocation59_spill] sm:$0xff] }
 0x3ba   :  { %v2413_v57 = vadd.f32 %v2397_v56, %v2361_v15  ;;  %v2414_v51 = vadd.f32 %v2398_v40, %v2362_v33  ;;  %v19160_v59 = vld [vmem:[#allocation160_spill] sm:$0xff]  ;;  %v2449_v38 = vmul.f32 %v14486_v12, %v19159_v2  ;;  %v14725_v36 = vmul.f32 %v19161_v52, %v14448_v5  ;;  %v19163_v56 = vld [vmem:[#allocation25_spill] sm:$0xff] }
 0x3bb   :  { %v2445_v48 = vmul.f32 %v19160_v59, %v19159_v2  ;;  %v3814_v26 = vadd.f32 %v3798_v53, %v3762_v47  ;;  %v19162_v20 = vld [vmem:[#allocation60_spill] sm:$0xff]  ;;  %v2450_v54 = vmul.f32 %v14703_v46, %v19159_v2  ;;  %v19164_v40 = vld [vmem:[#allocation93_spill] sm:$0xff]  ;;  %v2501_v53 = vmul.f32 %v14499_v32, %v19163_v56 }
 0x3bc   :  { %v14729_v18 = vmul.f32 %v19162_v20, %v14473_v31  ;;  %v14733_v49 = vld [vmem:[#allocation3 + $0x184] sm:$0xff]  ;;  %v2465_v15 = vadd.f32 %v2449_v38, %v2413_v57  ;;  %v2497_v59 = vmul.f32 %v19164_v40, %v19163_v56  ;;  %v2502_v20 = vmul.f32 %v14717_v6, %v19163_v56 }
 0x3bd   :  { %v2461_v33 = vadd.f32 %v2445_v48, %v2409_v7  ;;  %v3866_v47 = vadd.f32 %v3850_v25, %v3814_v26  ;;  %v19165_v5 = vld [vmem:[#allocation61_spill] sm:$0xff]  ;;  %v2466_v31 = vadd.f32 %v2450_v54, %v2414_v51  ;;  %v1878_v27 = vmul.f32 %v14671_v50, %v19058_v3  ;;  %v19166_v7 = vld [vmem:[#allocation26_spill] sm:$0xff]  ;;  %v19167_v57 = vld [vmem:[#allocation152_spill] sm:$0xff] }
 0x3be   :  { %v14741_v52 = vmul.f32 %v19165_v5, %v14497_v63  ;;  %v2517_v38 = vadd.f32 %v2501_v53, %v2465_v15  ;;  %v2549_v40 = vmul.f32 %v19167_v57, %v19166_v7  ;;  %v14749_v37 = vld [vmem:[#allocation3 + $0x185] sm:$0xff]  ;;  %v2553_v63 = vmul.f32 %v14516_v55, %v19166_v7  ;;  %v19168_v26 = vld [vmem:[#allocation62_spill] sm:$0xff]  ;;  %v19171_v3 = vld [vmem:[#allocation63_spill] sm:$0xff] }
 0x3bf   :  { %v2513_v48 = vadd.f32 %v2497_v59, %v2461_v33  ;;  %v3918_v2 = vadd.f32 %v3902_v21, %v3866_v47  ;;  %v2518_v25 = vadd.f32 %v2502_v20, %v2466_v31  ;;  %v2554_v51 = vmul.f32 %v14733_v49, %v19166_v7  ;;  %v19169_v59 = vld [vmem:[#allocation27_spill] sm:$0xff]  ;;  %v19170_v53 = vld [vmem:[#allocation120_spill] sm:$0xff] }
 0x3c0   :  { %v14757_v54 = vmul.f32 %v19168_v26, %v14512_v39  ;;  %v1894_v33 = vadd.f32 %v1878_v27, %v14599_v61  ;;  %v2601_v57 = vmul.f32 %v19170_v53, %v19169_v59  ;;  %v14762_v47 = vld [vmem:[#allocation3 + $0x186] sm:$0xff]  ;;  %v2569_v20 = vadd.f32 %v2553_v63, %v2517_v38 }
 0x3c1   :  { %v2565_v15 = vadd.f32 %v2549_v40, %v2513_v48  ;;  %v3970_v21 = vadd.f32 %v3954_v0, %v3918_v2  ;;  %v2570_v31 = vadd.f32 %v2554_v51, %v2518_v25  ;;  %v2605_v5 = vmul.f32 %v14529_v4, %v19169_v59  ;;  %v14775_v2 = vld [vmem:[#allocation3 + $0x187] sm:$0xff]  ;;  %v19173_v40 = vld [vmem:[#allocation138_spill] sm:$0xff] }
 0x3c2   :  { %v14768_v7 = vmul.f32 %v19171_v3, %v14525_v19  ;;  %v1930_v39 = vmul.f32 %v14685_v16, %v19060_v9  ;;  %v2606_v61 = vmul.f32 %v14749_v37, %v19169_v59  ;;  %v19172_v38 = vld [vmem:[#allocation28_spill] sm:$0xff]  ;;  %v19177_v9 = vld [vmem:[#allocation65_spill] sm:$0xff] }
 0x3c3   :  { %v2617_v27 = vadd.f32 %v2601_v57, %v2565_v15  ;;  %v4022_v0 = vadd.f32 %v14681_v60, %v3970_v21  ;;  %v2621_v48 = vadd.f32 %v2605_v5, %v2569_v20  ;;  %v2653_v25 = vmul.f32 %v19173_v40, %v19172_v38  ;;  %v19174_v19 = vld [vmem:[#allocation64_spill] sm:$0xff]  ;;  %v14788_v57 = vld [vmem:[#allocation3 + $0x188] sm:$0xff] }
 0x3c4   :  { %v2657_v63 = vmul.f32 %v14544_v23, %v19172_v38  ;;  %v14783_v51 = vmul.f32 %v19174_v19, %v14542_v29  ;;  %v1946_v53 = vadd.f32 %v1930_v39, %v1894_v33  ;;  %v2622_v3 = vadd.f32 %v2606_v61, %v2570_v31  ;;  %v19175_v20 = vld [vmem:[#allocation29_spill] sm:$0xff]  ;;  %v14820_v19 = vld [vmem:[#allocation3 + $0x191] sm:$0xff] }
 0x3c5   :  { %v2658_v15 = vmul.f32 %v14762_v47, %v19172_v38  ;;  %v4074_v60 = vadd.f32 %v14691_v24, %v4022_v0  ;;  %v2669_v5 = vadd.f32 %v2653_v25, %v2617_v27  ;;  %v19176_v40 = vld [vmem:[#allocation141_spill] sm:$0xff]  ;;  %v14794_v59 = vmul.f32 %v19177_v9, %v14555_v30  ;;  %v19178_v27 = vld [vmem:[#allocation30_spill] sm:$0xff]  ;;  %v19179_v0 = vld [vmem:[#allocation115_spill] sm:$0xff] }
 0x3c6   :  { %v2673_v21 = vadd.f32 %v2657_v63, %v2621_v48  ;;  %v2705_v26 = vmul.f32 %v19176_v40, %v19175_v20  ;;  %v2709_v33 = vmul.f32 %v14562_v35, %v19175_v20  ;;  %v2710_v31 = vmul.f32 %v14775_v2, %v19175_v20  ;;  %v14805_v25 = vld [vmem:[#allocation3 + $0x140] sm:$0xff]  ;;  %v14807_v30 = vld [vmem:[#allocation3 + $0x190] sm:$0xff] }
 0x3c7   :  { %v2674_v29 = vadd.f32 %v2658_v15, %v2622_v3  ;;  %v4126_v24 = vadd.f32 %v14699_v22, %v4074_v60  ;;  %v1982_v39 = vmul.f32 %v14703_v46, %v19062_v14  ;;  %v2757_v48 = vmul.f32 %v19179_v0, %v19178_v27  ;;  %19180 = vst [vmem:[#allocation95_spill] sm:$0xff] %v14805_v25  ;;  %v19181_v60 = vld [vmem:[#allocation66_spill] sm:$0xff]  ;;  %v14818_v9 = vld [vmem:[#allocation3 + $0x141] sm:$0xff] }
 0x3c8   :  { %v2721_v61 = vadd.f32 %v2705_v26, %v2669_v5  ;;  %v2725_v3 = vadd.f32 %v2709_v33, %v2673_v21  ;;  %v2761_v15 = vmul.f32 %v14577_v1, %v19178_v27  ;;  %v2762_v40 = vmul.f32 %v14788_v57, %v19178_v27  ;;  %19182 = vst [vmem:[#allocation154_spill] sm:$0xff] %v14818_v9  ;;  %v19183_v33 = vld [vmem:[#allocation31_spill] sm:$0xff] }
 0x3c9   :  { %v2726_v63 = vadd.f32 %v2710_v31, %v2674_v29  ;;  %v4178_v22 = vadd.f32 %v14711_v62, %v4126_v24  ;;  %v14816_v26 = vmul.f32 %v19181_v60, %v14570_v8  ;;  %v1998_v5 = vadd.f32 %v1982_v39, %v1946_v53  ;;  %v19184_v24 = vld [vmem:[#allocation67_spill] sm:$0xff]  ;;  %v14846_v60 = vld [vmem:[#allocation3 + $0x143] sm:$0xff] }
 0x3ca   :  { %v2773_v0 = vadd.f32 %v2757_v48, %v2721_v61  ;;  %v2777_v21 = vadd.f32 %v2761_v15, %v2725_v3  ;;  %v2810_v31 = vmul.f32 %v19183_v33, %v14805_v25  ;;  %v2814_v27 = vmul.f32 %v14671_v50, %v19183_v33  ;;  %v14835_v61 = vld [vmem:[#allocation3 + $0x142] sm:$0xff]  ;;  %v14837_v48 = vld [vmem:[#allocation3 + $0x192] sm:$0xff]  ;;  %19187 = vst [vmem:[#allocation140_spill] sm:$0xff] %v14846_v60 }
 0x3cb   :  { %v2778_v29 = vadd.f32 %v2762_v40, %v2726_v63  ;;  %v4231_v62 = vadd.f32 %v14715_v43, %v4178_v22  ;;  %v14829_v8 = vmul.f32 %v19184_v24, %v14450_v11  ;;  %v2034_v53 = vmul.f32 %v14717_v6, %v19063_v13  ;;  %19185 = vst [vmem:[#allocation146_spill] sm:$0xff] %v14835_v61  ;;  %v19186_v15 = vld [vmem:[#allocation32_spill] sm:$0xff] }
 0x3cc   :  { %v2815_v39 = vmul.f32 %v19183_v33, %v14807_v30  ;;  %v2826_v3 = vadd.f32 %v2810_v31, %v2773_v0  ;;  %v2830_v63 = vadd.f32 %v2814_v27, %v2777_v21  ;;  %v2862_v40 = vmul.f32 %v19186_v15, %v14818_v9  ;;  %v14848_v33 = vld [vmem:[#allocation3 + $0x193] sm:$0xff]  ;;  %v19188_v27 = vld [vmem:[#allocation33_spill] sm:$0xff] }
 0x3cd   :  { %v2866_v43 = vmul.f32 %v14685_v16, %v19186_v15  ;;  %v4283_v11 = vadd.f32 %v14725_v36, %v4231_v62  ;;  %v2050_v22 = vadd.f32 %v2034_v53, %v1998_v5  ;;  %v2867_v24 = vmul.f32 %v19186_v15, %v14820_v19  ;;  %v14859_v62 = vld [vmem:[#allocation3 + $0x144] sm:$0xff]  ;;  %v14861_v53 = vld [vmem:[#allocation3 + $0x194] sm:$0xff] }
 0x3ce   :  { %v2831_v25 = vadd.f32 %v2815_v39, %v2778_v29  ;;  %v2878_v13 = vadd.f32 %v2862_v40, %v2826_v3  ;;  %v2914_v21 = vmul.f32 %v19188_v27, %v14835_v61  ;;  %v2918_v31 = vmul.f32 %v14703_v46, %v19188_v27  ;;  %19189 = vst [vmem:[#allocation107_spill] sm:$0xff] %v14859_v62 }
 0x3cf   :  { %v2882_v0 = vadd.f32 %v2866_v43, %v2830_v63  ;;  %v4335_v9 = vadd.f32 %v14729_v18, %v4283_v11  ;;  %v2086_v36 = vmul.f32 %v14733_v49, %v19125_v58  ;;  %v2919_v29 = vmul.f32 %v19188_v27, %v14837_v48  ;;  %v19190_v63 = vld [vmem:[#allocation34_spill] sm:$0xff] }
 0x3d0   :  { %v2883_v5 = vadd.f32 %v2867_v24, %v2831_v25  ;;  %v2930_v39 = vadd.f32 %v2914_v21, %v2878_v13  ;;  %v2966_v40 = vmul.f32 %v19190_v63, %v14846_v60  ;;  %v2970_v43 = vmul.f32 %v14717_v6, %v19190_v63  ;;  %v14870_v24 = vld [vmem:[#allocation3 + $0x145] sm:$0xff]  ;;  %v14872_v27 = vld [vmem:[#allocation3 + $0x195] sm:$0xff] }
 0x3d1   :  { %v2934_v3 = vadd.f32 %v2918_v31, %v2882_v0  ;;  %v4387_v18 = vadd.f32 %v14741_v52, %v4335_v9  ;;  %v2102_v11 = vadd.f32 %v2086_v36, %v2050_v22  ;;  %v2971_v25 = vmul.f32 %v19190_v63, %v14848_v33  ;;  %19191 = vst [vmem:[#allocation83_spill] sm:$0xff] %v14870_v24  ;;  %v19192_v0 = vld [vmem:[#allocation35_spill] sm:$0xff]  ;;  %v14883_v36 = vld [vmem:[#allocation3 + $0x146] sm:$0xff] }
 0x3d2   :  { %v2935_v61 = vadd.f32 %v2919_v29, %v2883_v5  ;;  %v2982_v15 = vadd.f32 %v2966_v40, %v2930_v39  ;;  %v3018_v21 = vmul.f32 %v19192_v0, %v14859_v62  ;;  %v3022_v31 = vmul.f32 %v14733_v49, %v19192_v0  ;;  %19193 = vst [vmem:[#allocation167_spill] sm:$0xff] %v14883_v36  ;;  %v14885_v5 = vld [vmem:[#allocation3 + $0x196] sm:$0xff] }
 0x3d3   :  { %v2986_v13 = vadd.f32 %v2970_v43, %v2934_v3  ;;  %v4439_v60 = vadd.f32 %v14757_v54, %v4387_v18  ;;  %v2138_v9 = vmul.f32 %v14749_v37, %v19131_v28  ;;  %v3023_v22 = vmul.f32 %v19192_v0, %v14861_v53  ;;  %v19194_v3 = vld [vmem:[#allocation36_spill] sm:$0xff]  ;;  %v14896_v0 = vld [vmem:[#allocation3 + $0x197] sm:$0xff] }
 0x3d4   :  { %v2987_v52 = vadd.f32 %v2971_v25, %v2935_v61  ;;  %v3034_v29 = vadd.f32 %v3018_v21, %v2982_v15  ;;  %v3070_v40 = vmul.f32 %v19194_v3, %v14870_v24  ;;  %v3074_v43 = vmul.f32 %v14749_v37, %v19194_v3  ;;  %v14894_v25 = vld [vmem:[#allocation3 + $0x147] sm:$0xff] }
 0x3d5   :  { %v3038_v39 = vadd.f32 %v3022_v31, %v2986_v13  ;;  %v4491_v54 = vadd.f32 %v14768_v7, %v4439_v60  ;;  %v2154_v18 = vadd.f32 %v2138_v9, %v2102_v11  ;;  %v3075_v61 = vmul.f32 %v19194_v3, %v14872_v27  ;;  %19195 = vst [vmem:[#allocation172_spill] sm:$0xff] %v14894_v25  ;;  %v19196_v13 = vld [vmem:[#allocation37_spill] sm:$0xff] }
 0x3d6   :  { %v3039_v62 = vadd.f32 %v3023_v22, %v2987_v52  ;;  %v3086_v63 = vadd.f32 %v3070_v40, %v3034_v29  ;;  %v3122_v21 = vmul.f32 %v19196_v13, %v14883_v36  ;;  %v3126_v31 = vmul.f32 %v14762_v47, %v19196_v13  ;;  %v14907_v9 = vld [vmem:[#allocation3 + $0x148] sm:$0xff]  ;;  %v14909_v52 = vld [vmem:[#allocation3 + $0x198] sm:$0xff] }
 0x3d7   :  { %v3090_v15 = vadd.f32 %v3074_v43, %v3038_v39  ;;  %v4543_v24 = vadd.f32 %v14783_v51, %v4491_v54  ;;  %v2190_v7 = vmul.f32 %v14762_v47, %v19137_v10  ;;  %v3127_v11 = vmul.f32 %v19196_v13, %v14885_v5  ;;  %19197 = vst [vmem:[#allocation121_spill] sm:$0xff] %v14907_v9  ;;  %v19198_v39 = vld [vmem:[#allocation38_spill] sm:$0xff] }
 0x3d8   :  { %v3091_v60 = vadd.f32 %v3075_v61, %v3039_v62  ;;  %v3138_v22 = vadd.f32 %v3122_v21, %v3086_v63  ;;  %v3174_v40 = vmul.f32 %v19198_v39, %v14894_v25  ;;  %v3178_v43 = vmul.f32 %v14775_v2, %v19198_v39  ;;  %v14918_v61 = vld [vmem:[#allocation3 + $0x150] sm:$0xff]  ;;  %v19200_v63 = vld [vmem:[#allocation39_spill] sm:$0xff] }
 0x3d9   :  { %v3142_v29 = vadd.f32 %v3126_v31, %v3090_v15  ;;  %v4595_v51 = vadd.f32 %v14794_v59, %v4543_v24  ;;  %v2206_v54 = vadd.f32 %v2190_v7, %v2154_v18  ;;  %v3179_v62 = vmul.f32 %v19198_v39, %v14896_v0  ;;  %19199 = vst [vmem:[#allocation168_spill] sm:$0xff] %v14918_v61  ;;  %v14929_v7 = vld [vmem:[#allocation3 + $0x151] sm:$0xff] }
 0x3da   :  { %v3143_v3 = vadd.f32 %v3127_v11, %v3091_v60  ;;  %v3190_v13 = vadd.f32 %v3174_v40, %v3138_v22  ;;  %v3226_v15 = vmul.f32 %v19200_v63, %v14907_v9  ;;  %v3230_v21 = vmul.f32 %v14788_v57, %v19200_v63  ;;  %19201 = vst [vmem:[#allocation173_spill] sm:$0xff] %v14929_v7 }
 0x3db   :  { %v3194_v36 = vadd.f32 %v3178_v43, %v3142_v29  ;;  %v4647_v31 = vadd.f32 %v14816_v26, %v4595_v51  ;;  %v2242_v59 = vmul.f32 %v14775_v2, %v19143_v17  ;;  %v3231_v18 = vmul.f32 %v19200_v63, %v14909_v52  ;;  %v19202_v26 = vld [vmem:[#allocation68_spill] sm:$0xff] }
 0x3dc   :  { %v3195_v24 = vadd.f32 %v3179_v62, %v3143_v3  ;;  %v3242_v60 = vadd.f32 %v3226_v15, %v3190_v13  ;;  %v3278_v22 = vmul.f32 %v19117_v41, %v14918_v61  ;;  %v3282_v29 = vmul.f32 %v19117_v41, %v14807_v30  ;;  %v14940_v62 = vld [vmem:[#allocation3 + $0x152] sm:$0xff] }
 0x3dd   :  { %v3246_v11 = vadd.f32 %v3230_v21, %v3194_v36  ;;  %v4700_v40 = vadd.f32 %v14829_v8, %v4647_v31  ;;  %v4736_v43 = vmul.f32 %v19202_v26, %v14461_v44  ;;  %v2258_v51 = vadd.f32 %v2242_v59, %v2206_v54  ;;  %19204 = vst [vmem:[#allocation169_spill] sm:$0xff] %v14940_v62  ;;  %v19205_v21 = vld [vmem:[#allocation69_spill] sm:$0xff]  ;;  %v14950_v54 = vld [vmem:[#allocation3 + $0x153] sm:$0xff] }
 0x3de   :  { %v14938_v3 = vadd.f32 %v3231_v18, %v3195_v24  ;;  %v3294_v63 = vadd.f32 %v3278_v22, %v3242_v60  ;;  %v3330_v36 = vmul.f32 %v19118_v34, %v14929_v7  ;;  %v3334_v13 = vmul.f32 %v19118_v34, %v14820_v19  ;;  %19206 = vst [vmem:[#allocation155_spill] sm:$0xff] %v14950_v54  ;;  %v19207_v24 = vld [vmem:[#allocation42_spill] sm:$0xff]  ;;  %v19210_v61 = vld [vmem:[#allocation43_spill] sm:$0xff] }
 0x3df   :  { %v3298_v39 = vadd.f32 %v3282_v29, %v3246_v11  ;;  %v4752_v15 = vadd.f32 %v4736_v43, %v4700_v40  ;;  %v4788_v8 = vmul.f32 %v19205_v21, %v14486_v12  ;;  %v2294_v44 = vmul.f32 %v14788_v57, %v19147_v42  ;;  %v19208_v22 = vld [vmem:[#allocation70_spill] sm:$0xff] }
 0x3e0   :  { %19203 = vst [vmem:[#allocation88_spill] sm:$0xff] %v14938_v3  ;;  %v3346_v31 = vadd.f32 %v3330_v36, %v3294_v63  ;;  %v3382_v18 = vmul.f32 %v19207_v24, %v14940_v62  ;;  %v3386_v60 = vmul.f32 %v19207_v24, %v14837_v48  ;;  %v4840_v29 = vmul.f32 %v19208_v22, %v14499_v32  ;;  %v14958_v43 = vld [vmem:[#allocation3 + $0x154] sm:$0xff]  ;;  %v19211_v36 = vld [vmem:[#allocation72_spill] sm:$0xff] }
 0x3e1   :  { %v3350_v59 = vadd.f32 %v3334_v13, %v3298_v39  ;;  %v4804_v11 = vadd.f32 %v4788_v8, %v4752_v15  ;;  %v2310_v40 = vadd.f32 %v2294_v44, %v2258_v51  ;;  %19209 = vst [vmem:[#allocation161_spill] sm:$0xff] %v14958_v43  ;;  %v3434_v9 = vmul.f32 %v19210_v61, %v14950_v54  ;;  %v14968_v8 = vld [vmem:[#allocation3 + $0x155] sm:$0xff]  ;;  %v19213_v44 = vld [vmem:[#allocation44_spill] sm:$0xff]  ;;  %v19216_v54 = vld [vmem:[#allocation45_spill] sm:$0xff] }
 0x3e2   :  { %v3398_v12 = vadd.f32 %v3382_v18, %v3346_v31  ;;  %v3438_v39 = vmul.f32 %v19210_v61, %v14848_v33  ;;  %v4892_v13 = vmul.f32 %v19211_v36, %v14516_v55  ;;  %v2347_v15 = vmul.f32 %v19151_v45, %v14807_v30  ;;  %19212 = vst [vmem:[#allocation170_spill] sm:$0xff] %v14968_v8  ;;  %v14976_v61 = vld [vmem:[#allocation3 + $0x156] sm:$0xff]  ;;  %v15014_v3 = vld [vmem:[#allocation3 + $0x161] sm:$0xff] }
 0x3e3   :  { %v3402_v7 = vadd.f32 %v3386_v60, %v3350_v59  ;;  %v4856_v63 = vadd.f32 %v4840_v29, %v4804_v11  ;;  %v3486_v31 = vmul.f32 %v19213_v44, %v14958_v43  ;;  %v3490_v59 = vmul.f32 %v19213_v44, %v14861_v53  ;;  %v19214_v60 = vld [vmem:[#allocation73_spill] sm:$0xff]  ;;  %19215 = vst [vmem:[#allocation116_spill] sm:$0xff] %v14976_v61  ;;  %v14986_v44 = vld [vmem:[#allocation3 + $0x157] sm:$0xff] }
 0x3e4   :  { %v3450_v32 = vadd.f32 %v3434_v9, %v3398_v12  ;;  %v4944_v11 = vmul.f32 %v19214_v60, %v14529_v4  ;;  %v2363_v29 = vadd.f32 %v2347_v15, %v2310_v40  ;;  %v3538_v62 = vmul.f32 %v19216_v54, %v14968_v8  ;;  %v19217_v12 = vld [vmem:[#allocation74_spill] sm:$0xff]  ;;  %19219 = vst [vmem:[#allocation133_spill] sm:$0xff] %v14986_v44  ;;  %v19223_v43 = vld [vmem:[#allocation47_spill] sm:$0xff] }
 0x3e5   :  { %v3454_v51 = vadd.f32 %v3438_v39, %v3402_v7  ;;  %v4908_v18 = vadd.f32 %v4892_v13, %v4856_v63  ;;  %v3542_v9 = vmul.f32 %v19216_v54, %v14872_v27  ;;  %v4996_v39 = vmul.f32 %v19217_v12, %v14544_v23  ;;  %v19218_v63 = vld [vmem:[#allocation23_spill] sm:$0xff]  ;;  %v19220_v15 = vld [vmem:[#allocation46_spill] sm:$0xff]  ;;  %19230 = vst [vmem:[#allocation112_spill] sm:$0xff] %v15014_v3 }
 0x3e6   :  { %v3502_v55 = vadd.f32 %v3486_v31, %v3450_v32  ;;  %v2399_v13 = vmul.f32 %v19218_v63, %v14820_v19  ;;  %v3590_v32 = vmul.f32 %v19220_v15, %v14976_v61  ;;  %v14994_v54 = vld [vmem:[#allocation3 + $0x158] sm:$0xff]  ;;  %v3642_v34 = vmul.f32 %v19223_v43, %v14986_v44  ;;  %v19229_v44 = vld [vmem:[#allocation78_spill] sm:$0xff]  ;;  %v19241_v63 = vld [vmem:[#allocation80_spill] sm:$0xff] }
 0x3e7   :  { %v3506_v24 = vadd.f32 %v3490_v59, %v3454_v51  ;;  %v4960_v7 = vadd.f32 %v4944_v11, %v4908_v18  ;;  %v3594_v51 = vmul.f32 %v19220_v15, %v14885_v5  ;;  %v19221_v59 = vld [vmem:[#allocation75_spill] sm:$0xff]  ;;  %19222 = vst [vmem:[#allocation87_spill] sm:$0xff] %v14994_v54  ;;  %v15004_v15 = vld [vmem:[#allocation3 + $0x160] sm:$0xff]  ;;  %v5205_v61 = vmul.f32 %v19229_v44, %v14685_v16 }
 0x3e8   :  { %v3554_v4 = vadd.f32 %v3538_v62, %v3502_v55  ;;  %v5048_v18 = vmul.f32 %v19221_v59, %v14562_v35  ;;  %v2415_v11 = vadd.f32 %v2399_v13, %v2363_v29  ;;  %v3646_v62 = vmul.f32 %v19223_v43, %v14896_v0  ;;  %v19224_v55 = vld [vmem:[#allocation76_spill] sm:$0xff]  ;;  %19226 = vst [vmem:[#allocation174_spill] sm:$0xff] %v15004_v15 }
 0x3e9   :  { %v3558_v40 = vadd.f32 %v3542_v9, %v3506_v24  ;;  %v5012_v31 = vadd.f32 %v4996_v39, %v4960_v7  ;;  %v5100_v9 = vmul.f32 %v19224_v55, %v14577_v1  ;;  %v19225_v7 = vld [vmem:[#allocation24_spill] sm:$0xff] }
 0x3ea   :  { %v3606_v23 = vadd.f32 %v3590_v32, %v3554_v4  ;;  %v2451_v39 = vmul.f32 %v19225_v7, %v14837_v48  ;;  %v1384_v35 = vld [vmem:[#allocation3 + $0x120] sm:$0xff] }
 0x3eb   :  { %v3610_v8 = vadd.f32 %v3594_v51, %v3558_v40  ;;  %v5064_v24 = vadd.f32 %v5048_v18, %v5012_v31  ;;  %v19227_v4 = vld [vmem:[#allocation48_spill] sm:$0xff]  ;;  %v19228_v18 = vld [vmem:[#allocation77_spill] sm:$0xff] }
 0x3ec   :  { %v3658_v29 = vadd.f32 %v3642_v34, %v3606_v23  ;;  %v3694_v40 = vmul.f32 %v19227_v4, %v14994_v54  ;;  %v3698_v32 = vmul.f32 %v19227_v4, %v14909_v52  ;;  %v1436_v51 = vld [vmem:[#allocation3 + $0x121] sm:$0xff]  ;;  %v5153_v1 = vmul.f32 %v19228_v18, %v14671_v50 }
 0x3ed   :  { %v3662_v13 = vadd.f32 %v3646_v62, %v3610_v8  ;;  %v1488_v43 = vld [vmem:[#allocation3 + $0x122] sm:$0xff]  ;;  %v5116_v31 = vadd.f32 %v5100_v9, %v5064_v24  ;;  %v2467_v25 = vadd.f32 %v2451_v39, %v2415_v11  ;;  %v2503_v24 = vmul.f32 %v19163_v56, %v14848_v33  ;;  %v19236_v11 = vld [vmem:[#allocation6_spill] sm:$0xff] }
 0x3ee   :  { %v3710_v34 = vadd.f32 %v3694_v40, %v3658_v29  ;;  %v19232_v23 = vld [vmem:[#allocation49_spill] sm:$0xff]  ;;  %v19233_v54 = vld [vmem:[#allocation4_spill] sm:$0xff]  ;;  %v1508_v39 = vmul.f32 %v19236_v11, %v1488_v43  ;;  %v19237_v29 = vld [vmem:[#allocation79_spill] sm:$0xff] }
 0x3ef   :  { %v15016_v8 = vadd.f32 %v3698_v32, %v3662_v13  ;;  %v3747_v62 = vmul.f32 %v19232_v23, %v15004_v15  ;;  %v1404_v4 = vmul.f32 %v19233_v54, %v1384_v35  ;;  %v1540_v7 = vld [vmem:[#allocation3 + $0x123] sm:$0xff]  ;;  %v5169_v41 = vadd.f32 %v5153_v1, %v5116_v31  ;;  %v19238_v32 = vld [vmem:[#allocation50_spill] sm:$0xff]  ;;  %v19240_v54 = vld [vmem:[#allocation7_spill] sm:$0xff] }
 0x3f0   :  { %v15023_v50 = vld [vmem:[#allocation3 + $0x162] sm:$0xff]  ;;  %v5257_v13 = vmul.f32 %v19237_v29, %v14703_v46  ;;  %v2519_v15 = vadd.f32 %v2503_v24, %v2467_v25  ;;  %v1560_v56 = vmul.f32 %v19240_v54, %v1540_v7  ;;  %v19242_v43 = vld [vmem:[#allocation51_spill] sm:$0xff] }
 0x3f1   :  { %19231 = vst [vmem:[#allocation163_spill] sm:$0xff] %v15016_v8  ;;  %19234 = vst [vmem:[#allocation104_spill] sm:$0xff] %v15023_v50  ;;  %v19235_v9 = vld [vmem:[#allocation5_spill] sm:$0xff]  ;;  %v3763_v40 = vadd.f32 %v3747_v62, %v3710_v34  ;;  %v3799_v8 = vmul.f32 %v19238_v32, %v15014_v3  ;;  %v5221_v35 = vadd.f32 %v5205_v61, %v5169_v41  ;;  %v19243_v62 = vld [vmem:[#allocation26_spill] sm:$0xff] }
 0x3f2   :  { %v1456_v16 = vmul.f32 %v19235_v9, %v1436_v51  ;;  %v1592_v23 = vld [vmem:[#allocation3 + $0x124] sm:$0xff]  ;;  %v5309_v51 = vmul.f32 %v19241_v63, %v14717_v6  ;;  %v3851_v11 = vmul.f32 %v19242_v43, %v15023_v50  ;;  %v2555_v32 = vmul.f32 %v19243_v62, %v14861_v53 }
 0x3f3   :  { %v15031_v31 = vld [vmem:[#allocation3 + $0x163] sm:$0xff]  ;;  %v3815_v9 = vadd.f32 %v3799_v8, %v3763_v40  ;;  %v5273_v34 = vadd.f32 %v5257_v13, %v5221_v35 }
 0x3f4   :  { %19239 = vst [vmem:[#allocation100_spill] sm:$0xff] %v15031_v31  ;;  %v1472_v1 = vadd.f32 %v1456_v16, %v1404_v4  ;;  %v1644_v46 = vld [vmem:[#allocation3 + $0x125] sm:$0xff]  ;;  %v2571_v43 = vadd.f32 %v2555_v32, %v2519_v15  ;;  %v19254_v32 = vld [vmem:[#allocation10_spill] sm:$0xff] }
 0x3f5   :  { %v15040_v3 = vld [vmem:[#allocation3 + $0x164] sm:$0xff]  ;;  %v3867_v24 = vadd.f32 %v3851_v11, %v3815_v9  ;;  %v5325_v40 = vadd.f32 %v5309_v51, %v5273_v34  ;;  %v19252_v11 = vld [vmem:[#allocation27_spill] sm:$0xff] }
 0x3f6   :  { %19244 = vst [vmem:[#allocation153_spill] sm:$0xff] %v15040_v3  ;;  %v1524_v41 = vadd.f32 %v1508_v39, %v1472_v1  ;;  %v19245_v25 = vld [vmem:[#allocation8_spill] sm:$0xff]  ;;  %v19246_v4 = vld [vmem:[#allocation81_spill] sm:$0xff] }
 0x3f7   :  { %v1612_v61 = vmul.f32 %v19245_v25, %v1592_v23  ;;  %v5361_v7 = vmul.f32 %v19246_v4, %v14733_v49  ;;  %v19247_v6 = vld [vmem:[#allocation52_spill] sm:$0xff]  ;;  %v19249_v35 = vld [vmem:[#allocation9_spill] sm:$0xff] }
 0x3f8   :  { %v3903_v8 = vmul.f32 %v19247_v6, %v15031_v31  ;;  %v1696_v16 = vld [vmem:[#allocation3 + $0x126] sm:$0xff]  ;;  %v1576_v13 = vadd.f32 %v1560_v56, %v1524_v41  ;;  %v1664_v54 = vmul.f32 %v19249_v35, %v1644_v46  ;;  %v2607_v6 = vmul.f32 %v19252_v11, %v14872_v27  ;;  %v19259_v11 = vld [vmem:[#allocation86_spill] sm:$0xff] }
 0x3f9   :  { %v15047_v50 = vld [vmem:[#allocation3 + $0x165] sm:$0xff]  ;;  %v5377_v9 = vadd.f32 %v5361_v7, %v5325_v40  ;;  %v1716_v51 = vmul.f32 %v19254_v32, %v1696_v16  ;;  %v19258_v40 = vld [vmem:[#allocation11_spill] sm:$0xff] }
 0x3fa   :  { %19248 = vst [vmem:[#allocation111_spill] sm:$0xff] %v15047_v50  ;;  %v19250_v62 = vld [vmem:[#allocation84_spill] sm:$0xff]  ;;  %v3919_v1 = vadd.f32 %v3903_v8, %v3867_v24  ;;  %v19251_v23 = vld [vmem:[#allocation53_spill] sm:$0xff]  ;;  %v1628_v15 = vadd.f32 %v1612_v61, %v1576_v13  ;;  %v5517_v61 = vmul.f32 %v19259_v11, %v14775_v2  ;;  %v19260_v16 = vld [vmem:[#allocation55_spill] sm:$0xff] }
 0x3fb   :  { %v5413_v39 = vmul.f32 %v19250_v62, %v14749_v37  ;;  %v3955_v25 = vmul.f32 %v19251_v23, %v15040_v3  ;;  %v1748_v49 = vld [vmem:[#allocation3 + $0x127] sm:$0xff]  ;;  %v19256_v37 = vld [vmem:[#allocation54_spill] sm:$0xff]  ;;  %v2623_v23 = vadd.f32 %v2607_v6, %v2571_v43 }
 0x3fc   :  { %v15056_v31 = vld [vmem:[#allocation3 + $0x166] sm:$0xff]  ;;  %v4007_v41 = vmul.f32 %v19256_v37, %v15047_v50  ;;  %v1680_v7 = vadd.f32 %v1664_v54, %v1628_v15  ;;  %v1768_v35 = vmul.f32 %v19258_v40, %v1748_v49  ;;  %v15080_v49 = vld [vmem:[%s17573_s2 + $0x50] ss:$0 sm:$0xff]  ;;  %v15158_v40 = vld [vmem:[#allocation3 + $0x137] sm:$0xff] }
 0x3fd   :  { %19253 = vst [vmem:[#allocation156_spill] sm:$0xff] %v15056_v31  ;;  %v19255_v56 = vld [vmem:[#allocation85_spill] sm:$0xff]  ;;  %v3971_v34 = vadd.f32 %v3955_v25, %v3919_v1  ;;  %v5429_v8 = vadd.f32 %v5413_v39, %v5377_v9  ;;  %v4059_v32 = vmul.f32 %v19260_v16, %v15056_v31  ;;  %v2659_v1 = vmul.f32 %v19172_v38, %v14885_v5  ;;  %v19263_v6 = vld [vmem:[#allocation12_spill] sm:$0xff]  ;;  %v15088_v16 = vld [vmem:[#allocation3 + $0x170] sm:$0xff] }
 0x3fe   :  { %v5465_v46 = vmul.f32 %v19255_v56, %v14762_v47  ;;  %v1800_v24 = vld [vmem:[#allocation3 + $0x128] sm:$0xff]  ;;  %v15070_v47 = vld [vmem:[#allocation3 + $0x130] sm:$0xff]  ;;  %v1732_v43 = vadd.f32 %v1716_v51, %v1680_v7  ;;  %19264 = vst [vmem:[#allocation99_spill] sm:$0xff] %v15080_v49  ;;  %v5569_v2 = vmul.f32 %v15080_v49, %v14788_v57  ;;  %v19265_v15 = vld [vmem:[#allocation56_spill] sm:$0xff] }
 0x3ff   :  { %v15063_v3 = vld [vmem:[#allocation3 + $0x167] sm:$0xff]  ;;  %v4023_v13 = vadd.f32 %v4007_v41, %v3971_v34  ;;  %19261 = vst [vmem:[#allocation105_spill] sm:$0xff] %v15070_v47  ;;  %v1820_v54 = vmul.f32 %v19263_v6, %v1800_v24  ;;  %v15086_v34 = vld [vmem:[#allocation3 + $0x131] sm:$0xff]  ;;  %19267 = vst [vmem:[#allocation157_spill] sm:$0xff] %v15088_v16 }
 0x400   :  { %19257 = vst [vmem:[#allocation162_spill] sm:$0xff] %v15063_v3  ;;  %v5481_v25 = vadd.f32 %v5465_v46, %v5429_v8  ;;  %v15074_v39 = vld [vmem:[#allocation3 + $0x168] sm:$0xff]  ;;  %v4111_v46 = vmul.f32 %v19265_v15, %v15063_v3  ;;  %19266 = vst [vmem:[#allocation106_spill] sm:$0xff] %v15086_v34  ;;  %v2675_v8 = vadd.f32 %v2659_v1, %v2623_v23  ;;  %v15094_v6 = vld [vmem:[#allocation3 + $0x132] sm:$0xff] }
 0x401   :  { %19262 = vst [vmem:[#allocation98_spill] sm:$0xff] %v15074_v39  ;;  %v4075_v9 = vadd.f32 %v4059_v32, %v4023_v13  ;;  %v1784_v51 = vadd.f32 %v1768_v35, %v1732_v43  ;;  %v19268_v24 = vld [vmem:[#allocation13_spill] sm:$0xff]  ;;  %19270 = vst [vmem:[#allocation147_spill] sm:$0xff] %v15094_v6  ;;  %v2711_v32 = vmul.f32 %v19175_v20, %v14896_v0  ;;  %v15098_v13 = vld [vmem:[#allocation3 + $0x171] sm:$0xff] }
 0x402   :  { %v5533_v41 = vadd.f32 %v5517_v61, %v5481_v25  ;;  %v1873_v7 = vmul.f32 %v19268_v24, %v15070_v47  ;;  %v19269_v31 = vld [vmem:[#allocation57_spill] sm:$0xff]  ;;  %19271 = vst [vmem:[#allocation101_spill] sm:$0xff] %v15098_v13  ;;  %v19272_v23 = vld [vmem:[#allocation14_spill] sm:$0xff] }
 0x403   :  { %v4127_v37 = vadd.f32 %v4111_v46, %v4075_v9  ;;  %v4163_v50 = vmul.f32 %v19269_v31, %v15074_v39  ;;  %v1836_v61 = vadd.f32 %v1820_v54, %v1784_v51  ;;  %v1925_v25 = vmul.f32 %v19272_v23, %v15086_v34  ;;  %v19273_v1 = vld [vmem:[#allocation58_spill] sm:$0xff]  ;;  %v19277_v51 = vld [vmem:[#allocation59_spill] sm:$0xff]  ;;  %v19297_v34 = vld [vmem:[#allocation65_spill] sm:$0xff] }
 0x404   :  { %v5585_v57 = vadd.f32 %v5569_v2, %v5533_v41  ;;  %v4216_v43 = vmul.f32 %v19273_v1, %v15088_v16  ;;  %v15104_v9 = vld [vmem:[#allocation3 + $0x133] sm:$0xff]  ;;  %v2727_v31 = vadd.f32 %v2711_v32, %v2675_v8  ;;  %v1977_v41 = vmul.f32 %v19062_v14, %v15094_v6 }
 0x405   :  { %v4179_v35 = vadd.f32 %v4163_v50, %v4127_v37  ;;  %19274 = vst [vmem:[#allocation124_spill] sm:$0xff] %v15104_v9  ;;  %v15107_v15 = vld [vmem:[#allocation3 + $0x172] sm:$0xff]  ;;  %v1889_v2 = vadd.f32 %v1873_v7, %v1836_v61  ;;  %v4268_v50 = vmul.f32 %v19277_v51, %v15098_v13  ;;  %v15130_v51 = vld [vmem:[#allocation3 + $0x1a0] sm:$0xff] }
 0x406   :  { %v5622_v46 = vsel %vm45_vm0, %v5585_v57, 0  ;;  %19275 = vst [vmem:[#allocation90_spill] sm:$0xff] %v15107_v15  ;;  %v15115_v37 = vld [vmem:[#allocation3 + $0x134] sm:$0xff]  ;;  %v19281_v57 = vld [vmem:[#allocation16_spill] sm:$0xff]  ;;  %19285 = vst [vmem:[#allocation117_spill] sm:$0xff] %v15130_v51 }
 0x407   :  { %v15111_v39 = vand.u32 4294901760, %v5622_v46  ;;  %v4232_v54 = vadd.f32 %v4216_v43, %v4179_v35  ;;  %19278 = vst [vmem:[#allocation175_spill] sm:$0xff] %v15115_v37  ;;  %v19279_v1 = vld [vmem:[#allocation30_spill] sm:$0xff]  ;;  %v1941_v8 = vadd.f32 %v1925_v25, %v1889_v2  ;;  %v2029_v7 = vmul.f32 %v19281_v57, %v15104_v9  ;;  %v19283_v35 = vld [vmem:[#allocation60_spill] sm:$0xff] }
 0x408   :  { %v2763_v23 = vmul.f32 %v19279_v1, %v14909_v52  ;;  %v15119_v16 = vld [vmem:[#allocation3 + $0x173] sm:$0xff]  ;;  %v4320_v43 = vmul.f32 %v19283_v35, %v15107_v15  ;;  %v2081_v25 = vmul.f32 %v19125_v58, %v15115_v37  ;;  %v15160_v37 = vld [vmem:[#allocation3 + $0x1a1] sm:$0xff] }
 0x409   :  { %19276 = vst [vmem:[#allocation144_spill] sm:$0xff] %v15111_v39  ;;  %19280 = vst [vmem:[#allocation94_spill] sm:$0xff] %v15119_v16  ;;  %v15124_v32 = vsub.f32 %v5622_v46, %v15111_v39  ;;  %v4284_v61 = vadd.f32 %v4268_v50, %v4232_v54  ;;  %v15128_v14 = vld [vmem:[#allocation3 + $0x135] sm:$0xff]  ;;  %v1993_v24 = vadd.f32 %v1977_v41, %v1941_v8  ;;  %v19287_v46 = vld [vmem:[#allocation61_spill] sm:$0xff] }
 0x40a   :  { %19284 = vst [vmem:[#allocation166_spill] sm:$0xff] %v15128_v14  ;;  %v2779_v13 = vadd.f32 %v2763_v23, %v2727_v31  ;;  %v15132_v3 = vld [vmem:[#allocation3 + $0x174] sm:$0xff]  ;;  %v4372_v54 = vmul.f32 %v19287_v46, %v15119_v16  ;;  %v2133_v23 = vmul.f32 %v19131_v28, %v15128_v14  ;;  %19293 = vst [vmem:[#allocation113_spill] sm:$0xff] %v15160_v37  ;;  %v15164_v28 = vld [vmem:[#allocation3 + $0x180] sm:$0xff] }
 0x40b   :  { %19282 = vst [vmem:[#allocation82_spill] sm:$0xff] %v15124_v32  ;;  %19286 = vst [vmem:[#allocation92_spill] sm:$0xff] %v15132_v3  ;;  %v18042_v2 = vand.u32 4294901760, %v15124_v32  ;;  %v4336_v57 = vadd.f32 %v4320_v43, %v4284_v61  ;;  %v15139_v50 = vld [vmem:[#allocation3 + $0x175] sm:$0xff]  ;;  %v2045_v31 = vadd.f32 %v2029_v7, %v1993_v24  ;;  %v15166_v14 = vld [vmem:[#allocation3 + $0x181] sm:$0xff] }
 0x40c   :  { %19288 = vst [vmem:[#allocation176_spill] sm:$0xff] %v15139_v50  ;;  %v15141_v39 = vld [vmem:[#allocation3 + $0x136] sm:$0xff]  ;;  %v15168_v9 = vld [vmem:[#allocation3 + $0x182] sm:$0xff] }
 0x40d   :  { %v15143_v35 = vld [vmem:[#allocation3 + $0x176] sm:$0xff]  ;;  %v5794_v61 = vsub.f32 %v15124_v32, %v18042_v2  ;;  %v4388_v43 = vadd.f32 %v4372_v54, %v4336_v57  ;;  %19295 = vst [vmem:[#allocation177_spill] sm:$0xff] %v15168_v9  ;;  %v2097_v2 = vadd.f32 %v2081_v25, %v2045_v31  ;;  %v2185_v57 = vmul.f32 %v19137_v10, %v15141_v39  ;;  %v15182_v25 = vld [vmem:[#allocation3 + $0x184] sm:$0xff] }
 0x40e   :  { %v15145_v15 = vld [vmem:[#allocation3 + $0x177] sm:$0xff]  ;;  %v15184_v31 = vld [vmem:[#allocation3 + $0x185] sm:$0xff] }
 0x40f   :  { %19289 = vst [vmem:[#allocation145_spill] sm:$0xff] %v15145_v15  ;;  %v19290_v41 = vld [vmem:[#allocation31_spill] sm:$0xff]  ;;  %v19291_v58 = vld [vmem:[#allocation62_spill] sm:$0xff]  ;;  %v5795_v32 = vand.u32 4294901760, %v5794_v61  ;;  %v4580_v47 = vmul.f32 %v19297_v34, %v15145_v15  ;;  %v19299_v61 = vld [vmem:[#allocation32_spill] sm:$0xff] }
 0x410   :  { %v2816_v8 = vmul.f32 %v19290_v41, %v15130_v51  ;;  %v4424_v46 = vmul.f32 %v19291_v58, %v15132_v3  ;;  %v15156_v16 = vld [vmem:[#allocation3 + $0x178] sm:$0xff]  ;;  %v19296_v3 = vld [vmem:[#allocation64_spill] sm:$0xff]  ;;  %v19298_v41 = vld [vmem:[#allocation66_spill] sm:$0xff] }
 0x411   :  { %19292 = vst [vmem:[#allocation158_spill] sm:$0xff] %v15156_v16  ;;  %v19294_v24 = vld [vmem:[#allocation63_spill] sm:$0xff]  ;;  %v4528_v6 = vmul.f32 %v19296_v3, %v15143_v35  ;;  %v4632_v1 = vmul.f32 %v19298_v41, %v15156_v16  ;;  %9975 = vmatprep.mubr.f32.mxu1 %v5795_v32  ;;  %v4737_v41 = vmul.f32 %v19202_v26, %v15166_v14  ;;  %v15198_v15 = vld [vmem:[#allocation3 + $0x187] sm:$0xff] }
 0x412   :  { %v4476_v7 = vmul.f32 %v19294_v24, %v15139_v50  ;;  %v2832_v54 = vadd.f32 %v2816_v8, %v2779_v13  ;;  %v4440_v58 = vadd.f32 %v4424_v46, %v4388_v43  ;;  %v15176_v24 = vld [vmem:[#allocation3 + $0x183] sm:$0xff]  ;;  %v15178_v50 = vld [vmem:[#allocation3 + $0x138] sm:$0xff]  ;;  %v2149_v46 = vadd.f32 %v2133_v23, %v2097_v2  ;;  %19301 = vst [vmem:[#allocation102_spill] sm:$0xff] %v15198_v15 }
 0x413   :  { %v15186_v13 = vld [vmem:[#allocation3 + $0x186] sm:$0xff]  ;;  %v2237_v8 = vmul.f32 %v19143_v17, %v15158_v40  ;;  %v2868_v43 = vmul.f32 %v19299_v61, %v15160_v37  ;;  %v19300_v34 = vld [vmem:[#allocation67_spill] sm:$0xff]  ;;  %v4789_v16 = vmul.f32 %v19205_v21, %v15168_v9  ;;  %v4841_v23 = vmul.f32 %v19208_v22, %v15176_v24 }
 0x414   :  { %v4492_v10 = vadd.f32 %v4476_v7, %v4440_v58  ;;  %v4685_v3 = vmul.f32 %v19300_v34, %v15164_v28  ;;  %v15200_v2 = vld [vmem:[#allocation3 + $0x1a2] sm:$0xff]  ;;  %v2201_v32 = vadd.f32 %v2185_v57, %v2149_v46  ;;  %v2289_v58 = vmul.f32 %v19147_v42, %v15178_v50  ;;  %v19304_v46 = vld [vmem:[#allocation95_spill] sm:$0xff] }
 0x415   :  { %19302 = vst [vmem:[#allocation109_spill] sm:$0xff] %v15200_v2  ;;  %v15204_v17 = vld [vmem:[#allocation3 + $0x188] sm:$0xff]  ;;  %v2884_v7 = vadd.f32 %v2868_v43, %v2832_v54  ;;  %v4893_v26 = vmul.f32 %v19211_v36, %v15182_v25  ;;  %v15212_v21 = vmul.f32 %v19214_v60, %v15184_v31  ;;  %v15216_v9 = vmul.f32 %v19217_v12, %v15186_v13  ;;  %v19321_v60 = vld [vmem:[#allocation83_spill] sm:$0xff] }
 0x416   :  { %19303 = vst [vmem:[#allocation159_spill] sm:$0xff] %v15204_v17  ;;  %v4544_v34 = vadd.f32 %v4528_v6, %v4492_v10  ;;  %v15220_v22 = vmul.f32 %v19221_v59, %v15198_v15  ;;  %v2253_v57 = vadd.f32 %v2237_v8, %v2201_v32  ;;  %v2342_v54 = vmul.f32 %v19304_v46, %v19151_v45  ;;  %v19305_v10 = vld [vmem:[#allocation33_spill] sm:$0xff] }
 0x417   :  { %v2920_v6 = vmul.f32 %v19305_v10, %v15200_v2  ;;  %v15228_v42 = vmul.f32 %v19224_v55, %v15204_v17  ;;  %v15232_v12 = vmul.f32 %v19228_v18, %v14807_v30  ;;  %v15236_v59 = vmul.f32 %v19229_v44, %v14820_v19  ;;  %v15238_v8 = vld [vmem:[#allocation3 + $0x1a3] sm:$0xff]  ;;  %v19308_v18 = vld [vmem:[#allocation154_spill] sm:$0xff]  ;;  %v19320_v55 = vld [vmem:[#allocation27_spill] sm:$0xff] }
 0x418   :  { %v4596_v43 = vadd.f32 %v4580_v47, %v4544_v34  ;;  %19306 = vst [vmem:[#allocation127_spill] sm:$0xff] %v15238_v8  ;;  %v15242_v32 = vmul.f32 %v19237_v29, %v14837_v48  ;;  %v15246_v47 = vmul.f32 %v19241_v63, %v14848_v33  ;;  %v2305_v34 = vadd.f32 %v2289_v58, %v2253_v57  ;;  %v19307_v29 = vld [vmem:[#allocation23_spill] sm:$0xff]  ;;  %v19309_v58 = vld [vmem:[#allocation34_spill] sm:$0xff]  ;;  %v19317_v63 = vld [vmem:[#allocation88_spill] sm:$0xff] }
 0x419   :  { %v2936_v46 = vadd.f32 %v2920_v6, %v2884_v7  ;;  %v15250_v30 = vmul.f32 %v19246_v4, %v14861_v53  ;;  %v15254_v19 = vmul.f32 %v19250_v62, %v14872_v27  ;;  %v15258_v44 = vmul.f32 %v19255_v56, %v14885_v5  ;;  %v19312_v5 = vld [vmem:[#allocation24_spill] sm:$0xff] }
 0x41a   :  { %v4648_v45 = vadd.f32 %v4632_v1, %v4596_v43  ;;  %v2358_v48 = vadd.f32 %v2342_v54, %v2305_v34  ;;  %v2394_v33 = vmul.f32 %v19308_v18, %v19307_v29  ;;  %v2972_v7 = vmul.f32 %v19309_v58, %v15238_v8  ;;  %v19310_v1 = vld [vmem:[#allocation40_spill] sm:$0xff]  ;;  %v19313_v54 = vld [vmem:[#allocation146_spill] sm:$0xff]  ;;  %v19315_v29 = vld [vmem:[#allocation25_spill] sm:$0xff] }
 0x41b   :  { %v3283_v57 = vmul.f32 %v19310_v1, %v15130_v51  ;;  %v15268_v6 = vmul.f32 %v19259_v11, %v14896_v0  ;;  %v15272_v27 = vmul.f32 %v15080_v49, %v14909_v52  ;;  %v2446_v43 = vmul.f32 %v19313_v54, %v19312_v5  ;;  %v15276_v34 = vld [vmem:[#allocation3 + $0x1a4] sm:$0xff]  ;;  %v19318_v51 = vld [vmem:[#allocation26_spill] sm:$0xff]  ;;  %v19319_v0 = vld [vmem:[#allocation107_spill] sm:$0xff] }
 0x41c   :  { %v4701_v53 = vadd.f32 %v4685_v3, %v4648_v45  ;;  %19314 = vst [vmem:[#allocation123_spill] sm:$0xff] %v15276_v34  ;;  %v2410_v18 = vadd.f32 %v2394_v33, %v2358_v48  ;;  %v19316_v56 = vld [vmem:[#allocation140_spill] sm:$0xff]  ;;  %v2988_v4 = vadd.f32 %v2972_v7, %v2936_v46  ;;  %v2550_v11 = vmul.f32 %v19319_v0, %v19318_v51  ;;  %v19322_v49 = vld [vmem:[#allocation167_spill] sm:$0xff]  ;;  %v19325_v46 = vld [vmem:[#allocation41_spill] sm:$0xff] }
 0x41d   :  { %19311 = vst [vmem:[#allocation135_spill] sm:$0xff] %v15272_v27  ;;  %v2498_v62 = vmul.f32 %v19316_v56, %v19315_v29  ;;  %v3299_v45 = vadd.f32 %v3283_v57, %v19317_v63  ;;  %v2602_v52 = vmul.f32 %v19321_v60, %v19320_v55  ;;  %v2654_v36 = vmul.f32 %v19322_v49, %v19172_v38  ;;  %v19323_v5 = vld [vmem:[#allocation172_spill] sm:$0xff]  ;;  %v19324_v33 = vld [vmem:[#allocation35_spill] sm:$0xff]  ;;  %v19326_v7 = vld [vmem:[#allocation30_spill] sm:$0xff] }
 0x41e   :  { %v4753_v3 = vadd.f32 %v4737_v41, %v4701_v53  ;;  %v2462_v54 = vadd.f32 %v2446_v43, %v2410_v18  ;;  %v2706_v48 = vmul.f32 %v19323_v5, %v19175_v20  ;;  %v3024_v56 = vmul.f32 %v19324_v33, %v15276_v34  ;;  %v19327_v57 = vld [vmem:[#allocation121_spill] sm:$0xff]  ;;  %v19328_v0 = vld [vmem:[#allocation31_spill] sm:$0xff]  ;;  %v19329_v51 = vld [vmem:[#allocation168_spill] sm:$0xff] }
 0x41f   :  { %v3335_v63 = vmul.f32 %v19325_v46, %v15160_v37  ;;  %v2758_v53 = vmul.f32 %v19327_v57, %v19326_v7  ;;  %v2811_v60 = vmul.f32 %v19329_v51, %v19328_v0  ;;  %v19330_v55 = vld [vmem:[#allocation173_spill] sm:$0xff]  ;;  %v19334_v57 = vld [vmem:[#allocation4_spill] sm:$0xff]  ;;  %v19337_v27 = vld [vmem:[#allocation106_spill] sm:$0xff] }
 0x420   :  { %v4805_v41 = vadd.f32 %v4789_v16, %v4753_v3  ;;  %v2863_v49 = vmul.f32 %v19330_v55, %v19299_v61  ;;  %v15299_v43 = vld [vmem:[#allocation3 + $0x1a5] sm:$0xff]  ;;  %v2514_v18 = vadd.f32 %v2498_v62, %v2462_v54  ;;  %v3040_v38 = vadd.f32 %v3024_v56, %v2988_v4  ;;  %v19333_v16 = vld [vmem:[#allocation155_spill] sm:$0xff]  ;;  %v19340_v4 = vld [vmem:[#allocation6_spill] sm:$0xff] }
 0x421   :  { %19331 = vst [vmem:[#allocation164_spill] sm:$0xff] %v15299_v43  ;;  %v19332_v5 = vld [vmem:[#allocation169_spill] sm:$0xff]  ;;  %v3351_v29 = vadd.f32 %v3335_v63, %v3299_v45  ;;  %v15307_v3 = vmul.f32 %v19333_v16, %v19309_v58  ;;  %v19338_v62 = vld [vmem:[#allocation36_spill] sm:$0xff]  ;;  %v19341_v45 = vld [vmem:[#allocation147_spill] sm:$0xff] }
 0x422   :  { %v15303_v20 = vmul.f32 %v19332_v5, %v19305_v10  ;;  %v4857_v37 = vadd.f32 %v4841_v23, %v4805_v41  ;;  %v19335_v7 = vld [vmem:[#allocation105_spill] sm:$0xff]  ;;  %v2566_v61 = vadd.f32 %v2550_v11, %v2514_v18  ;;  %v3076_v54 = vmul.f32 %v19338_v62, %v15299_v43  ;;  %v19339_v5 = vld [vmem:[#allocation42_spill] sm:$0xff] }
 0x423   :  { %v1405_v51 = vmul.f32 %v19335_v7, %v19334_v57  ;;  %v19336_v0 = vld [vmem:[#allocation5_spill] sm:$0xff]  ;;  %v3387_v10 = vmul.f32 %v19339_v5, %v15200_v2  ;;  %v1509_v23 = vmul.f32 %v19341_v45, %v19340_v4  ;;  %v19344_v57 = vld [vmem:[#allocation7_spill] sm:$0xff]  ;;  %v19346_v18 = vld [vmem:[#allocation170_spill] sm:$0xff] }
 0x424   :  { %v1457_v55 = vmul.f32 %v19337_v27, %v19336_v0  ;;  %v4909_v56 = vadd.f32 %v4893_v26, %v4857_v37  ;;  %v19342_v63 = vld [vmem:[#allocation161_spill] sm:$0xff]  ;;  %v19345_v27 = vld [vmem:[#allocation124_spill] sm:$0xff]  ;;  %v2618_v0 = vadd.f32 %v2602_v52, %v2566_v61  ;;  %v15329_v58 = vmul.f32 %v19346_v18, %v19338_v62  ;;  %v19352_v52 = vld [vmem:[#allocation38_spill] sm:$0xff] }
 0x425   :  { %v15321_v41 = vmul.f32 %v19342_v63, %v19324_v33  ;;  %v15323_v16 = vld [vmem:[#allocation3 + $0x1a6] sm:$0xff]  ;;  %v1561_v11 = vmul.f32 %v19345_v27, %v19344_v57  ;;  %v3092_v2 = vadd.f32 %v3076_v54, %v3040_v38  ;;  %v3403_v4 = vadd.f32 %v3387_v10, %v3351_v29  ;;  %v19359_v62 = vld [vmem:[#allocation87_spill] sm:$0xff] }
 0x426   :  { %19343 = vst [vmem:[#allocation148_spill] sm:$0xff] %v15323_v16  ;;  %v1473_v7 = vadd.f32 %v1457_v55, %v1405_v51  ;;  %v15331_v17 = vld [vmem:[#allocation3 + $0x1a7] sm:$0xff]  ;;  %v4961_v26 = vadd.f32 %v15212_v21, %v4909_v56  ;;  %v19351_v55 = vld [vmem:[#allocation175_spill] sm:$0xff]  ;;  %v2670_v57 = vadd.f32 %v2654_v36, %v2618_v0  ;;  %v19357_v36 = vld [vmem:[#allocation166_spill] sm:$0xff] }
 0x427   :  { %19347 = vst [vmem:[#allocation114_spill] sm:$0xff] %v15331_v17  ;;  %v19348_v37 = vld [vmem:[#allocation37_spill] sm:$0xff]  ;;  %v19349_v45 = vld [vmem:[#allocation116_spill] sm:$0xff]  ;;  %v19355_v21 = vld [vmem:[#allocation43_spill] sm:$0xff] }
 0x428   :  { %v15336_v63 = vmul.f32 %v19349_v45, %v19348_v37  ;;  %v1525_v33 = vadd.f32 %v1509_v23, %v1473_v7  ;;  %v19350_v51 = vld [vmem:[#allocation8_spill] sm:$0xff]  ;;  %v3128_v61 = vmul.f32 %v19348_v37, %v15323_v16  ;;  %v19353_v27 = vld [vmem:[#allocation133_spill] sm:$0xff]  ;;  %v3439_v29 = vmul.f32 %v19355_v21, %v15238_v8  ;;  %v19358_v37 = vld [vmem:[#allocation39_spill] sm:$0xff] }
 0x429   :  { %v1613_v15 = vmul.f32 %v19351_v55, %v19350_v51  ;;  %v15344_v38 = vmul.f32 %v19353_v27, %v19352_v52  ;;  %v15346_v54 = vld [vmem:[#allocation3 + $0x1a8] sm:$0xff]  ;;  %v5013_v10 = vadd.f32 %v15216_v9, %v4961_v26  ;;  %v3180_v23 = vmul.f32 %v19352_v52, %v15331_v17  ;;  %v19360_v26 = vld [vmem:[#allocation10_spill] sm:$0xff] }
 0x42a   :  { %19354 = vst [vmem:[#allocation165_spill] sm:$0xff] %v15346_v54  ;;  %v1577_v56 = vadd.f32 %v1561_v11, %v1525_v33  ;;  %v19356_v7 = vld [vmem:[#allocation9_spill] sm:$0xff]  ;;  %v2722_v51 = vadd.f32 %v2706_v48, %v2670_v57  ;;  %v3144_v55 = vadd.f32 %v3128_v61, %v3092_v2  ;;  %v15357_v27 = vmul.f32 %v19359_v62, %v19358_v37  ;;  %v19361_v11 = vld [vmem:[#allocation174_spill] sm:$0xff]  ;;  %v19362_v2 = vld [vmem:[#allocation112_spill] sm:$0xff] }
 0x42b   :  { %v1665_v0 = vmul.f32 %v19357_v36, %v19356_v7  ;;  %v3455_v45 = vadd.f32 %v3439_v29, %v3403_v4  ;;  %v5065_v18 = vadd.f32 %v15220_v22, %v5013_v10  ;;  %v3232_v8 = vmul.f32 %v19358_v37, %v15346_v54  ;;  %v19363_v4 = vld [vmem:[#allocation44_spill] sm:$0xff] }
 0x42c   :  { %v1629_v9 = vadd.f32 %v1613_v15, %v1577_v56  ;;  %v1717_v52 = vmul.f32 %v15141_v39, %v19360_v26  ;;  %v2774_v33 = vadd.f32 %v2758_v53, %v2722_v51  ;;  %v15366_v7 = vmul.f32 %v19361_v11, %v19310_v1  ;;  %v19364_v61 = vld [vmem:[#allocation104_spill] sm:$0xff]  ;;  %v19365_v39 = vld [vmem:[#allocation11_spill] sm:$0xff] }
 0x42d   :  { %v15370_v48 = vmul.f32 %v19362_v2, %v19325_v46  ;;  %v3491_v57 = vmul.f32 %v19363_v4, %v15276_v34  ;;  %v5117_v22 = vadd.f32 %v15228_v42, %v5065_v18  ;;  %v15377_v15 = vmul.f32 %v19364_v61, %v19339_v5  ;;  %v19366_v36 = vld [vmem:[#allocation100_spill] sm:$0xff]  ;;  %v19367_v42 = vld [vmem:[#allocation153_spill] sm:$0xff] }
 0x42e   :  { %v1681_v29 = vadd.f32 %v1665_v0, %v1629_v9  ;;  %v1769_v53 = vmul.f32 %v15158_v40, %v19365_v39  ;;  %v2827_v10 = vadd.f32 %v2811_v60, %v2774_v33  ;;  %v3196_v56 = vadd.f32 %v3180_v23, %v3144_v55  ;;  %v1854_v37 = vld [vmem:[#allocation3 + $0x140] sm:$0xff]  ;;  %v19369_v40 = vld [vmem:[#allocation45_spill] sm:$0xff]  ;;  %v19370_v60 = vld [vmem:[#allocation111_spill] sm:$0xff] }
 0x42f   :  { %v15383_v51 = vmul.f32 %v19366_v36, %v19355_v21  ;;  %v3507_v26 = vadd.f32 %v3491_v57, %v3455_v45  ;;  %v5170_v2 = vadd.f32 %v15232_v12, %v5117_v22  ;;  %v15388_v18 = vmul.f32 %v19367_v42, %v19363_v4  ;;  %v19368_v11 = vld [vmem:[#allocation12_spill] sm:$0xff]  ;;  %v19371_v45 = vld [vmem:[#allocation46_spill] sm:$0xff] }
 0x430   :  { %v1733_v61 = vadd.f32 %v1717_v52, %v1681_v29  ;;  %v1821_v0 = vmul.f32 %v15178_v50, %v19368_v11  ;;  %v2879_v9 = vadd.f32 %v2863_v49, %v2827_v10  ;;  %v15394_v23 = vmul.f32 %v19370_v60, %v19369_v40  ;;  %v19372_v33 = vld [vmem:[#allocation156_spill] sm:$0xff]  ;;  %v19373_v29 = vld [vmem:[#allocation13_spill] sm:$0xff]  ;;  %v19374_v10 = vld [vmem:[#allocation47_spill] sm:$0xff] }
 0x431   :  { %v3543_v55 = vmul.f32 %v19369_v40, %v15299_v43  ;;  %v15400_v57 = vmul.f32 %v19372_v33, %v19371_v45  ;;  %v5222_v12 = vadd.f32 %v15236_v59, %v5170_v2  ;;  %v3595_v52 = vmul.f32 %v19371_v45, %v15323_v16  ;;  %v19375_v4 = vld [vmem:[#allocation162_spill] sm:$0xff]  ;;  %v1906_v21 = vld [vmem:[#allocation3 + $0x141] sm:$0xff] }
 0x432   :  { %v1785_v22 = vadd.f32 %v1769_v53, %v1733_v61  ;;  %v1874_v50 = vmul.f32 %v19373_v29, %v1854_v37  ;;  %v2931_v49 = vadd.f32 %v15303_v20, %v2879_v9  ;;  %v15407_v11 = vadd.f32 %v3232_v8, %v3196_v56  ;;  %v19376_v2 = vld [vmem:[#allocation48_spill] sm:$0xff]  ;;  %v19377_v45 = vld [vmem:[#allocation98_spill] sm:$0xff]  ;;  %v19378_v53 = vld [vmem:[#allocation49_spill] sm:$0xff] }
 0x433   :  { %v3559_v39 = vadd.f32 %v3543_v55, %v3507_v26  ;;  %v15411_v40 = vmul.f32 %v19375_v4, %v19374_v10  ;;  %v5274_v33 = vadd.f32 %v15242_v32, %v5222_v12  ;;  %v3647_v59 = vmul.f32 %v19374_v10, %v15331_v17  ;;  %v19379_v56 = vld [vmem:[#allocation157_spill] sm:$0xff]  ;;  %v19381_v9 = vld [vmem:[#allocation50_spill] sm:$0xff]  ;;  %v19384_v4 = vld [vmem:[#allocation51_spill] sm:$0xff] }
 0x434   :  { %v15418_v61 = vmul.f32 %v19377_v45, %v19376_v2  ;;  %v1837_v37 = vadd.f32 %v1821_v0, %v1785_v22  ;;  %v2983_v20 = vadd.f32 %v15307_v3, %v2931_v49  ;;  %v3699_v8 = vmul.f32 %v19376_v2, %v15346_v54  ;;  %v19382_v55 = vld [vmem:[#allocation101_spill] sm:$0xff]  ;;  %v19385_v45 = vld [vmem:[#allocation90_spill] sm:$0xff]  ;;  %v19388_v42 = vld [vmem:[#allocation52_spill] sm:$0xff] }
 0x435   :  { %v15425_v26 = vmul.f32 %v19379_v56, %v19378_v53  ;;  %v15429_v32 = vmul.f32 %v19382_v55, %v19381_v9  ;;  %v1958_v12 = vld [vmem:[#allocation3 + $0x142] sm:$0xff]  ;;  %v5326_v10 = vadd.f32 %v15246_v47, %v5274_v33  ;;  %v15434_v60 = vmul.f32 %v19385_v45, %v19384_v4  ;;  %v19387_v3 = vld [vmem:[#allocation14_spill] sm:$0xff] }
 0x436   :  { %v1890_v0 = vadd.f32 %v1874_v50, %v1837_v37  ;;  %v1926_v22 = vmul.f32 %v19387_v3, %v1906_v21  ;;  %v3035_v49 = vadd.f32 %v15321_v41, %v2983_v20  ;;  %v3611_v2 = vadd.f32 %v3595_v52, %v3559_v39  ;;  %v19389_v53 = vld [vmem:[#allocation94_spill] sm:$0xff]  ;;  %v19392_v9 = vld [vmem:[#allocation92_spill] sm:$0xff]  ;;  %v19396_v21 = vld [vmem:[#allocation15_spill] sm:$0xff] }
 0x437   :  { %19380 = vst [vmem:[#allocation119_spill] sm:$0xff] %v15425_v26  ;;  %19383 = vst [vmem:[#allocation132_spill] sm:$0xff] %v15429_v32  ;;  %v15440_v56 = vmul.f32 %v19389_v53, %v19388_v42  ;;  %v19391_v26 = vld [vmem:[#allocation53_spill] sm:$0xff]  ;;  %v5378_v47 = vadd.f32 %v15250_v30, %v5326_v10  ;;  %v19394_v33 = vld [vmem:[#allocation54_spill] sm:$0xff]  ;;  %v1978_v37 = vmul.f32 %v19396_v21, %v1958_v12 }
 0x438   :  { %19386 = vst [vmem:[#allocation89_spill] sm:$0xff] %v15434_v60  ;;  %v15444_v55 = vmul.f32 %v19392_v9, %v19391_v26  ;;  %v2010_v32 = vld [vmem:[#allocation3 + $0x143] sm:$0xff]  ;;  %v1942_v50 = vadd.f32 %v1926_v22, %v1890_v0  ;;  %v3087_v41 = vadd.f32 %v15329_v58, %v3035_v49  ;;  %v19397_v52 = vld [vmem:[#allocation55_spill] sm:$0xff]  ;;  %v19404_v0 = vld [vmem:[#allocation58_spill] sm:$0xff] }
 0x439   :  { %19390 = vst [vmem:[#allocation137_spill] sm:$0xff] %v15440_v56  ;;  %v19395_v4 = vld [vmem:[#allocation176_spill] sm:$0xff]  ;;  %v15455_v39 = vmul.f32 %v15143_v35, %v19397_v52  ;;  %v19399_v42 = vld [vmem:[#allocation145_spill] sm:$0xff]  ;;  %v19402_v56 = vld [vmem:[#allocation158_spill] sm:$0xff]  ;;  %v15468_v12 = vmul.f32 %v15164_v28, %v19404_v0  ;;  %v3663_v52 = vadd.f32 %v3647_v59, %v3611_v2 }
 0x43a   :  { %19393 = vst [vmem:[#allocation151_spill] sm:$0xff] %v15444_v55  ;;  %v15449_v60 = vmul.f32 %v19395_v4, %v19394_v33  ;;  %v19398_v20 = vld [vmem:[#allocation56_spill] sm:$0xff]  ;;  %v19401_v55 = vld [vmem:[#allocation57_spill] sm:$0xff]  ;;  %v5430_v4 = vadd.f32 %v15254_v19, %v5378_v47  ;;  %v1994_v58 = vadd.f32 %v1978_v37, %v1942_v50  ;;  %v3139_v35 = vadd.f32 %v15336_v63, %v3087_v41  ;;  %v19407_v33 = vld [vmem:[#allocation59_spill] sm:$0xff] }
 0x43b   :  { %v15459_v26 = vmul.f32 %v19399_v42, %v19398_v20  ;;  %v15463_v30 = vmul.f32 %v19402_v56, %v19401_v55  ;;  %v2062_v10 = vld [vmem:[#allocation3 + $0x144] sm:$0xff]  ;;  %19405 = vst [vmem:[#allocation103_spill] sm:$0xff] %v15468_v12  ;;  %v15474_v42 = vmul.f32 %v15166_v14, %v19407_v33  ;;  %v15485_v50 = vld [vmem:[#allocation3 + $0x190] sm:$0xff]  ;;  %v19417_v41 = vld [vmem:[#allocation63_spill] sm:$0xff] }
 0x43c   :  { %v19406_v22 = vld [vmem:[#allocation16_spill] sm:$0xff]  ;;  %v19410_v56 = vld [vmem:[#allocation177_spill] sm:$0xff]  ;;  %v5482_v19 = vadd.f32 %v15258_v44, %v5430_v4  ;;  %v3191_v2 = vadd.f32 %v15344_v38, %v3139_v35  ;;  %v19415_v14 = vld [vmem:[#allocation62_spill] sm:$0xff] }
 0x43d   :  { %19400 = vst [vmem:[#allocation118_spill] sm:$0xff] %v15459_v26  ;;  %19403 = vst [vmem:[#allocation136_spill] sm:$0xff] %v15463_v30  ;;  %v2030_v49 = vmul.f32 %v19406_v22, %v2010_v32  ;;  %v19409_v26 = vld [vmem:[#allocation60_spill] sm:$0xff]  ;;  %v19412_v47 = vld [vmem:[#allocation61_spill] sm:$0xff]  ;;  %v15491_v37 = vmul.f32 %v15182_v25, %v19415_v14 }
 0x43e   :  { %19408 = vst [vmem:[#allocation160_spill] sm:$0xff] %v15474_v42  ;;  %v15478_v30 = vmul.f32 %v19410_v56, %v19409_v26  ;;  %v2114_v55 = vld [vmem:[#allocation3 + $0x145] sm:$0xff]  ;;  %v15483_v28 = vmul.f32 %v15176_v24, %v19412_v47  ;;  %v15495_v56 = vmul.f32 %v15184_v31, %v19417_v41  ;;  %v15501_v24 = vld [vmem:[#allocation3 + $0x191] sm:$0xff] }
 0x43f   :  { %v2046_v32 = vadd.f32 %v2030_v49, %v1994_v58  ;;  %v19414_v63 = vld [vmem:[#allocation17_spill] sm:$0xff]  ;;  %19416 = vst [vmem:[#allocation120_spill] sm:$0xff] %v15491_v37  ;;  %v19419_v44 = vld [vmem:[#allocation64_spill] sm:$0xff]  ;;  %v5534_v58 = vadd.f32 %v15268_v6, %v5482_v19  ;;  %v19422_v49 = vld [vmem:[#allocation102_spill] sm:$0xff] }
 0x440   :  { %19411 = vst [vmem:[#allocation93_spill] sm:$0xff] %v15478_v30  ;;  %19413 = vst [vmem:[#allocation152_spill] sm:$0xff] %v15483_v28  ;;  %v2082_v59 = vmul.f32 %v19414_v63, %v2062_v10  ;;  %v15499_v4 = vmul.f32 %v15186_v13, %v19419_v44  ;;  %v2166_v28 = vld [vmem:[#allocation3 + $0x146] sm:$0xff]  ;;  %v15508_v35 = vld [vmem:[#allocation3 + $0x192] sm:$0xff]  ;;  %v3243_v13 = vadd.f32 %v15357_v27, %v3191_v2 }
 0x441   :  { %19418 = vst [vmem:[#allocation138_spill] sm:$0xff] %v15495_v56  ;;  %v19421_v10 = vld [vmem:[#allocation65_spill] sm:$0xff]  ;;  %19424 = vst [vmem:[#allocation95_spill] sm:$0xff] %v15508_v35  ;;  %v15510_v25 = vld [vmem:[#allocation3 + $0x193] sm:$0xff] }
 0x442   :  { %19420 = vst [vmem:[#allocation141_spill] sm:$0xff] %v15499_v4  ;;  %v15506_v38 = vmul.f32 %v19422_v49, %v19421_v10  ;;  %19425 = vst [vmem:[#allocation154_spill] sm:$0xff] %v15510_v25  ;;  %v15512_v37 = vld [vmem:[#allocation3 + $0x194] sm:$0xff]  ;;  %v2098_v31 = vadd.f32 %v2082_v59, %v2046_v32  ;;  %v15516_v4 = vadd.f32 %v3699_v8, %v3663_v52  ;;  %v2218_v10 = vld [vmem:[#allocation3 + $0x147] sm:$0xff] }
 0x443   :  { %19426 = vst [vmem:[#allocation146_spill] sm:$0xff] %v15512_v37  ;;  %v19427_v56 = vld [vmem:[#allocation18_spill] sm:$0xff]  ;;  %v19430_v44 = vld [vmem:[#allocation159_spill] sm:$0xff]  ;;  %v19436_v32 = vld [vmem:[#allocation68_spill] sm:$0xff] }
 0x444   :  { %19423 = vst [vmem:[#allocation115_spill] sm:$0xff] %v15506_v38  ;;  %v2134_v30 = vmul.f32 %v19427_v56, %v2114_v55  ;;  %19428 = vst [vmem:[#allocation140_spill] sm:$0xff] %v15516_v4  ;;  %v19429_v42 = vld [vmem:[#allocation66_spill] sm:$0xff]  ;;  %v19432_v19 = vld [vmem:[#allocation67_spill] sm:$0xff]  ;;  %v15531_v55 = vmul.f32 %v19436_v32, %v15501_v24 }
 0x445   :  { %v15520_v6 = vmul.f32 %v19430_v44, %v19429_v42  ;;  %v15524_v49 = vmul.f32 %v19432_v19, %v15485_v50  ;;  %v15526_v38 = vld [vmem:[#allocation3 + $0x195] sm:$0xff]  ;;  %v3295_v44 = vadd.f32 %v15366_v7, %v3243_v13  ;;  %v19441_v4 = vld [vmem:[#allocation69_spill] sm:$0xff]  ;;  %v19450_v13 = vld [vmem:[#allocation20_spill] sm:$0xff] }
 0x446   :  { %19434 = vst [vmem:[#allocation83_spill] sm:$0xff] %v15526_v38  ;;  %v19435_v12 = vld [vmem:[#allocation135_spill] sm:$0xff]  ;;  %19437 = vst [vmem:[#allocation167_spill] sm:$0xff] %v15531_v55  ;;  %v2150_v52 = vadd.f32 %v2134_v30, %v2098_v31  ;;  %v2270_v19 = vld [vmem:[#allocation3 + $0x148] sm:$0xff] }
 0x447   :  { %19431 = vst [vmem:[#allocation88_spill] sm:$0xff] %v15520_v6  ;;  %19433 = vst [vmem:[#allocation107_spill] sm:$0xff] %v15524_v49  ;;  %v5586_v41 = vadd.f32 %v19435_v12, %v5534_v58  ;;  %v15533_v27 = vld [vmem:[#allocation3 + $0x196] sm:$0xff]  ;;  %v15541_v49 = vmul.f32 %v19441_v4, %v15508_v35  ;;  %v19445_v58 = vld [vmem:[#allocation72_spill] sm:$0xff] }
 0x448   :  { %19438 = vst [vmem:[#allocation172_spill] sm:$0xff] %v15533_v27  ;;  %v15535_v8 = vld [vmem:[#allocation3 + $0x197] sm:$0xff]  ;;  %v15549_v55 = vmul.f32 %v19445_v58, %v15512_v37  ;;  %v19462_v14 = vld [vmem:[#allocation21_spill] sm:$0xff] }
 0x449   :  { %19439 = vst [vmem:[#allocation121_spill] sm:$0xff] %v15535_v8  ;;  %v19440_v59 = vld [vmem:[#allocation19_spill] sm:$0xff]  ;;  %19442 = vst [vmem:[#allocation168_spill] sm:$0xff] %v15541_v49  ;;  %v19443_v6 = vld [vmem:[#allocation70_spill] sm:$0xff]  ;;  %v5625_v30 = vsel %vm45_vm0, %v5586_v41, 0  ;;  %v2238_v49 = vmul.f32 %v19450_v13, %v2218_v10 }
 0x44a   :  { %v2186_v2 = vmul.f32 %v19440_v59, %v2166_v28  ;;  %v15545_v12 = vmul.f32 %v19443_v6, %v15510_v25  ;;  %19446 = vst [vmem:[#allocation169_spill] sm:$0xff] %v15549_v55  ;;  %v15551_v32 = vld [vmem:[#allocation3 + $0x198] sm:$0xff]  ;;  %v19448_v28 = vld [vmem:[#allocation73_spill] sm:$0xff]  ;;  %v15559_v4 = vld [vmem:[#allocation3 + $0x1b0] sm:$0xff]  ;;  %v15561_v6 = vand.u32 4294901760, %v5625_v30 }
 0x44b   :  { %19447 = vst [vmem:[#allocation155_spill] sm:$0xff] %v15551_v32  ;;  %v15556_v7 = vmul.f32 %v19448_v28, %v15526_v38  ;;  %19451 = vst [vmem:[#allocation105_spill] sm:$0xff] %v15559_v4  ;;  %v19453_v55 = vld [vmem:[#allocation74_spill] sm:$0xff]  ;;  %v19455_v42 = vld [vmem:[#allocation75_spill] sm:$0xff] }
 0x44c   :  { %19444 = vst [vmem:[#allocation173_spill] sm:$0xff] %v15545_v12  ;;  %v2202_v31 = vadd.f32 %v2186_v2, %v2150_v52  ;;  %19452 = vst [vmem:[#allocation5_spill] sm:$0xff] %v15561_v6  ;;  %v3347_v12 = vadd.f32 %v15370_v48, %v3295_v44  ;;  %v15566_v58 = vmul.f32 %v19453_v55, %v15533_v27  ;;  %v2323_v37 = vld [vmem:[#allocation3 + $0x150] sm:$0xff]  ;;  %v19459_v10 = vld [vmem:[#allocation117_spill] sm:$0xff] }
 0x44d   :  { %19449 = vst [vmem:[#allocation4_spill] sm:$0xff] %v15556_v7  ;;  %v15570_v41 = vmul.f32 %v19455_v42, %v15535_v8  ;;  %v19457_v7 = vld [vmem:[#allocation76_spill] sm:$0xff]  ;;  %v19460_v2 = vld [vmem:[#allocation77_spill] sm:$0xff]  ;;  %v2290_v48 = vmul.f32 %v19462_v14, %v2270_v19  ;;  %v15582_v44 = vsub.f32 %v5625_v30, %v15561_v6  ;;  %v19465_v42 = vld [vmem:[#allocation78_spill] sm:$0xff] }
 0x44e   :  { %19454 = vst [vmem:[#allocation106_spill] sm:$0xff] %v15566_v58  ;;  %v15574_v52 = vmul.f32 %v19457_v7, %v15551_v32  ;;  %v15578_v28 = vmul.f32 %v19460_v2, %v19459_v10  ;;  %v2254_v38 = vadd.f32 %v2238_v49, %v2202_v31  ;;  %v3399_v58 = vadd.f32 %v15377_v15, %v3347_v12  ;;  %v19464_v55 = vld [vmem:[#allocation113_spill] sm:$0xff]  ;;  %v2375_v8 = vld [vmem:[#allocation3 + $0x151] sm:$0xff]  ;;  %v19471_v31 = vld [vmem:[#allocation80_spill] sm:$0xff] }
 0x44f   :  { %19456 = vst [vmem:[#allocation6_spill] sm:$0xff] %v15570_v41  ;;  %19463 = vst [vmem:[#allocation7_spill] sm:$0xff] %v15582_v44  ;;  %v15587_v41 = vmul.f32 %v19465_v42, %v19464_v55  ;;  %v19467_v7 = vld [vmem:[#allocation109_spill] sm:$0xff]  ;;  %v19468_v32 = vld [vmem:[#allocation79_spill] sm:$0xff] }
 0x450   :  { %19458 = vst [vmem:[#allocation147_spill] sm:$0xff] %v15574_v52  ;;  %19461 = vst [vmem:[#allocation161_spill] sm:$0xff] %v15578_v28  ;;  %v3284_v52 = vmul.f32 %v19310_v1, %v15559_v4  ;;  %v15593_v2 = vmul.f32 %v19468_v32, %v19467_v7  ;;  %v19470_v49 = vld [vmem:[#allocation127_spill] sm:$0xff]  ;;  %v2306_v30 = vadd.f32 %v2290_v48, %v2254_v38  ;;  %v19473_v6 = vld [vmem:[#allocation22_spill] sm:$0xff] }
 0x451   :  { %19466 = vst [vmem:[#allocation124_spill] sm:$0xff] %v15587_v41  ;;  %v15597_v19 = vmul.f32 %v19471_v31, %v19470_v49  ;;  %v2343_v28 = vmul.f32 %v19473_v6, %v2323_v37  ;;  %v15600_v15 = vld [vmem:[#allocation3 + $0x1b1] sm:$0xff]  ;;  %v3451_v42 = vadd.f32 %v15383_v51, %v3399_v58  ;;  %v19475_v41 = vld [vmem:[#allocation81_spill] sm:$0xff]  ;;  %v19477_v31 = vld [vmem:[#allocation84_spill] sm:$0xff]  ;;  %v19482_v58 = vand.u32 4294901760, %v15582_v44 }
 0x452   :  { %19469 = vst [vmem:[#allocation8_spill] sm:$0xff] %v15593_v2  ;;  %19474 = vst [vmem:[#allocation9_spill] sm:$0xff] %v15600_v15  ;;  %v15606_v4 = vmul.f32 %v19475_v41, %v15276_v34  ;;  %v2427_v55 = vld [vmem:[#allocation3 + $0x152] sm:$0xff]  ;;  %v3300_v2 = vadd.f32 %v3284_v52, %v15407_v11  ;;  %v19479_v38 = vld [vmem:[#allocation85_spill] sm:$0xff] }
 0x453   :  { %19472 = vst [vmem:[#allocation175_spill] sm:$0xff] %v15597_v19  ;;  %v2479_v32 = vld [vmem:[#allocation3 + $0x153] sm:$0xff]  ;;  %v15611_v19 = vmul.f32 %v19477_v31, %v15299_v43  ;;  %v15615_v48 = vmul.f32 %v19479_v38, %v15323_v16  ;;  %v2359_v49 = vadd.f32 %v2343_v28, %v2306_v30  ;;  %v5804_v41 = vsub.f32 %v15582_v44, %v19482_v58  ;;  %v19487_v30 = vld [vmem:[#allocation24_spill] sm:$0xff]  ;;  %v19488_v16 = vld [vmem:[#allocation25_spill] sm:$0xff] }
 0x454   :  { %19476 = vst [vmem:[#allocation166_spill] sm:$0xff] %v15606_v4  ;;  %v19481_v12 = vld [vmem:[#allocation23_spill] sm:$0xff]  ;;  %v3503_v4 = vadd.f32 %v15388_v18, %v3451_v42  ;;  %v19483_v11 = vld [vmem:[#allocation86_spill] sm:$0xff]  ;;  %v3336_v31 = vmul.f32 %v19325_v46, %v15600_v15  ;;  %v2499_v43 = vmul.f32 %v19488_v16, %v2479_v32  ;;  %v19493_v27 = vld [vmem:[#allocation28_spill] sm:$0xff] }
 0x455   :  { %19478 = vst [vmem:[#allocation87_spill] sm:$0xff] %v15611_v19  ;;  %19480 = vst [vmem:[#allocation10_spill] sm:$0xff] %v15615_v48  ;;  %v2395_v7 = vmul.f32 %v19481_v12, %v2375_v8  ;;  %v2531_v51 = vld [vmem:[#allocation3 + $0x154] sm:$0xff]  ;;  %v15624_v52 = vmul.f32 %v19483_v11, %v15331_v17  ;;  %v2447_v19 = vmul.f32 %v19487_v30, %v2427_v55  ;;  %v5805_v58 = vand.u32 4294901760, %v5804_v41  ;;  %v19496_v16 = vld [vmem:[#allocation133_spill] sm:$0xff] }
 0x456   :  { %v19485_v38 = vld [vmem:[#allocation99_spill] sm:$0xff]  ;;  %v3555_v18 = vadd.f32 %v15394_v23, %v3503_v4  ;;  %v19490_v42 = vld [vmem:[#allocation26_spill] sm:$0xff]  ;;  %v3352_v11 = vadd.f32 %v3336_v31, %v3300_v2 }
 0x457   :  { %19484 = vst [vmem:[#allocation11_spill] sm:$0xff] %v15624_v52  ;;  %v15630_v48 = vmul.f32 %v19485_v38, %v15346_v54  ;;  %v2411_v28 = vadd.f32 %v2395_v7, %v2359_v49  ;;  %v15634_v34 = vld [vmem:[#allocation3 + $0x1b2] sm:$0xff]  ;;  %v2551_v44 = vmul.f32 %v19490_v42, %v2531_v51  ;;  %v19494_v38 = vld [vmem:[#allocation116_spill] sm:$0xff]  ;;  %v1875_v7 = vmul.f32 %v2323_v37, %v19373_v29  ;;  %v19495_v54 = vld [vmem:[#allocation29_spill] sm:$0xff] }
 0x458   :  { %19489 = vst [vmem:[#allocation12_spill] sm:$0xff] %v15634_v34  ;;  %v19491_v17 = vld [vmem:[#allocation27_spill] sm:$0xff]  ;;  %v19492_v15 = vld [vmem:[#allocation170_spill] sm:$0xff]  ;;  %9976 = vmatmul.mubr.f32.gmra.mrb[8].mxu1 %v5805_v58  ;;  %v3607_v49 = vadd.f32 %v15400_v57, %v3555_v18  ;;  %v2707_v41 = vmul.f32 %v19496_v16, %v19495_v54  ;;  %v3388_v4 = vmul.f32 %v19339_v5, %v15634_v34  ;;  %v19502_v58 = vld [vmem:[#allocation32_spill] sm:$0xff] }
 0x459   :  { %19486 = vst [vmem:[#allocation100_spill] sm:$0xff] %v15630_v48  ;;  %v2463_v52 = vadd.f32 %v2447_v19, %v2411_v28  ;;  %v2603_v10 = vmul.f32 %v19492_v15, %v19491_v17  ;;  %v2655_v48 = vmul.f32 %v19494_v38, %v19493_v27  ;;  %v19497_v25 = vld [vmem:[#allocation30_spill] sm:$0xff]  ;;  %v19498_v31 = vld [vmem:[#allocation31_spill] sm:$0xff]  ;;  %v19501_v38 = vld [vmem:[#allocation149_spill] sm:$0xff]  ;;  %v1927_v37 = vmul.f32 %v2375_v8, %v19387_v3 }
 0x45a   :  { %v2759_v23 = vmul.f32 %v19359_v62, %v19497_v25  ;;  %v19499_v19 = vld [vmem:[#allocation174_spill] sm:$0xff]  ;;  %v1891_v29 = vadd.f32 %v1875_v7, %v19501_v38  ;;  %v3659_v57 = vadd.f32 %v15411_v40, %v3607_v49  ;;  %v19503_v16 = vld [vmem:[#allocation112_spill] sm:$0xff]  ;;  %v19504_v62 = vld [vmem:[#allocation33_spill] sm:$0xff]  ;;  %v1979_v7 = vmul.f32 %v2427_v55, %v19396_v21 }
 0x45b   :  { %v2515_v2 = vadd.f32 %v2499_v43, %v2463_v52  ;;  %v2812_v15 = vmul.f32 %v19499_v19, %v19498_v31  ;;  %v15652_v28 = vld [vmem:[#allocation3 + $0x1b3] sm:$0xff]  ;;  %v15659_v18 = vmul.f32 %v19503_v16, %v19502_v58  ;;  %v19505_v25 = vld [vmem:[#allocation104_spill] sm:$0xff]  ;;  %v3404_v43 = vadd.f32 %v3388_v4, %v3352_v11  ;;  %v19508_v8 = vld [vmem:[#allocation153_spill] sm:$0xff] }
 0x45c   :  { %19500 = vst [vmem:[#allocation13_spill] sm:$0xff] %v15652_v28  ;;  %v15663_v54 = vmul.f32 %v19505_v25, %v19504_v62  ;;  %v19506_v34 = vld [vmem:[#allocation34_spill] sm:$0xff]  ;;  %v1943_v31 = vadd.f32 %v1927_v37, %v1891_v29  ;;  %v3711_v3 = vadd.f32 %v15418_v61, %v3659_v57  ;;  %v19507_v40 = vld [vmem:[#allocation35_spill] sm:$0xff]  ;;  %v19509_v38 = vld [vmem:[#allocation36_spill] sm:$0xff]  ;;  %v2031_v61 = vmul.f32 %v2479_v32, %v19406_v22 }
 0x45d   :  { %v2567_v52 = vadd.f32 %v2551_v44, %v2515_v2  ;;  %v15667_v19 = vmul.f32 %v19366_v36, %v19506_v34  ;;  %v15673_v49 = vmul.f32 %v19508_v8, %v19507_v40  ;;  %v19510_v16 = vld [vmem:[#allocation111_spill] sm:$0xff]  ;;  %v19512_v4 = vld [vmem:[#allocation37_spill] sm:$0xff]  ;;  %v19513_v36 = vld [vmem:[#allocation156_spill] sm:$0xff]  ;;  %v2083_v32 = vmul.f32 %v2531_v51, %v19414_v63 }
 0x45e   :  { %v15677_v58 = vmul.f32 %v19510_v16, %v19509_v38  ;;  %v19511_v25 = vld [vmem:[#allocation43_spill] sm:$0xff]  ;;  %v15683_v2 = vmul.f32 %v19513_v36, %v19512_v4  ;;  %v1995_v21 = vadd.f32 %v1979_v7, %v1943_v31  ;;  %v19516_v57 = vld [vmem:[#allocation38_spill] sm:$0xff]  ;;  %v19520_v36 = vld [vmem:[#allocation157_spill] sm:$0xff] }
 0x45f   :  { %v3440_v44 = vmul.f32 %v19511_v25, %v15652_v28  ;;  %v2619_v11 = vadd.f32 %v2603_v10, %v2567_v52  ;;  %v15685_v29 = vld [vmem:[#allocation3 + $0x1b4] sm:$0xff]  ;;  %v15699_v4 = vmul.f32 %v19520_v36, %v19310_v1  ;;  %v19521_v7 = vld [vmem:[#allocation132_spill] sm:$0xff]  ;;  %v15719_v63 = vmul.f32 %v19389_v53, %v19511_v25 }
 0x460   :  { %19514 = vst [vmem:[#allocation90_spill] sm:$0xff] %v15685_v29  ;;  %v19515_v55 = vld [vmem:[#allocation119_spill] sm:$0xff]  ;;  %v19517_v8 = vld [vmem:[#allocation162_spill] sm:$0xff]  ;;  %v2047_v22 = vadd.f32 %v2031_v61, %v1995_v21 }
 0x461   :  { %v3764_v37 = vadd.f32 %v19515_v55, %v3711_v3  ;;  %v15691_v40 = vmul.f32 %v19517_v8, %v19516_v57  ;;  %v19518_v16 = vld [vmem:[#allocation39_spill] sm:$0xff]  ;;  %v19519_v38 = vld [vmem:[#allocation98_spill] sm:$0xff]  ;;  %v3456_v10 = vadd.f32 %v3440_v44, %v3404_v43  ;;  %v2671_v28 = vadd.f32 %v2655_v48, %v2619_v11  ;;  %v19522_v55 = vld [vmem:[#allocation101_spill] sm:$0xff] }
 0x462   :  { %v15695_v34 = vmul.f32 %v19519_v38, %v19518_v16  ;;  %v2115_v52 = vld [vmem:[#allocation3 + $0x155] sm:$0xff]  ;;  %v15707_v8 = vmul.f32 %v19522_v55, %v19325_v46  ;;  %v15711_v43 = vmul.f32 %v19385_v45, %v19339_v5  ;;  %v19523_v48 = vld [vmem:[#allocation44_spill] sm:$0xff]  ;;  %v19542_v16 = vld [vmem:[#allocation49_spill] sm:$0xff] }
 0x463   :  { %v15701_v31 = vld [vmem:[#allocation3 + $0x175] sm:$0xff]  ;;  %v3816_v3 = vadd.f32 %v19521_v7, %v3764_v37  ;;  %v3492_v38 = vmul.f32 %v19523_v48, %v15685_v29  ;;  %v2723_v36 = vadd.f32 %v2707_v41, %v2671_v28  ;;  %v2099_v37 = vadd.f32 %v2083_v32, %v2047_v22  ;;  %v19526_v7 = vld [vmem:[#allocation89_spill] sm:$0xff] }
 0x464   :  { %v15715_v44 = vld [vmem:[#allocation3 + $0x1b5] sm:$0xff]  ;;  %v2135_v45 = vmul.f32 %v19427_v56, %v2115_v52  ;;  %v15731_v29 = vmul.f32 %v19392_v9, %v19523_v48  ;;  %v19527_v28 = vld [vmem:[#allocation45_spill] sm:$0xff] }
 0x465   :  { %19524 = vst [vmem:[#allocation14_spill] sm:$0xff] %v15715_v44  ;;  %v2167_v11 = vld [vmem:[#allocation3 + $0x156] sm:$0xff]  ;;  %v3868_v55 = vadd.f32 %v19526_v7, %v3816_v3  ;;  %v3508_v41 = vadd.f32 %v3492_v38, %v3456_v10  ;;  %v15735_v53 = vmul.f32 %v19527_v28, %v15701_v31  ;;  %v2775_v46 = vadd.f32 %v2759_v23, %v2723_v36  ;;  %v19531_v3 = vld [vmem:[#allocation137_spill] sm:$0xff] }
 0x466   :  { %v15721_v51 = vld [vmem:[#allocation3 + $0x176] sm:$0xff]  ;;  %v3544_v22 = vmul.f32 %v19527_v28, %v15715_v44  ;;  %v2151_v52 = vadd.f32 %v2135_v45, %v2099_v37  ;;  %v2187_v9 = vmul.f32 %v19440_v59, %v2167_v11  ;;  %v15757_v44 = vld [vmem:[#allocation3 + $0x180] sm:$0xff] }
 0x467   :  { %v15723_v21 = vld [vmem:[#allocation3 + $0x1b6] sm:$0xff]  ;;  %19528 = vst [vmem:[#allocation92_spill] sm:$0xff] %v15735_v53  ;;  %v3920_v10 = vadd.f32 %v19531_v3, %v3868_v55  ;;  %v2828_v53 = vadd.f32 %v2812_v15, %v2775_v46  ;;  %v15761_v11 = vld [vmem:[#allocation3 + $0x181] sm:$0xff] }
 0x468   :  { %19525 = vst [vmem:[#allocation94_spill] sm:$0xff] %v15723_v21  ;;  %v15725_v61 = vld [vmem:[#allocation3 + $0x177] sm:$0xff]  ;;  %19536 = vst [vmem:[#allocation158_spill] sm:$0xff] %v15761_v11  ;;  %v15763_v37 = vld [vmem:[#allocation3 + $0x182] sm:$0xff]  ;;  %v2203_v55 = vadd.f32 %v2187_v9, %v2151_v52  ;;  %v15780_v52 = vmul.f32 %v19542_v16, %v15757_v44 }
 0x469   :  { %v15737_v25 = vld [vmem:[#allocation3 + $0x1b7] sm:$0xff]  ;;  %19537 = vst [vmem:[#allocation58_spill] sm:$0xff] %v15763_v37  ;;  %v15765_v45 = vld [vmem:[#allocation3 + $0x183] sm:$0xff] }
 0x46a   :  { %19529 = vst [vmem:[#allocation176_spill] sm:$0xff] %v15737_v25  ;;  %v2219_v5 = vld [vmem:[#allocation3 + $0x157] sm:$0xff]  ;;  %19538 = vst [vmem:[#allocation16_spill] sm:$0xff] %v15765_v45  ;;  %v15775_v15 = vld [vmem:[#allocation3 + $0x184] sm:$0xff] }
 0x46b   :  { %v15741_v32 = vld [vmem:[#allocation3 + $0x178] sm:$0xff]  ;;  %v19532_v38 = vld [vmem:[#allocation46_spill] sm:$0xff]  ;;  %v2239_v3 = vmul.f32 %v19450_v13, %v2219_v5  ;;  %19543 = vst [vmem:[#allocation60_spill] sm:$0xff] %v15780_v52  ;;  %v15782_v5 = vld [vmem:[#allocation3 + $0x185] sm:$0xff] }
 0x46c   :  { %v15743_v56 = vld [vmem:[#allocation3 + $0x1b8] sm:$0xff]  ;;  %v15749_v7 = vmul.f32 %v19532_v38, %v15721_v51  ;;  %v3596_v48 = vmul.f32 %v19532_v38, %v15723_v21  ;;  %v15784_v13 = vld [vmem:[#allocation3 + $0x186] sm:$0xff]  ;;  %v19544_v9 = vld [vmem:[#allocation50_spill] sm:$0xff] }
 0x46d   :  { %19530 = vst [vmem:[#allocation15_spill] sm:$0xff] %v15743_v56  ;;  %v19534_v23 = vld [vmem:[#allocation47_spill] sm:$0xff] }
 0x46e   :  { %19533 = vst [vmem:[#allocation56_spill] sm:$0xff] %v15749_v7  ;;  %v15755_v36 = vmul.f32 %v19534_v23, %v15725_v61  ;;  %v2271_v28 = vld [vmem:[#allocation3 + $0x158] sm:$0xff]  ;;  %v3648_v59 = vmul.f32 %v19534_v23, %v15737_v25  ;;  %v3560_v7 = vadd.f32 %v3544_v22, %v3508_v41  ;;  %v2324_v25 = vld [vmem:[#allocation3 + $0x160] sm:$0xff]  ;;  %v2880_v23 = vadd.f32 %v15659_v18, %v2828_v53 }
 0x46f   :  { %v19539_v21 = vld [vmem:[#allocation151_spill] sm:$0xff]  ;;  %v2291_v41 = vmul.f32 %v19462_v14, %v2271_v28  ;;  %v19548_v53 = vld [vmem:[#allocation52_spill] sm:$0xff]  ;;  %v19550_v14 = vld [vmem:[#allocation53_spill] sm:$0xff] }
 0x470   :  { %19535 = vst [vmem:[#allocation145_spill] sm:$0xff] %v15755_v36  ;;  %v3972_v38 = vadd.f32 %v19539_v21, %v3920_v10  ;;  %v19540_v36 = vld [vmem:[#allocation48_spill] sm:$0xff]  ;;  %v2255_v21 = vadd.f32 %v2239_v3, %v2203_v55  ;;  %v15790_v10 = vmul.f32 %v19544_v9, %v15761_v11  ;;  %v15798_v52 = vmul.f32 %v19548_v53, %v15765_v45  ;;  %v15807_v28 = vld [vmem:[#allocation3 + $0x188] sm:$0xff]  ;;  %v19552_v45 = vld [vmem:[#allocation54_spill] sm:$0xff] }
 0x471   :  { %v15771_v1 = vmul.f32 %v19540_v36, %v15741_v32  ;;  %v3700_v46 = vmul.f32 %v19540_v36, %v15743_v56  ;;  %v19546_v56 = vld [vmem:[#allocation51_spill] sm:$0xff]  ;;  %v15800_v36 = vld [vmem:[#allocation3 + $0x187] sm:$0xff]  ;;  %v2932_v55 = vadd.f32 %v15663_v54, %v2880_v23  ;;  %v2344_v3 = vmul.f32 %v19473_v6, %v2324_v25 }
 0x472   :  { %v4024_v22 = vadd.f32 %v15449_v60, %v3972_v38  ;;  %19545 = vst [vmem:[#allocation177_spill] sm:$0xff] %v15790_v10  ;;  %v15794_v18 = vmul.f32 %v19546_v56, %v15763_v37  ;;  %19549 = vst [vmem:[#allocation17_spill] sm:$0xff] %v15798_v52  ;;  %v15805_v60 = vmul.f32 %v19550_v14, %v15775_v15  ;;  %v19554_v37 = vld [vmem:[#allocation55_spill] sm:$0xff]  ;;  %v2428_v54 = vld [vmem:[#allocation3 + $0x162] sm:$0xff] }
 0x473   :  { %19541 = vst [vmem:[#allocation59_spill] sm:$0xff] %v15771_v1  ;;  %v2376_v1 = vld [vmem:[#allocation3 + $0x161] sm:$0xff]  ;;  %v2307_v38 = vadd.f32 %v2291_v41, %v2255_v21  ;;  %v3612_v10 = vadd.f32 %v3596_v48, %v3560_v7  ;;  %v15813_v52 = vmul.f32 %v19552_v45, %v15782_v5  ;;  %v15817_v11 = vmul.f32 %v19554_v37, %v15784_v13 }
 0x474   :  { %19547 = vst [vmem:[#allocation61_spill] sm:$0xff] %v15794_v18  ;;  %19551 = vst [vmem:[#allocation102_spill] sm:$0xff] %v15805_v60  ;;  %v4076_v18 = vadd.f32 %v15455_v39, %v4024_v22  ;;  %v2984_v23 = vadd.f32 %v15667_v19, %v2932_v55  ;;  %v15822_v60 = vmul.f32 %v19398_v20, %v15800_v36  ;;  %v19557_v39 = vld [vmem:[#allocation118_spill] sm:$0xff]  ;;  %v19558_v48 = vld [vmem:[#allocation57_spill] sm:$0xff] }
 0x475   :  { %19553 = vst [vmem:[#allocation18_spill] sm:$0xff] %v15813_v52  ;;  %19555 = vst [vmem:[#allocation159_spill] sm:$0xff] %v15817_v11  ;;  %v2360_v21 = vadd.f32 %v2344_v3, %v2307_v38  ;;  %v2396_v6 = vmul.f32 %v19481_v12, %v2376_v1  ;;  %v15828_v7 = vmul.f32 %v19558_v48, %v15807_v28  ;;  %v2480_v22 = vld [vmem:[#allocation3 + $0x163] sm:$0xff]  ;;  %v19567_v11 = vld [vmem:[#allocation146_spill] sm:$0xff] }
 0x476   :  { %19556 = vst [vmem:[#allocation135_spill] sm:$0xff] %v15822_v60  ;;  %v4128_v25 = vadd.f32 %v19557_v39, %v4076_v18  ;;  %v15832_v41 = vmul.f32 %v15485_v50, %v19404_v0  ;;  %v15836_v19 = vmul.f32 %v15501_v24, %v19407_v33  ;;  %v3036_v55 = vadd.f32 %v15673_v49, %v2984_v23  ;;  %v19563_v38 = vld [vmem:[#allocation136_spill] sm:$0xff]  ;;  %v19566_v60 = vld [vmem:[#allocation62_spill] sm:$0xff]  ;;  %v19569_v23 = vld [vmem:[#allocation63_spill] sm:$0xff] }
 0x477   :  { %19559 = vst [vmem:[#allocation19_spill] sm:$0xff] %v15828_v7  ;;  %v15841_v1 = vmul.f32 %v15508_v35, %v19409_v26  ;;  %v2412_v12 = vadd.f32 %v2396_v6, %v2360_v21  ;;  %v2448_v18 = vmul.f32 %v19487_v30, %v2428_v54  ;;  %v3664_v39 = vadd.f32 %v3648_v59, %v3612_v10  ;;  %v19564_v7 = vld [vmem:[#allocation154_spill] sm:$0xff]  ;;  %v2532_v52 = vld [vmem:[#allocation3 + $0x164] sm:$0xff]  ;;  %v19570_v35 = vld [vmem:[#allocation83_spill] sm:$0xff] }
 0x478   :  { %19560 = vst [vmem:[#allocation20_spill] sm:$0xff] %v15832_v41  ;;  %19561 = vst [vmem:[#allocation21_spill] sm:$0xff] %v15836_v19  ;;  %v4180_v3 = vadd.f32 %v19563_v38, %v4128_v25  ;;  %v15847_v41 = vmul.f32 %v19564_v7, %v19412_v47  ;;  %v15851_v19 = vmul.f32 %v19567_v11, %v19566_v60  ;;  %v19572_v30 = vld [vmem:[#allocation25_spill] sm:$0xff]  ;;  %v19573_v6 = vld [vmem:[#allocation103_spill] sm:$0xff] }
 0x479   :  { %19562 = vst [vmem:[#allocation22_spill] sm:$0xff] %v15841_v1  ;;  %v3088_v49 = vadd.f32 %v15677_v58, %v3036_v55  ;;  %v15856_v1 = vmul.f32 %v19570_v35, %v19569_v23  ;;  %v2464_v21 = vadd.f32 %v2448_v18, %v2412_v12  ;;  %v2500_v54 = vmul.f32 %v19572_v30, %v2480_v22  ;;  %v19574_v10 = vld [vmem:[#allocation64_spill] sm:$0xff]  ;;  %v19578_v7 = vld [vmem:[#allocation121_spill] sm:$0xff]  ;;  %v19581_v60 = vld [vmem:[#allocation155_spill] sm:$0xff] }
 0x47a   :  { %19565 = vst [vmem:[#allocation23_spill] sm:$0xff] %v15847_v41  ;;  %19568 = vst [vmem:[#allocation99_spill] sm:$0xff] %v15851_v19  ;;  %v4233_v59 = vadd.f32 %v19573_v6, %v4180_v3  ;;  %v19575_v25 = vld [vmem:[#allocation172_spill] sm:$0xff]  ;;  %v19577_v41 = vld [vmem:[#allocation65_spill] sm:$0xff]  ;;  %v2552_v6 = vmul.f32 %v19490_v42, %v2532_v52 }
 0x47b   :  { %19571 = vst [vmem:[#allocation24_spill] sm:$0xff] %v15856_v1  ;;  %v15862_v38 = vmul.f32 %v19575_v25, %v19574_v10  ;;  %v15866_v11 = vmul.f32 %v19578_v7, %v19577_v41  ;;  %v19580_v19 = vld [vmem:[#allocation66_spill] sm:$0xff]  ;;  %v2584_v55 = vld [vmem:[#allocation3 + $0x165] sm:$0xff]  ;;  %v3140_v12 = vadd.f32 %v15683_v2, %v3088_v49  ;;  %v19585_v18 = vld [vmem:[#allocation67_spill] sm:$0xff]  ;;  %v2516_v30 = vadd.f32 %v2500_v54, %v2464_v21 }
 0x47c   :  { %v15870_v58 = vmul.f32 %v19581_v60, %v19580_v19  ;;  %v15872_v35 = vld [vmem:[#allocation3 + $0x1a0] sm:$0xff]  ;;  %v19584_v22 = vld [vmem:[#allocation117_spill] sm:$0xff]  ;;  %v2604_v42 = vmul.f32 %v19491_v17, %v2584_v55  ;;  %v19597_v54 = vld [vmem:[#allocation127_spill] sm:$0xff] }
 0x47d   :  { %19576 = vst [vmem:[#allocation26_spill] sm:$0xff] %v15862_v38  ;;  %19579 = vst [vmem:[#allocation27_spill] sm:$0xff] %v15866_v11  ;;  %v15877_v3 = vmul.f32 %v19585_v18, %v19584_v22  ;;  %v2636_v38 = vld [vmem:[#allocation3 + $0x166] sm:$0xff]  ;;  %v15881_v11 = vadd.f32 %v3700_v46, %v3664_v39  ;;  %v3192_v49 = vadd.f32 %v15691_v40, %v3140_v12  ;;  %v19600_v22 = vld [vmem:[#allocation123_spill] sm:$0xff] }
 0x47e   :  { %19582 = vst [vmem:[#allocation170_spill] sm:$0xff] %v15870_v58  ;;  %19583 = vst [vmem:[#allocation28_spill] sm:$0xff] %v15872_v35  ;;  %v19587_v1 = vld [vmem:[#allocation160_spill] sm:$0xff]  ;;  %v19589_v25 = vld [vmem:[#allocation113_spill] sm:$0xff]  ;;  %v2568_v21 = vadd.f32 %v2552_v6, %v2516_v30  ;;  %v3751_v46 = vmul.f32 %v15872_v35, %v19542_v16 }
 0x47f   :  { %19586 = vst [vmem:[#allocation116_spill] sm:$0xff] %v15877_v3  ;;  %v4285_v7 = vadd.f32 %v19587_v1, %v4233_v59  ;;  %19588 = vst [vmem:[#allocation133_spill] sm:$0xff] %v15881_v11  ;;  %v19590_v60 = vld [vmem:[#allocation68_spill] sm:$0xff]  ;;  %v19592_v19 = vld [vmem:[#allocation109_spill] sm:$0xff]  ;;  %v3244_v17 = vadd.f32 %v15695_v34, %v3192_v49 }
 0x480   :  { %v15885_v58 = vmul.f32 %v19590_v60, %v19589_v25  ;;  %v19593_v41 = vld [vmem:[#allocation69_spill] sm:$0xff]  ;;  %v19598_v59 = vld [vmem:[#allocation70_spill] sm:$0xff]  ;;  %v2620_v55 = vadd.f32 %v2604_v42, %v2568_v21  ;;  %v19604_v30 = vld [vmem:[#allocation163_spill] sm:$0xff] }
 0x481   :  { %v15889_v10 = vmul.f32 %v19593_v41, %v19592_v19  ;;  %v15891_v2 = vld [vmem:[#allocation3 + $0x1a1] sm:$0xff]  ;;  %v15900_v25 = vmul.f32 %v19598_v59, %v19597_v54  ;;  %v3767_v6 = vadd.f32 %v3751_v46, %v19604_v30  ;;  %v3296_v49 = vadd.f32 %v15699_v4, %v3244_v17  ;;  %v2793_v42 = vld [vmem:[#allocation3 + $0x170] sm:$0xff] }
 0x482   :  { %19591 = vst [vmem:[#allocation174_spill] sm:$0xff] %v15885_v58  ;;  %19595 = vst [vmem:[#allocation112_spill] sm:$0xff] %v15891_v2  ;;  %v2688_v52 = vld [vmem:[#allocation3 + $0x167] sm:$0xff]  ;;  %v2656_v58 = vmul.f32 %v19493_v27, %v2636_v38  ;;  %v2845_v46 = vld [vmem:[#allocation3 + $0x171] sm:$0xff] }
 0x483   :  { %19594 = vst [vmem:[#allocation149_spill] sm:$0xff] %v15889_v10  ;;  %v19596_v1 = vld [vmem:[#allocation93_spill] sm:$0xff]  ;;  %19599 = vst [vmem:[#allocation33_spill] sm:$0xff] %v15900_v25  ;;  %v19601_v19 = vld [vmem:[#allocation72_spill] sm:$0xff] }
 0x484   :  { %v4337_v39 = vadd.f32 %v19596_v1, %v4285_v7  ;;  %v15904_v10 = vmul.f32 %v19601_v19, %v19600_v22  ;;  %v15907_v40 = vld [vmem:[#allocation3 + $0x1a2] sm:$0xff]  ;;  %v3803_v7 = vmul.f32 %v15891_v2, %v19544_v9  ;;  %v2672_v21 = vadd.f32 %v2656_v58, %v2620_v55  ;;  %v19616_v2 = vld [vmem:[#allocation75_spill] sm:$0xff] }
 0x485   :  { %19603 = vst [vmem:[#allocation153_spill] sm:$0xff] %v15907_v40  ;;  %v2740_v12 = vld [vmem:[#allocation3 + $0x168] sm:$0xff]  ;;  %v19605_v1 = vld [vmem:[#allocation152_spill] sm:$0xff]  ;;  %v3348_v58 = vadd.f32 %v15707_v8, %v3296_v49  ;;  %v2897_v55 = vld [vmem:[#allocation3 + $0x172] sm:$0xff] }
 0x486   :  { %19602 = vst [vmem:[#allocation104_spill] sm:$0xff] %v15904_v10  ;;  %v4389_v54 = vadd.f32 %v19605_v1, %v4337_v39  ;;  %v19606_v25 = vld [vmem:[#allocation164_spill] sm:$0xff]  ;;  %v19607_v35 = vld [vmem:[#allocation73_spill] sm:$0xff]  ;;  %v19610_v10 = vld [vmem:[#allocation74_spill] sm:$0xff]  ;;  %v3819_v30 = vadd.f32 %v3803_v7, %v3767_v6  ;;  %v3855_v39 = vmul.f32 %v15907_v40, %v19546_v56 }
 0x487   :  { %v15916_v3 = vmul.f32 %v19607_v35, %v19606_v25  ;;  %v19609_v22 = vld [vmem:[#allocation148_spill] sm:$0xff]  ;;  %v19612_v38 = vld [vmem:[#allocation29_spill] sm:$0xff]  ;;  %v2949_v6 = vld [vmem:[#allocation3 + $0x173] sm:$0xff]  ;;  %v3400_v8 = vadd.f32 %v15711_v43, %v3348_v58 }
 0x488   :  { %v15920_v27 = vmul.f32 %v19610_v10, %v19609_v22  ;;  %v2708_v19 = vmul.f32 %v19612_v38, %v2688_v52  ;;  %v15923_v34 = vld [vmem:[#allocation3 + $0x1a3] sm:$0xff]  ;;  %v19621_v38 = vld [vmem:[#allocation30_spill] sm:$0xff]  ;;  %v3871_v40 = vadd.f32 %v3855_v39, %v3819_v30 }
 0x489   :  { %19608 = vst [vmem:[#allocation111_spill] sm:$0xff] %v15916_v3  ;;  %19613 = vst [vmem:[#allocation119_spill] sm:$0xff] %v15923_v34  ;;  %v19614_v1 = vld [vmem:[#allocation120_spill] sm:$0xff]  ;;  %v19615_v3 = vld [vmem:[#allocation114_spill] sm:$0xff]  ;;  %v2760_v10 = vmul.f32 %v19621_v38, %v2740_v12 }
 0x48a   :  { %19611 = vst [vmem:[#allocation156_spill] sm:$0xff] %v15920_v27  ;;  %v4441_v25 = vadd.f32 %v19614_v1, %v4389_v54  ;;  %v15931_v35 = vmul.f32 %v19616_v2, %v19615_v3  ;;  %v19618_v22 = vld [vmem:[#allocation165_spill] sm:$0xff]  ;;  %v19619_v27 = vld [vmem:[#allocation76_spill] sm:$0xff]  ;;  %v2724_v17 = vadd.f32 %v2708_v19, %v2672_v21  ;;  %v3001_v7 = vld [vmem:[#allocation3 + $0x174] sm:$0xff]  ;;  %v3907_v54 = vmul.f32 %v15923_v34, %v19548_v53 }
 0x48b   :  { %v15935_v52 = vmul.f32 %v19619_v27, %v19618_v22  ;;  %v15938_v4 = vld [vmem:[#allocation3 + $0x1a4] sm:$0xff]  ;;  %v19622_v3 = vld [vmem:[#allocation138_spill] sm:$0xff] }
 0x48c   :  { %19617 = vst [vmem:[#allocation38_spill] sm:$0xff] %v15931_v35  ;;  %v4493_v1 = vadd.f32 %v19622_v3, %v4441_v25  ;;  %v19623_v35 = vld [vmem:[#allocation105_spill] sm:$0xff]  ;;  %v19627_v38 = vld [vmem:[#allocation32_spill] sm:$0xff]  ;;  %v2776_v19 = vadd.f32 %v2760_v10, %v2724_v17  ;;  %v3923_v49 = vadd.f32 %v3907_v54, %v3871_v40  ;;  %v3959_v21 = vmul.f32 %v15938_v4, %v19550_v14  ;;  %v19629_v3 = vld [vmem:[#allocation34_spill] sm:$0xff] }
 0x48d   :  { %19620 = vst [vmem:[#allocation162_spill] sm:$0xff] %v15935_v52  ;;  %v19624_v2 = vld [vmem:[#allocation77_spill] sm:$0xff]  ;;  %v19626_v52 = vld [vmem:[#allocation31_spill] sm:$0xff]  ;;  %v2865_v27 = vmul.f32 %v19627_v38, %v2845_v46  ;;  %v2917_v25 = vmul.f32 %v19504_v62, %v2897_v55  ;;  %v3452_v46 = vadd.f32 %v15719_v63, %v3400_v8  ;;  %v19632_v58 = vld [vmem:[#allocation36_spill] sm:$0xff]  ;;  %v3177_v55 = vmul.f32 %v15725_v61, %v19516_v57 }
 0x48e   :  { %v15946_v22 = vmul.f32 %v19624_v2, %v19623_v35  ;;  %v2813_v12 = vmul.f32 %v19626_v52, %v2793_v42  ;;  %v15950_v11 = vld [vmem:[#allocation3 + $0x1a5] sm:$0xff]  ;;  %v2969_v2 = vmul.f32 %v19629_v3, %v2949_v6  ;;  %v3975_v38 = vadd.f32 %v3959_v21, %v3923_v49  ;;  %v19631_v10 = vld [vmem:[#allocation115_spill] sm:$0xff] }
 0x48f   :  { %v19628_v30 = vld [vmem:[#allocation141_spill] sm:$0xff]  ;;  %v4011_v43 = vmul.f32 %v15950_v11, %v19552_v45  ;;  %v3073_v17 = vmul.f32 %v15701_v31, %v19632_v58  ;;  %v3504_v63 = vadd.f32 %v15731_v29, %v3452_v46  ;;  %v19637_v49 = vld [vmem:[#allocation40_spill] sm:$0xff] }
 0x490   :  { %19625 = vst [vmem:[#allocation98_spill] sm:$0xff] %v15946_v22  ;;  %v4545_v39 = vadd.f32 %v19628_v30, %v4493_v1  ;;  %v19630_v22 = vld [vmem:[#allocation35_spill] sm:$0xff]  ;;  %v15959_v42 = vld [vmem:[#allocation3 + $0x1a6] sm:$0xff]  ;;  %v2829_v52 = vadd.f32 %v2813_v12, %v2776_v19  ;;  %v19639_v30 = vld [vmem:[#allocation158_spill] sm:$0xff] }
 0x491   :  { %v3021_v34 = vmul.f32 %v19630_v22, %v3001_v7  ;;  %v19633_v54 = vld [vmem:[#allocation37_spill] sm:$0xff]  ;;  %v4027_v1 = vadd.f32 %v4011_v43, %v3975_v38  ;;  %v4063_v22 = vmul.f32 %v15959_v42, %v19554_v37  ;;  %v19635_v12 = vld [vmem:[#allocation88_spill] sm:$0xff]  ;;  %v19636_v19 = vld [vmem:[#allocation39_spill] sm:$0xff] }
 0x492   :  { %v4597_v40 = vadd.f32 %v19631_v10, %v4545_v39  ;;  %v3125_v62 = vmul.f32 %v15721_v51, %v19633_v54  ;;  %v15971_v6 = vld [vmem:[#allocation3 + $0x1a7] sm:$0xff]  ;;  %v2881_v7 = vadd.f32 %v2865_v27, %v2829_v52  ;;  %v3229_v31 = vmul.f32 %v15741_v32, %v19636_v19  ;;  %v19642_v52 = vld [vmem:[#allocation107_spill] sm:$0xff]  ;;  %v19643_v43 = vld [vmem:[#allocation42_spill] sm:$0xff] }
 0x493   :  { %19634 = vst [vmem:[#allocation157_spill] sm:$0xff] %v15971_v6  ;;  %v3281_v51 = vmul.f32 %v15757_v44, %v19637_v49  ;;  %v19638_v21 = vld [vmem:[#allocation41_spill] sm:$0xff]  ;;  %v19641_v29 = vld [vmem:[#allocation92_spill] sm:$0xff]  ;;  %v4079_v3 = vadd.f32 %v4063_v22, %v4027_v1  ;;  %v4115_v46 = vmul.f32 %v15971_v6, %v19398_v20  ;;  %v19644_v32 = vld [vmem:[#allocation58_spill] sm:$0xff] }
 0x494   :  { %v4649_v8 = vadd.f32 %v19635_v12, %v4597_v40  ;;  %v15983_v57 = vmul.f32 %v19639_v30, %v19638_v21  ;;  %v15985_v61 = vld [vmem:[#allocation3 + $0x1a8] sm:$0xff]  ;;  %v3556_v27 = vadd.f32 %v19641_v29, %v3504_v63  ;;  %v2933_v39 = vadd.f32 %v2917_v25, %v2881_v7  ;;  %v19645_v44 = vld [vmem:[#allocation43_spill] sm:$0xff]  ;;  %v19646_v40 = vld [vmem:[#allocation16_spill] sm:$0xff] }
 0x495   :  { %19640 = vst [vmem:[#allocation132_spill] sm:$0xff] %v15985_v61  ;;  %v15993_v10 = vmul.f32 %v19644_v32, %v19643_v43  ;;  %v15997_v58 = vmul.f32 %v19646_v40, %v19645_v44  ;;  %v19647_v54 = vld [vmem:[#allocation44_spill] sm:$0xff]  ;;  %v4131_v1 = vadd.f32 %v4115_v46, %v4079_v3  ;;  %v4167_v22 = vmul.f32 %v15985_v61, %v19558_v48  ;;  %v19650_v49 = vld [vmem:[#allocation45_spill] sm:$0xff]  ;;  %v19651_v30 = vld [vmem:[#allocation46_spill] sm:$0xff] }
 0x496   :  { %v4702_v38 = vadd.f32 %v19642_v52, %v4649_v8  ;;  %v16001_v12 = vmul.f32 %v15775_v15, %v19647_v54  ;;  %v19648_v63 = vld [vmem:[#allocation56_spill] sm:$0xff]  ;;  %v2985_v7 = vadd.f32 %v2969_v2, %v2933_v39  ;;  %v19649_v8 = vld [vmem:[#allocation167_spill] sm:$0xff]  ;;  %v16009_v21 = vmul.f32 %v15782_v5, %v19650_v49  ;;  %v19652_v52 = vld [vmem:[#allocation145_spill] sm:$0xff] }
 0x497   :  { %v3608_v25 = vadd.f32 %v19648_v63, %v3556_v27  ;;  %v16013_v29 = vmul.f32 %v15784_v13, %v19651_v30  ;;  %v4220_v15 = vmul.f32 %v19404_v0, %v19623_v35  ;;  %v4183_v39 = vadd.f32 %v4167_v22, %v4131_v1  ;;  %v19653_v46 = vld [vmem:[#allocation168_spill] sm:$0xff]  ;;  %v19654_v43 = vld [vmem:[#allocation47_spill] sm:$0xff]  ;;  %v19655_v32 = vld [vmem:[#allocation9_spill] sm:$0xff] }
 0x498   :  { %v4754_v19 = vadd.f32 %v19649_v8, %v4702_v38  ;;  %v3037_v2 = vadd.f32 %v3021_v34, %v2985_v7  ;;  %v3752_v3 = vmul.f32 %v19542_v16, %v19623_v35  ;;  %v16023_v5 = vmul.f32 %v15800_v36, %v19654_v43  ;;  %v19656_v40 = vld [vmem:[#allocation59_spill] sm:$0xff]  ;;  %v19658_v1 = vld [vmem:[#allocation173_spill] sm:$0xff]  ;;  %v19659_v22 = vld [vmem:[#allocation48_spill] sm:$0xff] }
 0x499   :  { %v3660_v27 = vadd.f32 %v19652_v52, %v3608_v25  ;;  %v4272_v13 = vmul.f32 %v19407_v33, %v19655_v32  ;;  %v3804_v44 = vmul.f32 %v19544_v9, %v19655_v32  ;;  %v4236_v34 = vadd.f32 %v4220_v15, %v4183_v39  ;;  %v19657_v25 = vld [vmem:[#allocation140_spill] sm:$0xff]  ;;  %v19662_v15 = vld [vmem:[#allocation169_spill] sm:$0xff] }
 0x49a   :  { %v4806_v38 = vadd.f32 %v19653_v46, %v4754_v19  ;;  %v3089_v63 = vadd.f32 %v3073_v17, %v3037_v2  ;;  %v3768_v7 = vadd.f32 %v3752_v3, %v19657_v25  ;;  %v16034_v8 = vmul.f32 %v15807_v28, %v19659_v22  ;;  %v19660_v36 = vld [vmem:[#allocation12_spill] sm:$0xff]  ;;  %v19663_v3 = vld [vmem:[#allocation13_spill] sm:$0xff] }
 0x49b   :  { %v3712_v54 = vadd.f32 %v19656_v40, %v3660_v27  ;;  %v4324_v19 = vmul.f32 %v19409_v26, %v19660_v36  ;;  %v3856_v49 = vmul.f32 %v19546_v56, %v19660_v36  ;;  %v19661_v30 = vld [vmem:[#allocation60_spill] sm:$0xff]  ;;  %v4288_v27 = vadd.f32 %v4272_v13, %v4236_v34  ;;  %v19664_v43 = vld [vmem:[#allocation177_spill] sm:$0xff] }
 0x49c   :  { %v4858_v35 = vadd.f32 %v19658_v1, %v4806_v38  ;;  %v3141_v46 = vadd.f32 %v3125_v62, %v3089_v63  ;;  %v3820_v17 = vadd.f32 %v3804_v44, %v3768_v7  ;;  %v16044_v39 = vmul.f32 %v15485_v50, %v19542_v16  ;;  %v19665_v62 = vld [vmem:[#allocation4_spill] sm:$0xff]  ;;  %v19666_v63 = vld [vmem:[#allocation90_spill] sm:$0xff] }
 0x49d   :  { %v3765_v52 = vadd.f32 %v19661_v30, %v3712_v54  ;;  %v4376_v28 = vmul.f32 %v19412_v47, %v19663_v3  ;;  %v3908_v38 = vmul.f32 %v19548_v53, %v19663_v3  ;;  %v4340_v1 = vadd.f32 %v4324_v19, %v4288_v27  ;;  %v19667_v50 = vld [vmem:[#allocation62_spill] sm:$0xff] }
 0x49e   :  { %v4910_v2 = vadd.f32 %v19662_v15, %v4858_v35  ;;  %v3193_v25 = vadd.f32 %v3177_v55, %v3141_v46  ;;  %v3872_v54 = vadd.f32 %v3856_v49, %v3820_v17  ;;  %v16054_v44 = vmul.f32 %v15501_v24, %v19544_v9  ;;  %v19668_v35 = vld [vmem:[#allocation61_spill] sm:$0xff]  ;;  %v19669_v55 = vld [vmem:[#allocation106_spill] sm:$0xff]  ;;  %v19670_v49 = vld [vmem:[#allocation95_spill] sm:$0xff] }
 0x49f   :  { %v3817_v40 = vadd.f32 %v19664_v43, %v3765_v52  ;;  %v4428_v34 = vmul.f32 %v19667_v50, %v19666_v63  ;;  %v3960_v7 = vmul.f32 %v19550_v14, %v19666_v63  ;;  %v4392_v15 = vadd.f32 %v4376_v28, %v4340_v1  ;;  %v19671_v27 = vld [vmem:[#allocation14_spill] sm:$0xff] }
 0x4a0   :  { %v4962_v13 = vadd.f32 %v19665_v62, %v4910_v2  ;;  %v3245_v30 = vadd.f32 %v3229_v31, %v3193_v25  ;;  %v3924_v52 = vadd.f32 %v3908_v38, %v3872_v54  ;;  %v16064_v46 = vmul.f32 %v19670_v49, %v19546_v56  ;;  %v19672_v2 = vld [vmem:[#allocation17_spill] sm:$0xff]  ;;  %v19673_v31 = vld [vmem:[#allocation6_spill] sm:$0xff]  ;;  %v19676_v54 = vld [vmem:[#allocation64_spill] sm:$0xff] }
 0x4a1   :  { %v3869_v22 = vadd.f32 %v19668_v35, %v3817_v40  ;;  %v4480_v24 = vmul.f32 %v19569_v23, %v19671_v27  ;;  %v4012_v17 = vmul.f32 %v19552_v45, %v19671_v27  ;;  %v4444_v63 = vadd.f32 %v4428_v34, %v4392_v15  ;;  %v19674_v38 = vld [vmem:[#allocation154_spill] sm:$0xff]  ;;  %v19678_v34 = vld [vmem:[#allocation147_spill] sm:$0xff]  ;;  %v19680_v15 = vld [vmem:[#allocation65_spill] sm:$0xff] }
 0x4a2   :  { %v5014_v19 = vadd.f32 %v19669_v55, %v4962_v13  ;;  %v3297_v62 = vadd.f32 %v3281_v51, %v3245_v30  ;;  %v3976_v40 = vadd.f32 %v3960_v7, %v3924_v52  ;;  %v16074_v25 = vmul.f32 %v19674_v38, %v19548_v53  ;;  %v19675_v1 = vld [vmem:[#allocation94_spill] sm:$0xff]  ;;  %v19679_v30 = vld [vmem:[#allocation176_spill] sm:$0xff] }
 0x4a3   :  { %v3921_v43 = vadd.f32 %v19672_v2, %v3869_v22  ;;  %v4532_v13 = vmul.f32 %v19676_v54, %v19675_v1  ;;  %v4064_v35 = vmul.f32 %v19554_v37, %v19675_v1  ;;  %v19677_v55 = vld [vmem:[#allocation102_spill] sm:$0xff]  ;;  %v4496_v22 = vadd.f32 %v4480_v24, %v4444_v63  ;;  %v19684_v24 = vld [vmem:[#allocation161_spill] sm:$0xff] }
 0x4a4   :  { %v5066_v28 = vadd.f32 %v19673_v31, %v5014_v19  ;;  %v3349_v27 = vadd.f32 %v15983_v57, %v3297_v62  ;;  %v4028_v51 = vadd.f32 %v4012_v17, %v3976_v40  ;;  %v4584_v52 = vmul.f32 %v19680_v15, %v19679_v30  ;;  %v19681_v19 = vld [vmem:[#allocation15_spill] sm:$0xff]  ;;  %v19682_v2 = vld [vmem:[#allocation66_spill] sm:$0xff] }
 0x4a5   :  { %v3973_v49 = vadd.f32 %v19677_v55, %v3921_v43  ;;  %v4636_v31 = vmul.f32 %v19682_v2, %v19681_v19  ;;  %v4116_v38 = vmul.f32 %v19398_v20, %v19679_v30  ;;  %v19683_v3 = vld [vmem:[#allocation18_spill] sm:$0xff]  ;;  %v16091_v43 = vld [vmem:[#allocation3 + $0x1c0] sm:$0xff]  ;;  %v4548_v57 = vadd.f32 %v4532_v13, %v4496_v22  ;;  %v19685_v55 = vld [vmem:[#allocation159_spill] sm:$0xff] }
 0x4a6   :  { %v5118_v7 = vadd.f32 %v19678_v34, %v5066_v28  ;;  %v3401_v1 = vadd.f32 %v15993_v10, %v3349_v27  ;;  %v4080_v63 = vadd.f32 %v4064_v35, %v4028_v51  ;;  %v4689_v62 = vmul.f32 %v16091_v43, %v19585_v18  ;;  %v16102_v10 = vld [vmem:[#allocation3 + $0x1c1] sm:$0xff]  ;;  %v19688_v22 = vld [vmem:[#allocation146_spill] sm:$0xff]  ;;  %v19693_v30 = vld [vmem:[#allocation19_spill] sm:$0xff] }
 0x4a7   :  { %v4025_v61 = vadd.f32 %v19683_v3, %v3973_v49  ;;  %v4168_v40 = vmul.f32 %v19558_v48, %v19681_v19  ;;  %v4221_v28 = vmul.f32 %v16091_v43, %v19404_v0  ;;  %19686 = vst [vmem:[#allocation101_spill] sm:$0xff] %v16102_v10  ;;  %v4600_v27 = vadd.f32 %v4584_v52, %v4548_v57  ;;  %v19687_v35 = vld [vmem:[#allocation124_spill] sm:$0xff] }
 0x4a8   :  { %v5171_v17 = vadd.f32 %v19684_v24, %v5118_v7  ;;  %v3453_v3 = vadd.f32 %v15997_v58, %v3401_v1  ;;  %v4132_v13 = vadd.f32 %v4116_v38, %v4080_v63  ;;  %v16107_v51 = vmul.f32 %v19688_v22, %v19550_v14  ;;  %v19689_v7 = vld [vmem:[#allocation83_spill] sm:$0xff]  ;;  %v16117_v1 = vld [vmem:[#allocation3 + $0x1c2] sm:$0xff] }
 0x4a9   :  { %v4077_v34 = vadd.f32 %v19685_v55, %v4025_v61  ;;  %v16111_v24 = vmul.f32 %v19689_v7, %v19552_v45  ;;  %v4273_v19 = vmul.f32 %v16102_v10, %v19407_v33  ;;  %v19690_v61 = vld [vmem:[#allocation135_spill] sm:$0xff]  ;;  %v4652_v52 = vadd.f32 %v4636_v31, %v4600_v27  ;;  %v19691_v57 = vld [vmem:[#allocation8_spill] sm:$0xff]  ;;  %v19695_v27 = vld [vmem:[#allocation121_spill] sm:$0xff] }
 0x4aa   :  { %v5223_v49 = vadd.f32 %v19687_v35, %v5171_v17  ;;  %v3505_v58 = vadd.f32 %v16001_v12, %v3453_v3  ;;  %v4184_v38 = vadd.f32 %v4168_v40, %v4132_v13  ;;  %v19692_v17 = vld [vmem:[#allocation172_spill] sm:$0xff]  ;;  %v4741_v22 = vmul.f32 %v16102_v10, %v19590_v60  ;;  %v19694_v31 = vld [vmem:[#allocation175_spill] sm:$0xff] }
 0x4ab   :  { %v4129_v55 = vadd.f32 %v19690_v61, %v4077_v34  ;;  %v16122_v35 = vmul.f32 %v19692_v17, %v19554_v37  ;;  %v4325_v7 = vmul.f32 %v16117_v1, %v19409_v26  ;;  %v4705_v3 = vadd.f32 %v4689_v62, %v4652_v52  ;;  %v16139_v17 = vld [vmem:[#allocation3 + $0x1c3] sm:$0xff] }
 0x4ac   :  { %v5275_v63 = vadd.f32 %v19691_v57, %v5223_v49  ;;  %v3557_v12 = vadd.f32 %v16009_v21, %v3505_v58  ;;  %v4237_v61 = vadd.f32 %v4221_v28, %v4184_v38  ;;  %v16133_v13 = vmul.f32 %v19695_v27, %v19398_v20  ;;  %v19696_v49 = vld [vmem:[#allocation155_spill] sm:$0xff]  ;;  %v19698_v58 = vld [vmem:[#allocation166_spill] sm:$0xff]  ;;  %v16148_v38 = vld [vmem:[#allocation3 + $0x1c4] sm:$0xff] }
 0x4ad   :  { %v4181_v34 = vadd.f32 %v19693_v30, %v4129_v55  ;;  %v16137_v57 = vmul.f32 %v19696_v49, %v19558_v48  ;;  %v4793_v36 = vmul.f32 %v16117_v1, %v19593_v41  ;;  %v19697_v30 = vld [vmem:[#allocation20_spill] sm:$0xff]  ;;  %v4377_v28 = vmul.f32 %v16139_v17, %v19412_v47  ;;  %v19699_v49 = vld [vmem:[#allocation21_spill] sm:$0xff] }
 0x4ae   :  { %v5327_v40 = vadd.f32 %v19694_v31, %v5275_v63  ;;  %v3609_v21 = vadd.f32 %v16013_v29, %v3557_v12  ;;  %v4289_v62 = vadd.f32 %v4273_v19, %v4237_v61  ;;  %v4757_v63 = vadd.f32 %v4741_v22, %v4705_v3  ;;  %v19700_v12 = vld [vmem:[#allocation87_spill] sm:$0xff] }
 0x4af   :  { %v4234_v55 = vadd.f32 %v19697_v30, %v4181_v34  ;;  %v4845_v31 = vmul.f32 %v16139_v17, %v19598_v59  ;;  %v3753_v27 = vmul.f32 %v16091_v43, %v19542_v16  ;;  %v4429_v19 = vmul.f32 %v16148_v38, %v19667_v50  ;;  %v19701_v30 = vld [vmem:[#allocation133_spill] sm:$0xff] }
 0x4b0   :  { %v5379_v52 = vadd.f32 %v19698_v58, %v5327_v40  ;;  %v3661_v34 = vadd.f32 %v16023_v5, %v3609_v21  ;;  %v4341_v29 = vadd.f32 %v4325_v7, %v4289_v62  ;;  %v16159_v40 = vld [vmem:[#allocation3 + $0x1c5] sm:$0xff]  ;;  %v3805_v3 = vmul.f32 %v16102_v10, %v19544_v9  ;;  %v19702_v58 = vld [vmem:[#allocation22_spill] sm:$0xff] }
 0x4b1   :  { %v4286_v6 = vadd.f32 %v19699_v49, %v4234_v55  ;;  %v3769_v22 = vadd.f32 %v3753_v27, %v19701_v30  ;;  %v3857_v16 = vmul.f32 %v16117_v1, %v19546_v56  ;;  %v4481_v21 = vmul.f32 %v16159_v40, %v19569_v23  ;;  %v19703_v62 = vld [vmem:[#allocation10_spill] sm:$0xff]  ;;  %v16171_v49 = vld [vmem:[#allocation3 + $0x1c6] sm:$0xff]  ;;  %v19704_v30 = vld [vmem:[#allocation23_spill] sm:$0xff] }
 0x4b2   :  { %v5431_v61 = vadd.f32 %v19700_v12, %v5379_v52  ;;  %v3713_v5 = vadd.f32 %v16034_v8, %v3661_v34  ;;  %v4393_v7 = vadd.f32 %v4377_v28, %v4341_v29  ;;  %v4809_v12 = vadd.f32 %v4793_v36, %v4757_v63  ;;  %v19705_v28 = vld [vmem:[#allocation11_spill] sm:$0xff]  ;;  %v16180_v29 = vld [vmem:[#allocation3 + $0x1c7] sm:$0xff] }
 0x4b3   :  { %v4338_v55 = vadd.f32 %v19702_v58, %v4286_v6  ;;  %v3821_v27 = vadd.f32 %v3805_v3, %v3769_v22  ;;  %v3909_v9 = vmul.f32 %v16139_v17, %v19548_v53  ;;  %v4533_v8 = vmul.f32 %v16171_v49, %v19676_v54  ;;  %v19707_v53 = vld [vmem:[#allocation99_spill] sm:$0xff] }
 0x4b4   :  { %v5483_v52 = vadd.f32 %v19703_v62, %v5431_v61  ;;  %v3766_v56 = vadd.f32 %v16044_v39, %v3713_v5  ;;  %v4445_v6 = vadd.f32 %v4429_v19, %v4393_v7  ;;  %v19706_v61 = vld [vmem:[#allocation72_spill] sm:$0xff]  ;;  %v3961_v63 = vmul.f32 %v16148_v38, %v19550_v14  ;;  %v16195_v14 = vld [vmem:[#allocation3 + $0x1c8] sm:$0xff] }
 0x4b5   :  { %v4390_v10 = vadd.f32 %v19704_v30, %v4338_v55  ;;  %v4897_v58 = vmul.f32 %v16148_v38, %v19706_v61  ;;  %v3873_v36 = vadd.f32 %v3857_v16, %v3821_v27  ;;  %v4585_v19 = vmul.f32 %v16180_v29, %v19680_v15  ;;  %v19708_v55 = vld [vmem:[#allocation100_spill] sm:$0xff] }
 0x4b6   :  { %v5535_v34 = vadd.f32 %v19705_v28, %v5483_v52  ;;  %v3818_v3 = vadd.f32 %v16054_v44, %v3766_v56  ;;  %v4497_v39 = vadd.f32 %v4481_v21, %v4445_v6  ;;  %v4861_v7 = vadd.f32 %v4845_v31, %v4809_v12  ;;  %v19709_v30 = vld [vmem:[#allocation24_spill] sm:$0xff]  ;;  %v16200_v6 = vld [vmem:[#allocation3 + $0x1d0] sm:$0xff] }
 0x4b7   :  { %v4442_v22 = vadd.f32 %v19707_v53, %v4390_v10  ;;  %v3925_v62 = vadd.f32 %v3909_v9, %v3873_v36  ;;  %v4013_v52 = vmul.f32 %v16159_v40, %v19552_v45  ;;  %v19710_v10 = vld [vmem:[#allocation73_spill] sm:$0xff]  ;;  %v4637_v31 = vmul.f32 %v16195_v14, %v19682_v2 }
 0x4b8   :  { %v5587_v5 = vadd.f32 %v19708_v55, %v5535_v34  ;;  %v3870_v27 = vadd.f32 %v16064_v46, %v3818_v3  ;;  %v4949_v44 = vmul.f32 %v16159_v40, %v19710_v10  ;;  %v4549_v21 = vadd.f32 %v4533_v8, %v4497_v39  ;;  %v19711_v46 = vld [vmem:[#allocation26_spill] sm:$0xff]  ;;  %v19712_v39 = vld [vmem:[#allocation27_spill] sm:$0xff] }
 0x4b9   :  { %v4494_v16 = vadd.f32 %v19709_v30, %v4442_v22  ;;  %v3977_v12 = vadd.f32 %v3961_v63, %v3925_v62  ;;  %v4065_v45 = vmul.f32 %v16171_v49, %v19554_v37  ;;  %v4690_v8 = vmul.f32 %v16200_v6, %v19585_v18  ;;  %v16223_v30 = vld [vmem:[#allocation3 + $0x1d2] sm:$0xff] }
 0x4ba   :  { %v5628_v56 = vsel %vm45_vm0, %v5587_v5, 0  ;;  %v3922_v34 = vadd.f32 %v16074_v25, %v3870_v27  ;;  %v4913_v36 = vadd.f32 %v4897_v58, %v4861_v7  ;;  %v4601_v53 = vadd.f32 %v4585_v19, %v4549_v21  ;;  %v19713_v5 = vld [vmem:[#allocation74_spill] sm:$0xff] }
 0x4bb   :  { %v16206_v9 = vand.u32 4294901760, %v5628_v56  ;;  %v4546_v28 = vadd.f32 %v19711_v46, %v4494_v16  ;;  %v4029_v22 = vadd.f32 %v4013_v52, %v3977_v12  ;;  %v4117_v3 = vmul.f32 %v16180_v29, %v19398_v20  ;;  %v16221_v25 = vld [vmem:[#allocation3 + $0x1d1] sm:$0xff] }
 0x4bc   :  { %v3974_v55 = vadd.f32 %v16107_v51, %v3922_v34  ;;  %v5001_v62 = vmul.f32 %v16171_v49, %v19713_v5  ;;  %v4653_v58 = vadd.f32 %v4637_v31, %v4601_v53  ;;  %v4742_v19 = vmul.f32 %v16221_v25, %v19590_v60  ;;  %v19714_v16 = vld [vmem:[#allocation170_spill] sm:$0xff]  ;;  %v19716_v53 = vld [vmem:[#allocation75_spill] sm:$0xff] }
 0x4bd   :  { %v16215_v63 = vsub.f32 %v5628_v56, %v16206_v9  ;;  %v4598_v37 = vadd.f32 %v19712_v39, %v4546_v28  ;;  %v4081_v7 = vadd.f32 %v4065_v45, %v4029_v22  ;;  %v4169_v20 = vmul.f32 %v16195_v14, %v19558_v48  ;;  %v19715_v48 = vld [vmem:[#allocation116_spill] sm:$0xff]  ;;  %v16243_v22 = vld [vmem:[#allocation3 + $0x1d3] sm:$0xff] }
 0x4be   :  { %v4026_v51 = vadd.f32 %v16111_v24, %v3974_v55  ;;  %v4794_v21 = vmul.f32 %v16223_v30, %v19593_v41  ;;  %v4965_v56 = vadd.f32 %v4949_v44, %v4913_v36  ;;  %v4706_v12 = vadd.f32 %v4690_v8, %v4653_v58  ;;  %v16245_v39 = vld [vmem:[#allocation3 + $0x1d4] sm:$0xff] }
 0x4bf   :  { %v18167_v52 = vand.u32 4294901760, %v16215_v63  ;;  %v4650_v27 = vadd.f32 %v19714_v16, %v4598_v37  ;;  %v4133_v46 = vadd.f32 %v4117_v3, %v4081_v7  ;;  %v4222_v31 = vmul.f32 %v16200_v6, %v19404_v0  ;;  %v19717_v55 = vld [vmem:[#allocation174_spill] sm:$0xff] }
 0x4c0   :  { %v4078_v34 = vadd.f32 %v16122_v35, %v4026_v51  ;;  %v5053_v24 = vmul.f32 %v16180_v29, %v19716_v53  ;;  %v4758_v44 = vadd.f32 %v4742_v19, %v4706_v12  ;;  %v4846_v8 = vmul.f32 %v16243_v22, %v19598_v59  ;;  %v19718_v12 = vld [vmem:[#allocation149_spill] sm:$0xff] }
 0x4c1   :  { %v5814_v45 = vsub.f32 %v16215_v63, %v18167_v52  ;;  %v4703_v28 = vadd.f32 %v19715_v48, %v4650_v27  ;;  %v4185_v36 = vadd.f32 %v4169_v20, %v4133_v46  ;;  %v4274_v3 = vmul.f32 %v16221_v25, %v19407_v33  ;;  %v19719_v48 = vld [vmem:[#allocation28_spill] sm:$0xff] }
 0x4c2   :  { %v4130_v35 = vadd.f32 %v16133_v13, %v4078_v34  ;;  %v4898_v7 = vmul.f32 %v16245_v39, %v19706_v61  ;;  %v5017_v16 = vadd.f32 %v5001_v62, %v4965_v56  ;;  %v4810_v27 = vadd.f32 %v4794_v21, %v4758_v44  ;;  %v16263_v34 = vld [vmem:[#allocation3 + $0x1d5] sm:$0xff]  ;;  %v19721_v44 = vld [vmem:[#allocation33_spill] sm:$0xff] }
 0x4c3   :  { %v5815_v37 = vand.u32 4294901760, %v5814_v45  ;;  %v4755_v58 = vadd.f32 %v19717_v55, %v4703_v28  ;;  %v4238_v51 = vadd.f32 %v4222_v31, %v4185_v36  ;;  %v4326_v19 = vmul.f32 %v16223_v30, %v19409_v26  ;;  %v19720_v28 = vld [vmem:[#allocation112_spill] sm:$0xff]  ;;  %v16265_v55 = vld [vmem:[#allocation3 + $0x1d6] sm:$0xff] }
 0x4c4   :  { %v4182_v46 = vadd.f32 %v16137_v57, %v4130_v35  ;;  %v4219_v45 = vmul.f32 %v19404_v0, %v19719_v48  ;;  %v4271_v13 = vmul.f32 %v19407_v33, %v19720_v28  ;;  %v4862_v62 = vadd.f32 %v4846_v8, %v4810_v27  ;;  %v19723_v27 = vld [vmem:[#allocation104_spill] sm:$0xff]  ;;  %v19724_v48 = vld [vmem:[#allocation153_spill] sm:$0xff] }
 0x4c5   :  { %9978 = vmatprep.mubr.f32.mxu1 %v5815_v37  ;;  %v4807_v20 = vadd.f32 %v19718_v12, %v4755_v58  ;;  %v4950_v21 = vmul.f32 %v16263_v34, %v19710_v10  ;;  %v4290_v56 = vadd.f32 %v4274_v3, %v4238_v51  ;;  %v4378_v31 = vmul.f32 %v16243_v22, %v19412_v47  ;;  %v19722_v37 = vld [vmem:[#allocation76_spill] sm:$0xff] }
 0x4c6   :  { %v4235_v36 = vadd.f32 %v4219_v45, %v4182_v46  ;;  %v5105_v0 = vmul.f32 %v16195_v14, %v19722_v37  ;;  %v5002_v33 = vmul.f32 %v16265_v55, %v19713_v5  ;;  %v5069_v58 = vadd.f32 %v5053_v24, %v5017_v16  ;;  %v16283_v45 = vld [vmem:[#allocation3 + $0x1d7] sm:$0xff] }
 0x4c7   :  { %v4859_v57 = vadd.f32 %v19721_v44, %v4807_v20  ;;  %v4914_v35 = vadd.f32 %v4898_v7, %v4862_v62  ;;  %v4342_v12 = vadd.f32 %v4326_v19, %v4290_v56  ;;  %v4430_v8 = vmul.f32 %v16245_v39, %v19667_v50  ;;  %v19725_v20 = vld [vmem:[#allocation119_spill] sm:$0xff] }
 0x4c8   :  { %v4287_v51 = vadd.f32 %v4271_v13, %v4235_v36  ;;  %v4323_v28 = vmul.f32 %v19409_v26, %v19724_v48  ;;  %v4375_v46 = vmul.f32 %v19412_v47, %v19725_v20  ;;  %v16285_v44 = vld [vmem:[#allocation3 + $0x1d8] sm:$0xff]  ;;  %v5054_v24 = vmul.f32 %v16283_v45, %v19716_v53  ;;  %v19727_v26 = vld [vmem:[#allocation77_spill] sm:$0xff] }
 0x4c9   :  { %v4911_v3 = vadd.f32 %v19723_v27, %v4859_v57  ;;  %v4966_v52 = vadd.f32 %v4950_v21, %v4914_v35  ;;  %v4394_v7 = vadd.f32 %v4378_v31, %v4342_v12  ;;  %v4482_v16 = vmul.f32 %v16263_v34, %v19569_v23  ;;  %v19726_v19 = vld [vmem:[#allocation111_spill] sm:$0xff]  ;;  %v19728_v35 = vld [vmem:[#allocation156_spill] sm:$0xff] }
 0x4ca   :  { %v4339_v62 = vadd.f32 %v4323_v28, %v4287_v51  ;;  %v5158_v56 = vmul.f32 %v19727_v26, %v16200_v6  ;;  %v5106_v47 = vmul.f32 %v16285_v44, %v19722_v37  ;;  %v5121_v57 = vadd.f32 %v5105_v0, %v5069_v58  ;;  %v5139_v51 = vld [vmem:[#allocation3 + $0x1e0] sm:$0xff] }
 0x4cb   :  { %v4963_v13 = vadd.f32 %v19726_v19, %v4911_v3  ;;  %v5018_v36 = vadd.f32 %v5002_v33, %v4966_v52  ;;  %v4446_v27 = vadd.f32 %v4430_v8, %v4394_v7  ;;  %v4534_v21 = vmul.f32 %v16265_v55, %v19676_v54  ;;  %v5191_v20 = vld [vmem:[#allocation3 + $0x1e1] sm:$0xff]  ;;  %v19729_v33 = vld [vmem:[#allocation38_spill] sm:$0xff] }
 0x4cc   :  { %v4391_v12 = vadd.f32 %v4375_v46, %v4339_v62  ;;  %v4427_v48 = vmul.f32 %v19667_v50, %v15938_v4  ;;  %v4479_v3 = vmul.f32 %v19569_v23, %v15950_v11  ;;  %v5159_v28 = vmul.f32 %v19727_v26, %v5139_v51  ;;  %v19730_v46 = vld [vmem:[#allocation78_spill] sm:$0xff] }
 0x4cd   :  { %v5015_v31 = vadd.f32 %v19728_v35, %v4963_v13  ;;  %v5070_v6 = vadd.f32 %v5054_v24, %v5018_v36  ;;  %v4498_v0 = vadd.f32 %v4482_v16, %v4446_v27  ;;  %v4586_v52 = vmul.f32 %v16283_v45, %v19680_v15  ;;  %v19731_v24 = vld [vmem:[#allocation162_spill] sm:$0xff]  ;;  %v19732_v27 = vld [vmem:[#allocation157_spill] sm:$0xff] }
 0x4ce   :  { %v4443_v8 = vadd.f32 %v4427_v48, %v4391_v12  ;;  %v5210_v7 = vmul.f32 %v19730_v46, %v16221_v25  ;;  %v5211_v4 = vmul.f32 %v19730_v46, %v5191_v20  ;;  %v5174_v50 = vadd.f32 %v5158_v56, %v5121_v57  ;;  %v19733_v57 = vld [vmem:[#allocation98_spill] sm:$0xff]  ;;  %v19734_v48 = vld [vmem:[#allocation79_spill] sm:$0xff] }
 0x4cf   :  { %v5067_v58 = vadd.f32 %v19729_v33, %v5015_v31  ;;  %v5122_v19 = vadd.f32 %v5106_v47, %v5070_v6  ;;  %v4550_v11 = vadd.f32 %v4534_v21, %v4498_v0  ;;  %v4638_v23 = vmul.f32 %v16285_v44, %v19682_v2  ;;  %v5243_v31 = vld [vmem:[#allocation3 + $0x1e2] sm:$0xff] }
 0x4d0   :  { %v5208_v16 = vmul.f32 %v19730_v46, %v19655_v32  ;;  %v4495_v62 = vadd.f32 %v4479_v3, %v4443_v8  ;;  %v4531_v36 = vmul.f32 %v19676_v54, %v15959_v42  ;;  %v4583_v25 = vmul.f32 %v19680_v15, %v19732_v27  ;;  %v19735_v15 = vld [vmem:[#allocation12_spill] sm:$0xff] }
 0x4d1   :  { %v5119_v13 = vadd.f32 %v19731_v24, %v5067_v58  ;;  %v5175_v35 = vadd.f32 %v5159_v28, %v5122_v19  ;;  %v4602_v56 = vadd.f32 %v4586_v52, %v4550_v11  ;;  %v4691_v47 = vmul.f32 %v5139_v51, %v19585_v18  ;;  %v19736_v58 = vld [vmem:[#allocation132_spill] sm:$0xff]  ;;  %v19737_v19 = vld [vmem:[#allocation13_spill] sm:$0xff] }
 0x4d2   :  { %v4547_v12 = vadd.f32 %v4531_v36, %v4495_v62  ;;  %v5262_v6 = vmul.f32 %v19734_v48, %v16223_v30  ;;  %v5263_v32 = vmul.f32 %v19734_v48, %v5243_v31  ;;  %v5226_v3 = vadd.f32 %v5210_v7, %v5174_v50  ;;  %v5295_v8 = vld [vmem:[#allocation3 + $0x1e3] sm:$0xff]  ;;  %v10888_v30 = vld [vmem:[#allocation3 + $0x1b0] sm:$0xff] }
 0x4d3   :  { %v5172_v21 = vadd.f32 %v19733_v57, %v5119_v13  ;;  %v5227_v0 = vadd.f32 %v5211_v4, %v5175_v35  ;;  %v4654_v33 = vadd.f32 %v4638_v23, %v4602_v56  ;;  %v4743_v42 = vmul.f32 %v5191_v20, %v19590_v60  ;;  %v19738_v11 = vld [vmem:[#allocation80_spill] sm:$0xff]  ;;  %v19739_v56 = vld [vmem:[#allocation90_spill] sm:$0xff]  ;;  %v19740_v57 = vld [vmem:[#allocation81_spill] sm:$0xff] }
 0x4d4   :  { %v5260_v28 = vmul.f32 %v19734_v48, %v19735_v15  ;;  %v4599_v52 = vadd.f32 %v4583_v25, %v4547_v12  ;;  %v4635_v51 = vmul.f32 %v19682_v2, %v19736_v58  ;;  %v5312_v24 = vmul.f32 %v19738_v11, %v19737_v19  ;;  %v5347_v62 = vld [vmem:[#allocation3 + $0x1e4] sm:$0xff] }
 0x4d5   :  { %v5224_v54 = vadd.f32 %v5208_v16, %v5172_v21  ;;  %v4688_v13 = vmul.f32 %v10888_v30, %v19585_v18  ;;  %v4707_v7 = vadd.f32 %v4691_v47, %v4654_v33  ;;  %v4795_v4 = vmul.f32 %v5243_v31, %v19593_v41  ;;  %v10889_v21 = vld [vmem:[#allocation3 + $0x1b1] sm:$0xff]  ;;  %v5399_v12 = vld [vmem:[#allocation3 + $0x1e5] sm:$0xff] }
 0x4d6   :  { %v4651_v20 = vadd.f32 %v4635_v51, %v4599_v52  ;;  %v5279_v23 = vadd.f32 %v5263_v32, %v5227_v0  ;;  %v5315_v16 = vmul.f32 %v19738_v11, %v5295_v8  ;;  %v5278_v36 = vadd.f32 %v5262_v6, %v5226_v3  ;;  %v19741_v32 = vld [vmem:[#allocation14_spill] sm:$0xff]  ;;  %v19742_v0 = vld [vmem:[#allocation84_spill] sm:$0xff] }
 0x4d7   :  { %v5276_v50 = vadd.f32 %v5260_v28, %v5224_v54  ;;  %v5314_v2 = vmul.f32 %v19738_v11, %v16243_v22  ;;  %v4759_v27 = vadd.f32 %v4743_v42, %v4707_v7  ;;  %v4847_v25 = vmul.f32 %v5295_v8, %v19598_v59  ;;  %v10890_v54 = vld [vmem:[#allocation3 + $0x1b2] sm:$0xff]  ;;  %v5451_v58 = vld [vmem:[#allocation3 + $0x1e6] sm:$0xff] }
 0x4d8   :  { %v5364_v18 = vmul.f32 %v19740_v57, %v19739_v56  ;;  %v4704_v47 = vadd.f32 %v4688_v13, %v4651_v20  ;;  %v4740_v31 = vmul.f32 %v10889_v21, %v19590_v60  ;;  %v5416_v33 = vmul.f32 %v19742_v0, %v19741_v32  ;;  %v19743_v30 = vld [vmem:[#allocation94_spill] sm:$0xff]  ;;  %v19744_v13 = vld [vmem:[#allocation85_spill] sm:$0xff] }
 0x4d9   :  { %v5328_v35 = vadd.f32 %v5312_v24, %v5276_v50  ;;  %v4792_v6 = vmul.f32 %v10890_v54, %v19593_v41  ;;  %v4811_v3 = vadd.f32 %v4795_v4, %v4759_v27  ;;  %v4899_v22 = vmul.f32 %v5347_v62, %v19706_v61  ;;  %v10891_v4 = vld [vmem:[#allocation3 + $0x1b3] sm:$0xff]  ;;  %v5503_v20 = vld [vmem:[#allocation3 + $0x1e7] sm:$0xff] }
 0x4da   :  { %v4756_v15 = vadd.f32 %v4740_v31, %v4704_v47  ;;  %v5331_v28 = vadd.f32 %v5315_v16, %v5279_v23  ;;  %v5367_v52 = vmul.f32 %v19740_v57, %v5347_v62  ;;  %v5330_v51 = vadd.f32 %v5314_v2, %v5278_v36  ;;  %v19745_v23 = vld [vmem:[#allocation176_spill] sm:$0xff]  ;;  %v19746_v16 = vld [vmem:[#allocation86_spill] sm:$0xff]  ;;  %v5555_v47 = vld [vmem:[#allocation3 + $0x1e8] sm:$0xff] }
 0x4db   :  { %v5380_v42 = vadd.f32 %v5364_v18, %v5328_v35  ;;  %v5366_v60 = vmul.f32 %v19740_v57, %v16245_v39  ;;  %v4863_v8 = vadd.f32 %v4847_v25, %v4811_v3  ;;  %v4951_v19 = vmul.f32 %v5399_v12, %v19710_v10 }
 0x4dc   :  { %v5468_v41 = vmul.f32 %v19744_v13, %v19743_v30  ;;  %v4808_v7 = vadd.f32 %v4792_v6, %v4756_v15  ;;  %v4844_v50 = vmul.f32 %v10891_v4, %v19598_v59  ;;  %v5520_v62 = vmul.f32 %v19746_v16, %v19745_v23  ;;  %v5244_v4 = vld [vmem:[#allocation3 + $0x1f2] sm:$0xff] }
 0x4dd   :  { %v5432_v24 = vadd.f32 %v5416_v33, %v5380_v42  ;;  %v4896_v36 = vmul.f32 %v19706_v61, %v19739_v56  ;;  %v4915_v2 = vadd.f32 %v4899_v22, %v4863_v8  ;;  %v5003_v39 = vmul.f32 %v5451_v58, %v19713_v5  ;;  %v16363_v61 = vld [vmem:[%s17573_s2 + $0x50] ss:$0 sm:$0xff]  ;;  %v19747_v56 = vld [vmem:[#allocation15_spill] sm:$0xff] }
 0x4de   :  { %v4860_v25 = vadd.f32 %v4844_v50, %v4808_v7  ;;  %v5383_v35 = vadd.f32 %v5367_v52, %v5331_v28  ;;  %v5419_v18 = vmul.f32 %v19742_v0, %v5399_v12  ;;  %v5382_v21 = vadd.f32 %v5366_v60, %v5330_v51  ;;  %v5140_v22 = vld [vmem:[#allocation3 + $0x1f0] sm:$0xff] }
 0x4df   :  { %v5484_v27 = vadd.f32 %v5468_v41, %v5432_v24  ;;  %v5418_v59 = vmul.f32 %v19742_v0, %v16263_v34  ;;  %v4967_v31 = vadd.f32 %v4951_v19, %v4915_v2  ;;  %v5055_v33 = vmul.f32 %v5503_v20, %v19716_v53  ;;  %v5192_v8 = vld [vmem:[#allocation3 + $0x1f1] sm:$0xff] }
 0x4e0   :  { %v5572_v6 = vmul.f32 %v16363_v61, %v19747_v56  ;;  %v4912_v3 = vadd.f32 %v4896_v36, %v4860_v25  ;;  %v4948_v12 = vmul.f32 %v19710_v10, %v19741_v32  ;;  %v5000_v34 = vmul.f32 %v19713_v5, %v19743_v30 }
 0x4e1   :  { %v5536_v54 = vadd.f32 %v5520_v62, %v5484_v27  ;;  %v5019_v42 = vadd.f32 %v5003_v39, %v4967_v31  ;;  %v5107_v15 = vmul.f32 %v5555_v47, %v19722_v37  ;;  %v5435_v51 = vadd.f32 %v5419_v18, %v5383_v35 }
 0x4e2   :  { %v4964_v52 = vadd.f32 %v4948_v12, %v4912_v3  ;;  %v5471_v60 = vmul.f32 %v19744_v13, %v5451_v58  ;;  %v5434_v19 = vadd.f32 %v5418_v59, %v5382_v21  ;;  %v5470_v24 = vmul.f32 %v19744_v13, %v16265_v55  ;;  %v5348_v21 = vld [vmem:[#allocation3 + $0x1f4] sm:$0xff] }
 0x4e3   :  { %v5588_v28 = vadd.f32 %v5572_v6, %v5536_v54  ;;  %v5071_v41 = vadd.f32 %v5055_v33, %v5019_v42  ;;  %v5160_v10 = vmul.f32 %v19727_v26, %v5140_v22  ;;  %v5052_v5 = vmul.f32 %v19716_v53, %v19745_v23  ;;  %v5296_v53 = vld [vmem:[#allocation3 + $0x1f3] sm:$0xff] }
 0x4e4   :  { %v5016_v7 = vadd.f32 %v5000_v34, %v4964_v52  ;;  %v5104_v30 = vmul.f32 %v19722_v37, %v19747_v56  ;;  %v5157_v58 = vmul.f32 %v19727_v26, %v16091_v43  ;;  %v5212_v55 = vmul.f32 %v19730_v46, %v5192_v8  ;;  %v19748_v43 = vld [vmem:[#allocation101_spill] sm:$0xff]  ;;  %v5400_v3 = vld [vmem:[#allocation3 + $0x1f5] sm:$0xff] }
 0x4e5   :  { %v5631_v32 = vsel %vm45_vm0, %v5588_v28, 0  ;;  %v5123_v62 = vadd.f32 %v5107_v15, %v5071_v41  ;;  %v5522_v2 = vmul.f32 %v19746_v16, %v16283_v45  ;;  %v5487_v39 = vadd.f32 %v5471_v60, %v5435_v51  ;;  %v5452_v42 = vld [vmem:[#allocation3 + $0x1f6] sm:$0xff] }
 0x4e6   :  { %v16381_v50 = vand.u32 4294901760, %v5631_v32  ;;  %v5068_v36 = vadd.f32 %v5052_v5, %v5016_v7  ;;  %v5523_v27 = vmul.f32 %v19746_v16, %v5503_v20  ;;  %v5486_v37 = vadd.f32 %v5470_v24, %v5434_v19  ;;  %v5504_v60 = vld [vmem:[#allocation3 + $0x1f7] sm:$0xff] }
 0x4e7   :  { %v5176_v25 = vadd.f32 %v5160_v10, %v5123_v62  ;;  %v5264_v35 = vmul.f32 %v19734_v48, %v5244_v4  ;;  %v5209_v26 = vmul.f32 %v19730_v46, %v19748_v43  ;;  %v5261_v45 = vmul.f32 %v19734_v48, %v16117_v1 }
 0x4e8   :  { %v16390_v23 = vsub.f32 %v5631_v32, %v16381_v50  ;;  %v5120_v18 = vadd.f32 %v5104_v30, %v5068_v36  ;;  %v5316_v20 = vmul.f32 %v19738_v11, %v5296_v53  ;;  %v5574_v54 = vmul.f32 %v16363_v61, %v16285_v44 }
 0x4e9   :  { %v5228_v31 = vadd.f32 %v5212_v55, %v5176_v25  ;;  %v5539_v56 = vadd.f32 %v5523_v27, %v5487_v39  ;;  %v5575_v6 = vmul.f32 %v16363_v61, %v5555_v47  ;;  %v5538_v12 = vadd.f32 %v5522_v2, %v5486_v37 }
 0x4ea   :  { %v5823_v59 = vand.u32 4294901760, %v16390_v23  ;;  %v5173_v33 = vadd.f32 %v5157_v58, %v5120_v18  ;;  %v5368_v34 = vmul.f32 %v19740_v57, %v5348_v21  ;;  %v5313_v48 = vmul.f32 %v19738_v11, %v16139_v17  ;;  %v5556_v11 = vld [vmem:[#allocation3 + $0x1f8] sm:$0xff] }
 0x4eb   :  { %v5280_v22 = vadd.f32 %v5264_v35, %v5228_v31  ;;  %v5420_v44 = vmul.f32 %v19742_v0, %v5400_v3  ;;  %v5365_v47 = vmul.f32 %v19740_v57, %v16148_v38  ;;  %v5591_v51 = vadd.f32 %v5575_v6, %v5539_v56  ;;  %v19749_v3 = vld [vmem:[#allocation125_spill] sm:$0xff] }
 0x4ec   :  { %v5824_v46 = vsub.f32 %v16390_v23, %v5823_v59  ;;  %v5225_v1 = vadd.f32 %v5209_v26, %v5173_v33  ;;  %v5590_v8 = vadd.f32 %v5574_v54, %v5538_v12  ;;  %v5472_v24 = vmul.f32 %v19744_v13, %v5452_v42  ;;  %v19751_v12 = vld [vmem:[#allocation142_spill] sm:$0xff] }
 0x4ed   :  { %v5332_v28 = vadd.f32 %v5316_v20, %v5280_v22  ;;  %v5417_v17 = vmul.f32 %v19742_v0, %v16159_v40  ;;  %v5524_v32 = vmul.f32 %v19746_v16, %v5504_v60  ;;  %v5469_v5 = vmul.f32 %v19744_v13, %v16171_v49  ;;  %v19752_v22 = vld [vmem:[#allocation122_spill] sm:$0xff]  ;;  %v19763_v60 = vld [vmem:[#allocation96_spill] sm:$0xff] }
 0x4ee   :  { %v5825_v15 = vand.u32 4294901760, %v5824_v46  ;;  %v5277_v52 = vadd.f32 %v5261_v45, %v5225_v1  ;;  %v5640_v38 = vsel %vm45_vm0, %v5591_v51, 0  ;;  %v5637_v57 = vsel %vm45_vm0, %v5590_v8, 0  ;;  %v19750_v46 = vld [vmem:[#allocation130_spill] sm:$0xff]  ;;  %v19754_v1 = vld [vmem:[#allocation129_spill] sm:$0xff]  ;;  %v19762_v51 = vld [vmem:[#allocation139_spill] sm:$0xff] }
 0x4ef   :  { %v5384_v19 = vadd.f32 %v5368_v34, %v5332_v28  ;;  %v5576_v4 = vmul.f32 %v16363_v61, %v5556_v11  ;;  %v5521_v62 = vmul.f32 %v19746_v16, %v16180_v29  ;;  %v16422_v40 = vand.u32 4294901760, %v5640_v38  ;;  %v19753_v34 = vld [vmem:[#allocation71_spill] sm:$0xff]  ;;  %v19756_v42 = vld [vmem:[#allocation134_spill] sm:$0xff] }
 0x4f0   :  { %9979 = vmatmul.mubr.f32.gmra.mrb[10].mxu1 %v5825_v15  ;;  %v5329_v41 = vadd.f32 %v5313_v48, %v5277_v52  ;;  %v5573_v36 = vmul.f32 %v16363_v61, %v16195_v14  ;;  %v16426_v2 = vand.u32 4294901760, %v5637_v57  ;;  %v19755_v48 = vld [vmem:[#allocation91_spill] sm:$0xff]  ;;  %v19760_v52 = vld [vmem:[#allocation5_spill] sm:$0xff]  ;;  %v19769_v11 = vld [vmem:[#allocation126_spill] sm:$0xff] }
 0x4f1   :  { %v5436_v10 = vadd.f32 %v5420_v44, %v5384_v19  ;;  %v16429_v39 = vsub.f32 %v5640_v38, %v16422_v40  ;;  %v19757_v15 = vld [vmem:[#allocation131_spill] sm:$0xff]  ;;  %v19759_v44 = vld [vmem:[#allocation144_spill] sm:$0xff]  ;;  %v19765_v19 = vld [vmem:[#allocation97_spill] sm:$0xff]  ;;  %v19774_v38 = vand.u32 4294901760, %v19763_v60 }
 0x4f2   :  { %v5381_v7 = vadd.f32 %v5365_v47, %v5329_v41  ;;  %v16433_v37 = vsub.f32 %v5637_v57, %v16426_v2  ;;  %v19758_v28 = vld [vmem:[#allocation171_spill] sm:$0xff]  ;;  %v19761_v47 = vld [vmem:[#allocation128_spill] sm:$0xff]  ;;  %v19775_v57 = vand.u32 4294901760, %v19765_v19 }
 0x4f3   :  { %v5488_v30 = vadd.f32 %v5472_v24, %v5436_v10  ;;  %v5853_v61 = vand.u32 4294901760, %v16429_v39  ;;  %v19764_v8 = vld [vmem:[#allocation143_spill] sm:$0xff]  ;;  %v19766_v24 = vld [vmem:[#allocation110_spill] sm:$0xff]  ;;  %v19767_v41 = vld [vmem:[#allocation108_spill] sm:$0xff] }
 0x4f4   :  { %v5433_v58 = vadd.f32 %v5417_v17, %v5381_v7  ;;  %v5843_v35 = vand.u32 4294901760, %v16433_v37  ;;  %v19768_v17 = vld [vmem:[#allocation150_spill] sm:$0xff]  ;;  %v19772_v7 = vand.u32 4294901760, %v19761_v47 }
 0x4f5   :  { %v5540_v0 = vadd.f32 %v5524_v32, %v5488_v30  ;;  %v5854_v21 = vsub.f32 %v16429_v39, %v5853_v61  ;;  %v19770_v10 = vld [vmem:[#allocation82_spill] sm:$0xff]  ;;  %v19771_v32 = vld [vmem:[#allocation7_spill] sm:$0xff]  ;;  %v19776_v30 = vand.u32 4294901760, %v19766_v24 }
 0x4f6   :  { %v5485_v55 = vadd.f32 %v5469_v5, %v5433_v58  ;;  %v5844_v45 = vsub.f32 %v16433_v37, %v5843_v35  ;;  %v19773_v5 = vand.u32 4294901760, %v19762_v51  ;;  %v19778_v58 = vand.u32 4294901760, %v19768_v17 }
 0x4f7   :  { %v5592_v49 = vadd.f32 %v5576_v4, %v5540_v0  ;;  %v5855_v54 = vand.u32 4294901760, %v5854_v21  ;;  %v19777_v4 = vand.u32 4294901760, %v19767_v41  ;;  %v19780_v0 = vand.u32 4294901760, %v19770_v10 }
 0x4f8   :  { %v5537_v13 = vadd.f32 %v5521_v62, %v5485_v55  ;;  %v5845_v56 = vand.u32 4294901760, %v5844_v45  ;;  %v19779_v62 = vand.u32 4294901760, %v19769_v11  ;;  %v19781_v55 = vand.u32 4294901760, %v19771_v32 }
 0x4f9   :  { %v5643_v27 = vsel %vm45_vm0, %v5592_v49, 0 }
 0x4fa   :  { %v5589_v53 = vadd.f32 %v5573_v36, %v5537_v13  ;;  %v16435_v29 = vand.u32 4294901760, %v5643_v27  ;;  %v19782_v36 = vand.u32 4294901760, %v16215_v63 }
 0x4fc   :  { %v5634_v16 = vsel %vm45_vm0, %v5589_v53, 0  ;;  %v16439_v25 = vsub.f32 %v5643_v27, %v16435_v29 }
 0x4fd   :  { %v16441_v14 = vand.u32 4294901760, %v5634_v16 }
 0x4fe   :  { %v5863_v43 = vand.u32 4294901760, %v16439_v25 }
 0x4ff   :  { %v16446_v18 = vsub.f32 %v5634_v16, %v16441_v14  ;;  %v16589_v16 = vld [vmem:[%s17571_s1 + $0x29] ss:$0 sm:$0xff] }
 0x500   :  { %v5864_v20 = vsub.f32 %v16439_v25, %v5863_v43 }
 0x501   :  { %v5833_v26 = vand.u32 4294901760, %v16446_v18 }
 0x502   :  { %v5865_v6 = vand.u32 4294901760, %v5864_v20 }
 0x503   :  { %v5834_v31 = vsub.f32 %v16446_v18, %v5833_v26 }
 0x505   :  { %v5835_v33 = vand.u32 4294901760, %v5834_v31 }
 0x507   :  { %9981 = vmatprep.mubr.f32.mxu1 %v5835_v33 }
 0x508   :  { %9982 = vmatmul.mubr.f32.gmra.mrb[12].mxu1 %v5845_v56 }
 0x509   :  { %9984 = vmatprep.mubr.f32.mxu1 %v5855_v54 }
 0x50c   :  { %9985 = vmatmul.mubr.f32.gmra.mrb[14].mxu1 %v5865_v6 }
 0x50d   :  { %9989 = vmatprep.mubr.f32.mxu1 %v19749_v3 }
 0x510   :  { %9990 = vmatmul.mubr.f32.vlgmr.msra.gmra.mrb[0].mxu1 %v19750_v46 }
 0x511   :  { %10014 = vmatpush3.msra.mxu1 %v19751_v12  ;;  %9992 = vmatprep.mubr.f32.mxu1 %v19752_v22 }
 0x512   :  { %10039 = vmatprep.subr.mxu1 %v19753_v34 }
 0x514   :  { %9993 = vmatmul.mubr.f32.gmra.mrb[2].mxu1 %v19754_v1 }
 0x515   :  { %9995 = vmatprep.mubr.f32.mxu1 %v19755_v48 }
 0x518   :  { %9996 = vmatmul.mubr.f32.gmra.mrb[4].mxu1 %v19756_v42 }
 0x519   :  { %9998 = vmatprep.mubr.f32.mxu1 %v19757_v15 }
 0x51c   :  { %9999 = vmatmul.mubr.f32.gmra.mrb[6].mxu1 %v19758_v28 }
 0x51d   :  { %10001 = vmatprep.mubr.f32.mxu1 %v19759_v44 }
 0x520   :  { %10002 = vmatmul.mubr.f32.gmra.mrb[8].mxu1 %v19760_v52 }
 0x521   :  { %10004 = vmatprep.mubr.f32.mxu1 %v16206_v9 }
 0x524   :  { %10005 = vmatmul.mubr.f32.gmra.mrb[10].mxu1 %v16381_v50 }
 0x525   :  { %10007 = vmatprep.mubr.f32.mxu1 %v16441_v14 }
 0x528   :  { %10008 = vmatmul.mubr.f32.gmra.mrb[12].mxu1 %v16426_v2 }
 0x529   :  { %10010 = vmatprep.mubr.f32.mxu1 %v16422_v40 }
 0x52c   :  { %10011 = vmatmul.mubr.f32.gmra.mrb[14].mxu1 %v16435_v29 }
 0x52d   :  { %10015 = vmatprep.mubr.f32.mxu1 %v19761_v47 }
 0x530   :  { %10016 = vmatmul.mubr.f32.vlgmr.msra.gmra.mrb[0].mxu1 %v19762_v51 }
 0x531   :  { %10040 = vmatpush3.msra.mxu1 %v19753_v34  ;;  %10018 = vmatprep.mubr.f32.mxu1 %v19763_v60 }
 0x532   :  { %10065 = vmatprep.subr.mxu1 %v19764_v8 }
 0x534   :  { %10019 = vmatmul.mubr.f32.gmra.mrb[2].mxu1 %v19765_v19 }
 0x535   :  { %10021 = vmatprep.mubr.f32.mxu1 %v19766_v24 }
 0x538   :  { %10022 = vmatmul.mubr.f32.gmra.mrb[4].mxu1 %v19767_v41 }
 0x539   :  { %10024 = vmatprep.mubr.f32.mxu1 %v19768_v17 }
 0x53c   :  { %10025 = vmatmul.mubr.f32.gmra.mrb[6].mxu1 %v19769_v11 }
 0x53d   :  { %10027 = vmatprep.mubr.f32.mxu1 %v19770_v10 }
 0x540   :  { %10028 = vmatmul.mubr.f32.gmra.mrb[8].mxu1 %v19771_v32 }
 0x541   :  { %10030 = vmatprep.mubr.f32.mxu1 %v16215_v63  ;;  %v16_v63 = vld [vmem:[%s17571_s1 + $0x10] sm:$0xff] }
 0x544   :  { %10031 = vmatmul.mubr.f32.gmra.mrb[10].mxu1 %v16390_v23  ;;  %v17_v23 = vld [vmem:[%s17571_s1 + $0x18] sm:$0xff] }
 0x545   :  { %10033 = vmatprep.mubr.f32.mxu1 %v16446_v18 }
 0x548   :  { %10034 = vmatmul.mubr.f32.gmra.mrb[12].mxu1 %v16433_v37 }
 0x549   :  { %10036 = vmatprep.mubr.f32.mxu1 %v16429_v39 }
 0x54c   :  { %10037 = vmatmul.mubr.f32.gmra.mrb[14].mxu1 %v16439_v25 }
 0x54d   :  { %10041 = vmatprep.mubr.f32.mxu1 %v19772_v7 }
 0x550   :  { %10042 = vmatmul.mubr.f32.vlgmr.msra.gmra.mrb[0].mxu1 %v19773_v5 }
 0x551   :  { %10066 = vmatpush3.msra.mxu1 %v19764_v8  ;;  %10044 = vmatprep.mubr.f32.mxu1 %v19774_v38 }
 0x552   :  { %10091 = vmatprep.subr.mxu1 %v19753_v34 }
 0x554   :  { %10045 = vmatmul.mubr.f32.gmra.mrb[2].mxu1 %v19775_v57 }
 0x555   :  { %10047 = vmatprep.mubr.f32.mxu1 %v19776_v30 }
 0x558   :  { %10048 = vmatmul.mubr.f32.gmra.mrb[4].mxu1 %v19777_v4 }
 0x559   :  { %10050 = vmatprep.mubr.f32.mxu1 %v19778_v58 }
 0x55c   :  { %10051 = vmatmul.mubr.f32.gmra.mrb[6].mxu1 %v19779_v62 }
 0x55d   :  { %10053 = vmatprep.mubr.f32.mxu1 %v19780_v0 }
 0x560   :  { %10054 = vmatmul.mubr.f32.gmra.mrb[8].mxu1 %v19781_v55 }
 0x561   :  { %10056 = vmatprep.mubr.f32.mxu1 %v19782_v36 }
 0x564   :  { %10057 = vmatmul.mubr.f32.gmra.mrb[10].mxu1 %v5823_v59  ;;  %v7102_v59 = vand.u32 4294901760, %v16_v63 }
 0x565   :  { %10059 = vmatprep.mubr.f32.mxu1 %v5833_v26 }
 0x568   :  { %10060 = vmatmul.mubr.f32.gmra.mrb[12].mxu1 %v5843_v35 }
 0x569   :  { %10062 = vmatprep.mubr.f32.mxu1 %v5853_v61 }
 0x56c   :  { %10063 = vmatmul.mubr.f32.gmra.mrb[14].mxu1 %v5863_v43 }
 0x56d   :  { %10067 = vmatprep.mubr.f32.mxu1 %v19749_v3 }
 0x570   :  { %10068 = vmatmul.mubr.f32.vlgmr.msra.gmra.mrb[0].mxu1 %v19750_v46 }
 0x571   :  { %10092 = vmatpush3.msra.mxu1 %v19753_v34  ;;  %10070 = vmatprep.mubr.f32.mxu1 %v19752_v22 }
 0x574   :  { %10071 = vmatmul.mubr.f32.gmra.mrb[2].mxu1 %v19754_v1 }
 0x575   :  { %10073 = vmatprep.mubr.f32.mxu1 %v19755_v48 }
 0x578   :  { %10074 = vmatmul.mubr.f32.gmra.mrb[4].mxu1 %v19756_v42 }
 0x579   :  { %10076 = vmatprep.mubr.f32.mxu1 %v19757_v15 }
 0x57c   :  { %10077 = vmatmul.mubr.f32.gmra.mrb[6].mxu1 %v19758_v28 }
 0x57d   :  { %10079 = vmatprep.mubr.f32.mxu1 %v19759_v44 }
 0x580   :  { %10080 = vmatmul.mubr.f32.gmra.mrb[8].mxu1 %v19760_v52 }
 0x581   :  { %10082 = vmatprep.mubr.f32.mxu1 %v16206_v9 }
 0x584   :  { %10083 = vmatmul.mubr.f32.gmra.mrb[10].mxu1 %v16381_v50 }
 0x585   :  { %10085 = vmatprep.mubr.f32.mxu1 %v16441_v14 }
 0x588   :  { %10086 = vmatmul.mubr.f32.gmra.mrb[12].mxu1 %v16426_v2 }
 0x589   :  { %10088 = vmatprep.mubr.f32.mxu1 %v16422_v40 }
 0x58c   :  { %10089 = vmatmul.mubr.f32.gmra.mrb[14].mxu1 %v16435_v29 }
 0x58d   :  { %10093 = vmatprep.mubr.f32.mxu1 %v19749_v3 }
 0x590   :  { %10094 = vmatmul.mubr.f32.vlgmr.msra.gmra.mrb[0].mxu1 %v19750_v46 }
 0x591   :  { %10096 = vmatprep.mubr.f32.mxu1 %v19752_v22 }
 0x594   :  { %10097 = vmatmul.mubr.f32.gmra.mrb[2].mxu1 %v19754_v1 }
 0x595   :  { %10099 = vmatprep.mubr.f32.mxu1 %v19755_v48 }
 0x598   :  { %10100 = vmatmul.mubr.f32.gmra.mrb[4].mxu1 %v19756_v42 }
 0x599   :  { %10102 = vmatprep.mubr.f32.mxu1 %v19757_v15 }
 0x59c   :  { %10103 = vmatmul.mubr.f32.gmra.mrb[6].mxu1 %v19758_v28 }
 0x59d   :  { %10105 = vmatprep.mubr.f32.mxu1 %v19759_v44 }
 0x5a0   :  { %10106 = vmatmul.mubr.f32.gmra.mrb[8].mxu1 %v19760_v52 }
 0x5a1   :  { %10108 = vmatprep.mubr.f32.mxu1 %v16206_v9  ;;  %v7105_v9 = vand.u32 4294901760, %v17_v23 }
 0x5a3   :  { %v16567_v49 = vpack.c.bf16 %v7105_v9, %v7102_v59 }
 0x5a4   :  { %10109 = vmatmul.mubr.f32.gmra.mrb[10].mxu1 %v16381_v50  ;;  %v16571_v50 = vsub.f32 %v16_v63, %v7102_v59 }
 0x5a5   :  { %10111 = vmatprep.mubr.f32.mxu1 %v16441_v14  ;;  %10442 = vmatprep.subr.bf16.mxu0 %v16567_v49 }
 0x5a6   :  { %10444 = vmatpush3.bf16.msra.mxu0 %v16567_v49 }
 0x5a8   :  { %10112 = vmatmul.mubr.f32.gmra.mrb[12].mxu1 %v16426_v2  ;;  %v7331_v2 = vand.u32 4294901760, %v16571_v50 }
 0x5a9   :  { %10114 = vmatprep.mubr.f32.mxu1 %v16422_v40  ;;  %v16573_v40 = vsub.f32 %v17_v23, %v7105_v9 }
 0x5aa   :  { %v7332_v39 = vsub.f32 %v16571_v50, %v7331_v2 }
 0x5ab   :  { %v7338_v13 = vand.u32 4294901760, %v16573_v40 }
 0x5ac   :  { %10115 = vmatmul.mubr.f32.gmra.mrb[14].mxu1 %v16435_v29  ;;  %v7333_v53 = vand.u32 4294901760, %v7332_v39 }
 0x5ad   :  { %v7339_v27 = vsub.f32 %v16573_v40, %v7338_v13 }
 0x5af   :  { %v7340_v37 = vand.u32 4294901760, %v7339_v27 }
 0x5b1   :  { %v16583_v29 = vpack.c.bf16 %v7340_v37, %v7333_v53 }
 0x5b3   :  { %10446 = vmatprep.subr.bf16.mxu0 %v16583_v29 }
 0x663   :  { %v10095_v25 = vpop.f32.mrb[0].mxu1 }
 0x664   :  { %v16592_v14 = vadd.f32 %v10095_v25, %v16589_v16  ;;  %v6642_v61 = vpop.f32.mrb[1].mxu1 }
 0x665   :  { %v16595_v35 = vadd.f32 %v16589_v16, %v6642_v61 }
 0x666   :  { %v6737_v18 = vsel %vm1185_vm1, %v16592_v14, 0.0  ;;  %v6776_v43 = vmul.f32 %v16592_v14, %v16592_v14 }
 0x667   :  { %v6736_v26 = vsel %vm1185_vm1, %v16595_v35, 0.0  ;;  %v6775_v21 = vmul.f32 %v16595_v35, %v16595_v35  ;;  %v10098_v45 = vpop.f32.mrb[2].mxu1 }
 0x668   :  { %v6792_v31 = vsel %vm1185_vm1, %v6776_v43, 0.0  ;;  %v6738_v20 = vadd.f32 %v6737_v18, %v6736_v26  ;;  %v16607_v33 = vadd.f32 %v10098_v45, %v16589_v16  ;;  %v6654_v54 = vpop.f32.mrb[3].mxu1 }
 0x669   :  { %v6791_v56 = vsel %vm1185_vm1, %v6775_v21, 0.0  ;;  %v16611_v6 = vadd.f32 %v16589_v16, %v6654_v54 }
 0x66a   :  { %v6793_v3 = vadd.f32 %v6792_v31, %v6791_v56  ;;  %v6778_v46 = vmul.f32 %v16607_v33, %v16607_v33  ;;  %v6741_v15 = vsel %vm1185_vm1, %v16607_v33, 0.0 }
 0x66b   :  { %v6739_v12 = vsel %vm1185_vm1, %v16611_v6, 0.0  ;;  %v6777_v22 = vmul.f32 %v16611_v6, %v16611_v6  ;;  %v10101_v34 = vpop.f32.mrb[4].mxu1 }
 0x66c   :  { %v6740_v1 = vadd.f32 %v6739_v12, %v6738_v20  ;;  %v16620_v48 = vadd.f32 %v10101_v34, %v16589_v16  ;;  %v6666_v42 = vpop.f32.mrb[5].mxu1  ;;  %v6796_v51 = vsel %vm1185_vm1, %v6778_v46, 0.0 }
 0x66d   :  { %v6794_v28 = vsel %vm1185_vm1, %v6777_v22, 0.0  ;;  %v16626_v44 = vadd.f32 %v16589_v16, %v6666_v42 }
 0x66e   :  { %v6795_v52 = vadd.f32 %v6794_v28, %v6793_v3  ;;  %v6742_v47 = vadd.f32 %v6741_v15, %v6740_v1  ;;  %v6780_v60 = vmul.f32 %v16620_v48, %v16620_v48  ;;  %v6745_v32 = vsel %vm1185_vm1, %v16620_v48, 0.0 }
 0x66f   :  { %v6743_v8 = vsel %vm1185_vm1, %v16626_v44, 0.0  ;;  %v6779_v19 = vmul.f32 %v16626_v44, %v16626_v44  ;;  %v10104_v24 = vpop.f32.mrb[6].mxu1 }
 0x670   :  { %v6744_v41 = vadd.f32 %v6743_v8, %v6742_v47  ;;  %v6797_v17 = vadd.f32 %v6796_v51, %v6795_v52  ;;  %v16636_v11 = vadd.f32 %v10104_v24, %v16589_v16  ;;  %v6678_v10 = vpop.f32.mrb[7].mxu1  ;;  %v6800_v30 = vsel %vm1185_vm1, %v6780_v60, 0.0 }
 0x671   :  { %v6798_v7 = vsel %vm1185_vm1, %v6779_v19, 0.0  ;;  %v16642_v5 = vadd.f32 %v16589_v16, %v6678_v10 }
 0x672   :  { %v6799_v38 = vadd.f32 %v6798_v7, %v6797_v17  ;;  %v6746_v57 = vadd.f32 %v6745_v32, %v6744_v41  ;;  %v6782_v4 = vmul.f32 %v16636_v11, %v16636_v11  ;;  %v6749_v59 = vsel %vm1185_vm1, %v16636_v11, 0.0 }
 0x673   :  { %v6747_v58 = vsel %vm1185_vm1, %v16642_v5, 0.0  ;;  %v6781_v62 = vmul.f32 %v16642_v5, %v16642_v5  ;;  %v10107_v0 = vpop.f32.mrb[8].mxu1 }
 0x674   :  { %v6748_v55 = vadd.f32 %v6747_v58, %v6746_v57  ;;  %v6801_v36 = vadd.f32 %v6800_v30, %v6799_v38  ;;  %v16652_v63 = vadd.f32 %v10107_v0, %v16589_v16  ;;  %v6690_v23 = vpop.f32.mrb[9].mxu1  ;;  %v6804_v37 = vsel %vm1185_vm1, %v6782_v4, 0.0 }
 0x675   :  { %v6802_v9 = vsel %vm1185_vm1, %v6781_v62, 0.0  ;;  %v16658_v39 = vadd.f32 %v16589_v16, %v6690_v23 }
 0x676   :  { %v6803_v27 = vadd.f32 %v6802_v9, %v6801_v36  ;;  %v6750_v53 = vadd.f32 %v6749_v59, %v6748_v55  ;;  %v6784_v25 = vmul.f32 %v16652_v63, %v16652_v63  ;;  %v6753_v20 = vsel %vm1185_vm1, %v16652_v63, 0.0 }
 0x677   :  { %v6751_v61 = vsel %vm1185_vm1, %v16658_v39, 0.0  ;;  %v6783_v18 = vmul.f32 %v16658_v39, %v16658_v39  ;;  %v10110_v43 = vpop.f32.mrb[10].mxu1 }
 0x678   :  { %v6752_v26 = vadd.f32 %v6751_v61, %v6750_v53  ;;  %v6805_v21 = vadd.f32 %v6804_v37, %v6803_v27  ;;  %v16668_v45 = vadd.f32 %v10110_v43, %v16589_v16  ;;  %v6702_v31 = vpop.f32.mrb[11].mxu1  ;;  %v6808_v12 = vsel %vm1185_vm1, %v6784_v25, 0.0 }
 0x679   :  { %v6806_v54 = vsel %vm1185_vm1, %v6783_v18, 0.0  ;;  %v16674_v56 = vadd.f32 %v16589_v16, %v6702_v31  ;;  %v16712_v25 = vpack.c.bf16 %v16573_v40, %v16571_v50 }
 0x67a   :  { %v6807_v3 = vadd.f32 %v6806_v54, %v6805_v21  ;;  %v6754_v46 = vadd.f32 %v6753_v20, %v6752_v26  ;;  %v6786_v22 = vmul.f32 %v16668_v45, %v16668_v45  ;;  %v6757_v51 = vsel %vm1185_vm1, %v16668_v45, 0.0 }
 0x67b   :  { %v6755_v34 = vsel %vm1185_vm1, %v16674_v56, 0.0  ;;  %v6785_v1 = vmul.f32 %v16674_v56, %v16674_v56  ;;  %v10113_v42 = vpop.f32.mrb[12].mxu1 }
 0x67c   :  { %v6756_v15 = vadd.f32 %v6755_v34, %v6754_v46  ;;  %v6809_v28 = vadd.f32 %v6808_v12, %v6807_v3  ;;  %v16684_v52 = vadd.f32 %v10113_v42, %v16589_v16  ;;  %v6714_v47 = vpop.f32.mrb[13].mxu1  ;;  %v6812_v41 = vsel %vm1185_vm1, %v6786_v22, 0.0 }
 0x67d   :  { %v6810_v60 = vsel %vm1185_vm1, %v6785_v1, 0.0  ;;  %v16690_v8 = vadd.f32 %v16589_v16, %v6714_v47 }
 0x67e   :  { %v6811_v19 = vadd.f32 %v6810_v60, %v6809_v28  ;;  %v6758_v24 = vadd.f32 %v6757_v51, %v6756_v15  ;;  %v6788_v17 = vmul.f32 %v16684_v52, %v16684_v52  ;;  %v6761_v58 = vsel %vm1185_vm1, %v16684_v52, 0.0 }
 0x67f   :  { %v6759_v10 = vsel %vm1185_vm1, %v16690_v8, 0.0  ;;  %v6787_v32 = vmul.f32 %v16690_v8, %v16690_v8  ;;  %v10116_v7 = vpop.f32.mrb[14].mxu1 }
 0x680   :  { %v6760_v38 = vadd.f32 %v6759_v10, %v6758_v24  ;;  %v6813_v57 = vadd.f32 %v6812_v41, %v6811_v19  ;;  %v16700_v30 = vadd.f32 %v10116_v7, %v16589_v16  ;;  %v6726_v4 = vpop.f32.mrb[15].mxu1  ;;  %v6816_v23 = vsel %vm1185_vm1, %v6788_v17, 0.0 }
 0x681   :  { %v6814_v62 = vsel %vm1185_vm1, %v6787_v32, 0.0  ;;  %v10496_v0 = vadd.f32 %v16589_v16, %v6726_v4 }
 0x682   :  { %v6815_v55 = vadd.f32 %v6814_v62, %v6813_v57  ;;  %v6762_v36 = vadd.f32 %v6761_v58, %v6760_v38  ;;  %v6790_v59 = vmul.f32 %v16700_v30, %v16700_v30  ;;  %v6765_v61 = vsel %vm1185_vm1, %v16700_v30, 0.0  ;;  %v16758_v62 = vld [vmem:[%s17571_s1 + $0x2a] ss:$0 sm:$0xff] }
 0x683   :  { %v6763_v9 = vsel %vm1185_vm1, %v10496_v0, 0.0  ;;  %v6789_v27 = vmul.f32 %v10496_v0, %v10496_v0 }
 0x684   :  { %v6764_v53 = vadd.f32 %v6763_v9, %v6762_v36  ;;  %v6817_v37 = vadd.f32 %v6816_v23, %v6815_v55  ;;  %v6820_v26 = vsel %vm1185_vm1, %v6790_v59, 0.0  ;;  %v16767_v59 = vld [vmem:[%s17571_s1 + $0x2b] ss:$0 sm:$0xff] }
 0x685   :  { %v6818_v16 = vsel %vm1185_vm1, %v6789_v27, 0.0 }
 0x686   :  { %v6766_v18 = vadd.f32 %v6765_v61, %v6764_v53  ;;  %v6819_v43 = vadd.f32 %v6818_v16, %v6817_v37 }
 0x688   :  { %v6767_v21 = vrot.slane %v6766_v18, 4  ;;  %v6821_v31 = vadd.f32 %v6820_v26, %v6819_v43 }
 0x68a   :  { %v6768_v20 = vadd.f32 %v6767_v21, %v6766_v18  ;;  %v6822_v54 = vrot.slane %v6821_v31, 4 }
 0x68c   :  { %v6769_v3 = vrot.slane %v6768_v20, 2  ;;  %v6823_v46 = vadd.f32 %v6822_v54, %v6821_v31 }
 0x68e   :  { %v6770_v12 = vadd.f32 %v6769_v3, %v6768_v20  ;;  %v6824_v22 = vrot.slane %v6823_v46, 2 }
 0x690   :  { %v6771_v34 = vrot.slane %v6770_v12, 1  ;;  %v6825_v1 = vadd.f32 %v6824_v22, %v6823_v46 }
 0x692   :  { %v6772_v42 = vadd.f32 %v6771_v34, %v6770_v12  ;;  %v6826_v15 = vrot.slane %v6825_v1, 1 }
 0x694   :  { %v16718_v28 = vmul.f32 0.0078125, %v6772_v42  ;;  %v6827_v47 = vadd.f32 %v6826_v15, %v6825_v1 }
 0x696   :  { %v6828_v51 = vmul.f32 0.0078125, %v6827_v47  ;;  %v6829_v60 = vmul.f32 %v16718_v28, %v16718_v28  ;;  %v6845_v19 = vsub.f32 %v10496_v0, %v16718_v28  ;;  %v6831_v24 = vsub.f32 %v16595_v35, %v16718_v28 }
 0x697   :  { %v6832_v41 = vsub.f32 %v16592_v14, %v16718_v28  ;;  %v6833_v17 = vsub.f32 %v16611_v6, %v16718_v28  ;;  %v6834_v10 = vsub.f32 %v16607_v33, %v16718_v28  ;;  %v6835_v32 = vsub.f32 %v16626_v44, %v16718_v28 }
 0x698   :  { %v6830_v7 = vsub.f32 %v6828_v51, %v6829_v60  ;;  %v6836_v38 = vsub.f32 %v16620_v48, %v16718_v28  ;;  %v6837_v57 = vsub.f32 %v16642_v5, %v16718_v28  ;;  %v6838_v35 = vsub.f32 %v16636_v11, %v16718_v28 }
 0x699   :  { %v6839_v14 = vsub.f32 %v16658_v39, %v16718_v28  ;;  %v6840_v6 = vsub.f32 %v16652_v63, %v16718_v28  ;;  %v6841_v33 = vsub.f32 %v16674_v56, %v16718_v28  ;;  %v6842_v44 = vsub.f32 %v16668_v45, %v16718_v28 }
 0x69a   :  { %v6847_v4 = vadd.f32 1e-05, %v6830_v7  ;;  %v6843_v48 = vsub.f32 %v16690_v8, %v16718_v28  ;;  %v6844_v5 = vsub.f32 %v16684_v52, %v16718_v28  ;;  %v6846_v11 = vsub.f32 %v16700_v30, %v16718_v28 }
 0x69c   :  { %10851 = vrsqrt.f32 %v6847_v4 }
 0x6a6   :  { %v16753_v58 = vpop.eup %10851 }
 0x6a7   :  { %v6863_v0 = vmul.f32 %v16753_v58, %v6845_v19  ;;  %v6849_v55 = vmul.f32 %v16753_v58, %v6831_v24  ;;  %v6850_v36 = vmul.f32 %v16753_v58, %v6832_v41  ;;  %v6851_v23 = vmul.f32 %v16753_v58, %v6833_v17 }
 0x6a8   :  { %v6852_v9 = vmul.f32 %v16753_v58, %v6834_v10  ;;  %v6853_v27 = vmul.f32 %v16753_v58, %v6835_v32  ;;  %v6854_v53 = vmul.f32 %v16753_v58, %v6836_v38  ;;  %v6855_v37 = vmul.f32 %v16753_v58, %v6837_v57 }
 0x6a9   :  { %v6869_v61 = vmul.f32 %v16758_v62, %v6849_v55  ;;  %v6870_v16 = vmul.f32 %v16758_v62, %v6850_v36  ;;  %v6871_v18 = vmul.f32 %v16758_v62, %v6851_v23  ;;  %v6883_v20 = vmul.f32 %v16758_v62, %v6863_v0 }
 0x6aa   :  { %v6872_v43 = vmul.f32 %v16758_v62, %v6852_v9  ;;  %v6873_v26 = vmul.f32 %v16758_v62, %v6853_v27  ;;  %v6874_v21 = vmul.f32 %v16758_v62, %v6854_v53  ;;  %v6875_v31 = vmul.f32 %v16758_v62, %v6855_v37 }
 0x6ab   :  { %v6889_v54 = vadd.f32 %v16767_v59, %v6869_v61  ;;  %v6890_v3 = vadd.f32 %v16767_v59, %v6870_v16  ;;  %v6891_v46 = vadd.f32 %v16767_v59, %v6871_v18  ;;  %v16797_v51 = vadd.f32 %v16767_v59, %v6883_v20 }
 0x6ac   :  { %v16785_v12 = vadd.f32 %v16767_v59, %v6872_v43  ;;  %v16788_v22 = vadd.f32 %v16767_v59, %v6873_v26  ;;  %v16791_v34 = vadd.f32 %v16767_v59, %v6874_v21  ;;  %v16794_v47 = vadd.f32 %v16767_v59, %v6875_v31 }
 0x6ad   :  { %v6921_v1 = vmul.f32 0.044715, %v6889_v54  ;;  %v6922_v42 = vmul.f32 0.044715, %v6890_v3  ;;  %v6923_v15 = vmul.f32 0.044715, %v6891_v46  ;;  %v6856_v37 = vmul.f32 %v16753_v58, %v6838_v35 }
 0x6ae   :  { %v6924_v19 = vmul.f32 0.044715, %v16785_v12  ;;  %v6925_v24 = vmul.f32 0.044715, %v16788_v22  ;;  %v16801_v41 = vmul.f32 0.5, %v6889_v54  ;;  %v16804_v38 = vmul.f32 0.5, %v6890_v3 }
 0x6af   :  { %v6937_v60 = vmul.f32 %v6921_v1, %v6889_v54  ;;  %v6938_v17 = vmul.f32 %v6922_v42, %v6890_v3  ;;  %v6939_v10 = vmul.f32 %v6923_v15, %v6891_v46  ;;  %v6926_v32 = vmul.f32 0.044715, %v16791_v34 }
 0x6b0   :  { %v6940_v57 = vmul.f32 %v6924_v19, %v16785_v12  ;;  %v6941_v4 = vmul.f32 %v6925_v24, %v16788_v22  ;;  %v6927_v23 = vmul.f32 0.044715, %v16794_v47  ;;  %v6876_v20 = vmul.f32 %v16758_v62, %v6856_v37 }
 0x6b1   :  { %v6953_v7 = vmul.f32 %v6937_v60, %v6889_v54  ;;  %v6954_v0 = vmul.f32 %v6938_v17, %v6890_v3  ;;  %v6955_v55 = vmul.f32 %v6939_v10, %v6891_v46  ;;  %v6942_v36 = vmul.f32 %v6926_v32, %v16791_v34 }
 0x6b2   :  { %v6956_v27 = vmul.f32 %v6940_v57, %v16785_v12  ;;  %v6957_v53 = vmul.f32 %v6941_v4, %v16788_v22  ;;  %v6943_v43 = vmul.f32 %v6927_v23, %v16794_v47  ;;  %v6896_v60 = vadd.f32 %v16767_v59, %v6876_v20 }
 0x6b3   :  { %v6969_v9 = vadd.f32 %v6953_v7, %v6889_v54  ;;  %v6970_v61 = vadd.f32 %v6954_v0, %v6890_v3  ;;  %v6971_v16 = vadd.f32 %v6955_v55, %v6891_v46  ;;  %v6958_v18 = vmul.f32 %v6942_v36, %v16791_v34 }
 0x6b4   :  { %v6972_v21 = vadd.f32 %v6956_v27, %v16785_v12  ;;  %v6973_v31 = vadd.f32 %v6957_v53, %v16788_v22  ;;  %v6959_v15 = vmul.f32 %v6943_v43, %v16794_v47  ;;  %v6857_v17 = vmul.f32 %v16753_v58, %v6839_v14 }
 0x6b5   :  { %v6985_v26 = vmul.f32 0.7978846, %v6969_v9  ;;  %v6986_v54 = vmul.f32 0.7978846, %v6970_v61  ;;  %v6987_v1 = vmul.f32 0.7978846, %v6971_v16  ;;  %v6974_v42 = vadd.f32 %v6958_v18, %v16791_v34 }
 0x6b6   :  { %v6988_v35 = vmul.f32 0.7978846, %v6972_v21  ;;  %v6989_v3 = vmul.f32 0.7978846, %v6973_v31  ;;  %v6975_v24 = vadd.f32 %v6959_v15, %v16794_v47  ;;  %v6907_v10 = vmul.f32 0.5, %v6891_v46 }
 0x6b7   :  { %10853 = vtanh.f32 %v6985_v26  ;;  %v6990_v19 = vmul.f32 0.7978846, %v6974_v42  ;;  %v6928_v32 = vmul.f32 0.044715, %v6896_v60  ;;  %v6858_v7 = vmul.f32 %v16753_v58, %v6840_v6 }
 0x6b8   :  { %10855 = vtanh.f32 %v6986_v54  ;;  %v6991_v57 = vmul.f32 0.7978846, %v6975_v24  ;;  %v6877_v4 = vmul.f32 %v16758_v62, %v6857_v17  ;;  %v6859_v0 = vmul.f32 %v16753_v58, %v6841_v33 }
 0x6b9   :  { %10857 = vtanh.f32 %v6987_v1  ;;  %v6944_v39 = vmul.f32 %v6928_v32, %v6896_v60  ;;  %v6878_v14 = vmul.f32 %v16758_v62, %v6858_v7  ;;  %v6860_v63 = vmul.f32 %v16753_v58, %v6842_v44 }
 0x6ba   :  { %10859 = vtanh.f32 %v6988_v35  ;;  %v16841_v6 = vadd.f32 %v16767_v59, %v6877_v4  ;;  %v6879_v46 = vmul.f32 %v16758_v62, %v6859_v0  ;;  %v6861_v56 = vmul.f32 %v16753_v58, %v6843_v48 }
 0x6bb   :  { %10861 = vtanh.f32 %v6989_v3  ;;  %v6960_v33 = vmul.f32 %v6944_v39, %v6896_v60  ;;  %v16849_v55 = vadd.f32 %v16767_v59, %v6878_v14  ;;  %v6880_v45 = vmul.f32 %v16758_v62, %v6860_v63 }
 0x6bc   :  { %10863 = vtanh.f32 %v6990_v19  ;;  %v6908_v44 = vmul.f32 0.5, %v16785_v12  ;;  %v6929_v36 = vmul.f32 0.044715, %v16841_v6  ;;  %v16855_v23 = vadd.f32 %v16767_v59, %v6879_v46 }
 0x6bd   :  { %10865 = vtanh.f32 %v6991_v57  ;;  %v6881_v9 = vmul.f32 %v16758_v62, %v6861_v56  ;;  %v6909_v8 = vmul.f32 0.5, %v16788_v22  ;;  %v6976_v27 = vadd.f32 %v6960_v33, %v6896_v60 }
 0x6be   :  { %v6930_v48 = vmul.f32 0.044715, %v16849_v55  ;;  %v16861_v53 = vadd.f32 %v16767_v59, %v6880_v45  ;;  %v6910_v37 = vmul.f32 0.5, %v16791_v34  ;;  %v6911_v61 = vmul.f32 0.5, %v16794_v47 }
 0x6bf   :  { %v6945_v12 = vmul.f32 %v6929_v36, %v16841_v6  ;;  %v6931_v16 = vmul.f32 0.044715, %v16855_v23  ;;  %v16867_v43 = vmul.f32 0.5, %v6896_v60  ;;  %v6992_v26 = vmul.f32 0.7978846, %v6976_v27 }
 0x6c0   :  { %v6946_v22 = vmul.f32 %v6930_v48, %v16849_v55  ;;  %v6932_v21 = vmul.f32 0.044715, %v16861_v53  ;;  %v16874_v47 = vadd.f32 %v16767_v59, %v6881_v9 }
 0x6c1   :  { %v10854_v18 = vpop.eup %10853  ;;  %v6961_v54 = vmul.f32 %v6945_v12, %v16841_v6  ;;  %v6947_v34 = vmul.f32 %v6931_v16, %v16855_v23  ;;  %10867 = vtanh.f32 %v6992_v26 }
 0x6c2   :  { %v10856_v31 = vpop.eup %10855  ;;  %v7017_v20 = vadd.f32 1.0, %v10854_v18  ;;  %v6962_v15 = vmul.f32 %v6946_v22, %v16849_v55  ;;  %v6948_v35 = vmul.f32 %v6932_v21, %v16861_v53 }
 0x6c3   :  { %v10858_v1 = vpop.eup %10857  ;;  %v7018_v42 = vadd.f32 1.0, %v10856_v31  ;;  %v6977_v24 = vadd.f32 %v6961_v54, %v16841_v6  ;;  %v16881_v17 = vmul.f32 %v6947_v34, %v16855_v23 }
 0x6c4   :  { %v10860_v3 = vpop.eup %10859  ;;  %v7033_v60 = vmul.f32 %v7017_v20, %v16801_v41  ;;  %v7019_v19 = vadd.f32 1.0, %v10858_v1  ;;  %v6978_v4 = vadd.f32 %v6962_v15, %v16849_v55  ;;  %v16886_v0 = vmul.f32 %v6948_v35, %v16861_v53 }
 0x6c5   :  { %v10862_v32 = vpop.eup %10861  ;;  %v7034_v7 = vmul.f32 %v7018_v42, %v16804_v38  ;;  %v7020_v57 = vadd.f32 1.0, %v10860_v3  ;;  %v6993_v46 = vmul.f32 0.7978846, %v6977_v24 }
 0x6c6   :  { %v10864_v39 = vpop.eup %10863  ;;  %v7054_v14 = vsel %vm1185_vm1, %v7033_v60, 0  ;;  %v7035_v63 = vmul.f32 %v7019_v19, %v6907_v10  ;;  %v7021_v41 = vadd.f32 1.0, %v10862_v32 }
 0x6c7   :  { %v10866_v56 = vpop.eup %10865  ;;  %v16889_v33 = vand.u32 4294901760, %v7054_v14  ;;  %v7057_v45 = vsel %vm1185_vm1, %v7034_v7, 0  ;;  %v7036_v36 = vmul.f32 %v7020_v57, %v6908_v44  ;;  %v7022_v9 = vadd.f32 1.0, %v10864_v39 }
 0x6c8   :  { %v16892_v38 = vand.u32 4294901760, %v7057_v45  ;;  %v7060_v27 = vsel %vm1185_vm1, %v7035_v63, 0  ;;  %v7037_v48 = vmul.f32 %v7021_v41, %v6909_v8  ;;  %v7023_v12 = vadd.f32 1.0, %v10866_v56 }
 0x6c9   :  { %v16896_v16 = vsub.f32 %v7054_v14, %v16889_v33  ;;  %v16898_v18 = vand.u32 4294901760, %v7060_v27  ;;  %v7063_v10 = vsel %vm1185_vm1, %v7036_v36, 0  ;;  %v7038_v26 = vmul.f32 %v7022_v9, %v6910_v37 }
 0x6ca   :  { %v16902_v22 = vsub.f32 %v7057_v45, %v16892_v38  ;;  %v16904_v21 = vand.u32 4294901760, %v7063_v10  ;;  %v7066_v44 = vsel %vm1185_vm1, %v7037_v48, 0  ;;  %v7039_v31 = vmul.f32 %v7023_v12, %v6911_v61 }
 0x6cb   :  { %v7170_v20 = vand.u32 4294901760, %v16896_v16  ;;  %v16909_v8 = vsub.f32 %v7060_v27, %v16898_v18  ;;  %v16911_v54 = vand.u32 4294901760, %v7066_v44  ;;  %v7069_v34 = vsel %vm1185_vm1, %v7038_v26, 0  ;;  %v10868_v35 = vpop.eup %10867 }
 0x6cc   :  { %v7180_v1 = vand.u32 4294901760, %v16902_v22  ;;  %v16916_v37 = vsub.f32 %v7063_v10, %v16904_v21  ;;  %v16918_v42 = vand.u32 4294901760, %v7069_v34  ;;  %v7072_v15 = vsel %vm1185_vm1, %v7039_v31, 0 }
 0x6cd   :  { %v7171_v61 = vsub.f32 %v16896_v16, %v7170_v20  ;;  %v7190_v3 = vand.u32 4294901760, %v16909_v8  ;;  %v16926_v60 = vsub.f32 %v7066_v44, %v16911_v54  ;;  %v16928_v19 = vand.u32 4294901760, %v7072_v15 }
 0x6ce   :  { %v7181_v24 = vsub.f32 %v16902_v22, %v7180_v1  ;;  %v7200_v32 = vand.u32 4294901760, %v16916_v37  ;;  %v16935_v7 = vsub.f32 %v7069_v34, %v16918_v42  ;;  %v7024_v57 = vadd.f32 1.0, %v10868_v35 }
 0x6cf   :  { %v7172_v39 = vand.u32 4294901760, %v7171_v61  ;;  %v7191_v14 = vsub.f32 %v16909_v8, %v7190_v3  ;;  %v7210_v63 = vand.u32 4294901760, %v16926_v60  ;;  %v16942_v41 = vsub.f32 %v7072_v15, %v16928_v19 }
 0x6d0   :  { %v7182_v56 = vand.u32 4294901760, %v7181_v24  ;;  %v7201_v45 = vsub.f32 %v16916_v37, %v7200_v32  ;;  %v7220_v36 = vand.u32 4294901760, %v16935_v7  ;;  %v7040_v9 = vmul.f32 %v7024_v57, %v16867_v43 }
 0x6d1   :  { %10121 = vmatprep.mubr.f32.mxu0 %v7172_v39  ;;  %v7192_v27 = vand.u32 4294901760, %v7191_v14  ;;  %v7211_v48 = vsub.f32 %v16926_v60, %v7210_v63  ;;  %v7230_v12 = vand.u32 4294901760, %v16942_v41  ;;  %10869 = vtanh.f32 %v6993_v46 }
 0x6d2   :  { %v6935_v10 = vmul.f32 0.044715, %v16797_v51  ;;  %10122 = vmatmul.mubr.f32.vlgmr.msra.gmra.mrb[16].mxu0 %v7182_v56  ;;  %v7075_v26 = vsel %vm1185_vm1, %v7040_v9, 0  ;;  %v6994_v44 = vmul.f32 0.7978846, %v6978_v4  ;;  %v7202_v31 = vand.u32 4294901760, %v7201_v45 }
 0x6d3   :  { %10448 = vmatpush3.bf16.msra.mxu0 %v16583_v29  ;;  %10124 = vmatprep.mubr.f32.mxu0 %v7192_v27  ;;  %v7221_v43 = vsub.f32 %v16935_v7, %v7220_v36  ;;  %v16959_v34 = vand.u32 4294901760, %v7075_v26  ;;  %v6979_v15 = vadd.f32 %v16881_v17, %v16855_v23  ;;  %v7212_v46 = vand.u32 4294901760, %v7211_v48 }
 0x6d4   :  { %10871 = vtanh.f32 %v6994_v44  ;;  %v6980_v35 = vadd.f32 %v16886_v0, %v16861_v53  ;;  %v6933_v4 = vmul.f32 0.044715, %v16874_v47  ;;  %10450 = vmatprep.subr.bf16.mxu0 %v16712_v25  ;;  %v7231_v29 = vsub.f32 %v16942_v41, %v7230_v12 }
 0x6d5   :  { %v16971_v61 = vsub.f32 %v7075_v26, %v16959_v34  ;;  %v6995_v24 = vmul.f32 0.7978846, %v6979_v15  ;;  %v6862_v17 = vmul.f32 %v16753_v58, %v6844_v5  ;;  %v6951_v39 = vmul.f32 %v6935_v10, %v16797_v51 }
 0x6d6   :  { %10125 = vmatmul.mubr.f32.gmra.mrb[18].mxu0 %v7202_v31  ;;  %v6996_v57 = vmul.f32 0.7978846, %v6980_v35  ;;  %v6949_v0 = vmul.f32 %v6933_v4, %v16874_v47  ;;  %v6864_v45 = vmul.f32 %v16753_v58, %v6846_v11  ;;  %v7222_v52 = vand.u32 4294901760, %v7221_v43 }
 0x6d7   :  { %10127 = vmatprep.mubr.f32.mxu0 %v7212_v46  ;;  %v7240_v14 = vand.u32 4294901760, %v16971_v61  ;;  %10873 = vtanh.f32 %v6995_v24  ;;  %v6882_v56 = vmul.f32 %v16758_v62, %v6862_v17  ;;  %v6967_v9 = vmul.f32 %v6951_v39, %v16797_v51 }
 0x6d8   :  { %10875 = vtanh.f32 %v6996_v57  ;;  %v6965_v5 = vmul.f32 %v6949_v0, %v16874_v47  ;;  %v7232_v27 = vand.u32 4294901760, %v7231_v29  ;;  %v6884_v26 = vmul.f32 %v16758_v62, %v6864_v45 }
 0x6d9   :  { %v7241_v48 = vsub.f32 %v16971_v61, %v7240_v14  ;;  %v16991_v10 = vadd.f32 %v16767_v59, %v6882_v56  ;;  %v6983_v28 = vadd.f32 %v6967_v9, %v16797_v51  ;;  %v6913_v58 = vmul.f32 0.5, %v16841_v6 }
 0x6da   :  { %10128 = vmatmul.mubr.f32.gmra.mrb[20].mxu0 %v7222_v52  ;;  %v6981_v30 = vadd.f32 %v6965_v5, %v16874_v47  ;;  %v16999_v31 = vadd.f32 %v16767_v59, %v6884_v26  ;;  %v6914_v17 = vmul.f32 0.5, %v16849_v55  ;;  %v6915_v55 = vmul.f32 0.5, %v16855_v23 }
 0x6db   :  { %v10870_v11 = vpop.eup %10869  ;;  %10130 = vmatprep.mubr.f32.mxu0 %v7232_v27  ;;  %v6934_v44 = vmul.f32 0.044715, %v16991_v10  ;;  %v7242_v43 = vand.u32 4294901760, %v7241_v48  ;;  %v6999_v35 = vmul.f32 0.7978846, %v6983_v28  ;;  %v6916_v48 = vmul.f32 0.5, %v16861_v53 }
 0x6dc   :  { %v7025_v15 = vadd.f32 1.0, %v10870_v11  ;;  %v6997_v46 = vmul.f32 0.7978846, %v6981_v30  ;;  %v6936_v4 = vmul.f32 0.044715, %v16999_v31 }
 0x6dd   :  { %v6950_v62 = vmul.f32 %v6934_v44, %v16991_v10 }
 0x6de   :  { %v10872_v29 = vpop.eup %10871  ;;  %10131 = vmatmul.mubr.f32.gmra.mrb[22].mxu0 %v7242_v43  ;;  %v7041_v24 = vmul.f32 %v7025_v15, %v6913_v58  ;;  %10877 = vtanh.f32 %v6997_v46  ;;  %v6952_v59 = vmul.f32 %v6936_v4, %v16999_v31 }
 0x6df   :  { %v7026_v6 = vadd.f32 1.0, %v10872_v29  ;;  %v6966_v57 = vmul.f32 %v6950_v62, %v16991_v10  ;;  %10879 = vtanh.f32 %v6999_v35 }
 0x6e0   :  { %v7078_v0 = vsel %vm1185_vm1, %v7041_v24, 0  ;;  %v6968_v5 = vmul.f32 %v6952_v59, %v16999_v31 }
 0x6e1   :  { %v10874_v39 = vpop.eup %10873  ;;  %v17007_v56 = vand.u32 4294901760, %v7078_v0  ;;  %v7042_v45 = vmul.f32 %v7026_v6, %v6914_v17  ;;  %v6982_v52 = vadd.f32 %v6966_v57, %v16991_v10 }
 0x6e2   :  { %v10876_v9 = vpop.eup %10875  ;;  %v7027_v27 = vadd.f32 1.0, %v10874_v39  ;;  %v6984_v43 = vadd.f32 %v6968_v5, %v16999_v31  ;;  %v6917_v39 = vmul.f32 0.5, %v16874_v47 }
 0x6e3   :  { %v17014_v26 = vsub.f32 %v7078_v0, %v17007_v56  ;;  %v7081_v30 = vsel %vm1185_vm1, %v7042_v45, 0  ;;  %v7028_v28 = vadd.f32 1.0, %v10876_v9  ;;  %v6998_v11 = vmul.f32 0.7978846, %v6982_v52 }
 0x6e4   :  { %v17017_v58 = vand.u32 4294901760, %v7081_v30  ;;  %v7043_v44 = vmul.f32 %v7027_v27, %v6915_v55  ;;  %v7000_v35 = vmul.f32 0.7978846, %v6984_v43  ;;  %v6919_v9 = vmul.f32 0.5, %v16797_v51 }
 0x6e5   :  { %v7250_v15 = vand.u32 4294901760, %v17014_v26  ;;  %v7044_v46 = vmul.f32 %v7028_v28, %v6916_v48  ;;  %10881 = vtanh.f32 %v6998_v11 }
 0x6e6   :  { %v17022_v23 = vsub.f32 %v7081_v30, %v17017_v58  ;;  %v7084_v53 = vsel %vm1185_vm1, %v7043_v44, 0  ;;  %10883 = vtanh.f32 %v7000_v35 }
 0x6e7   :  { %v7251_v62 = vsub.f32 %v17014_v26, %v7250_v15  ;;  %v17028_v4 = vand.u32 4294901760, %v7084_v53  ;;  %v7087_v29 = vsel %vm1185_vm1, %v7044_v46, 0 }
 0x6e8   :  { %v10878_v24 = vpop.eup %10877  ;;  %v7260_v17 = vand.u32 4294901760, %v17022_v23  ;;  %v17032_v6 = vand.u32 4294901760, %v7087_v29 }
 0x6e9   :  { %v10880_v57 = vpop.eup %10879  ;;  %v7252_v59 = vand.u32 4294901760, %v7251_v62  ;;  %v17035_v0 = vsub.f32 %v7084_v53, %v17028_v4  ;;  %v7029_v45 = vadd.f32 1.0, %v10878_v24 }
 0x6ea   :  { %v7261_v52 = vsub.f32 %v17022_v23, %v7260_v17  ;;  %v17042_v5 = vsub.f32 %v7087_v29, %v17032_v6  ;;  %v7031_v55 = vadd.f32 1.0, %v10880_v57  ;;  %v6918_v57 = vmul.f32 0.5, %v16991_v10 }
 0x6eb   :  { %10133 = vmatprep.mubr.f32.mxu0 %v7252_v59  ;;  %v7270_v27 = vand.u32 4294901760, %v17035_v0  ;;  %v7045_v48 = vmul.f32 %v7029_v45, %v6917_v39 }
 0x6ec   :  { %v7262_v30 = vand.u32 4294901760, %v7261_v52  ;;  %v7280_v28 = vand.u32 4294901760, %v17042_v5  ;;  %v7047_v11 = vmul.f32 %v7031_v55, %v6919_v9  ;;  %v6920_v55 = vmul.f32 0.5, %v16999_v31 }
 0x6ed   :  { %v7271_v47 = vsub.f32 %v17035_v0, %v7270_v27  ;;  %v7090_v44 = vsel %vm1185_vm1, %v7045_v48, 0 }
 0x6ee   :  { %10134 = vmatmul.mubr.f32.gmra.mrb[24].mxu0 %v7262_v30  ;;  %v7281_v51 = vsub.f32 %v17042_v5, %v7280_v28  ;;  %v17054_v43 = vand.u32 4294901760, %v7090_v44  ;;  %v7096_v46 = vsel %vm1185_vm1, %v7047_v11, 0 }
 0x6ef   :  { %v10882_v53 = vpop.eup %10881  ;;  %v7272_v35 = vand.u32 4294901760, %v7271_v47  ;;  %v17057_v62 = vand.u32 4294901760, %v7096_v46 }
 0x6f0   :  { %v7282_v29 = vand.u32 4294901760, %v7281_v51  ;;  %v17060_v24 = vsub.f32 %v7090_v44, %v17054_v43  ;;  %v7030_v59 = vadd.f32 1.0, %v10882_v53  ;;  %v10884_v39 = vpop.eup %10883 }
 0x6f1   :  { %10136 = vmatprep.mubr.f32.mxu0 %v7272_v35  ;;  %v17065_v9 = vsub.f32 %v7096_v46, %v17057_v62  ;;  %v7032_v48 = vadd.f32 1.0, %v10884_v39 }
 0x6f2   :  { %10137 = vmatmul.mubr.f32.gmra.mrb[26].mxu0 %v7282_v29  ;;  %v7290_v45 = vand.u32 4294901760, %v17060_v24  ;;  %v7046_v52 = vmul.f32 %v7030_v59, %v6918_v57 }
 0x6f3   :  { %v7048_v47 = vmul.f32 %v7032_v48, %v6920_v55  ;;  %v7310_v51 = vand.u32 4294901760, %v17065_v9 }
 0x6f4   :  { %v7291_v30 = vsub.f32 %v17060_v24, %v7290_v45  ;;  %v7093_v11 = vsel %vm1185_vm1, %v7046_v52, 0 }
 0x6f5   :  { %v17072_v10 = vand.u32 4294901760, %v7093_v11  ;;  %v7099_v46 = vsel %vm1185_vm1, %v7048_v47, 0  ;;  %v7311_v29 = vsub.f32 %v17065_v9, %v7310_v51  ;;  %v10457_v47 = vpack.c.bf16 %v7338_v13, %v7331_v2  ;;  %v17225_v13 = vld [vmem:[%s17571_s1 + $0x2c] ss:$0 sm:$0xff] }
 0x6f6   :  { %v7292_v44 = vand.u32 4294901760, %v7291_v30  ;;  %v17079_v31 = vand.u32 4294901760, %v7099_v46 }
 0x6f7   :  { %v17076_v53 = vsub.f32 %v7093_v11, %v17072_v10  ;;  %v7312_v55 = vand.u32 4294901760, %v7311_v29  ;;  %v10899_v29 = vld [vmem:[#allocation2 + $0x38] sm:$0xff] }
 0x6f8   :  { %10139 = vmatprep.mubr.f32.mxu0 %v7292_v44  ;;  %v17086_v57 = vsub.f32 %v7099_v46, %v17079_v31 }
 0x6f9   :  { %v7300_v35 = vand.u32 4294901760, %v17076_v53 }
 0x6fa   :  { %v7320_v39 = vand.u32 4294901760, %v17086_v57 }
 0x6fb   :  { %v7301_v59 = vsub.f32 %v17076_v53, %v7300_v35 }
 0x6fc   :  { %v7321_v48 = vsub.f32 %v17086_v57, %v7320_v39 }
 0x6fd   :  { %v7302_v52 = vand.u32 4294901760, %v7301_v59 }
 0x6fe   :  { %v7322_v30 = vand.u32 4294901760, %v7321_v48  ;;  %v10900_v48 = vld [vmem:[#allocation2 + $0x30] sm:$0xff] }
 0x6ff   :  { %10140 = vmatmul.mubr.f32.gmra.mrb[28].mxu0 %v7302_v52 }
 0x700   :  { %10142 = vmatprep.mubr.f32.mxu0 %v7312_v55 }
 0x703   :  { %10143 = vmatmul.mubr.f32.gmra.mrb[30].mxu0 %v7322_v30 }
 0x704   :  { %10149 = vmatprep.mubr.f32.mxu0 %v16889_v33 }
 0x707   :  { %10150 = vmatmul.mubr.f32.vlgmr.msra.gmra.mrb[16].mxu0 %v16892_v38 }
 0x708   :  { %10452 = vmatpush3.bf16.msra.mxu0 %v16712_v25  ;;  %10152 = vmatprep.mubr.f32.mxu0 %v16898_v18  ;;  %v17116_v25 = vld [vmem:[%s17571_s1 + $0x20] sm:$0xff] }
 0x709   :  { %10454 = vmatprep.subr.bf16.mxu0 %v16567_v49  ;;  %v17120_v11 = vand.u32 4294901760, %v17116_v25 }
 0x70b   :  { %10153 = vmatmul.mubr.f32.gmra.mrb[18].mxu0 %v16904_v21  ;;  %10285 = vmatprep.subr.mxu1 %v17120_v11 }
 0x70c   :  { %10155 = vmatprep.mubr.f32.mxu0 %v16911_v54  ;;  %10286 = vmatpush3.msra.mxu1 %v17120_v11 }
 0x70f   :  { %10156 = vmatmul.mubr.f32.gmra.mrb[20].mxu0 %v16918_v42 }
 0x710   :  { %10158 = vmatprep.mubr.f32.mxu0 %v16928_v19 }
 0x713   :  { %10159 = vmatmul.mubr.f32.gmra.mrb[22].mxu0 %v16959_v34 }
 0x714   :  { %10161 = vmatprep.mubr.f32.mxu0 %v17007_v56 }
 0x717   :  { %10162 = vmatmul.mubr.f32.gmra.mrb[24].mxu0 %v17017_v58 }
 0x718   :  { %10164 = vmatprep.mubr.f32.mxu0 %v17028_v4 }
 0x71b   :  { %10165 = vmatmul.mubr.f32.gmra.mrb[26].mxu0 %v17032_v6 }
 0x71c   :  { %10167 = vmatprep.mubr.f32.mxu0 %v17054_v43 }
 0x71f   :  { %10168 = vmatmul.mubr.f32.gmra.mrb[28].mxu0 %v17072_v10 }
 0x720   :  { %10170 = vmatprep.mubr.f32.mxu0 %v17057_v62 }
 0x723   :  { %10171 = vmatmul.mubr.f32.gmra.mrb[30].mxu0 %v17079_v31 }
 0x724   :  { %10177 = vmatprep.mubr.f32.mxu0 %v16896_v16 }
 0x727   :  { %10178 = vmatmul.mubr.f32.vlgmr.msra.gmra.mrb[16].mxu0 %v16902_v22  ;;  %v10893_v22 = vld [vmem:[#allocation2 + $0x8] sm:$0xff] }
 0x728   :  { %10456 = vmatpush3.bf16.msra.mxu0 %v16567_v49  ;;  %10180 = vmatprep.mubr.f32.mxu0 %v16909_v8 }
 0x729   :  { %10458 = vmatprep.subr.bf16.mxu0 %v10457_v47 }
 0x72b   :  { %10181 = vmatmul.mubr.f32.gmra.mrb[18].mxu0 %v16916_v37 }
 0x72c   :  { %10183 = vmatprep.mubr.f32.mxu0 %v16926_v60 }
 0x72f   :  { %10184 = vmatmul.mubr.f32.gmra.mrb[20].mxu0 %v16935_v7  ;;  %v10895_v7 = vld [vmem:[#allocation2 + $0x18] sm:$0xff] }
 0x730   :  { %10186 = vmatprep.mubr.f32.mxu0 %v16942_v41 }
 0x733   :  { %10187 = vmatmul.mubr.f32.gmra.mrb[22].mxu0 %v16971_v61 }
 0x734   :  { %10189 = vmatprep.mubr.f32.mxu0 %v17014_v26 }
 0x737   :  { %10190 = vmatmul.mubr.f32.gmra.mrb[24].mxu0 %v17022_v23 }
 0x738   :  { %10192 = vmatprep.mubr.f32.mxu0 %v17035_v0 }
 0x73b   :  { %10193 = vmatmul.mubr.f32.gmra.mrb[26].mxu0 %v17042_v5 }
 0x73c   :  { %10195 = vmatprep.mubr.f32.mxu0 %v17060_v24 }
 0x73f   :  { %10196 = vmatmul.mubr.f32.gmra.mrb[28].mxu0 %v17076_v53 }
 0x740   :  { %10198 = vmatprep.mubr.f32.mxu0 %v17065_v9 }
 0x743   :  { %10199 = vmatmul.mubr.f32.gmra.mrb[30].mxu0 %v17086_v57 }
 0x744   :  { %10205 = vmatprep.mubr.f32.mxu0 %v7170_v20  ;;  %v10894_v20 = vld [vmem:[#allocation2] sm:$0xff] }
 0x747   :  { %10206 = vmatmul.mubr.f32.vlgmr.msra.gmra.mrb[16].mxu0 %v7180_v1 }
 0x748   :  { %10460 = vmatpush3.bf16.msra.mxu0 %v10457_v47  ;;  %10208 = vmatprep.mubr.f32.mxu0 %v7190_v3 }
 0x749   :  { %10462 = vmatprep.subr.bf16.mxu0 %v16567_v49 }
 0x74b   :  { %10209 = vmatmul.mubr.f32.gmra.mrb[18].mxu0 %v7200_v32 }
 0x74c   :  { %10211 = vmatprep.mubr.f32.mxu0 %v7210_v63 }
 0x74f   :  { %10212 = vmatmul.mubr.f32.gmra.mrb[20].mxu0 %v7220_v36  ;;  %v10896_v36 = vld [vmem:[#allocation2 + $0x10] sm:$0xff] }
 0x750   :  { %10214 = vmatprep.mubr.f32.mxu0 %v7230_v12 }
 0x753   :  { %10215 = vmatmul.mubr.f32.gmra.mrb[22].mxu0 %v7240_v14 }
 0x754   :  { %10217 = vmatprep.mubr.f32.mxu0 %v7250_v15 }
 0x757   :  { %10218 = vmatmul.mubr.f32.gmra.mrb[24].mxu0 %v7260_v17 }
 0x758   :  { %10220 = vmatprep.mubr.f32.mxu0 %v7270_v27 }
 0x75b   :  { %10221 = vmatmul.mubr.f32.gmra.mrb[26].mxu0 %v7280_v28 }
 0x75c   :  { %10223 = vmatprep.mubr.f32.mxu0 %v7290_v45 }
 0x75f   :  { %10224 = vmatmul.mubr.f32.gmra.mrb[28].mxu0 %v7300_v35 }
 0x760   :  { %10226 = vmatprep.mubr.f32.mxu0 %v7310_v51 }
 0x763   :  { %10227 = vmatmul.mubr.f32.gmra.mrb[30].mxu0 %v7320_v39 }
 0x764   :  { %10233 = vmatprep.mubr.f32.mxu0 %v16889_v33 }
 0x767   :  { %10234 = vmatmul.mubr.f32.vlgmr.msra.gmra.mrb[16].mxu0 %v16892_v38 }
 0x768   :  { %10464 = vmatpush3.bf16.msra.mxu0 %v16567_v49  ;;  %10236 = vmatprep.mubr.f32.mxu0 %v16898_v18  ;;  %v17212_v49 = vsub.f32 %v17116_v25, %v17120_v11 }
 0x76a   :  { %v17215_v50 = vand.u32 4294901760, %v17212_v49 }
 0x76b   :  { %10237 = vmatmul.mubr.f32.gmra.mrb[18].mxu0 %v16904_v21 }
 0x76c   :  { %10239 = vmatprep.mubr.f32.mxu0 %v16911_v54  ;;  %v8503_v40 = vsub.f32 %v17212_v49, %v17215_v50 }
 0x76e   :  { %v17219_v2 = vand.u32 4294901760, %v8503_v40 }
 0x76f   :  { %10240 = vmatmul.mubr.f32.gmra.mrb[20].mxu0 %v16918_v42 }
 0x770   :  { %10242 = vmatprep.mubr.f32.mxu0 %v16928_v19  ;;  %10311 = vmatprep.subr.mxu1 %v17219_v2 }
 0x773   :  { %10243 = vmatmul.mubr.f32.gmra.mrb[22].mxu0 %v16959_v34 }
 0x774   :  { %10245 = vmatprep.mubr.f32.mxu0 %v17007_v56 }
 0x777   :  { %10246 = vmatmul.mubr.f32.gmra.mrb[24].mxu0 %v17017_v58 }
 0x778   :  { %10248 = vmatprep.mubr.f32.mxu0 %v17028_v4 }
 0x77b   :  { %10249 = vmatmul.mubr.f32.gmra.mrb[26].mxu0 %v17032_v6 }
 0x77c   :  { %10251 = vmatprep.mubr.f32.mxu0 %v17054_v43 }
 0x77f   :  { %10252 = vmatmul.mubr.f32.gmra.mrb[28].mxu0 %v17072_v10 }
 0x780   :  { %10254 = vmatprep.mubr.f32.mxu0 %v17057_v62 }
 0x783   :  { %10255 = vmatmul.mubr.f32.gmra.mrb[30].mxu0 %v17079_v31 }
 0x784   :  { %10261 = vmatprep.mubr.f32.mxu0 %v16889_v33 }
 0x787   :  { %10262 = vmatmul.mubr.f32.vlgmr.msra.gmra.mrb[16].mxu0 %v16892_v38 }
 0x788   :  { %10264 = vmatprep.mubr.f32.mxu0 %v16898_v18 }
 0x78b   :  { %10265 = vmatmul.mubr.f32.gmra.mrb[18].mxu0 %v16904_v21 }
 0x78c   :  { %10267 = vmatprep.mubr.f32.mxu0 %v16911_v54 }
 0x78f   :  { %10268 = vmatmul.mubr.f32.gmra.mrb[20].mxu0 %v16918_v42 }
 0x790   :  { %10270 = vmatprep.mubr.f32.mxu0 %v16928_v19 }
 0x793   :  { %10271 = vmatmul.mubr.f32.gmra.mrb[22].mxu0 %v16959_v34 }
 0x794   :  { %10273 = vmatprep.mubr.f32.mxu0 %v17007_v56 }
 0x797   :  { %10274 = vmatmul.mubr.f32.gmra.mrb[24].mxu0 %v17017_v58 }
 0x798   :  { %10276 = vmatprep.mubr.f32.mxu0 %v17028_v4 }
 0x79b   :  { %10277 = vmatmul.mubr.f32.gmra.mrb[26].mxu0 %v17032_v6  ;;  %v10897_v6 = vld [vmem:[#allocation2 + $0x28] sm:$0xff] }
 0x79c   :  { %10279 = vmatprep.mubr.f32.mxu0 %v17054_v43  ;;  %v10898_v43 = vld [vmem:[#allocation2 + $0x20] sm:$0xff] }
 0x79f   :  { %10280 = vmatmul.mubr.f32.gmra.mrb[28].mxu0 %v17072_v10 }
 0x7a0   :  { %10282 = vmatprep.mubr.f32.mxu0 %v17057_v62 }
 0x7a3   :  { %10283 = vmatmul.mubr.f32.gmra.mrb[30].mxu0 %v17079_v31 }
 0x85a   :  { %v10263_v33 = vpop.f32.mrb[16].mxu0 }
 0x85b   :  { %v10497_v38 = vadd.f32 %v10263_v33, %v17225_v13  ;;  %v8111_v16 = vpop.f32.mrb[17].mxu0 }
 0x85c   :  { %v10498_v18 = vadd.f32 %v17225_v13, %v8111_v16 }
 0x85d   :  { %v8206_v21 = vmul.f32 %v10893_v22, %v10497_v38 }
 0x85e   :  { %v8205_v8 = vmul.f32 %v10894_v20, %v10498_v18  ;;  %v10266_v54 = vpop.f32.mrb[18].mxu0 }
 0x85f   :  { %v8229_v1 = vsel %vm45_vm0, %v8206_v21, 0  ;;  %v10499_v37 = vadd.f32 %v10266_v54, %v17225_v13  ;;  %v8123_v42 = vpop.f32.mrb[19].mxu0 }
 0x860   :  { %v17231_v3 = vand.u32 4294901760, %v8229_v1  ;;  %v8226_v60 = vsel %vm45_vm0, %v8205_v8, 0  ;;  %v10500_v19 = vadd.f32 %v17225_v13, %v8123_v42 }
 0x861   :  { %v17235_v32 = vand.u32 4294901760, %v8226_v60  ;;  %v8208_v63 = vmul.f32 %v10895_v7, %v10499_v37  ;;  %v10902_v7 = vld [vmem:[#allocation2 + $0x40] sm:$0xff] }
 0x862   :  { %v17238_v41 = vsub.f32 %v8229_v1, %v17231_v3  ;;  %v8207_v12 = vmul.f32 %v10896_v36, %v10500_v19  ;;  %v10269_v34 = vpop.f32.mrb[20].mxu0  ;;  %v10901_v1 = vld [vmem:[#allocation2 + $0x48] sm:$0xff] }
 0x863   :  { %v17241_v61 = vsub.f32 %v8226_v60, %v17235_v32  ;;  %v8235_v14 = vsel %vm45_vm0, %v8208_v63, 0  ;;  %v10501_v56 = vadd.f32 %v10269_v34, %v17225_v13  ;;  %v8135_v26 = vpop.f32.mrb[21].mxu0 }
 0x864   :  { %v8351_v58 = vand.u32 4294901760, %v17238_v41  ;;  %v17246_v15 = vand.u32 4294901760, %v8235_v14  ;;  %v8232_v23 = vsel %vm45_vm0, %v8207_v12, 0  ;;  %v10502_v4 = vadd.f32 %v17225_v13, %v8135_v26 }
 0x865   :  { %v17250_v17 = vand.u32 4294901760, %v8232_v23  ;;  %v8210_v0 = vmul.f32 %v10897_v6, %v10501_v56  ;;  %v8341_v5 = vand.u32 4294901760, %v17241_v61 }
 0x866   :  { %v8352_v27 = vsub.f32 %v17238_v41, %v8351_v58  ;;  %v17257_v28 = vsub.f32 %v8235_v14, %v17246_v15  ;;  %v8209_v62 = vmul.f32 %v10898_v43, %v10502_v4  ;;  %v10272_v24 = vpop.f32.mrb[22].mxu0 }
 0x867   :  { %v17260_v45 = vsub.f32 %v8232_v23, %v17250_v17  ;;  %v8241_v9 = vsel %vm45_vm0, %v8210_v0, 0  ;;  %v10503_v10 = vadd.f32 %v10272_v24, %v17225_v13  ;;  %v8147_v44 = vpop.f32.mrb[23].mxu0  ;;  %v8342_v51 = vsub.f32 %v17241_v61, %v8341_v5 }
 0x868   :  { %v17267_v53 = vand.u32 4294901760, %v8241_v9  ;;  %v8238_v46 = vsel %vm45_vm0, %v8209_v62, 0  ;;  %v10504_v31 = vadd.f32 %v17225_v13, %v8147_v44  ;;  %v8353_v52 = vand.u32 4294901760, %v8352_v27  ;;  %v10903_v62 = vld [vmem:[#allocation2 + $0x58] sm:$0xff] }
 0x869   :  { %v17271_v35 = vand.u32 4294901760, %v8238_v46  ;;  %v8212_v57 = vmul.f32 %v10899_v29, %v10503_v10  ;;  %v8343_v59 = vand.u32 4294901760, %v8342_v51  ;;  %v8361_v39 = vand.u32 4294901760, %v17260_v45  ;;  %v10904_v51 = vld [vmem:[#allocation2 + $0x50] sm:$0xff] }
 0x86a   :  { %v17275_v55 = vsub.f32 %v8241_v9, %v17267_v53  ;;  %v8211_v30 = vmul.f32 %v10900_v48, %v10504_v31  ;;  %v10275_v25 = vpop.f32.mrb[24].mxu0  ;;  %v8371_v47 = vand.u32 4294901760, %v17257_v28 }
 0x86b   :  { %v17279_v40 = vsub.f32 %v8238_v46, %v17271_v35  ;;  %v8247_v33 = vsel %vm45_vm0, %v8212_v57, 0  ;;  %v10505_v38 = vadd.f32 %v10275_v25, %v17225_v13  ;;  %v8159_v16 = vpop.f32.mrb[25].mxu0  ;;  %10287 = vmatprep.mubr.f32.mxu1 %v8343_v59  ;;  %v8362_v18 = vsub.f32 %v17260_v45, %v8361_v39 }
 0x86c   :  { %v17286_v22 = vand.u32 4294901760, %v8247_v33  ;;  %v8244_v21 = vsel %vm45_vm0, %v8211_v30, 0  ;;  %v10506_v20 = vadd.f32 %v17225_v13, %v8159_v16  ;;  %10288 = vmatmul.mubr.f32.vlgmr.msra.gmra.mrb[16].mxu1 %v8353_v52  ;;  %v8372_v8 = vsub.f32 %v17257_v28, %v8371_v47 }
 0x86d   :  { %v17293_v54 = vand.u32 4294901760, %v8244_v21  ;;  %v8214_v37 = vmul.f32 %v10901_v1, %v10505_v38  ;;  %10312 = vmatpush3.msra.mxu1 %v17219_v2  ;;  %v8363_v42 = vand.u32 4294901760, %v8362_v18  ;;  %v8381_v60 = vand.u32 4294901760, %v17279_v40 }
 0x86e   :  { %v17298_v19 = vsub.f32 %v8247_v33, %v17286_v22  ;;  %v8213_v63 = vmul.f32 %v10902_v7, %v10506_v20  ;;  %v10278_v36 = vpop.f32.mrb[26].mxu0  ;;  %v8373_v12 = vand.u32 4294901760, %v8372_v8  ;;  %v8391_v34 = vand.u32 4294901760, %v17275_v55  ;;  %10337 = vmatprep.subr.mxu1 %v17212_v49  ;;  %v10905_v20 = vld [vmem:[#allocation2 + $0x68] sm:$0xff]  ;;  %v10906_v7 = vld [vmem:[#allocation2 + $0x60] sm:$0xff] }
 0x86f   :  { %v17303_v14 = vsub.f32 %v8244_v21, %v17293_v54  ;;  %v8253_v56 = vsel %vm45_vm0, %v8214_v37, 0  ;;  %v10507_v2 = vadd.f32 %v10278_v36, %v17225_v13  ;;  %v8171_v26 = vpop.f32.mrb[27].mxu0  ;;  %10290 = vmatprep.mubr.f32.mxu1 %v8363_v42  ;;  %v8382_v23 = vsub.f32 %v17279_v40, %v8381_v60 }
 0x870   :  { %v17310_v4 = vand.u32 4294901760, %v8253_v56  ;;  %v8250_v6 = vsel %vm45_vm0, %v8213_v63, 0  ;;  %v10508_v0 = vadd.f32 %v17225_v13, %v8171_v26  ;;  %10291 = vmatmul.mubr.f32.gmra.mrb[18].mxu1 %v8373_v12  ;;  %v8392_v27 = vsub.f32 %v17275_v55, %v8391_v34 }
 0x871   :  { %v17317_v43 = vand.u32 4294901760, %v8250_v6  ;;  %v8216_v24 = vmul.f32 %v10903_v62, %v10507_v2  ;;  %v8383_v9 = vand.u32 4294901760, %v8382_v23  ;;  %v8401_v10 = vand.u32 4294901760, %v17303_v14 }
 0x872   :  { %v17321_v44 = vsub.f32 %v8253_v56, %v17310_v4  ;;  %v8215_v46 = vmul.f32 %v10904_v51, %v10508_v0  ;;  %v10281_v31 = vpop.f32.mrb[28].mxu0  ;;  %v8393_v29 = vand.u32 4294901760, %v8392_v27  ;;  %v8411_v57 = vand.u32 4294901760, %v17298_v19 }
 0x873   :  { %v17325_v59 = vsub.f32 %v8250_v6, %v17317_v43  ;;  %v8259_v52 = vsel %vm45_vm0, %v8216_v24, 0  ;;  %v10509_v48 = vadd.f32 %v10281_v31, %v17225_v13  ;;  %v8183_v30 = vpop.f32.mrb[29].mxu0  ;;  %10293 = vmatprep.mubr.f32.mxu1 %v8383_v9  ;;  %v8402_v25 = vsub.f32 %v17303_v14, %v8401_v10 }
 0x874   :  { %v17332_v33 = vand.u32 4294901760, %v8259_v52  ;;  %v8256_v38 = vsel %vm45_vm0, %v8215_v46, 0  ;;  %v10510_v16 = vadd.f32 %v17225_v13, %v8183_v30  ;;  %10294 = vmatmul.mubr.f32.gmra.mrb[20].mxu1 %v8393_v29  ;;  %v8412_v18 = vsub.f32 %v17298_v19, %v8411_v57  ;;  %v10907_v46 = vld [vmem:[#allocation2 + $0x78] sm:$0xff]  ;;  %v10908_v30 = vld [vmem:[#allocation2 + $0x70] sm:$0xff] }
 0x875   :  { %v17339_v21 = vand.u32 4294901760, %v8256_v38  ;;  %v8218_v8 = vmul.f32 %v10905_v20, %v10509_v48  ;;  %v8403_v1 = vand.u32 4294901760, %v8402_v25  ;;  %v8421_v37 = vand.u32 4294901760, %v17325_v59 }
 0x876   :  { %v17343_v42 = vsub.f32 %v8259_v52, %v17332_v33  ;;  %v8217_v63 = vmul.f32 %v10906_v7, %v10510_v16  ;;  %v10284_v36 = vpop.f32.mrb[30].mxu0  ;;  %v8413_v12 = vand.u32 4294901760, %v8412_v18  ;;  %v8431_v56 = vand.u32 4294901760, %v17321_v44 }
 0x877   :  { %v17347_v2 = vsub.f32 %v8256_v38, %v17339_v21  ;;  %v8265_v26 = vsel %vm45_vm0, %v8218_v8, 0  ;;  %v10511_v23 = vadd.f32 %v10284_v36, %v17225_v13  ;;  %v8195_v6 = vpop.f32.mrb[31].mxu0  ;;  %10296 = vmatprep.mubr.f32.mxu1 %v8403_v1  ;;  %v8422_v0 = vsub.f32 %v17325_v59, %v8421_v37 }
 0x878   :  { %v17354_v27 = vand.u32 4294901760, %v8265_v26  ;;  %v8262_v62 = vsel %vm45_vm0, %v8217_v63, 0  ;;  %v10512_v24 = vadd.f32 %v17225_v13, %v8195_v6  ;;  %10297 = vmatmul.mubr.f32.gmra.mrb[22].mxu1 %v8413_v12  ;;  %v8432_v9 = vsub.f32 %v17321_v44, %v8431_v56 }
 0x879   :  { %v17361_v51 = vand.u32 4294901760, %v8262_v62  ;;  %v8220_v31 = vmul.f32 %v10907_v46, %v10511_v23  ;;  %v8423_v29 = vand.u32 4294901760, %v8422_v0  ;;  %v8441_v52 = vand.u32 4294901760, %v17347_v2 }
 0x87a   :  { %v17365_v48 = vsub.f32 %v8265_v26, %v17354_v27  ;;  %v8219_v25 = vmul.f32 %v10908_v30, %v10512_v24  ;;  %v8433_v38 = vand.u32 4294901760, %v8432_v9  ;;  %v8451_v13 = vand.u32 4294901760, %v17343_v42 }
 0x87b   :  { %v17369_v16 = vsub.f32 %v8262_v62, %v17361_v51  ;;  %v8271_v18 = vsel %vm45_vm0, %v8220_v31, 0  ;;  %10299 = vmatprep.mubr.f32.mxu1 %v8423_v29  ;;  %v8442_v20 = vsub.f32 %v17347_v2, %v8441_v52 }
 0x87c   :  { %v17375_v8 = vand.u32 4294901760, %v8271_v18  ;;  %v8268_v1 = vsel %vm45_vm0, %v8219_v25, 0  ;;  %10300 = vmatmul.mubr.f32.gmra.mrb[24].mxu1 %v8433_v38  ;;  %v8452_v7 = vsub.f32 %v17343_v42, %v8451_v13  ;;  %v8471_v63 = vand.u32 4294901760, %v17365_v48 }
 0x87d   :  { %v17382_v36 = vand.u32 4294901760, %v8268_v1  ;;  %v8443_v12 = vand.u32 4294901760, %v8442_v20  ;;  %v8461_v26 = vand.u32 4294901760, %v17369_v16 }
 0x87e   :  { %v17386_v23 = vsub.f32 %v8271_v18, %v17375_v8  ;;  %v8453_v6 = vand.u32 4294901760, %v8452_v7  ;;  %v8472_v0 = vsub.f32 %v17365_v48, %v8471_v63 }
 0x87f   :  { %v17392_v62 = vsub.f32 %v8268_v1, %v17382_v36  ;;  %10302 = vmatprep.mubr.f32.mxu1 %v8443_v12  ;;  %v8462_v24 = vsub.f32 %v17369_v16, %v8461_v26 }
 0x880   :  { %10303 = vmatmul.mubr.f32.gmra.mrb[26].mxu1 %v8453_v6  ;;  %v8491_v9 = vand.u32 4294901760, %v17386_v23  ;;  %v8473_v29 = vand.u32 4294901760, %v8472_v0 }
 0x881   :  { %v8463_v46 = vand.u32 4294901760, %v8462_v24  ;;  %v8481_v31 = vand.u32 4294901760, %v17392_v62 }
 0x882   :  { %v8492_v30 = vsub.f32 %v17386_v23, %v8491_v9 }
 0x883   :  { %10305 = vmatprep.mubr.f32.mxu1 %v8463_v46  ;;  %v8482_v25 = vsub.f32 %v17392_v62, %v8481_v31 }
 0x884   :  { %10306 = vmatmul.mubr.f32.gmra.mrb[28].mxu1 %v8473_v29  ;;  %v8493_v18 = vand.u32 4294901760, %v8492_v30 }
 0x885   :  { %v8483_v38 = vand.u32 4294901760, %v8482_v25 }
 0x887   :  { %10308 = vmatprep.mubr.f32.mxu1 %v8483_v38 }
 0x888   :  { %10309 = vmatmul.mubr.f32.gmra.mrb[30].mxu1 %v8493_v18 }
 0x889   :  { %10313 = vmatprep.mubr.f32.mxu1 %v17235_v32 }
 0x88c   :  { %10314 = vmatmul.mubr.f32.vlgmr.msra.gmra.mrb[16].mxu1 %v17231_v3 }
 0x88d   :  { %10338 = vmatpush3.msra.mxu1 %v17212_v49  ;;  %10316 = vmatprep.mubr.f32.mxu1 %v17250_v17 }
 0x88e   :  { %10363 = vmatprep.subr.mxu1 %v17120_v11 }
 0x890   :  { %10317 = vmatmul.mubr.f32.gmra.mrb[18].mxu1 %v17246_v15 }
 0x891   :  { %10319 = vmatprep.mubr.f32.mxu1 %v17271_v35 }
 0x894   :  { %10320 = vmatmul.mubr.f32.gmra.mrb[20].mxu1 %v17267_v53 }
 0x895   :  { %10322 = vmatprep.mubr.f32.mxu1 %v17293_v54 }
 0x898   :  { %10323 = vmatmul.mubr.f32.gmra.mrb[22].mxu1 %v17286_v22 }
 0x899   :  { %10325 = vmatprep.mubr.f32.mxu1 %v17317_v43 }
 0x89c   :  { %10326 = vmatmul.mubr.f32.gmra.mrb[24].mxu1 %v17310_v4 }
 0x89d   :  { %10328 = vmatprep.mubr.f32.mxu1 %v17339_v21 }
 0x8a0   :  { %10329 = vmatmul.mubr.f32.gmra.mrb[26].mxu1 %v17332_v33 }
 0x8a1   :  { %10331 = vmatprep.mubr.f32.mxu1 %v17361_v51 }
 0x8a4   :  { %10332 = vmatmul.mubr.f32.gmra.mrb[28].mxu1 %v17354_v27 }
 0x8a5   :  { %10334 = vmatprep.mubr.f32.mxu1 %v17382_v36 }
 0x8a8   :  { %10335 = vmatmul.mubr.f32.gmra.mrb[30].mxu1 %v17375_v8 }
 0x8a9   :  { %10339 = vmatprep.mubr.f32.mxu1 %v17241_v61 }
 0x8ac   :  { %10340 = vmatmul.mubr.f32.vlgmr.msra.gmra.mrb[16].mxu1 %v17238_v41 }
 0x8ad   :  { %10364 = vmatpush3.msra.mxu1 %v17120_v11  ;;  %10342 = vmatprep.mubr.f32.mxu1 %v17260_v45 }
 0x8ae   :  { %10389 = vmatprep.subr.mxu1 %v17215_v50 }
 0x8b0   :  { %10343 = vmatmul.mubr.f32.gmra.mrb[18].mxu1 %v17257_v28 }
 0x8b1   :  { %10345 = vmatprep.mubr.f32.mxu1 %v17279_v40 }
 0x8b4   :  { %10346 = vmatmul.mubr.f32.gmra.mrb[20].mxu1 %v17275_v55 }
 0x8b5   :  { %10348 = vmatprep.mubr.f32.mxu1 %v17303_v14 }
 0x8b8   :  { %10349 = vmatmul.mubr.f32.gmra.mrb[22].mxu1 %v17298_v19 }
 0x8b9   :  { %10351 = vmatprep.mubr.f32.mxu1 %v17325_v59 }
 0x8bc   :  { %10352 = vmatmul.mubr.f32.gmra.mrb[24].mxu1 %v17321_v44 }
 0x8bd   :  { %10354 = vmatprep.mubr.f32.mxu1 %v17347_v2 }
 0x8c0   :  { %10355 = vmatmul.mubr.f32.gmra.mrb[26].mxu1 %v17343_v42 }
 0x8c1   :  { %10357 = vmatprep.mubr.f32.mxu1 %v17369_v16 }
 0x8c4   :  { %10358 = vmatmul.mubr.f32.gmra.mrb[28].mxu1 %v17365_v48 }
 0x8c5   :  { %10360 = vmatprep.mubr.f32.mxu1 %v17392_v62 }
 0x8c8   :  { %10361 = vmatmul.mubr.f32.gmra.mrb[30].mxu1 %v17386_v23 }
 0x8c9   :  { %10365 = vmatprep.mubr.f32.mxu1 %v8341_v5 }
 0x8cc   :  { %10366 = vmatmul.mubr.f32.vlgmr.msra.gmra.mrb[16].mxu1 %v8351_v58 }
 0x8cd   :  { %10390 = vmatpush3.msra.mxu1 %v17215_v50  ;;  %10368 = vmatprep.mubr.f32.mxu1 %v8361_v39 }
 0x8ce   :  { %10415 = vmatprep.subr.mxu1 %v17120_v11 }
 0x8d0   :  { %10369 = vmatmul.mubr.f32.gmra.mrb[18].mxu1 %v8371_v47 }
 0x8d1   :  { %10371 = vmatprep.mubr.f32.mxu1 %v8381_v60 }
 0x8d4   :  { %10372 = vmatmul.mubr.f32.gmra.mrb[20].mxu1 %v8391_v34 }
 0x8d5   :  { %10374 = vmatprep.mubr.f32.mxu1 %v8401_v10 }
 0x8d8   :  { %10375 = vmatmul.mubr.f32.gmra.mrb[22].mxu1 %v8411_v57 }
 0x8d9   :  { %10377 = vmatprep.mubr.f32.mxu1 %v8421_v37 }
 0x8dc   :  { %10378 = vmatmul.mubr.f32.gmra.mrb[24].mxu1 %v8431_v56 }
 0x8dd   :  { %10380 = vmatprep.mubr.f32.mxu1 %v8441_v52 }
 0x8e0   :  { %10381 = vmatmul.mubr.f32.gmra.mrb[26].mxu1 %v8451_v13 }
 0x8e1   :  { %10383 = vmatprep.mubr.f32.mxu1 %v8461_v26 }
 0x8e4   :  { %10384 = vmatmul.mubr.f32.gmra.mrb[28].mxu1 %v8471_v63 }
 0x8e5   :  { %10386 = vmatprep.mubr.f32.mxu1 %v8481_v31 }
 0x8e8   :  { %10387 = vmatmul.mubr.f32.gmra.mrb[30].mxu1 %v8491_v9 }
 0x8e9   :  { %10391 = vmatprep.mubr.f32.mxu1 %v17235_v32 }
 0x8ec   :  { %10392 = vmatmul.mubr.f32.vlgmr.msra.gmra.mrb[16].mxu1 %v17231_v3 }
 0x8ed   :  { %10416 = vmatpush3.msra.mxu1 %v17120_v11  ;;  %10394 = vmatprep.mubr.f32.mxu1 %v17250_v17  ;;  %v9390_v11 = vld [vmem:[%s17571_s1 + $0x2d] ss:$0 sm:$0xff] }
 0x8f0   :  { %10395 = vmatmul.mubr.f32.gmra.mrb[18].mxu1 %v17246_v15 }
 0x8f1   :  { %10397 = vmatprep.mubr.f32.mxu1 %v17271_v35 }
 0x8f4   :  { %10398 = vmatmul.mubr.f32.gmra.mrb[20].mxu1 %v17267_v53 }
 0x8f5   :  { %10400 = vmatprep.mubr.f32.mxu1 %v17293_v54 }
 0x8f8   :  { %10401 = vmatmul.mubr.f32.gmra.mrb[22].mxu1 %v17286_v22 }
 0x8f9   :  { %10403 = vmatprep.mubr.f32.mxu1 %v17317_v43 }
 0x8fc   :  { %10404 = vmatmul.mubr.f32.gmra.mrb[24].mxu1 %v17310_v4 }
 0x8fd   :  { %10406 = vmatprep.mubr.f32.mxu1 %v17339_v21 }
 0x900   :  { %10407 = vmatmul.mubr.f32.gmra.mrb[26].mxu1 %v17332_v33 }
 0x901   :  { %10409 = vmatprep.mubr.f32.mxu1 %v17361_v51 }
 0x904   :  { %10410 = vmatmul.mubr.f32.gmra.mrb[28].mxu1 %v17354_v27 }
 0x905   :  { %10412 = vmatprep.mubr.f32.mxu1 %v17382_v36 }
 0x908   :  { %10413 = vmatmul.mubr.f32.gmra.mrb[30].mxu1 %v17375_v8 }
 0x909   :  { %10417 = vmatprep.mubr.f32.mxu1 %v17235_v32 }
 0x90c   :  { %10418 = vmatmul.mubr.f32.vlgmr.msra.gmra.mrb[16].mxu1 %v17231_v3 }
 0x90d   :  { %10420 = vmatprep.mubr.f32.mxu1 %v17250_v17 }
 0x910   :  { %10421 = vmatmul.mubr.f32.gmra.mrb[18].mxu1 %v17246_v15 }
 0x911   :  { %10423 = vmatprep.mubr.f32.mxu1 %v17271_v35 }
 0x914   :  { %10424 = vmatmul.mubr.f32.gmra.mrb[20].mxu1 %v17267_v53 }
 0x915   :  { %10426 = vmatprep.mubr.f32.mxu1 %v17293_v54 }
 0x918   :  { %10427 = vmatmul.mubr.f32.gmra.mrb[22].mxu1 %v17286_v22 }
 0x919   :  { %10429 = vmatprep.mubr.f32.mxu1 %v17317_v43 }
 0x91c   :  { %10430 = vmatmul.mubr.f32.gmra.mrb[24].mxu1 %v17310_v4 }
 0x91d   :  { %10432 = vmatprep.mubr.f32.mxu1 %v17339_v21 }
 0x920   :  { %10433 = vmatmul.mubr.f32.gmra.mrb[26].mxu1 %v17332_v33 }
 0x921   :  { %10435 = vmatprep.mubr.f32.mxu1 %v17361_v51 }
 0x924   :  { %10436 = vmatmul.mubr.f32.gmra.mrb[28].mxu1 %v17354_v27 }
 0x925   :  { %10438 = vmatprep.mubr.f32.mxu1 %v17382_v36 }
 0x928   :  { %10439 = vmatmul.mubr.f32.gmra.mrb[30].mxu1 %v17375_v8 }
 0x9df   :  { %v10419_v49 = vpop.f32.mrb[16].mxu1 }
 0x9e0   :  { %v10513_v50 = vadd.f32 %v10419_v49, %v9390_v11  ;;  %v9270_v3 = vpop.f32.mrb[17].mxu1 }
 0x9e1   :  { %v10514_v32 = vadd.f32 %v9390_v11, %v9270_v3 }
 0x9e2   :  { %9365 = vst.msk [vmem:[%s17574_s3 + $0x8] sm:$0xff] %vm45_vm0, %v10513_v50 }
 0x9e3   :  { %9364 = vst.msk [vmem:[%s17574_s3] sm:$0xff] %vm45_vm0, %v10514_v32  ;;  %v10422_v41 = vpop.f32.mrb[18].mxu1 }
 0x9e4   :  { %v10515_v61 = vadd.f32 %v10422_v41, %v9390_v11  ;;  %v9282_v58 = vpop.f32.mrb[19].mxu1 }
 0x9e5   :  { %v10516_v15 = vadd.f32 %v9390_v11, %v9282_v58 }
 0x9e6   :  { %9367 = vst.msk [vmem:[%s17574_s3 + $0x18] sm:$0xff] %vm45_vm0, %v10515_v61 }
 0x9e7   :  { %9366 = vst.msk [vmem:[%s17574_s3 + $0x10] sm:$0xff] %vm45_vm0, %v10516_v15  ;;  %v10425_v17 = vpop.f32.mrb[20].mxu1 }
 0x9e8   :  { %v10517_v5 = vadd.f32 %v10425_v17, %v9390_v11  ;;  %v9294_v28 = vpop.f32.mrb[21].mxu1 }
 0x9e9   :  { %v10518_v45 = vadd.f32 %v9390_v11, %v9294_v28 }
 0x9ea   :  { %9369 = vst.msk [vmem:[%s17574_s3 + $0x28] sm:$0xff] %vm45_vm0, %v10517_v5 }
 0x9eb   :  { %9368 = vst.msk [vmem:[%s17574_s3 + $0x20] sm:$0xff] %vm45_vm0, %v10518_v45  ;;  %v10428_v53 = vpop.f32.mrb[22].mxu1 }
 0x9ec   :  { %v10519_v35 = vadd.f32 %v10428_v53, %v9390_v11  ;;  %v9306_v39 = vpop.f32.mrb[23].mxu1 }
 0x9ed   :  { %v10520_v55 = vadd.f32 %v9390_v11, %v9306_v39 }
 0x9ee   :  { %9371 = vst.msk [vmem:[%s17574_s3 + $0x38] sm:$0xff] %vm45_vm0, %v10519_v35 }
 0x9ef   :  { %9370 = vst.msk [vmem:[%s17574_s3 + $0x30] sm:$0xff] %vm45_vm0, %v10520_v55  ;;  %v10431_v47 = vpop.f32.mrb[24].mxu1 }
 0x9f0   :  { %v10521_v40 = vadd.f32 %v10431_v47, %v9390_v11  ;;  %v9318_v22 = vpop.f32.mrb[25].mxu1 }
 0x9f1   :  { %v10522_v54 = vadd.f32 %v9390_v11, %v9318_v22 }
 0x9f2   :  { %9373 = vst.msk [vmem:[%s17574_s3 + $0x48] sm:$0xff] %vm45_vm0, %v10521_v40 }
 0x9f3   :  { %9372 = vst.msk [vmem:[%s17574_s3 + $0x40] sm:$0xff] %vm45_vm0, %v10522_v54  ;;  %v10434_v60 = vpop.f32.mrb[26].mxu1 }
 0x9f4   :  { %v10523_v19 = vadd.f32 %v10434_v60, %v9390_v11  ;;  %v9330_v34 = vpop.f32.mrb[27].mxu1 }
 0x9f5   :  { %v10524_v14 = vadd.f32 %v9390_v11, %v9330_v34 }
 0x9f6   :  { %9375 = vst.msk [vmem:[%s17574_s3 + $0x58] sm:$0xff] %vm45_vm0, %v10523_v19 }
 0x9f7   :  { %9374 = vst.msk [vmem:[%s17574_s3 + $0x50] sm:$0xff] %vm45_vm0, %v10524_v14  ;;  %v10437_v4 = vpop.f32.mrb[28].mxu1 }
 0x9f8   :  { %v10525_v43 = vadd.f32 %v10437_v4, %v9390_v11  ;;  %v9342_v10 = vpop.f32.mrb[29].mxu1 }
 0x9f9   :  { %v10526_v44 = vadd.f32 %v9390_v11, %v9342_v10 }
 0x9fa   :  { %9377 = vst.msk [vmem:[%s17574_s3 + $0x68] sm:$0xff] %vm45_vm0, %v10525_v43 }
 0x9fb   :  { %9376 = vst.msk [vmem:[%s17574_s3 + $0x60] sm:$0xff] %vm45_vm0, %v10526_v44  ;;  %v10440_v57 = vpop.f32.mrb[30].mxu1 }
 0x9fc   :  { %v10527_v59 = vadd.f32 %v10440_v57, %v9390_v11  ;;  %v9354_v33 = vpop.f32.mrb[31].mxu1 }
 0x9fd   :  { %v10528_v21 = vadd.f32 %v9390_v11, %v9354_v33 }
 0x9fe   :  { %9379 = vst.msk [vmem:[%s17574_s3 + $0x78] sm:$0xff] %vm45_vm0, %v10527_v59 }
 0x9ff   :  { %9378 = vst.msk [vmem:[%s17574_s3 + $0x70] sm:$0xff] %vm45_vm0, %v10528_v21 }

</bundles_post_ra>
